<compile_context>
chip_gen: v7x
topology: tpu7x:2x2x1
jax: 0.10.0
libtpu: 0.0.40
codegen_flags: <defaults>
</compile_context>

<pallas_src>
from functools import partial

import jax
import jax.numpy as jnp
from jax.experimental import pallas as pl
from jax.experimental.pallas import tpu as pltpu

NEG_SLOPE = 0.01            # F.leaky_relu / nn.LeakyReLU default slope
MARGIN = 0.3
NUM_POINTS = 24             # module default is 250; small demo size
NUM_BORDER = NUM_POINTS // 3            # border points per instance = 8
NUM_FG = NUM_POINTS - NUM_BORDER        # foreground points per instance = 16
# TODO(synk): the reference default border_ic=6 is inconsistent with the
# borders[:, :3] slicing fed to e_conv1; border_ic=3 keeps shapes consistent.
BORDER_IC = 3
OUTPUT_D = 64
BC = 256                    # border branch output channels
MXU_DTYPE = jnp.bfloat16    # matmul operand dtype (f32 accumulate)
PAD_C = 16                  # layer-1 input channels padded to one bf16 tile

# ---------------------- packed bias / small-f32 slab -------------------------
BIAS_SPEC = (
    ("b1m", 128), ("b2m", 256), ("b3m", 512), ("b47", 512), ("b5", 512),
    ("b6", 64), ("b8", 512), ("b9", 64), ("bg", 1), ("wg0", 64), ("wg1", 64),
    ("b1b", 192), ("b2b", 384), ("b3b", 512), ("b4b", 256), ("b5b", 512),
    ("b6b", 256), ("bh1", 256), ("bh2", 64),
)
BIAS_OFF = {}
_o = 0
for _name, _c in BIAS_SPEC:
    BIAS_OFF[_name] = (_o, _c)
    _o += -(-_c // 128) * 128           # 128-lane aligned segments
BIAS_TOTAL = _o


# ------------------------- packed weight slab layouts ------------------------
def _layout(entries, lanes):
    """entries: (name, rows, cols). Returns ({name: (r0, r1, cols)}, shape)."""
    table, r = {}, 0
    for name, rows, cols in entries:
        table[name] = (r, r + rows, cols)
        r += rows
    return table, (r, lanes)


EARLY_SLAB, EARLY_SHAPE = _layout(                 # BlockSpec-delivered (72 KB)
    [("w1m", PAD_C, 128), ("w1b", PAD_C, 192), ("w2m", 128, 256)], 256)
W512_SLAB, W512_SHAPE = _layout(                   # streamed (2.2 MB)
    [("w3m", 256, 512), ("w47", 512, 512), ("w5", 256, 512), ("w8", 256, 512),
     ("w2b", 192, 384), ("w3b", 384, 512), ("w5b", 256, 512)], 512)
W256_SLAB, W256_SHAPE = _layout(                   # streamed (1.0 MB)
    [("w4b", 512, 256), ("w6b", 512, 256), ("wh1", 960, 256)], 256)
W64_SLAB, W64_SHAPE = _layout(                     # streamed (0.16 MB)
    [("w6", 512, 64), ("w9", 512, 64), ("wh2", 256, 64)], 64)


def _lrelu(x):
    return jnp.maximum(x, NEG_SLOPE * x)


# --------------------------------- fused kernel ------------------------------
def run_fused(packed, fg_flat, env_flat, spatial):
    """fg_flat [N*P_FG, 16], env_flat [N*P_B, 16], spatial [N, 64] -> [N, 64]."""
    n = spatial.shape[0]
    p_fg = fg_flat.shape[0] // n
    p_b = env_flat.shape[0] // n

    def kernel(fg_ref, env_ref, se_ref, early_ref, bias_ref,
               w512_hbm, w256_hbm, w64_hbm,
               out_ref, w512_buf, w256_buf, w64_buf, feat_buf, sem):
        # Stream the three big weight slabs HBM -> VMEM; waits sit right before
        # first use so the early-layer compute hides most of the transfer.
        cp512 = pltpu.make_async_copy(w512_hbm, w512_buf, sem.at[0])
        cp64 = pltpu.make_async_copy(w64_hbm, w64_buf, sem.at[1])
        cp256 = pltpu.make_async_copy(w256_hbm, w256_buf, sem.at[2])
        cp512.start()
        cp64.start()
        cp256.start()

        def bias(name):                       # [1, c] f32 slice of the slab
            off, c = BIAS_OFF[name]
            return bias_ref[0:1, off:off + c]

        def wslab(buf, table, name):          # [K, C] bf16 slice of a slab
            r0, r1, c = table[name]
            return buf[r0:r1, 0:c]

        def mm(a, w, b, act=True):            # 1x1 conv (+folded BN) (+lrelu)
            y = jnp.dot(a.astype(MXU_DTYPE), w,
                        preferred_element_type=jnp.float32) + b
            return _lrelu(y) if act else y

        # ---------------- main branch (PoseNetFeatOffsetEmb) ----------------
        fg = fg_ref[...]                                          # [NP, 16]
        h = mm(fg, wslab(early_ref, EARLY_SLAB, "w1m"), bias("b1m"))   # 128
        h = mm(h, wslab(early_ref, EARLY_SLAB, "w2m"), bias("b2m"))    # 256
        cp512.wait()
        pf2 = mm(h, wslab(w512_buf, W512_SLAB, "w3m"), bias("b3m"))    # 512
        h47 = mm(pf2, wslab(w512_buf, W512_SLAB, "w47"), bias("b47"))  # 512
        x1 = mm(h47[:, 0:256], wslab(w512_buf, W512_SLAB, "w5"), bias("b5"))
        cp64.wait()
        x1 = mm(x1, wslab(w64_buf, W64_SLAB, "w6"), bias("b6"))        # 64
        x2 = mm(h47[:, 256:512], wslab(w512_buf, W512_SLAB, "w8"), bias("b8"))
        x2 = mm(x2, wslab(w64_buf, W64_SLAB, "w9"), bias("b9"))        # 64

        ap = jnp.mean(x1.reshape(n, p_fg, 64), axis=1)            # [N, 64]
        mp = jnp.max(x2.reshape(n, p_fg, 64), axis=1)             # [N, 64]

        # conv_weight (128 -> 1) as lane reductions, softmax over points.
        wf = (jnp.sum(x1 * bias("wg0"), axis=-1, keepdims=True)
              + jnp.sum(x2 * bias("wg1"), axis=-1, keepdims=True)
              + bias("bg"))                                       # [NP, 1]
        wf = wf.reshape(n, p_fg, 1)
        wf = wf - jnp.max(wf, axis=1, keepdims=True)
        ex = jnp.exp(wf)
        weight = ex / jnp.sum(ex, axis=1, keepdims=True)          # [N, P, 1]
        wx3 = jnp.sum(weight * pf2.reshape(n, p_fg, 512), axis=1)  # [N, 512]

        # ------------------ border branch (PointFeatFuse3P) -----------------
        env = env_ref[...]                                        # [NPb, 16]
        hb = mm(env, wslab(early_ref, EARLY_SLAB, "w1b"), bias("b1b"))  # 192
        hb = mm(hb, wslab(w512_buf, W512_SLAB, "w2b"), bias("b2b"))     # 384
        hb = mm(hb, wslab(w512_buf, W512_SLAB, "w3b"), bias("b3b"))     # 512
        cp256.wait()
        hb = mm(hb, wslab(w256_buf, W256_SLAB, "w4b"), bias("b4b"))     # 256
        hb = mm(hb, wslab(w512_buf, W512_SLAB, "w5b"), bias("b5b"))     # 512
        hb = mm(hb, wslab(w256_buf, W256_SLAB, "w6b"), bias("b6b"))     # 256
        border = jnp.max(hb.reshape(n, p_b, BC), axis=1)          # [N, 256]

        # ---------------------------- last_emb head --------------------------
        # feat = [ap | mp | wx3 | border | spatial] lane-concatenated into one
        # [N, 960] buffer, then a single K=960 dot (matches torch.cat order).
        feat_buf[:, 0:64] = ap
        feat_buf[:, 64:128] = mp
        feat_buf[:, 128:640] = wx3
        feat_buf[:, 640:896] = border
        feat_buf[:, 896:960] = se_ref[...]
        hh = mm(feat_buf[...], wslab(w256_buf, W256_SLAB, "wh1"),
                bias("bh1"))                                      # [N, 256]
        out_ref[...] = mm(hh, wslab(w64_buf, W64_SLAB, "wh2"),
                          bias("bh2"), act=False)                 # [N, 64]

    vconst = lambda shape: pl.BlockSpec(shape, lambda i: (0, 0))
    hbm = pl.BlockSpec(memory_space=pl.ANY)
    return pl.pallas_call(
        kernel,
        grid=(1,),
        in_specs=[vconst(fg_flat.shape), vconst(env_flat.shape),
                  vconst(spatial.shape), vconst(EARLY_SHAPE),
                  vconst(packed["bias"].shape), hbm, hbm, hbm],
        out_specs=pl.BlockSpec((n, OUTPUT_D), lambda i: (0, 0)),
        out_shape=jax.ShapeDtypeStruct((n, OUTPUT_D), jnp.float32),
        scratch_shapes=[pltpu.VMEM(W512_SHAPE, MXU_DTYPE),
                        pltpu.VMEM(W256_SHAPE, MXU_DTYPE),
                        pltpu.VMEM(W64_SHAPE, MXU_DTYPE),
                        pltpu.VMEM((n, 960), jnp.float32),
                        pltpu.SemaphoreType.DMA((3,))],
        compiler_params=pltpu.CompilerParams(
            dimension_semantics=("arbitrary",),
            vmem_limit_bytes=32 * 1024 * 1024),
    )(fg_flat, env_flat, spatial, packed["early"], packed["bias"],
      packed["w512"], packed["w256"], packed["w64"])


# --------------------------- plain-JAX glue pieces ---------------------------
def location_embedding(f_g, dim_g=64, wave_len=1000.0):
    x_min, y_min, x_max, y_max = jnp.split(f_g, 4, axis=1)
    cx = (x_min + x_max) * 0.5
    cy = (y_min + y_max) * 0.5
    w = x_max - x_min + 1.0
    h = y_max - y_min + 1.0
    position_mat = jnp.concatenate([cx, cy, w, h], axis=-1)          # [N, 4]
    feat_range = jnp.arange(dim_g // 8, dtype=jnp.float32)
    dim_mat = 1.0 / jnp.power(wave_len, feat_range / (dim_g / 8.0))  # [8]
    mul_mat = 100.0 * position_mat[:, :, None] * dim_mat[None, None, :]
    mul_mat = mul_mat.reshape(f_g.shape[0], -1)                      # [N, 32]
    return jnp.concatenate([jnp.sin(mul_mat), jnp.cos(mul_mat)], axis=-1)


def compute_triplet_loss(inputs, targets, margin=MARGIN):
    # N x N (N <= 8) pairwise distances + margin ranking loss — glue scale.
    sq = jnp.sum(inputs * inputs, axis=1, keepdims=True)
    dist = sq + sq.T - 2.0 * (inputs @ inputs.T)
    dist = jnp.sqrt(jnp.maximum(dist, 1e-12))
    mask = targets[:, None] == targets[None, :]
    dist_ap = jnp.max(jnp.where(mask, dist, -jnp.inf), axis=1)
    dist_an = jnp.min(jnp.where(mask, jnp.inf, dist), axis=1)
    loss = jnp.mean(jnp.maximum(dist_ap - dist_an + margin, 0.0))
    # mirrors `if mask.float().unique().shape[0] > 1`
    loss = jnp.where(jnp.any(~mask), loss, 0.0)
    return loss.reshape(1)


@partial(jax.jit, static_argnames=("infer",))
def tracker_offset_emb_forward(packed, points, labels, xyxys, infer=False):
    pts, boxes = points[0], xyxys[0]              # [N, NUM_POINTS, 8], [N, 4]
    n = pts.shape[0]
    spatial = location_embedding(boxes)           # [N, 64]
    # foreground cloud: first NUM_FG points, 5 channels; border: remaining 8ch.
    fg = pts[:, :NUM_FG, :5].reshape(n * NUM_FG, 5)
    env = pts[:, NUM_FG:, :].reshape(n * NUM_BORDER, 8)
    # pad layer-1 channels to one bf16 sublane tile so the first conv runs as
    # a K=16 MXU dot instead of per-channel VPU broadcast-MACs.
    fg_flat = jnp.pad(fg, ((0, 0), (0, PAD_C - 5)))
    env_flat = jnp.pad(env, ((0, 0), (0, PAD_C - 8)))
    embeds = run_fused(packed, fg_flat, env_flat, spatial)        # [N, 64]
    if infer:
        return embeds
    return compute_triplet_loss(embeds, labels[0])


# ------------------------------ parameter init -------------------------------
def init_params(key):
    it = iter(jax.random.split(key, 128))

    def conv(c_in, c_out):
        k1, k2 = next(it), next(it)
        bound = 1.0 / (c_in ** 0.5)
        w = jax.random.uniform(k1, (c_in, c_out), jnp.float32, -bound, bound)
        b = jax.random.uniform(k2, (c_out,), jnp.float32, -bound, bound)
        return w, b

    def conv_bn(c_in, c_out):
        # eval-mode BatchNorm1d folded into the preceding 1x1 conv
        w, b = conv(c_in, c_out)
        k1, k2, k3, k4 = next(it), next(it), next(it), next(it)
        gamma = 1.0 + 0.1 * jax.random.normal(k1, (c_out,), jnp.float32)
        beta = 0.1 * jax.random.normal(k2, (c_out,), jnp.float32)
        mean = 0.1 * jax.random.normal(k3, (c_out,), jnp.float32)
        var = 1.0 + 0.5 * jax.random.uniform(k4, (c_out,), jnp.float32)
        scale = gamma / jnp.sqrt(var + 1e-5)
        return w * scale[None, :], (b - mean) * scale + beta

    main = {
        "conv1": conv_bn(2, 64), "conv2": conv_bn(64, 128),
        "conv3": conv_bn(128, 256),
        "e_conv1": conv_bn(3, 64), "e_conv2": conv_bn(64, 128),
        "e_conv3": conv_bn(128, 256),
        "conv4": conv_bn(512, 256), "conv5": conv_bn(256, 512),
        "conv6": conv(512, 64),
        "conv7": conv_bn(512, 256), "conv8": conv_bn(256, 512),
        "conv9": conv(512, 64),
        "conv_weight": conv(128, 1),
    }
    border = {
        "conv1": conv(2, 64), "conv2": conv(64, 128), "conv3": conv(128, 128),
        "e_conv1": conv(BORDER_IC, 64), "e_conv2": conv(64, 128),
        "e_conv3": conv(128, 256),
        "t_conv1": conv(3, 64), "t_conv2": conv(64, 128),
        "t_conv3": conv(128, 128),
        "conv4": conv(512, 256), "conv5": conv(256, 512), "conv6": conv(512, BC),
    }
    head = {"fc1": conv(704 + BC, 256), "fc2": conv(256, OUTPUT_D)}
    return {"main": main, "border": border, "head": head}


def pack_params(params):
    """Fuse per-layer PyTorch-style weights into the kernel's packed slabs."""
    m, bd, hd = params["main"], params["border"], params["head"]
    f32 = jnp.float32

    def blockdiag(blocks):
        rows = sum(w.shape[0] for w, _ in blocks)
        cols = sum(w.shape[1] for w, _ in blocks)
        big = jnp.zeros((rows, cols), f32)
        r = c = 0
        bs = []
        for w, b in blocks:
            big = big.at[r:r + w.shape[0], c:c + w.shape[1]].set(w)
            bs.append(b)
            r += w.shape[0]
            c += w.shape[1]
        return big, jnp.concatenate(bs)

    W, B = {}, {}

    # --- main branch: layer 1 scatters by channel position of fg[..., :5]
    # (x = channels 3:5 -> conv1, emb = channels 0:3 -> e_conv1; rest zero-pad).
    w1m = jnp.zeros((PAD_C, 128), f32)
    w1m = w1m.at[3:5, 0:64].set(m["conv1"][0])
    w1m = w1m.at[0:3, 64:128].set(m["e_conv1"][0])
    W["w1m"] = w1m
    B["b1m"] = jnp.concatenate([m["conv1"][1], m["e_conv1"][1]])

    W["w2m"], B["b2m"] = blockdiag([m["conv2"], m["e_conv2"]])
    W["w3m"], B["b3m"] = blockdiag([m["conv3"], m["e_conv3"]])   # -> pointfeat_2
    W["w47"] = jnp.concatenate([m["conv4"][0], m["conv7"][0]], axis=1)
    B["b47"] = jnp.concatenate([m["conv4"][1], m["conv7"][1]])
    W["w5"], B["b5"] = m["conv5"]
    W["w6"], B["b6"] = m["conv6"]
    W["w8"], B["b8"] = m["conv8"]
    W["w9"], B["b9"] = m["conv9"]
    # conv_weight split into two 128-aligned f32 segments (x1 rows, x2 rows).
    B["wg0"] = m["conv_weight"][0][:64, 0]
    B["wg1"] = m["conv_weight"][0][64:, 0]
    B["bg"] = m["conv_weight"][1]

    # --- border branch: layer 1 scatters channels of env[..., :8]
    # (x = 3:5 -> conv1, emb = 0:3 -> e_conv1, t = 5:8 -> t_conv1).
    w1b = jnp.zeros((PAD_C, 192), f32)
    w1b = w1b.at[3:5, 0:64].set(bd["conv1"][0])
    w1b = w1b.at[0:3, 64:128].set(bd["e_conv1"][0])
    w1b = w1b.at[5:8, 128:192].set(bd["t_conv1"][0])
    W["w1b"] = w1b
    B["b1b"] = jnp.concatenate([bd["conv1"][1], bd["e_conv1"][1],
                                bd["t_conv1"][1]])
    W["w2b"], B["b2b"] = blockdiag([bd["conv2"], bd["e_conv2"], bd["t_conv2"]])
    W["w3b"], B["b3b"] = blockdiag([bd["conv3"], bd["e_conv3"], bd["t_conv3"]])
    W["w4b"], B["b4b"] = bd["conv4"]
    W["w5b"], B["b5b"] = bd["conv5"]
    W["w6b"], B["b6b"] = bd["conv6"]

    # --- head (fc1 rows in torch.cat order: ap | mp | wx3 | border | spatial)
    W["wh1"], B["bh1"] = hd["fc1"]
    W["wh2"], B["bh2"] = hd["fc2"]

    def slab(table, shape):
        buf = jnp.zeros(shape, f32)
        for name, (r0, r1, c) in table.items():
            w = W[name]
            assert w.shape == (r1 - r0, c), (name, w.shape, (r1 - r0, c))
            buf = buf.at[r0:r1, 0:c].set(w)
        return buf.astype(MXU_DTYPE)

    packed = {
        "early": slab(EARLY_SLAB, EARLY_SHAPE),
        "w512": slab(W512_SLAB, W512_SHAPE),
        "w256": slab(W256_SLAB, W256_SHAPE),
        "w64": slab(W64_SLAB, W64_SHAPE),
    }

    # --- single lane-aligned f32 bias/misc slab
    parts = []
    for name, c in BIAS_SPEC:
        bvec = B[name].astype(f32)
        assert bvec.shape == (c,), (name, bvec.shape)
        cpad = -(-c // 128) * 128
        parts.append(jnp.pad(bvec, (0, cpad - c)))
    packed["bias"] = jnp.concatenate(parts).reshape(1, -1)
    assert packed["bias"].shape == (1, BIAS_TOTAL)
    return packed


if __name__ == "__main__":
    key = jax.random.PRNGKey(0)
    kp, k1, k2 = jax.random.split(key, 3)
    packed = pack_params(init_params(kp))

    N = 8
    # points: [1, N, NUM_POINTS, 8]; first NUM_FG points (channels :5) are the
    # foreground cloud, the rest are environment/border points (8 channels).
    points = jax.random.normal(k1, (1, N, NUM_POINTS, 8), jnp.float32)
    xyxys = jnp.abs(jax.random.normal(k2, (1, N, 4), jnp.float32))
    xyxys = xyxys.at[..., 2:].add(xyxys[..., :2])      # ensure max >= min
    labels = jnp.array([[0, 0, 1, 1, 2, 2, 3, 3]], dtype=jnp.int32)

    loss = tracker_offset_emb_forward(packed, points, labels, xyxys, infer=False)
    loss = jax.block_until_ready(loss)
    assert loss.shape == (1,) and bool(jnp.isfinite(loss[0]))

    embeds = tracker_offset_emb_forward(packed, points, labels, xyxys, infer=True)
    embeds = jax.block_until_ready(embeds)
    assert embeds.shape == (N, OUTPUT_D)
    assert bool(jnp.all(jnp.isfinite(embeds)))

    print("KERNEL_OK")
</pallas_src>

<mosaic_0001>
module attributes {stable_mosaic.version = 11 : i64} {
  func.func @kernel(%arg0: i32, %arg1: memref<128x16xf32, #tpu.memory_space<vmem>>, %arg2: memref<64x16xf32, #tpu.memory_space<vmem>>, %arg3: memref<8x64xf32, #tpu.memory_space<vmem>>, %arg4: memref<160x256xbf16, #tpu.memory_space<vmem>>, %arg5: memref<1x5632xf32, #tpu.memory_space<vmem>>, %arg6: memref<2112x512xbf16, #tpu.memory_space<any>>, %arg7: memref<1984x256xbf16, #tpu.memory_space<any>>, %arg8: memref<1280x64xbf16, #tpu.memory_space<any>>, %arg9: memref<8x64xf32, #tpu.memory_space<vmem>>, %arg10: memref<2112x512xbf16, #tpu.memory_space<vmem>>, %arg11: memref<1984x256xbf16, #tpu.memory_space<vmem>>, %arg12: memref<1280x64xbf16, #tpu.memory_space<vmem>>, %arg13: memref<8x960xf32, #tpu.memory_space<vmem>>, %arg14: memref<3x!tpu.dma_semaphore, #tpu.memory_space<semaphore_mem>>) attributes {dimension_semantics = [#tpu.dimension_semantics<arbitrary>], iteration_bounds = array<i64: 1>, scalar_prefetch = 0 : i64, scratch_operands = 5 : i64, tpu.core_type = #tpu.core_type<tc>, window_params = [{pipeline_mode = #tpu.pipeline_mode<synchronous>, transform_indices = @transform_0, window_bounds = array<i64: 128, 16>}, {pipeline_mode = #tpu.pipeline_mode<synchronous>, transform_indices = @transform_1, window_bounds = array<i64: 64, 16>}, {pipeline_mode = #tpu.pipeline_mode<synchronous>, transform_indices = @transform_2, window_bounds = array<i64: 8, 64>}, {pipeline_mode = #tpu.pipeline_mode<synchronous>, transform_indices = @transform_3, window_bounds = array<i64: 160, 256>}, {pipeline_mode = #tpu.pipeline_mode<synchronous>, transform_indices = @transform_4, window_bounds = array<i64: 1, 5632>}, {}, {}, {}, {pipeline_mode = #tpu.pipeline_mode<synchronous>, transform_indices = @transform_8, window_bounds = array<i64: 8, 64>}]} {
    %c0_i32 = arith.constant 0 : i32
    %0 = tpu.memref_slice %arg14[%c0_i32] : memref<3x!tpu.dma_semaphore, #tpu.memory_space<semaphore_mem>> -> memref<1x!tpu.dma_semaphore, #tpu.memory_space<semaphore_mem>>
    %1 = tpu.memref_squeeze %0 : memref<1x!tpu.dma_semaphore, #tpu.memory_space<semaphore_mem>> -> memref<!tpu.dma_semaphore, #tpu.memory_space<semaphore_mem>>
    tpu.enqueue_dma source(%arg6 : memref<2112x512xbf16, #tpu.memory_space<any>>) target(%arg10 : memref<2112x512xbf16, #tpu.memory_space<vmem>>) target_semaphore(%1 : memref<!tpu.dma_semaphore, #tpu.memory_space<semaphore_mem>>)
    %c1_i32 = arith.constant 1 : i32
    %2 = tpu.memref_slice %arg14[%c1_i32] : memref<3x!tpu.dma_semaphore, #tpu.memory_space<semaphore_mem>> -> memref<1x!tpu.dma_semaphore, #tpu.memory_space<semaphore_mem>>
    %3 = tpu.memref_squeeze %2 : memref<1x!tpu.dma_semaphore, #tpu.memory_space<semaphore_mem>> -> memref<!tpu.dma_semaphore, #tpu.memory_space<semaphore_mem>>
    tpu.enqueue_dma source(%arg8 : memref<1280x64xbf16, #tpu.memory_space<any>>) target(%arg12 : memref<1280x64xbf16, #tpu.memory_space<vmem>>) target_semaphore(%3 : memref<!tpu.dma_semaphore, #tpu.memory_space<semaphore_mem>>)
    %c2_i32 = arith.constant 2 : i32
    %4 = tpu.memref_slice %arg14[%c2_i32] : memref<3x!tpu.dma_semaphore, #tpu.memory_space<semaphore_mem>> -> memref<1x!tpu.dma_semaphore, #tpu.memory_space<semaphore_mem>>
    %5 = tpu.memref_squeeze %4 : memref<1x!tpu.dma_semaphore, #tpu.memory_space<semaphore_mem>> -> memref<!tpu.dma_semaphore, #tpu.memory_space<semaphore_mem>>
    tpu.enqueue_dma source(%arg7 : memref<1984x256xbf16, #tpu.memory_space<any>>) target(%arg11 : memref<1984x256xbf16, #tpu.memory_space<vmem>>) target_semaphore(%5 : memref<!tpu.dma_semaphore, #tpu.memory_space<semaphore_mem>>)
    %c0 = arith.constant 0 : index
    %c0_0 = arith.constant 0 : index
    %6 = vector.load %arg1[%c0, %c0_0] : memref<128x16xf32, #tpu.memory_space<vmem>>, vector<128x16xf32>
    %c0_1 = arith.constant 0 : index
    %c0_2 = arith.constant 0 : index
    %7 = vector.load %arg4[%c0_1, %c0_2] : memref<160x256xbf16, #tpu.memory_space<vmem>>, vector<16x128xbf16>
    %c0_3 = arith.constant 0 : index
    %c0_4 = arith.constant 0 : index
    %8 = vector.load %arg5[%c0_3, %c0_4] : memref<1x5632xf32, #tpu.memory_space<vmem>>, vector<1x128xf32>
    %9 = arith.truncf %6 : vector<128x16xf32> to vector<128x16xbf16>
    %cst = arith.constant dense<0.000000e+00> : vector<128x128xf32>
    %10 = tpu.matmul %9, %7, %cst {dimension_numbers = #tpu.dot_dimension_numbers<[1], [0], [0], [1], [0, 0, 1, 1], [], []>} : vector<128x16xbf16>, vector<16x128xbf16>, vector<128x128xf32> -> vector<128x128xf32>
    %11 = vector.broadcast %8 : vector<1x128xf32> to vector<128x128xf32>
    %12 = arith.addf %10, %11 : vector<128x128xf32>
    %cst_5 = arith.constant 0.00999999977 : f32
    %13 = vector.broadcast %cst_5 : f32 to vector<128x128xf32>
    %14 = arith.mulf %13, %12 : vector<128x128xf32>
    %15 = arith.maximumf %12, %14 : vector<128x128xf32>
    %c32 = arith.constant 32 : index
    %c0_6 = arith.constant 0 : index
    %16 = vector.load %arg4[%c32, %c0_6] : memref<160x256xbf16, #tpu.memory_space<vmem>>, vector<128x256xbf16>
    %c0_7 = arith.constant 0 : index
    %c128 = arith.constant 128 : index
    %17 = vector.load %arg5[%c0_7, %c128] : memref<1x5632xf32, #tpu.memory_space<vmem>>, vector<1x256xf32>
    %18 = arith.truncf %15 : vector<128x128xf32> to vector<128x128xbf16>
    %cst_8 = arith.constant dense<0.000000e+00> : vector<128x256xf32>
    %19 = tpu.matmul %18, %16, %cst_8 {dimension_numbers = #tpu.dot_dimension_numbers<[1], [0], [0], [1], [0, 0, 1, 1], [], []>} : vector<128x128xbf16>, vector<128x256xbf16>, vector<128x256xf32> -> vector<128x256xf32>
    %20 = vector.broadcast %17 : vector<1x256xf32> to vector<128x256xf32>
    %21 = arith.addf %19, %20 : vector<128x256xf32>
    %cst_9 = arith.constant 0.00999999977 : f32
    %22 = vector.broadcast %cst_9 : f32 to vector<128x256xf32>
    %23 = arith.mulf %22, %21 : vector<128x256xf32>
    %24 = arith.maximumf %21, %23 : vector<128x256xf32>
    %c0_i32_10 = arith.constant 0 : i32
    %25 = tpu.memref_slice %arg14[%c0_i32_10] : memref<3x!tpu.dma_semaphore, #tpu.memory_space<semaphore_mem>> -> memref<1x!tpu.dma_semaphore, #tpu.memory_space<semaphore_mem>>
    %26 = tpu.memref_squeeze %25 : memref<1x!tpu.dma_semaphore, #tpu.memory_space<semaphore_mem>> -> memref<!tpu.dma_semaphore, #tpu.memory_space<semaphore_mem>>
    tpu.wait_dma2 semaphore(%26 : memref<!tpu.dma_semaphore, #tpu.memory_space<semaphore_mem>>) src(%arg6 : memref<2112x512xbf16, #tpu.memory_space<any>>) dst(%arg10 : memref<2112x512xbf16, #tpu.memory_space<vmem>>)
    %c0_11 = arith.constant 0 : index
    %c0_12 = arith.constant 0 : index
    %27 = vector.load %arg10[%c0_11, %c0_12] : memref<2112x512xbf16, #tpu.memory_space<vmem>>, vector<256x512xbf16>
    %c0_13 = arith.constant 0 : index
    %c384 = arith.constant 384 : index
    %28 = vector.load %arg5[%c0_13, %c384] : memref<1x5632xf32, #tpu.memory_space<vmem>>, vector<1x512xf32>
    %29 = arith.truncf %24 : vector<128x256xf32> to vector<128x256xbf16>
    %cst_14 = arith.constant dense<0.000000e+00> : vector<128x512xf32>
    %30 = tpu.matmul %29, %27, %cst_14 {dimension_numbers = #tpu.dot_dimension_numbers<[1], [0], [0], [1], [0, 0, 1, 1], [], []>} : vector<128x256xbf16>, vector<256x512xbf16>, vector<128x512xf32> -> vector<128x512xf32>
    %31 = vector.broadcast %28 : vector<1x512xf32> to vector<128x512xf32>
    %32 = arith.addf %30, %31 : vector<128x512xf32>
    %cst_15 = arith.constant 0.00999999977 : f32
    %33 = vector.broadcast %cst_15 : f32 to vector<128x512xf32>
    %34 = arith.mulf %33, %32 : vector<128x512xf32>
    %35 = arith.maximumf %32, %34 : vector<128x512xf32>
    %c256 = arith.constant 256 : index
    %c0_16 = arith.constant 0 : index
    %36 = vector.load %arg10[%c256, %c0_16] : memref<2112x512xbf16, #tpu.memory_space<vmem>>, vector<512x512xbf16>
    %c0_17 = arith.constant 0 : index
    %c896 = arith.constant 896 : index
    %37 = vector.load %arg5[%c0_17, %c896] : memref<1x5632xf32, #tpu.memory_space<vmem>>, vector<1x512xf32>
    %38 = arith.truncf %35 : vector<128x512xf32> to vector<128x512xbf16>
    %cst_18 = arith.constant dense<0.000000e+00> : vector<128x512xf32>
    %39 = tpu.matmul %38, %36, %cst_18 {dimension_numbers = #tpu.dot_dimension_numbers<[1], [0], [0], [1], [0, 0, 1, 1], [], []>} : vector<128x512xbf16>, vector<512x512xbf16>, vector<128x512xf32> -> vector<128x512xf32>
    %40 = vector.broadcast %37 : vector<1x512xf32> to vector<128x512xf32>
    %41 = arith.addf %39, %40 : vector<128x512xf32>
    %cst_19 = arith.constant 0.00999999977 : f32
    %42 = vector.broadcast %cst_19 : f32 to vector<128x512xf32>
    %43 = arith.mulf %42, %41 : vector<128x512xf32>
    %44 = arith.maximumf %41, %43 : vector<128x512xf32>
    %45 = vector.extract_strided_slice %44 {offsets = [0, 0], sizes = [128, 256], strides = [1, 1]} : vector<128x512xf32> to vector<128x256xf32>
    %c768 = arith.constant 768 : index
    %c0_20 = arith.constant 0 : index
    %46 = vector.load %arg10[%c768, %c0_20] : memref<2112x512xbf16, #tpu.memory_space<vmem>>, vector<256x512xbf16>
    %c0_21 = arith.constant 0 : index
    %c1408 = arith.constant 1408 : index
    %47 = vector.load %arg5[%c0_21, %c1408] : memref<1x5632xf32, #tpu.memory_space<vmem>>, vector<1x512xf32>
    %48 = arith.truncf %45 : vector<128x256xf32> to vector<128x256xbf16>
    %cst_22 = arith.constant dense<0.000000e+00> : vector<128x512xf32>
    %49 = tpu.matmul %48, %46, %cst_22 {dimension_numbers = #tpu.dot_dimension_numbers<[1], [0], [0], [1], [0, 0, 1, 1], [], []>} : vector<128x256xbf16>, vector<256x512xbf16>, vector<128x512xf32> -> vector<128x512xf32>
    %50 = vector.broadcast %47 : vector<1x512xf32> to vector<128x512xf32>
    %51 = arith.addf %49, %50 : vector<128x512xf32>
    %cst_23 = arith.constant 0.00999999977 : f32
    %52 = vector.broadcast %cst_23 : f32 to vector<128x512xf32>
    %53 = arith.mulf %52, %51 : vector<128x512xf32>
    %54 = arith.maximumf %51, %53 : vector<128x512xf32>
    %c1_i32_24 = arith.constant 1 : i32
    %55 = tpu.memref_slice %arg14[%c1_i32_24] : memref<3x!tpu.dma_semaphore, #tpu.memory_space<semaphore_mem>> -> memref<1x!tpu.dma_semaphore, #tpu.memory_space<semaphore_mem>>
    %56 = tpu.memref_squeeze %55 : memref<1x!tpu.dma_semaphore, #tpu.memory_space<semaphore_mem>> -> memref<!tpu.dma_semaphore, #tpu.memory_space<semaphore_mem>>
    tpu.wait_dma2 semaphore(%56 : memref<!tpu.dma_semaphore, #tpu.memory_space<semaphore_mem>>) src(%arg8 : memref<1280x64xbf16, #tpu.memory_space<any>>) dst(%arg12 : memref<1280x64xbf16, #tpu.memory_space<vmem>>)
    %c0_25 = arith.constant 0 : index
    %c0_26 = arith.constant 0 : index
    %57 = vector.load %arg12[%c0_25, %c0_26] : memref<1280x64xbf16, #tpu.memory_space<vmem>>, vector<512x64xbf16>
    %c0_27 = arith.constant 0 : index
    %c1920 = arith.constant 1920 : index
    %58 = vector.load %arg5[%c0_27, %c1920] : memref<1x5632xf32, #tpu.memory_space<vmem>>, vector<1x64xf32>
    %59 = arith.truncf %54 : vector<128x512xf32> to vector<128x512xbf16>
    %cst_28 = arith.constant dense<0.000000e+00> : vector<128x64xf32>
    %60 = tpu.matmul %59, %57, %cst_28 {dimension_numbers = #tpu.dot_dimension_numbers<[1], [0], [0], [1], [0, 0, 1, 1], [], []>} : vector<128x512xbf16>, vector<512x64xbf16>, vector<128x64xf32> -> vector<128x64xf32>
    %61 = vector.broadcast %58 : vector<1x64xf32> to vector<128x64xf32>
    %62 = arith.addf %60, %61 : vector<128x64xf32>
    %cst_29 = arith.constant 0.00999999977 : f32
    %63 = vector.broadcast %cst_29 : f32 to vector<128x64xf32>
    %64 = arith.mulf %63, %62 : vector<128x64xf32>
    %65 = arith.maximumf %62, %64 : vector<128x64xf32>
    %66 = vector.extract_strided_slice %44 {offsets = [0, 256], sizes = [128, 256], strides = [1, 1]} : vector<128x512xf32> to vector<128x256xf32>
    %c1024 = arith.constant 1024 : index
    %c0_30 = arith.constant 0 : index
    %67 = vector.load %arg10[%c1024, %c0_30] : memref<2112x512xbf16, #tpu.memory_space<vmem>>, vector<256x512xbf16>
    %c0_31 = arith.constant 0 : index
    %c2048 = arith.constant 2048 : index
    %68 = vector.load %arg5[%c0_31, %c2048] : memref<1x5632xf32, #tpu.memory_space<vmem>>, vector<1x512xf32>
    %69 = arith.truncf %66 : vector<128x256xf32> to vector<128x256xbf16>
    %cst_32 = arith.constant dense<0.000000e+00> : vector<128x512xf32>
    %70 = tpu.matmul %69, %67, %cst_32 {dimension_numbers = #tpu.dot_dimension_numbers<[1], [0], [0], [1], [0, 0, 1, 1], [], []>} : vector<128x256xbf16>, vector<256x512xbf16>, vector<128x512xf32> -> vector<128x512xf32>
    %71 = vector.broadcast %68 : vector<1x512xf32> to vector<128x512xf32>
    %72 = arith.addf %70, %71 : vector<128x512xf32>
    %cst_33 = arith.constant 0.00999999977 : f32
    %73 = vector.broadcast %cst_33 : f32 to vector<128x512xf32>
    %74 = arith.mulf %73, %72 : vector<128x512xf32>
    %75 = arith.maximumf %72, %74 : vector<128x512xf32>
    %c512 = arith.constant 512 : index
    %c0_34 = arith.constant 0 : index
    %76 = vector.load %arg12[%c512, %c0_34] : memref<1280x64xbf16, #tpu.memory_space<vmem>>, vector<512x64xbf16>
    %c0_35 = arith.constant 0 : index
    %c2560 = arith.constant 2560 : index
    %77 = vector.load %arg5[%c0_35, %c2560] : memref<1x5632xf32, #tpu.memory_space<vmem>>, vector<1x64xf32>
    %78 = arith.truncf %75 : vector<128x512xf32> to vector<128x512xbf16>
    %cst_36 = arith.constant dense<0.000000e+00> : vector<128x64xf32>
    %79 = tpu.matmul %78, %76, %cst_36 {dimension_numbers = #tpu.dot_dimension_numbers<[1], [0], [0], [1], [0, 0, 1, 1], [], []>} : vector<128x512xbf16>, vector<512x64xbf16>, vector<128x64xf32> -> vector<128x64xf32>
    %80 = vector.broadcast %77 : vector<1x64xf32> to vector<128x64xf32>
    %81 = arith.addf %79, %80 : vector<128x64xf32>
    %cst_37 = arith.constant 0.00999999977 : f32
    %82 = vector.broadcast %cst_37 : f32 to vector<128x64xf32>
    %83 = arith.mulf %82, %81 : vector<128x64xf32>
    %84 = arith.maximumf %81, %83 : vector<128x64xf32>
    %85 = vector.shape_cast %65 : vector<128x64xf32> to vector<8x16x64xf32>
    %cst_38 = arith.constant dense<0.000000e+00> : vector<8x64xf32>
    %86 = vector.multi_reduction <add>, %85, %cst_38 [1] : vector<8x16x64xf32> to vector<8x64xf32>
    %cst_39 = arith.constant 1.600000e+01 : f32
    %87 = vector.broadcast %cst_39 : f32 to vector<8x64xf32>
    %88 = arith.divf %86, %87 : vector<8x64xf32>
    %89 = vector.shape_cast %84 : vector<128x64xf32> to vector<8x16x64xf32>
    %cst_40 = arith.constant dense<0xFF800000> : vector<8x64xf32>
    %90 = vector.multi_reduction <maximumf>, %89, %cst_40 [1] : vector<8x16x64xf32> to vector<8x64xf32>
    %c0_41 = arith.constant 0 : index
    %c2816 = arith.constant 2816 : index
    %91 = vector.load %arg5[%c0_41, %c2816] : memref<1x5632xf32, #tpu.memory_space<vmem>>, vector<1x64xf32>
    %92 = vector.broadcast %91 : vector<1x64xf32> to vector<128x64xf32>
    %93 = arith.mulf %65, %92 : vector<128x64xf32>
    %cst_42 = arith.constant dense<0.000000e+00> : vector<128xf32>
    %94 = vector.multi_reduction <add>, %93, %cst_42 [1] : vector<128x64xf32> to vector<128xf32>
    %95 = vector.shape_cast %94 : vector<128xf32> to vector<128x1xf32>
    %c0_43 = arith.constant 0 : index
    %c2944 = arith.constant 2944 : index
    %96 = vector.load %arg5[%c0_43, %c2944] : memref<1x5632xf32, #tpu.memory_space<vmem>>, vector<1x64xf32>
    %97 = vector.broadcast %96 : vector<1x64xf32> to vector<128x64xf32>
    %98 = arith.mulf %84, %97 : vector<128x64xf32>
    %cst_44 = arith.constant dense<0.000000e+00> : vector<128xf32>
    %99 = vector.multi_reduction <add>, %98, %cst_44 [1] : vector<128x64xf32> to vector<128xf32>
    %100 = vector.shape_cast %99 : vector<128xf32> to vector<128x1xf32>
    %101 = arith.addf %95, %100 : vector<128x1xf32>
    %c0_45 = arith.constant 0 : index
    %c2688 = arith.constant 2688 : index
    %102 = vector.load %arg5[%c0_45, %c2688] : memref<1x5632xf32, #tpu.memory_space<vmem>>, vector<1x1xf32>
    %103 = vector.broadcast %102 : vector<1x1xf32> to vector<128x1xf32>
    %104 = arith.addf %101, %103 : vector<128x1xf32>
    %105 = vector.shape_cast %104 : vector<128x1xf32> to vector<8x16x1xf32>
    %cst_46 = arith.constant dense<0xFF800000> : vector<8x1xf32>
    %106 = vector.multi_reduction <maximumf>, %105, %cst_46 [1] : vector<8x16x1xf32> to vector<8x1xf32>
    %107 = vector.shape_cast %106 : vector<8x1xf32> to vector<8x1x1xf32>
    %108 = vector.broadcast %107 : vector<8x1x1xf32> to vector<8x16x1xf32>
    %109 = arith.subf %105, %108 : vector<8x16x1xf32>
    %110 = math.exp %109 : vector<8x16x1xf32>
    %cst_47 = arith.constant dense<0.000000e+00> : vector<8x1xf32>
    %111 = vector.multi_reduction <add>, %110, %cst_47 [1] : vector<8x16x1xf32> to vector<8x1xf32>
    %112 = vector.shape_cast %111 : vector<8x1xf32> to vector<8x1x1xf32>
    %113 = vector.broadcast %112 : vector<8x1x1xf32> to vector<8x16x1xf32>
    %114 = arith.divf %110, %113 : vector<8x16x1xf32>
    %115 = vector.shape_cast %35 : vector<128x512xf32> to vector<8x16x512xf32>
    %116 = vector.broadcast %114 : vector<8x16x1xf32> to vector<8x16x512xf32>
    %117 = arith.mulf %116, %115 : vector<8x16x512xf32>
    %cst_48 = arith.constant dense<0.000000e+00> : vector<8x512xf32>
    %118 = vector.multi_reduction <add>, %117, %cst_48 [1] : vector<8x16x512xf32> to vector<8x512xf32>
    %c0_49 = arith.constant 0 : index
    %c0_50 = arith.constant 0 : index
    %119 = vector.load %arg2[%c0_49, %c0_50] : memref<64x16xf32, #tpu.memory_space<vmem>>, vector<64x16xf32>
    %c16 = arith.constant 16 : index
    %c0_51 = arith.constant 0 : index
    %120 = vector.load %arg4[%c16, %c0_51] : memref<160x256xbf16, #tpu.memory_space<vmem>>, vector<16x192xbf16>
    %c0_52 = arith.constant 0 : index
    %c3072 = arith.constant 3072 : index
    %121 = vector.load %arg5[%c0_52, %c3072] : memref<1x5632xf32, #tpu.memory_space<vmem>>, vector<1x192xf32>
    %122 = arith.truncf %119 : vector<64x16xf32> to vector<64x16xbf16>
    %cst_53 = arith.constant dense<0.000000e+00> : vector<64x192xf32>
    %123 = tpu.matmul %122, %120, %cst_53 {dimension_numbers = #tpu.dot_dimension_numbers<[1], [0], [0], [1], [0, 0, 1, 1], [], []>} : vector<64x16xbf16>, vector<16x192xbf16>, vector<64x192xf32> -> vector<64x192xf32>
    %124 = vector.broadcast %121 : vector<1x192xf32> to vector<64x192xf32>
    %125 = arith.addf %123, %124 : vector<64x192xf32>
    %cst_54 = arith.constant 0.00999999977 : f32
    %126 = vector.broadcast %cst_54 : f32 to vector<64x192xf32>
    %127 = arith.mulf %126, %125 : vector<64x192xf32>
    %128 = arith.maximumf %125, %127 : vector<64x192xf32>
    %c1280 = arith.constant 1280 : index
    %c0_55 = arith.constant 0 : index
    %129 = vector.load %arg10[%c1280, %c0_55] : memref<2112x512xbf16, #tpu.memory_space<vmem>>, vector<192x384xbf16>
    %c0_56 = arith.constant 0 : index
    %c3328 = arith.constant 3328 : index
    %130 = vector.load %arg5[%c0_56, %c3328] : memref<1x5632xf32, #tpu.memory_space<vmem>>, vector<1x384xf32>
    %131 = arith.truncf %128 : vector<64x192xf32> to vector<64x192xbf16>
    %cst_57 = arith.constant dense<0.000000e+00> : vector<64x384xf32>
    %132 = tpu.matmul %131, %129, %cst_57 {dimension_numbers = #tpu.dot_dimension_numbers<[1], [0], [0], [1], [0, 0, 1, 1], [], []>} : vector<64x192xbf16>, vector<192x384xbf16>, vector<64x384xf32> -> vector<64x384xf32>
    %133 = vector.broadcast %130 : vector<1x384xf32> to vector<64x384xf32>
    %134 = arith.addf %132, %133 : vector<64x384xf32>
    %cst_58 = arith.constant 0.00999999977 : f32
    %135 = vector.broadcast %cst_58 : f32 to vector<64x384xf32>
    %136 = arith.mulf %135, %134 : vector<64x384xf32>
    %137 = arith.maximumf %134, %136 : vector<64x384xf32>
    %c1472 = arith.constant 1472 : index
    %c0_59 = arith.constant 0 : index
    %138 = vector.load %arg10[%c1472, %c0_59] : memref<2112x512xbf16, #tpu.memory_space<vmem>>, vector<384x512xbf16>
    %c0_60 = arith.constant 0 : index
    %c3712 = arith.constant 3712 : index
    %139 = vector.load %arg5[%c0_60, %c3712] : memref<1x5632xf32, #tpu.memory_space<vmem>>, vector<1x512xf32>
    %140 = arith.truncf %137 : vector<64x384xf32> to vector<64x384xbf16>
    %cst_61 = arith.constant dense<0.000000e+00> : vector<64x512xf32>
    %141 = tpu.matmul %140, %138, %cst_61 {dimension_numbers = #tpu.dot_dimension_numbers<[1], [0], [0], [1], [0, 0, 1, 1], [], []>} : vector<64x384xbf16>, vector<384x512xbf16>, vector<64x512xf32> -> vector<64x512xf32>
    %142 = vector.broadcast %139 : vector<1x512xf32> to vector<64x512xf32>
    %143 = arith.addf %141, %142 : vector<64x512xf32>
    %cst_62 = arith.constant 0.00999999977 : f32
    %144 = vector.broadcast %cst_62 : f32 to vector<64x512xf32>
    %145 = arith.mulf %144, %143 : vector<64x512xf32>
    %146 = arith.maximumf %143, %145 : vector<64x512xf32>
    %c2_i32_63 = arith.constant 2 : i32
    %147 = tpu.memref_slice %arg14[%c2_i32_63] : memref<3x!tpu.dma_semaphore, #tpu.memory_space<semaphore_mem>> -> memref<1x!tpu.dma_semaphore, #tpu.memory_space<semaphore_mem>>
    %148 = tpu.memref_squeeze %147 : memref<1x!tpu.dma_semaphore, #tpu.memory_space<semaphore_mem>> -> memref<!tpu.dma_semaphore, #tpu.memory_space<semaphore_mem>>
    tpu.wait_dma2 semaphore(%148 : memref<!tpu.dma_semaphore, #tpu.memory_space<semaphore_mem>>) src(%arg7 : memref<1984x256xbf16, #tpu.memory_space<any>>) dst(%arg11 : memref<1984x256xbf16, #tpu.memory_space<vmem>>)
    %c0_64 = arith.constant 0 : index
    %c0_65 = arith.constant 0 : index
    %149 = vector.load %arg11[%c0_64, %c0_65] : memref<1984x256xbf16, #tpu.memory_space<vmem>>, vector<512x256xbf16>
    %c0_66 = arith.constant 0 : index
    %c4224 = arith.constant 4224 : index
    %150 = vector.load %arg5[%c0_66, %c4224] : memref<1x5632xf32, #tpu.memory_space<vmem>>, vector<1x256xf32>
    %151 = arith.truncf %146 : vector<64x512xf32> to vector<64x512xbf16>
    %cst_67 = arith.constant dense<0.000000e+00> : vector<64x256xf32>
    %152 = tpu.matmul %151, %149, %cst_67 {dimension_numbers = #tpu.dot_dimension_numbers<[1], [0], [0], [1], [0, 0, 1, 1], [], []>} : vector<64x512xbf16>, vector<512x256xbf16>, vector<64x256xf32> -> vector<64x256xf32>
    %153 = vector.broadcast %150 : vector<1x256xf32> to vector<64x256xf32>
    %154 = arith.addf %152, %153 : vector<64x256xf32>
    %cst_68 = arith.constant 0.00999999977 : f32
    %155 = vector.broadcast %cst_68 : f32 to vector<64x256xf32>
    %156 = arith.mulf %155, %154 : vector<64x256xf32>
    %157 = arith.maximumf %154, %156 : vector<64x256xf32>
    %c1856 = arith.constant 1856 : index
    %c0_69 = arith.constant 0 : index
    %158 = vector.load %arg10[%c1856, %c0_69] : memref<2112x512xbf16, #tpu.memory_space<vmem>>, vector<256x512xbf16>
    %c0_70 = arith.constant 0 : index
    %c4480 = arith.constant 4480 : index
    %159 = vector.load %arg5[%c0_70, %c4480] : memref<1x5632xf32, #tpu.memory_space<vmem>>, vector<1x512xf32>
    %160 = arith.truncf %157 : vector<64x256xf32> to vector<64x256xbf16>
    %cst_71 = arith.constant dense<0.000000e+00> : vector<64x512xf32>
    %161 = tpu.matmul %160, %158, %cst_71 {dimension_numbers = #tpu.dot_dimension_numbers<[1], [0], [0], [1], [0, 0, 1, 1], [], []>} : vector<64x256xbf16>, vector<256x512xbf16>, vector<64x512xf32> -> vector<64x512xf32>
    %162 = vector.broadcast %159 : vector<1x512xf32> to vector<64x512xf32>
    %163 = arith.addf %161, %162 : vector<64x512xf32>
    %cst_72 = arith.constant 0.00999999977 : f32
    %164 = vector.broadcast %cst_72 : f32 to vector<64x512xf32>
    %165 = arith.mulf %164, %163 : vector<64x512xf32>
    %166 = arith.maximumf %163, %165 : vector<64x512xf32>
    %c512_73 = arith.constant 512 : index
    %c0_74 = arith.constant 0 : index
    %167 = vector.load %arg11[%c512_73, %c0_74] : memref<1984x256xbf16, #tpu.memory_space<vmem>>, vector<512x256xbf16>
    %c0_75 = arith.constant 0 : index
    %c4992 = arith.constant 4992 : index
    %168 = vector.load %arg5[%c0_75, %c4992] : memref<1x5632xf32, #tpu.memory_space<vmem>>, vector<1x256xf32>
    %169 = arith.truncf %166 : vector<64x512xf32> to vector<64x512xbf16>
    %cst_76 = arith.constant dense<0.000000e+00> : vector<64x256xf32>
    %170 = tpu.matmul %169, %167, %cst_76 {dimension_numbers = #tpu.dot_dimension_numbers<[1], [0], [0], [1], [0, 0, 1, 1], [], []>} : vector<64x512xbf16>, vector<512x256xbf16>, vector<64x256xf32> -> vector<64x256xf32>
    %171 = vector.broadcast %168 : vector<1x256xf32> to vector<64x256xf32>
    %172 = arith.addf %170, %171 : vector<64x256xf32>
    %cst_77 = arith.constant 0.00999999977 : f32
    %173 = vector.broadcast %cst_77 : f32 to vector<64x256xf32>
    %174 = arith.mulf %173, %172 : vector<64x256xf32>
    %175 = arith.maximumf %172, %174 : vector<64x256xf32>
    %176 = vector.shape_cast %175 : vector<64x256xf32> to vector<8x8x256xf32>
    %cst_78 = arith.constant dense<0xFF800000> : vector<8x256xf32>
    %177 = vector.multi_reduction <maximumf>, %176, %cst_78 [1] : vector<8x8x256xf32> to vector<8x256xf32>
    %c0_79 = arith.constant 0 : index
    %c0_80 = arith.constant 0 : index
    %178 = vector.load %arg13[%c0_79, %c0_80] : memref<8x960xf32, #tpu.memory_space<vmem>>, vector<8x64xf32>
    tpu.vector_store %arg13[%c0_79, %c0_80], %88 {strides = array<i32>} : memref<8x960xf32, #tpu.memory_space<vmem>>, vector<8x64xf32>,
    %c0_81 = arith.constant 0 : index
    %c64 = arith.constant 64 : index
    %179 = vector.load %arg13[%c0_81, %c64] : memref<8x960xf32, #tpu.memory_space<vmem>>, vector<8x64xf32>
    tpu.vector_store %arg13[%c0_81, %c64], %90 {strides = array<i32>} : memref<8x960xf32, #tpu.memory_space<vmem>>, vector<8x64xf32>,
    %c0_82 = arith.constant 0 : index
    %c128_83 = arith.constant 128 : index
    %180 = vector.load %arg13[%c0_82, %c128_83] : memref<8x960xf32, #tpu.memory_space<vmem>>, vector<8x512xf32>
    tpu.vector_store %arg13[%c0_82, %c128_83], %118 {strides = array<i32>} : memref<8x960xf32, #tpu.memory_space<vmem>>, vector<8x512xf32>,
    %c0_84 = arith.constant 0 : index
    %c640 = arith.constant 640 : index
    %181 = vector.load %arg13[%c0_84, %c640] : memref<8x960xf32, #tpu.memory_space<vmem>>, vector<8x256xf32>
    tpu.vector_store %arg13[%c0_84, %c640], %177 {strides = array<i32>} : memref<8x960xf32, #tpu.memory_space<vmem>>, vector<8x256xf32>,
    %c0_85 = arith.constant 0 : index
    %c0_86 = arith.constant 0 : index
    %182 = vector.load %arg3[%c0_85, %c0_86] : memref<8x64xf32, #tpu.memory_space<vmem>>, vector<8x64xf32>
    %c0_87 = arith.constant 0 : index
    %c896_88 = arith.constant 896 : index
    %183 = vector.load %arg13[%c0_87, %c896_88] : memref<8x960xf32, #tpu.memory_space<vmem>>, vector<8x64xf32>
    tpu.vector_store %arg13[%c0_87, %c896_88], %182 {strides = array<i32>} : memref<8x960xf32, #tpu.memory_space<vmem>>, vector<8x64xf32>,
    %c0_89 = arith.constant 0 : index
    %c0_90 = arith.constant 0 : index
    %184 = vector.load %arg13[%c0_89, %c0_90] : memref<8x960xf32, #tpu.memory_space<vmem>>, vector<8x960xf32>
    %c1024_91 = arith.constant 1024 : index
    %c0_92 = arith.constant 0 : index
    %185 = vector.load %arg11[%c1024_91, %c0_92] : memref<1984x256xbf16, #tpu.memory_space<vmem>>, vector<960x256xbf16>
    %c0_93 = arith.constant 0 : index
    %c5248 = arith.constant 5248 : index
    %186 = vector.load %arg5[%c0_93, %c5248] : memref<1x5632xf32, #tpu.memory_space<vmem>>, vector<1x256xf32>
    %187 = arith.truncf %184 : vector<8x960xf32> to vector<8x960xbf16>
    %cst_94 = arith.constant dense<0.000000e+00> : vector<8x256xf32>
    %188 = tpu.matmul %187, %185, %cst_94 {dimension_numbers = #tpu.dot_dimension_numbers<[1], [0], [0], [1], [0, 0, 1, 1], [], []>} : vector<8x960xbf16>, vector<960x256xbf16>, vector<8x256xf32> -> vector<8x256xf32>
    %189 = vector.broadcast %186 : vector<1x256xf32> to vector<8x256xf32>
    %190 = arith.addf %188, %189 : vector<8x256xf32>
    %cst_95 = arith.constant 0.00999999977 : f32
    %191 = vector.broadcast %cst_95 : f32 to vector<8x256xf32>
    %192 = arith.mulf %191, %190 : vector<8x256xf32>
    %193 = arith.maximumf %190, %192 : vector<8x256xf32>
    %c1024_96 = arith.constant 1024 : index
    %c0_97 = arith.constant 0 : index
    %194 = vector.load %arg12[%c1024_96, %c0_97] : memref<1280x64xbf16, #tpu.memory_space<vmem>>, vector<256x64xbf16>
    %c0_98 = arith.constant 0 : index
    %c5504 = arith.constant 5504 : index
    %195 = vector.load %arg5[%c0_98, %c5504] : memref<1x5632xf32, #tpu.memory_space<vmem>>, vector<1x64xf32>
    %196 = arith.truncf %193 : vector<8x256xf32> to vector<8x256xbf16>
    %cst_99 = arith.constant dense<0.000000e+00> : vector<8x64xf32>
    %197 = tpu.matmul %196, %194, %cst_99 {dimension_numbers = #tpu.dot_dimension_numbers<[1], [0], [0], [1], [0, 0, 1, 1], [], []>} : vector<8x256xbf16>, vector<256x64xbf16>, vector<8x64xf32> -> vector<8x64xf32>
    %198 = vector.broadcast %195 : vector<1x64xf32> to vector<8x64xf32>
    %199 = arith.addf %197, %198 : vector<8x64xf32>
    %c0_100 = arith.constant 0 : index
    %c0_101 = arith.constant 0 : index
    %200 = vector.load %arg9[%c0_100, %c0_101] : memref<8x64xf32, #tpu.memory_space<vmem>>, vector<8x64xf32>
    tpu.vector_store %arg9[%c0_100, %c0_101], %199 {strides = array<i32>} : memref<8x64xf32, #tpu.memory_space<vmem>>, vector<8x64xf32>,
    return
  }
  func.func @transform_0(%arg0: i32) -> (i32, i32) {
    %c0_i32 = arith.constant 0 : i32
    %c0_i32_0 = arith.constant 0 : i32
    %c0_i32_1 = arith.constant 0 : i32
    return %c0_i32, %c0_i32_0 : i32, i32
  }
  func.func @transform_1(%arg0: i32) -> (i32, i32) {
    %c0_i32 = arith.constant 0 : i32
    %c0_i32_0 = arith.constant 0 : i32
    %c0_i32_1 = arith.constant 0 : i32
    return %c0_i32, %c0_i32_0 : i32, i32
  }
  func.func @transform_2(%arg0: i32) -> (i32, i32) {
    %c0_i32 = arith.constant 0 : i32
    %c0_i32_0 = arith.constant 0 : i32
    %c0_i32_1 = arith.constant 0 : i32
    return %c0_i32, %c0_i32_0 : i32, i32
  }
  func.func @transform_3(%arg0: i32) -> (i32, i32) {
    %c0_i32 = arith.constant 0 : i32
    %c0_i32_0 = arith.constant 0 : i32
    %c0_i32_1 = arith.constant 0 : i32
    return %c0_i32, %c0_i32_0 : i32, i32
  }
  func.func @transform_4(%arg0: i32) -> (i32, i32) {
    %c0_i32 = arith.constant 0 : i32
    %c0_i32_0 = arith.constant 0 : i32
    %c0_i32_1 = arith.constant 0 : i32
    return %c0_i32, %c0_i32_0 : i32, i32
  }
  func.func @transform_8(%arg0: i32) -> (i32, i32) {
    %c0_i32 = arith.constant 0 : i32
    %c0_i32_0 = arith.constant 0 : i32
    %c0_i32_1 = arith.constant 0 : i32
    return %c0_i32, %c0_i32_0 : i32, i32
  }
}

</mosaic_0001>

<bundles_post_ra>
// kernel: tracker_offset_emb_forward.1
= control target key start
LH: loop header
LB: loop body
LE: loop exit
PB: predicated region body
PF: predicated region fallthrough
CT: control target
= control target key end

     0   :  { %13 = vsyncpa [#allocation8], 0  ;;  %s11803_s0 = inlined_call_operand.vmem [shape: f32[128,16], index: 0, kind: input, shape index: {}]   ;;  %s11804_s1 = inlined_call_operand.vmem [shape: f32[64,16], index: 1, kind: input, shape index: {}]   ;;  %s11805_s2 = inlined_call_operand.vmem [shape: f32[8,64], index: 2, kind: input, shape index: {}]   ;;  %s11806_s3 = inlined_call_operand.hbm [shape: bf16[160,256], index: 3, kind: input, shape index: {}]   ;;  %s11807_s4 = inlined_call_operand.hbm [shape: f32[1,5632], index: 4, kind: input, shape index: {}]   ;;  %s11808_s5 = inlined_call_operand.hbm [shape: bf16[2112,512], index: 5, kind: input, shape index: {}]   ;;  %s11809_s6 = inlined_call_operand.hbm [shape: bf16[1984,256], index: 6, kind: input, shape index: {}]   ;;  %s11810_s7 = inlined_call_operand.vmem [shape: bf16[1280,64], index: 7, kind: input, shape index: {}]   ;;  %s11811_s8 = inlined_call_operand.vmem [shape: f32[8,64], index: 8, kind: output, shape index: {}]  }
   0x1   :  { %14 = vsyncpa [#allocation10], 0  ;;  %s7662_s27 = smov [#allocation7]   ;;  %s7608_s9 = scalar_lea.hbm %s11806_s3, 2560 }
   0x2   :  { %s26_s28 = sshll.u32 %s7662_s27, 4  ;;  %p7609_p0 = scmp.ne.s32.totalorder %s11806_s3, %s7608_s9  ;;  %s27_s28 = int_to_ptr.vmem [resolvable:$true] %s26_s28 }
   0x3   :  { %p7612_p1 = scmp.lt.u32.totalorder %s7608_s9, %s11806_s3 }
   0x5   :  { %p7614_p2 = pnand %p7612_p1, %p7609_p0 }
   0x7   :  { %7617 = shalt.err (!%p7614_p2)
}
   0x8   :  { %s7618_s14 = scalar_lea.vmem %s27_s28, 2560  ;;  %p7623_p4 = scmp.lt.s32.totalorder %s27_s28, %s27_s28 }
   0x9   :  { %p7619_p3 = scmp.ne.s32.totalorder %s27_s28, %s7618_s14  ;;  %p7624_p5 = scmp.lt.s32.totalorder %s7618_s14, %s7618_s14 }
   0xb   :  { %p7625_p6 = por %p7624_p5, %p7623_p4 }
   0xd   :  { %p7626_p7 = pnand %p7625_p6, %p7619_p3 }
   0xf   :  { %7629 = shalt.err (!%p7626_p7)
}
  0x10   :  { %s7663_s15 = smov 128   ;;  %s7664_s16 = smov 8  }
  0x11   :  { %32 = dma.hbm_to_vmem [thread:$0]  %s11806_s3, 2560, %s27_s28, [#allocation8], %s7663_s15, %s7663_s15, %s7664_s16  }
  0x12   :  { %s7665_s19 = smov [#allocation9]   ;;  %s7630_s23 = scalar_lea.hbm %s11807_s4, 704 }
  0x13   :  { %s39_s20 = sshll.u32 %s7665_s19, 4  ;;  %p7631_p8 = scmp.ne.s32.totalorder %s11807_s4, %s7630_s23  ;;  %s40_s20 = int_to_ptr.vmem [resolvable:$true] %s39_s20 }
  0x14   :  { %p7634_p9 = scmp.lt.u32.totalorder %s7630_s23, %s11807_s4 }
  0x16   :  { %p7636_p10 = pnand %p7634_p9, %p7631_p8 }
  0x18   :  { %7639 = shalt.err (!%p7636_p10)
}
  0x19   :  { %s7640_s29 = scalar_lea.vmem %s40_s20, 704  ;;  %p7645_p12 = scmp.lt.s32.totalorder %s40_s20, %s40_s20 }
  0x1a   :  { %p7641_p11 = scmp.ne.s32.totalorder %s40_s20, %s7640_s29  ;;  %p7646_p13 = scmp.lt.s32.totalorder %s7640_s29, %s7640_s29 }
  0x1c   :  { %p7647_p0 = por %p7646_p13, %p7645_p12 }
  0x1e   :  { %p7648_p1 = pnand %p7647_p0, %p7641_p11 }
  0x20   :  { %7651 = shalt.err (!%p7648_p1)
}
  0x21   :  { %42 = dma.hbm_to_vmem [thread:$0]  %s11807_s4, 704, %s40_s20, [#allocation10]  }
  0x22   :  { %7652 = dma.done.wait [#allocation8], 2560  }
  0x23   :  { %7653 = vsyncadd [#allocation8], 4294964736 }
  0x24   :  { %7654 = dma.done.wait [#allocation10], 704  }
  0x25   :  { %7655 = vsyncadd [#allocation10], 4294966592  ;;  %s54_s30 = sld [smem:[#allocation0]]   ;;  %s7666_s9 = smov 512  }
  0x26   :  { %66 = sst [smem:[#allocation12]] %s7666_s9  ;;  %s7667_s10 = smov 4  }
  0x27   :  { %68 = sst [smem:[#allocation12 + $0x1]] %s7666_s9  ;;  %s7668_s11 = smov 64  }
  0x28   :  { %70 = sst [smem:[#allocation12 + $0x2]] %s7667_s10  ;;  %s7669_s12 = smov 2  }
  0x29   :  { %72 = sst [smem:[#allocation12 + $0x3]] %s7668_s11  ;;  %s7670_s4 = smov [#allocation2]  }
  0x2a   :  { %74 = sst [smem:[#allocation12 + $0x4]] %s7663_s15  ;;  %s62_s13 = sshll.u32 %s7670_s4, 4  ;;  %s63_s13 = int_to_ptr.vmem [resolvable:$true] %s62_s13 }
  0x2b   :  { %76 = sst [smem:[#allocation12 + $0x5]] %s7669_s12  ;;  %s6868_s14 = sshll.u32 %s54_s30, 26 }
  0x2c   :  { %s7671_s16 = smov 256   ;;  %s7754_s17 = sadd.s32 134217728, %s6868_s14 }
  0x2d   :  { %78 = sst [smem:[#allocation12 + $0x6]] %s7671_s16  ;;  %s7672_s18 = smov [#allocation6]  }
  0x2e   :  { %80 = sst [smem:[#allocation12 + $0x7]] %s7668_s11  ;;  %s7673_s19 = smov [#allocation11]  }
  0x2f   :  { %82 = sst [smem:[#allocation12 + $0x8]] %s7667_s10 }
  0x30   :  { %84 = dma.general %s11808_s5, 67584, %s63_s13, %s7672_s18, %s7673_s19, [#allocation12], %s7754_s17, 0  }
  0x31   :  { %v7765_v0 = vld [vmem:[%s11810_s7] sm:$0xff]  ;;  %v7770_v1 = vld [vmem:[%s11810_s7 + $0x8] sm:$0xff]  ;;  %v7775_v2 = vld [vmem:[%s11810_s7 + $0x10] sm:$0xff] }
  0x32   :  { %12070 = vst [vmem:[#allocation21_spill] sm:$0xff] %v7765_v0  ;;  %12071 = vst [vmem:[#allocation22_spill] sm:$0xff] %v7770_v1  ;;  %v7780_v3 = vld [vmem:[%s11810_s7 + $0x18] sm:$0xff]  ;;  %v7785_v4 = vld [vmem:[%s11810_s7 + $0x20] sm:$0xff] }
  0x33   :  { %12072 = vst [vmem:[#allocation23_spill] sm:$0xff] %v7775_v2  ;;  %12073 = vst [vmem:[#allocation24_spill] sm:$0xff] %v7780_v3  ;;  %v7790_v5 = vld [vmem:[%s11810_s7 + $0x28] sm:$0xff]  ;;  %v7795_v6 = vld [vmem:[%s11810_s7 + $0x30] sm:$0xff] }
  0x34   :  { %12074 = vst [vmem:[#allocation25_spill] sm:$0xff] %v7785_v4  ;;  %12075 = vst [vmem:[#allocation26_spill] sm:$0xff] %v7790_v5  ;;  %v7800_v7 = vld [vmem:[%s11810_s7 + $0x38] sm:$0xff]  ;;  %v7805_v8 = vld [vmem:[%s11810_s7 + $0x40] sm:$0xff] }
  0x35   :  { %12076 = vst [vmem:[#allocation27_spill] sm:$0xff] %v7795_v6  ;;  %12077 = vst [vmem:[#allocation28_spill] sm:$0xff] %v7800_v7  ;;  %v7810_v9 = vld [vmem:[%s11810_s7 + $0x48] sm:$0xff]  ;;  %v7815_v10 = vld [vmem:[%s11810_s7 + $0x50] sm:$0xff] }
  0x36   :  { %12078 = vst [vmem:[#allocation29_spill] sm:$0xff] %v7805_v8  ;;  %12079 = vst [vmem:[#allocation30_spill] sm:$0xff] %v7810_v9  ;;  %v7820_v11 = vld [vmem:[%s11810_s7 + $0x58] sm:$0xff]  ;;  %v7825_v12 = vld [vmem:[%s11810_s7 + $0x60] sm:$0xff] }
  0x37   :  { %12080 = vst [vmem:[#allocation31_spill] sm:$0xff] %v7815_v10  ;;  %12081 = vst [vmem:[#allocation32_spill] sm:$0xff] %v7820_v11  ;;  %v7830_v13 = vld [vmem:[%s11810_s7 + $0x68] sm:$0xff]  ;;  %v7835_v14 = vld [vmem:[%s11810_s7 + $0x70] sm:$0xff] }
  0x38   :  { %12082 = vst [vmem:[#allocation33_spill] sm:$0xff] %v7825_v12  ;;  %12083 = vst [vmem:[#allocation34_spill] sm:$0xff] %v7830_v13  ;;  %v7840_v15 = vld [vmem:[%s11810_s7 + $0x78] sm:$0xff]  ;;  %v7845_v16 = vld [vmem:[%s11810_s7 + $0x80] sm:$0xff] }
  0x39   :  { %12084 = vst [vmem:[#allocation35_spill] sm:$0xff] %v7835_v14  ;;  %12085 = vst [vmem:[#allocation36_spill] sm:$0xff] %v7840_v15  ;;  %v7850_v17 = vld [vmem:[%s11810_s7 + $0x88] sm:$0xff]  ;;  %v7855_v18 = vld [vmem:[%s11810_s7 + $0x90] sm:$0xff] }
  0x3a   :  { %12086 = vst [vmem:[#allocation37_spill] sm:$0xff] %v7845_v16  ;;  %12087 = vst [vmem:[#allocation38_spill] sm:$0xff] %v7850_v17  ;;  %v7860_v19 = vld [vmem:[%s11810_s7 + $0x98] sm:$0xff]  ;;  %v7865_v20 = vld [vmem:[%s11810_s7 + $0xa0] sm:$0xff] }
  0x3b   :  { %12088 = vst [vmem:[#allocation39_spill] sm:$0xff] %v7855_v18  ;;  %12089 = vst [vmem:[#allocation40_spill] sm:$0xff] %v7860_v19  ;;  %v7870_v21 = vld [vmem:[%s11810_s7 + $0xa8] sm:$0xff]  ;;  %v7875_v22 = vld [vmem:[%s11810_s7 + $0xb0] sm:$0xff] }
  0x3c   :  { %12090 = vst [vmem:[#allocation41_spill] sm:$0xff] %v7865_v20  ;;  %12091 = vst [vmem:[#allocation42_spill] sm:$0xff] %v7870_v21  ;;  %v7880_v23 = vld [vmem:[%s11810_s7 + $0xb8] sm:$0xff]  ;;  %v7885_v24 = vld [vmem:[%s11810_s7 + $0xc0] sm:$0xff] }
  0x3d   :  { %12092 = vst [vmem:[#allocation43_spill] sm:$0xff] %v7875_v22  ;;  %12093 = vst [vmem:[#allocation44_spill] sm:$0xff] %v7880_v23  ;;  %v7890_v25 = vld [vmem:[%s11810_s7 + $0xc8] sm:$0xff]  ;;  %v7895_v26 = vld [vmem:[%s11810_s7 + $0xd0] sm:$0xff] }
  0x3e   :  { %12094 = vst [vmem:[#allocation45_spill] sm:$0xff] %v7885_v24  ;;  %12095 = vst [vmem:[#allocation46_spill] sm:$0xff] %v7890_v25  ;;  %v7900_v27 = vld [vmem:[%s11810_s7 + $0xd8] sm:$0xff]  ;;  %v7905_v28 = vld [vmem:[%s11810_s7 + $0xe0] sm:$0xff] }
  0x3f   :  { %12096 = vst [vmem:[#allocation47_spill] sm:$0xff] %v7895_v26  ;;  %12097 = vst [vmem:[#allocation48_spill] sm:$0xff] %v7900_v27  ;;  %v7910_v29 = vld [vmem:[%s11810_s7 + $0xe8] sm:$0xff]  ;;  %v7915_v30 = vld [vmem:[%s11810_s7 + $0xf0] sm:$0xff] }
  0x40   :  { %12098 = vst [vmem:[#allocation49_spill] sm:$0xff] %v7905_v28  ;;  %12099 = vst [vmem:[#allocation50_spill] sm:$0xff] %v7910_v29  ;;  %v7920_v31 = vld [vmem:[%s11810_s7 + $0xf8] sm:$0xff]  ;;  %v7925_v32 = vld [vmem:[%s11810_s7 + $0x100] sm:$0xff] }
  0x41   :  { %12100 = vst [vmem:[#allocation51_spill] sm:$0xff] %v7915_v30  ;;  %12101 = vst [vmem:[#allocation52_spill] sm:$0xff] %v7920_v31  ;;  %v7930_v33 = vld [vmem:[%s11810_s7 + $0x108] sm:$0xff]  ;;  %v7935_v34 = vld [vmem:[%s11810_s7 + $0x110] sm:$0xff] }
  0x42   :  { %12102 = vst [vmem:[#allocation53_spill] sm:$0xff] %v7925_v32  ;;  %12103 = vst [vmem:[#allocation54_spill] sm:$0xff] %v7930_v33  ;;  %v7940_v35 = vld [vmem:[%s11810_s7 + $0x118] sm:$0xff]  ;;  %v7945_v36 = vld [vmem:[%s11810_s7 + $0x120] sm:$0xff] }
  0x43   :  { %12104 = vst [vmem:[#allocation55_spill] sm:$0xff] %v7935_v34  ;;  %12105 = vst [vmem:[#allocation56_spill] sm:$0xff] %v7940_v35  ;;  %v7950_v37 = vld [vmem:[%s11810_s7 + $0x128] sm:$0xff]  ;;  %v7955_v38 = vld [vmem:[%s11810_s7 + $0x130] sm:$0xff] }
  0x44   :  { %12106 = vst [vmem:[#allocation57_spill] sm:$0xff] %v7945_v36  ;;  %12107 = vst [vmem:[#allocation58_spill] sm:$0xff] %v7950_v37  ;;  %v7960_v39 = vld [vmem:[%s11810_s7 + $0x138] sm:$0xff]  ;;  %v7965_v40 = vld [vmem:[%s11810_s7 + $0x140] sm:$0xff] }
  0x45   :  { %12108 = vst [vmem:[#allocation59_spill] sm:$0xff] %v7955_v38  ;;  %12109 = vst [vmem:[#allocation60_spill] sm:$0xff] %v7960_v39  ;;  %v7970_v41 = vld [vmem:[%s11810_s7 + $0x148] sm:$0xff]  ;;  %v7975_v42 = vld [vmem:[%s11810_s7 + $0x150] sm:$0xff] }
  0x46   :  { %12110 = vst [vmem:[#allocation61_spill] sm:$0xff] %v7965_v40  ;;  %12111 = vst [vmem:[#allocation62_spill] sm:$0xff] %v7970_v41  ;;  %v7980_v43 = vld [vmem:[%s11810_s7 + $0x158] sm:$0xff]  ;;  %v7985_v44 = vld [vmem:[%s11810_s7 + $0x160] sm:$0xff] }
  0x47   :  { %12112 = vst [vmem:[#allocation63_spill] sm:$0xff] %v7975_v42  ;;  %12113 = vst [vmem:[#allocation64_spill] sm:$0xff] %v7980_v43  ;;  %v7990_v45 = vld [vmem:[%s11810_s7 + $0x168] sm:$0xff]  ;;  %v7995_v46 = vld [vmem:[%s11810_s7 + $0x170] sm:$0xff] }
  0x48   :  { %12114 = vst [vmem:[#allocation65_spill] sm:$0xff] %v7985_v44  ;;  %12115 = vst [vmem:[#allocation66_spill] sm:$0xff] %v7990_v45  ;;  %v8000_v47 = vld [vmem:[%s11810_s7 + $0x178] sm:$0xff]  ;;  %v8005_v48 = vld [vmem:[%s11810_s7 + $0x180] sm:$0xff] }
  0x49   :  { %12116 = vst [vmem:[#allocation67_spill] sm:$0xff] %v7995_v46  ;;  %12117 = vst [vmem:[#allocation68_spill] sm:$0xff] %v8000_v47  ;;  %v8010_v49 = vld [vmem:[%s11810_s7 + $0x188] sm:$0xff]  ;;  %v8015_v50 = vld [vmem:[%s11810_s7 + $0x190] sm:$0xff] }
  0x4a   :  { %12118 = vst [vmem:[#allocation69_spill] sm:$0xff] %v8005_v48  ;;  %12119 = vst [vmem:[#allocation70_spill] sm:$0xff] %v8010_v49  ;;  %v8020_v51 = vld [vmem:[%s11810_s7 + $0x198] sm:$0xff]  ;;  %v8025_v52 = vld [vmem:[%s11810_s7 + $0x1a0] sm:$0xff] }
  0x4b   :  { %12120 = vst [vmem:[#allocation71_spill] sm:$0xff] %v8015_v50  ;;  %12121 = vst [vmem:[#allocation72_spill] sm:$0xff] %v8020_v51  ;;  %v8030_v53 = vld [vmem:[%s11810_s7 + $0x1a8] sm:$0xff]  ;;  %v8035_v54 = vld [vmem:[%s11810_s7 + $0x1b0] sm:$0xff] }
  0x4c   :  { %12122 = vst [vmem:[#allocation73_spill] sm:$0xff] %v8025_v52  ;;  %12123 = vst [vmem:[#allocation74_spill] sm:$0xff] %v8030_v53  ;;  %v8040_v55 = vld [vmem:[%s11810_s7 + $0x1b8] sm:$0xff]  ;;  %v8045_v56 = vld [vmem:[%s11810_s7 + $0x1c0] sm:$0xff] }
  0x4d   :  { %12124 = vst [vmem:[#allocation75_spill] sm:$0xff] %v8035_v54  ;;  %12125 = vst [vmem:[#allocation76_spill] sm:$0xff] %v8040_v55  ;;  %v8050_v57 = vld [vmem:[%s11810_s7 + $0x1c8] sm:$0xff]  ;;  %v8055_v58 = vld [vmem:[%s11810_s7 + $0x1d0] sm:$0xff] }
  0x4e   :  { %12126 = vst [vmem:[#allocation77_spill] sm:$0xff] %v8045_v56  ;;  %12127 = vst [vmem:[#allocation78_spill] sm:$0xff] %v8050_v57  ;;  %v8060_v59 = vld [vmem:[%s11810_s7 + $0x1d8] sm:$0xff]  ;;  %v8065_v60 = vld [vmem:[%s11810_s7 + $0x1e0] sm:$0xff] }
  0x4f   :  { %12128 = vst [vmem:[#allocation79_spill] sm:$0xff] %v8055_v58  ;;  %12129 = vst [vmem:[#allocation80_spill] sm:$0xff] %v8060_v59  ;;  %v8070_v61 = vld [vmem:[%s11810_s7 + $0x1e8] sm:$0xff]  ;;  %v8075_v62 = vld [vmem:[%s11810_s7 + $0x1f0] sm:$0xff] }
  0x50   :  { %12130 = vst [vmem:[#allocation81_spill] sm:$0xff] %v8065_v60  ;;  %12131 = vst [vmem:[#allocation82_spill] sm:$0xff] %v8070_v61  ;;  %v8080_v63 = vld [vmem:[%s11810_s7 + $0x1f8] sm:$0xff]  ;;  %v8085_v55 = vld [vmem:[%s11810_s7 + $0x200] sm:$0xff] }
  0x51   :  { %12132 = vst [vmem:[#allocation83_spill] sm:$0xff] %v8075_v62  ;;  %12133 = vst [vmem:[#allocation84_spill] sm:$0xff] %v8080_v63  ;;  %v8090_v54 = vld [vmem:[%s11810_s7 + $0x208] sm:$0xff]  ;;  %v8095_v53 = vld [vmem:[%s11810_s7 + $0x210] sm:$0xff] }
  0x52   :  { %12134 = vst [vmem:[#allocation85_spill] sm:$0xff] %v8085_v55  ;;  %12135 = vst [vmem:[#allocation86_spill] sm:$0xff] %v8090_v54  ;;  %v8100_v62 = vld [vmem:[%s11810_s7 + $0x218] sm:$0xff]  ;;  %v8105_v63 = vld [vmem:[%s11810_s7 + $0x220] sm:$0xff] }
  0x53   :  { %12136 = vst [vmem:[#allocation87_spill] sm:$0xff] %v8095_v53  ;;  %12137 = vst [vmem:[#allocation88_spill] sm:$0xff] %v8100_v62  ;;  %v8110_v55 = vld [vmem:[%s11810_s7 + $0x228] sm:$0xff]  ;;  %v8115_v54 = vld [vmem:[%s11810_s7 + $0x230] sm:$0xff] }
  0x54   :  { %12138 = vst [vmem:[#allocation89_spill] sm:$0xff] %v8105_v63  ;;  %12139 = vst [vmem:[#allocation90_spill] sm:$0xff] %v8110_v55  ;;  %v8120_v53 = vld [vmem:[%s11810_s7 + $0x238] sm:$0xff]  ;;  %v8125_v62 = vld [vmem:[%s11810_s7 + $0x240] sm:$0xff] }
  0x55   :  { %12140 = vst [vmem:[#allocation91_spill] sm:$0xff] %v8115_v54  ;;  %12141 = vst [vmem:[#allocation92_spill] sm:$0xff] %v8120_v53  ;;  %v8130_v63 = vld [vmem:[%s11810_s7 + $0x248] sm:$0xff]  ;;  %v8135_v55 = vld [vmem:[%s11810_s7 + $0x250] sm:$0xff] }
  0x56   :  { %12142 = vst [vmem:[#allocation93_spill] sm:$0xff] %v8125_v62  ;;  %12143 = vst [vmem:[#allocation94_spill] sm:$0xff] %v8130_v63  ;;  %v8140_v54 = vld [vmem:[%s11810_s7 + $0x258] sm:$0xff]  ;;  %v8145_v53 = vld [vmem:[%s11810_s7 + $0x260] sm:$0xff] }
  0x57   :  { %12144 = vst [vmem:[#allocation95_spill] sm:$0xff] %v8135_v55  ;;  %12145 = vst [vmem:[#allocation96_spill] sm:$0xff] %v8140_v54  ;;  %v8150_v62 = vld [vmem:[%s11810_s7 + $0x268] sm:$0xff]  ;;  %v8155_v63 = vld [vmem:[%s11810_s7 + $0x270] sm:$0xff] }
  0x58   :  { %12146 = vst [vmem:[#allocation97_spill] sm:$0xff] %v8145_v53  ;;  %12147 = vst [vmem:[#allocation98_spill] sm:$0xff] %v8150_v62  ;;  %v8160_v55 = vld [vmem:[%s11810_s7 + $0x278] sm:$0xff] }
  0x59   :  { %12148 = vst [vmem:[#allocation99_spill] sm:$0xff] %v8155_v63  ;;  %12149 = vst [vmem:[#allocation100_spill] sm:$0xff] %v8160_v55 }
  0x5a   :  { %285 = vsyncadd [#allocation6 + $0x1], 10240  ;;  %302 = sst [smem:[#allocation15]] %s7671_s16  ;;  %s7674_s5 = smov [#allocation3]   ;;  %vm360_vm0 = vcmask 130048  }
  0x5b   :  { %s298_s28 = sshll.u32 %s7674_s5, 4  ;;  %304 = sst [smem:[#allocation15 + $0x1]] %s7671_s16  ;;  %s299_s28 = int_to_ptr.vmem [resolvable:$true] %s298_s28 }
  0x5c   :  { %306 = sst [smem:[#allocation15 + $0x2]] %s7669_s12  ;;  %s7675_s7 = smov [#allocation6 + $0x2]  }
  0x5d   :  { %308 = sst [smem:[#allocation15 + $0x3]] %s7668_s11  ;;  %s7676_s30 = smov [#allocation14]  }
  0x5e   :  { %310 = sst [smem:[#allocation15 + $0x4]] %s7663_s15 }
  0x5f   :  { %312 = sst [smem:[#allocation15 + $0x5]] %s7669_s12 }
  0x60   :  { %314 = sst [smem:[#allocation15 + $0x6]] %s7663_s15 }
  0x61   :  { %316 = sst [smem:[#allocation15 + $0x7]] %s7668_s11 }
  0x62   :  { %318 = sst [smem:[#allocation15 + $0x8]] %s7667_s10 }
  0x63   :  { %320 = dma.general %s11809_s6, 31744, %s299_s28, %s7675_s7, %s7676_s30, [#allocation15], %s7754_s17, 0  }
  0x64   :  { %v7529_v55 = vld [vmem:[#allocation7] ss:$8 sps:$4 sm:$0xff]   ;;  %v323_v53 = vld [vmem:[%s11803_s0 + $0x10] sm:$0xff]  ;;  %v324_v61 = vld [vmem:[%s11803_s0 + $0x18] sm:$0xff] }
  0x65   :  { %v321_v63 = vld [vmem:[%s11803_s0] sm:$0xff]  ;;  %v322_v62 = vld [vmem:[%s11803_s0 + $0x8] sm:$0xff]  ;;  %7209 = vmatprep.subr.bf16.mxu0 %v7529_v55  ;;  %v341_v51 = vpack.c.bf16 %v324_v61, %v323_v53  ;;  %v7535_v61 = vld [vmem:[#allocation7 + $0x30] ss:$8 sps:$4 sm:$0xff]  }
  0x66   :  { %v340_v54 = vpack.c.bf16 %v322_v62, %v321_v63  ;;  %v325_v52 = vld [vmem:[%s11803_s0 + $0x20] sm:$0xff]  ;;  %v326_v60 = vld [vmem:[%s11803_s0 + $0x28] sm:$0xff]  ;;  %7210 = vmatpush3.bf16.msra.mxu0 %v7529_v55  ;;  %v327_v62 = vld [vmem:[%s11803_s0 + $0x30] sm:$0xff] }
  0x67   :  { %v342_v59 = vpack.c.bf16 %v326_v60, %v325_v52  ;;  %v328_v63 = vld [vmem:[%s11803_s0 + $0x38] sm:$0xff]  ;;  %v329_v50 = vld [vmem:[%s11803_s0 + $0x40] sm:$0xff] }
  0x68   :  { %7211 = vmatprep.mubr.msk.bf16.mxu0 %vm360_vm0, %v340_v54  ;;  %v7530_v53 = vld [vmem:[#allocation7 + $0x24] ss:$8 sps:$4 sm:$0xff]   ;;  %v7532_v52 = vld [vmem:[#allocation7 + $0x20] ss:$8 sps:$4 sm:$0xff]   ;;  %v7533_v55 = vld [vmem:[#allocation7 + $0x34] ss:$8 sps:$4 sm:$0xff]   ;;  %v343_v60 = vpack.c.bf16 %v328_v63, %v327_v62 }
  0x69   :  { %7212 = vmatmul.mubr.msk.bf16.vlgmr.msra.gmra.mrb[0].mxu0 %vm360_vm0, %v341_v51  ;;  %v330_v54 = vld [vmem:[%s11803_s0 + $0x48] sm:$0xff]  ;;  %630 = vmatprep.subr.bf16.mxu1 %v7530_v53  ;;  %v332_v53 = vld [vmem:[%s11803_s0 + $0x58] sm:$0xff] }
  0x6a   :  { %7215 = vmatprep.mubr.msk.bf16.mxu0 %vm360_vm0, %v342_v59  ;;  %631 = vmatpush1.bf16.msra.mxu1 %v7532_v52  ;;  %v344_v58 = vpack.c.bf16 %v330_v54, %v329_v50  ;;  %v7536_v51 = vld [vmem:[#allocation7 + $0x44] ss:$8 sps:$4 sm:$0xff]   ;;  %v7538_v49 = vld [vmem:[#allocation7 + $0x40] ss:$8 sps:$4 sm:$0xff]   ;;  %v331_v59 = vld [vmem:[%s11803_s0 + $0x50] sm:$0xff] }
  0x6b   :  { %632 = vmatprep.subr.bf16.mxu1 %v7533_v55  ;;  %v7539_v62 = vld [vmem:[#allocation7 + $0x54] ss:$8 sps:$4 sm:$0xff]   ;;  %v333_v50 = vld [vmem:[%s11803_s0 + $0x60] sm:$0xff]  ;;  %v334_v63 = vld [vmem:[%s11803_s0 + $0x68] sm:$0xff]  ;;  %v345_v52 = vpack.c.bf16 %v332_v53, %v331_v59 }
  0x6c   :  { %v346_v54 = vpack.c.bf16 %v334_v63, %v333_v50  ;;  %v7542_v55 = vld [vmem:[#allocation7 + $0x64] ss:$8 sps:$4 sm:$0xff]   ;;  %v7545_v59 = vld [vmem:[#allocation7 + $0x74] ss:$8 sps:$4 sm:$0xff]   ;;  %v7547_v53 = vld [vmem:[#allocation7 + $0x70] ss:$8 sps:$4 sm:$0xff]  }
  0x6d   :  { %v7550_v50 = vld [vmem:[#allocation7 + $0x80] ss:$8 sps:$4 sm:$0xff]   ;;  %v7551_v63 = vld [vmem:[#allocation7 + $0x94] ss:$8 sps:$4 sm:$0xff]  }
  0x6e   :  { %633 = vmatpush1.bf16.msra.mxu1 %v7535_v61  ;;  %v335_v61 = vld [vmem:[%s11803_s0 + $0x70] sm:$0xff] }
  0x6f   :  { %634 = vmatprep.subr.bf16.mxu1 %v7536_v51  ;;  %v336_v51 = vld [vmem:[%s11803_s0 + $0x78] sm:$0xff] }
  0x71   :  { %7216 = vmatmul.mubr.msk.bf16.gmra.mrb[4].mxu0 %vm360_vm0, %v343_v60  ;;  %v7544_v60 = vld [vmem:[#allocation7 + $0x60] ss:$8 sps:$4 sm:$0xff]  }
  0x72   :  { %7219 = vmatprep.mubr.msk.bf16.mxu0 %vm360_vm0, %v344_v58  ;;  %635 = vmatpush1.bf16.msra.mxu1 %v7538_v49  ;;  %v7541_v58 = vld [vmem:[#allocation7 + $0x50] ss:$8 sps:$4 sm:$0xff]   ;;  %v347_v49 = vpack.c.bf16 %v336_v51, %v335_v61 }
  0x73   :  { %636 = vmatprep.subr.bf16.mxu1 %v7539_v62  ;;  %v7548_v62 = vld [vmem:[#allocation7 + $0x84] ss:$8 sps:$4 sm:$0xff]  }
  0x76   :  { %637 = vmatpush1.bf16.msra.mxu1 %v7541_v58  ;;  %v11812_v58 = vmov 0  }
  0x77   :  { %638 = vmatprep.subr.bf16.mxu1 %v7542_v55  ;;  %662 = vmatprep.mubr.bf16.mxu1 %v11812_v58 }
  0x79   :  { %7220 = vmatmul.mubr.msk.bf16.gmra.mrb[8].mxu0 %vm360_vm0, %v345_v52  ;;  %v7553_v52 = vld [vmem:[#allocation7 + $0x90] ss:$8 sps:$4 sm:$0xff]  }
  0x7a   :  { %7223 = vmatprep.mubr.msk.bf16.mxu0 %vm360_vm0, %v346_v54  ;;  %639 = vmatpush1.bf16.msra.mxu1 %v7544_v60  ;;  %v8232_v54 = vld [vmem:[#allocation9] ss:$0 sm:$0xff] }
  0x7b   :  { %640 = vmatprep.subr.bf16.mxu1 %v7545_v59 }
  0x7e   :  { %641 = vmatpush1.bf16.msra.mxu1 %v7547_v53 }
  0x7f   :  { %642 = vmatprep.subr.bf16.mxu1 %v7548_v62 }
  0x81   :  { %7224 = vmatmul.mubr.msk.bf16.gmra.mrb[12].mxu0 %vm360_vm0, %v347_v49 }
  0x82   :  { %643 = vmatpush1.bf16.msra.mxu1 %v7550_v50 }
  0x83   :  { %644 = vmatprep.subr.bf16.mxu1 %v7551_v63 }
  0x86   :  { %645 = vmatpush1.bf16.msra.mxu1 %v7553_v52 }
 0x13c   :  { %v7213_v55 = vpop.f32.mrb[0].mxu0 }
 0x13d   :  { %v428_v60 = vadd.f32 %v7213_v55, %v8232_v54  ;;  %v419_v61 = vpop.f32.mrb[1].mxu0 }
 0x13e   :  { %v420_v51 = vadd.f32 %v8232_v54, %v419_v61  ;;  %v7214_v49 = vpop.f32.mrb[2].mxu0 }
 0x13f   :  { %v484_v59 = vmul.f32 0.01, %v428_v60  ;;  %v431_v53 = vadd.f32 %v7214_v49, %v8232_v54  ;;  %v422_v62 = vpop.f32.mrb[3].mxu0 }
 0x140   :  { %v482_v50 = vmul.f32 0.01, %v420_v51  ;;  %v423_v63 = vadd.f32 %v8232_v54, %v422_v62 }
 0x141   :  { %v485_v52 = vmul.f32 0.01, %v431_v53  ;;  %v500_v48 = vmax.f32 %v428_v60, %v484_v59 }
 0x142   :  { %v483_v57 = vmul.f32 0.01, %v423_v63  ;;  %v498_v56 = vmax.f32 %v420_v51, %v482_v50 }
 0x143   :  { %v501_v58 = vmax.f32 %v431_v53, %v485_v52 }
 0x144   :  { %v499_v39 = vmax.f32 %v423_v63, %v483_v57  ;;  %v7217_v47 = vpop.f32.mrb[4].mxu0  ;;  %v12150_v57 = vmov 0  }
 0x145   :  { %v444_v55 = vadd.f32 %v7217_v47, %v8232_v54  ;;  %v435_v38 = vpop.f32.mrb[5].mxu0  ;;  %v532_v46 = vpack.c.bf16 %v501_v58, %v500_v48 }
 0x146   :  { %v436_v61 = vadd.f32 %v8232_v54, %v435_v38  ;;  %v531_v37 = vpack.c.bf16 %v499_v39, %v498_v56  ;;  %v7218_v45 = vpop.f32.mrb[6].mxu0 }
 0x147   :  { %v488_v49 = vmul.f32 0.01, %v444_v55  ;;  %v447_v36 = vadd.f32 %v7218_v45, %v8232_v54  ;;  %v438_v44 = vpop.f32.mrb[7].mxu0 }
 0x148   :  { %v486_v62 = vmul.f32 0.01, %v436_v61  ;;  %663 = vmatmul.mubr.bf16.vlgmr.msra.gmra.mrb[0].mxu1 %v531_v37  ;;  %v439_v60 = vadd.f32 %v8232_v54, %v438_v44 }
 0x149   :  { %v504_v59 = vmax.f32 %v444_v55, %v488_v49  ;;  %v489_v51 = vmul.f32 0.01, %v447_v36  ;;  %672 = vmatprep.mubr.bf16.mxu1 %v12150_v57 }
 0x14a   :  { %v502_v53 = vmax.f32 %v436_v61, %v486_v62  ;;  %v487_v47 = vmul.f32 0.01, %v439_v60 }
 0x14b   :  { %v505_v50 = vmax.f32 %v447_v36, %v489_v51 }
 0x14c   :  { %v503_v48 = vmax.f32 %v439_v60, %v487_v47  ;;  %v7221_v58 = vpop.f32.mrb[8].mxu0 }
 0x14d   :  { %v460_v38 = vadd.f32 %v7221_v58, %v8232_v54  ;;  %v451_v39 = vpop.f32.mrb[9].mxu0  ;;  %v534_v56 = vpack.c.bf16 %v505_v50, %v504_v59 }
 0x14e   :  { %v452_v45 = vadd.f32 %v8232_v54, %v451_v39  ;;  %v533_v63 = vpack.c.bf16 %v503_v48, %v502_v53  ;;  %v7222_v52 = vpop.f32.mrb[10].mxu0 }
 0x14f   :  { %v492_v37 = vmul.f32 0.01, %v460_v38  ;;  %v463_v44 = vadd.f32 %v7222_v52, %v8232_v54  ;;  %v454_v55 = vpop.f32.mrb[11].mxu0 }
 0x150   :  { %673 = vmatmul.mubr.bf16.gmra.mrb[4].mxu1 %v532_v46  ;;  %v490_v49 = vmul.f32 0.01, %v452_v45  ;;  %v455_v61 = vadd.f32 %v8232_v54, %v454_v55 }
 0x151   :  { %v508_v62 = vmax.f32 %v460_v38, %v492_v37  ;;  %682 = vmatprep.mubr.bf16.mxu1 %v12150_v57  ;;  %v493_v36 = vmul.f32 0.01, %v463_v44 }
 0x152   :  { %v506_v60 = vmax.f32 %v452_v45, %v490_v49  ;;  %v491_v51 = vmul.f32 0.01, %v455_v61 }
 0x153   :  { %v509_v47 = vmax.f32 %v463_v44, %v493_v36 }
 0x154   :  { %v507_v59 = vmax.f32 %v455_v61, %v491_v51  ;;  %v7225_v50 = vpop.f32.mrb[12].mxu0 }
 0x155   :  { %v476_v53 = vadd.f32 %v7225_v50, %v8232_v54  ;;  %v467_v48 = vpop.f32.mrb[13].mxu0  ;;  %v536_v58 = vpack.c.bf16 %v509_v47, %v508_v62 }
 0x156   :  { %v468_v39 = vadd.f32 %v8232_v54, %v467_v48  ;;  %v535_v52 = vpack.c.bf16 %v507_v59, %v506_v60  ;;  %v7226_v46 = vpop.f32.mrb[14].mxu0  ;;  %v530_v60 = vld [vmem:[#allocation9 + $0x1] sm:$0x3] }
 0x157   :  { %v496_v35 = vmul.f32 0.01, %v476_v53  ;;  %v479_v55 = vadd.f32 %v7226_v46, %v8232_v54  ;;  %v470_v38 = vpop.f32.mrb[15].mxu0 }
 0x158   :  { %683 = vmatmul.mubr.bf16.gmra.mrb[8].mxu1 %v533_v63  ;;  %v494_v37 = vmul.f32 0.01, %v468_v39  ;;  %v471_v45 = vadd.f32 %v8232_v54, %v470_v38 }
 0x159   :  { %692 = vmatprep.mubr.bf16.mxu1 %v12150_v57  ;;  %v512_v44 = vmax.f32 %v476_v53, %v496_v35  ;;  %v497_v49 = vmul.f32 0.01, %v479_v55  ;;  %v540_v35 = vlaneseq }
 0x15a   :  { %v510_v61 = vmax.f32 %v468_v39, %v494_v37  ;;  %v495_v36 = vmul.f32 0.01, %v471_v45 }
 0x15b   :  { %v513_v51 = vmax.f32 %v479_v55, %v497_v49  ;;  %v8257_v54 = vshrl.u32 %v540_v35, 7 }
 0x15c   :  { %v511_v62 = vmax.f32 %v471_v45, %v495_v36 }
 0x15d   :  { %v538_v47 = vpack.c.bf16 %v513_v51, %v512_v44  ;;  %12151 = vst [vmem:[#allocation101_spill] sm:$0xff] %v8257_v54  ;;  %v8260_v63 = vsub.s32 0, %v8257_v54 }
 0x15e   :  { %v537_v50 = vpack.c.bf16 %v511_v62, %v510_v61 }
 0x15f   :  { %12152 = vst [vmem:[#allocation102_spill] sm:$0xff] %v8260_v63  ;;  %v8266_v59 = vrot.slane %v530_v60, %v8260_v63 }
 0x160   :  { %693 = vmatmul.mubr.bf16.gmra.mrb[12].mxu1 %v534_v56  ;;  %v8263_v56 = vsub.s32 1, %v8257_v54 }
 0x161   :  { %702 = vmatprep.mubr.bf16.mxu1 %v12150_v57 }
 0x162   :  { %12153 = vst [vmem:[#allocation103_spill] sm:$0xff] %v8263_v56  ;;  %v8269_v53 = vrot.slane %v530_v60, %v8263_v56 }
 0x168   :  { %703 = vmatmul.mubr.bf16.gmra.mrb[16].mxu1 %v535_v52 }
 0x169   :  { %712 = vmatprep.mubr.bf16.mxu1 %v12150_v57 }
 0x170   :  { %713 = vmatmul.mubr.bf16.gmra.mrb[20].mxu1 %v536_v58 }
 0x171   :  { %722 = vmatprep.mubr.bf16.mxu1 %v12150_v57 }
 0x178   :  { %723 = vmatmul.mubr.bf16.gmra.mrb[24].mxu1 %v537_v50 }
 0x179   :  { %732 = vmatprep.mubr.bf16.mxu1 %v12150_v57 }
 0x180   :  { %733 = vmatmul.mubr.bf16.gmra.mrb[28].mxu1 %v538_v47 }
 0x21b   :  { %v664_v48 = vpop.f32.mrb[0].mxu1 }
 0x21c   :  { %v8272_v58 = vadd.f32 %v664_v48, %v8266_v59  ;;  %v666_v39 = vpop.f32.mrb[1].mxu1 }
 0x21d   :  { %v8275_v52 = vadd.f32 %v666_v39, %v8269_v53  ;;  %v668_v46 = vpop.f32.mrb[2].mxu1 }
 0x21e   :  { %v8278_v55 = vmul.f32 0.01, %v8272_v58  ;;  %v8281_v38 = vadd.f32 %v668_v46, %v8266_v59  ;;  %v670_v37 = vpop.f32.mrb[3].mxu1 }
 0x21f   :  { %v8284_v45 = vmul.f32 0.01, %v8275_v52  ;;  %v8287_v44 = vadd.f32 %v670_v37, %v8269_v53 }
 0x220   :  { %v8292_v61 = vmul.f32 0.01, %v8281_v38 }
 0x221   :  { %v8297_v51 = vmul.f32 0.01, %v8287_v44 }
 0x223   :  { %v674_v50 = vpop.f32.mrb[4].mxu1 }
 0x224   :  { %v8304_v35 = vadd.f32 %v674_v50, %v8266_v59  ;;  %v676_v60 = vpop.f32.mrb[5].mxu1 }
 0x225   :  { %v8307_v48 = vadd.f32 %v676_v60, %v8269_v53  ;;  %v678_v39 = vpop.f32.mrb[6].mxu1 }
 0x226   :  { %v8310_v46 = vmul.f32 0.01, %v8304_v35  ;;  %v8313_v37 = vadd.f32 %v678_v39, %v8266_v59  ;;  %v680_v49 = vpop.f32.mrb[7].mxu1 }
 0x227   :  { %v8316_v62 = vmul.f32 0.01, %v8307_v48  ;;  %v8319_v47 = vadd.f32 %v680_v49, %v8269_v53 }
 0x228   :  { %v8324_v60 = vmul.f32 0.01, %v8313_v37 }
 0x229   :  { %v8329_v43 = vmul.f32 0.01, %v8319_v47 }
 0x22b   :  { %v684_v49 = vpop.f32.mrb[8].mxu1 }
 0x22c   :  { %v8336_v42 = vadd.f32 %v684_v49, %v8266_v59  ;;  %v686_v50 = vpop.f32.mrb[9].mxu1 }
 0x22d   :  { %v8339_v33 = vadd.f32 %v686_v50, %v8269_v53  ;;  %v688_v41 = vpop.f32.mrb[10].mxu1 }
 0x22e   :  { %v8342_v36 = vmul.f32 0.01, %v8336_v42  ;;  %v8345_v32 = vadd.f32 %v688_v41, %v8266_v59  ;;  %v690_v40 = vpop.f32.mrb[11].mxu1 }
 0x22f   :  { %v8348_v39 = vmul.f32 0.01, %v8339_v33  ;;  %v8351_v34 = vadd.f32 %v690_v40, %v8269_v53 }
 0x230   :  { %v8356_v50 = vmul.f32 0.01, %v8345_v32 }
 0x231   :  { %v8361_v7 = vmul.f32 0.01, %v8351_v34 }
 0x233   :  { %v694_v40 = vpop.f32.mrb[12].mxu1 }
 0x234   :  { %v8368_v15 = vadd.f32 %v694_v40, %v8266_v59  ;;  %v696_v49 = vpop.f32.mrb[13].mxu1 }
 0x235   :  { %v8371_v22 = vadd.f32 %v696_v49, %v8269_v53  ;;  %v698_v6 = vpop.f32.mrb[14].mxu1 }
 0x236   :  { %v8374_v23 = vmul.f32 0.01, %v8368_v15  ;;  %v8377_v30 = vadd.f32 %v698_v6, %v8266_v59  ;;  %v700_v14 = vpop.f32.mrb[15].mxu1 }
 0x237   :  { %v8380_v41 = vmul.f32 0.01, %v8371_v22  ;;  %v8383_v31 = vadd.f32 %v700_v14, %v8269_v53 }
 0x238   :  { %v8388_v49 = vmul.f32 0.01, %v8377_v30 }
 0x239   :  { %v8393_v5 = vmul.f32 0.01, %v8383_v31 }
 0x23b   :  { %v704_v14 = vpop.f32.mrb[16].mxu1 }
 0x23c   :  { %v8400_v13 = vadd.f32 %v704_v14, %v8266_v59  ;;  %v706_v40 = vpop.f32.mrb[17].mxu1 }
 0x23d   :  { %v8403_v20 = vadd.f32 %v706_v40, %v8269_v53  ;;  %v708_v4 = vpop.f32.mrb[18].mxu1 }
 0x23e   :  { %v8406_v21 = vmul.f32 0.01, %v8400_v13  ;;  %v8409_v28 = vadd.f32 %v708_v4, %v8266_v59  ;;  %v710_v12 = vpop.f32.mrb[19].mxu1 }
 0x23f   :  { %v8412_v6 = vmul.f32 0.01, %v8403_v20  ;;  %v8415_v29 = vadd.f32 %v710_v12, %v8269_v53 }
 0x240   :  { %v8420_v40 = vmul.f32 0.01, %v8409_v28 }
 0x241   :  { %v8425_v3 = vmul.f32 0.01, %v8415_v29 }
 0x243   :  { %v714_v12 = vpop.f32.mrb[20].mxu1 }
 0x244   :  { %v8432_v11 = vadd.f32 %v714_v12, %v8266_v59  ;;  %v716_v14 = vpop.f32.mrb[21].mxu1 }
 0x245   :  { %v8435_v18 = vadd.f32 %v716_v14, %v8269_v53  ;;  %v718_v2 = vpop.f32.mrb[22].mxu1 }
 0x246   :  { %v8438_v19 = vmul.f32 0.01, %v8432_v11  ;;  %v8441_v26 = vadd.f32 %v718_v2, %v8266_v59  ;;  %v720_v10 = vpop.f32.mrb[23].mxu1 }
 0x247   :  { %v8444_v4 = vmul.f32 0.01, %v8435_v18  ;;  %v8447_v27 = vadd.f32 %v720_v10, %v8269_v53 }
 0x248   :  { %v8452_v14 = vmul.f32 0.01, %v8441_v26 }
 0x249   :  { %v8457_v1 = vmul.f32 0.01, %v8447_v27 }
 0x24b   :  { %v724_v10 = vpop.f32.mrb[24].mxu1 }
 0x24c   :  { %v8464_v25 = vadd.f32 %v724_v10, %v8266_v59  ;;  %v726_v12 = vpop.f32.mrb[25].mxu1 }
 0x24d   :  { %v8467_v9 = vadd.f32 %v726_v12, %v8269_v53  ;;  %v728_v16 = vpop.f32.mrb[26].mxu1 }
 0x24e   :  { %12154 = vst [vmem:[#allocation104_spill] sm:$0xff] %v8464_v25  ;;  %v8470_v17 = vmul.f32 0.01, %v8464_v25  ;;  %v8473_v0 = vadd.f32 %v728_v16, %v8266_v59  ;;  %v730_v24 = vpop.f32.mrb[27].mxu1 }
 0x24f   :  { %12155 = vst [vmem:[#allocation105_spill] sm:$0xff] %v8467_v9  ;;  %v8476_v2 = vmul.f32 0.01, %v8467_v9  ;;  %v8479_v57 = vadd.f32 %v730_v24, %v8269_v53 }
 0x250   :  { %12156 = vst [vmem:[#allocation106_spill] sm:$0xff] %v8470_v17  ;;  %12157 = vst [vmem:[#allocation107_spill] sm:$0xff] %v8473_v0  ;;  %v8484_v12 = vmul.f32 0.01, %v8473_v0 }
 0x251   :  { %12158 = vst [vmem:[#allocation108_spill] sm:$0xff] %v8476_v2  ;;  %v8489_v54 = vmul.f32 0.01, %v8479_v57 }
 0x252   :  { %12159 = vst [vmem:[#allocation109_spill] sm:$0xff] %v8484_v12 }
 0x253   :  { %v734_v24 = vpop.f32.mrb[28].mxu1 }
 0x254   :  { %v8496_v63 = vadd.f32 %v734_v24, %v8266_v59  ;;  %v736_v10 = vpop.f32.mrb[29].mxu1 }
 0x255   :  { %v8499_v17 = vadd.f32 %v736_v10, %v8269_v53  ;;  %v738_v25 = vpop.f32.mrb[30].mxu1 }
 0x256   :  { %12160 = vst [vmem:[#allocation110_spill] sm:$0xff] %v8496_v63  ;;  %v8502_v8 = vmul.f32 0.01, %v8496_v63  ;;  %v8505_v2 = vadd.f32 %v738_v25, %v8266_v59  ;;  %v740_v9 = vpop.f32.mrb[31].mxu1 }
 0x257   :  { %v8508_v16 = vmul.f32 0.01, %v8499_v17  ;;  %v8511_v56 = vadd.f32 %v740_v9, %v8269_v53 }
 0x258   :  { %12161 = vst [vmem:[#allocation111_spill] sm:$0xff] %v8502_v8  ;;  %12162 = vst [vmem:[#allocation112_spill] sm:$0xff] %v8505_v2  ;;  %v8516_v10 = vmul.f32 0.01, %v8505_v2 }
 0x259   :  { %v8521_v0 = vmul.f32 0.01, %v8511_v56 }
 0x25a   :  { %12163 = vst [vmem:[#allocation113_spill] sm:$0xff] %v8516_v10 }
 0x25b   :  { %7656 = dma.done.wait [#allocation6], 67584 }
 0x25c   :  { %7657 = vsyncadd [#allocation6], 4294899712  ;;  %v12164_v9 = vmax.f32 %v8275_v52, %v8284_v45  ;;  %v12165_v53 = vmax.f32 %v8287_v44, %v8297_v51  ;;  %v812_v12 = vld [vmem:[#allocation2 + $0x8] sm:$0xff]  ;;  %v811_v8 = vld [vmem:[#allocation2] sm:$0xff] }
 0x25d   :  { %v816_v63 = vld [vmem:[#allocation2 + $0x28] sm:$0xff]  ;;  %913 = vmatprep.subr.bf16.mxu0 %v812_v12  ;;  %v815_v25 = vld [vmem:[#allocation2 + $0x20] sm:$0xff]  ;;  %v814_v52 = vld [vmem:[#allocation2 + $0x18] sm:$0xff] }
 0x25e   :  { %v877_v24 = vpack.c.bf16 %v12165_v53, %v12164_v9  ;;  %914 = vmatpush1.bf16.msra.mxu0 %v811_v8  ;;  %v820_v10 = vld [vmem:[#allocation2 + $0x48] sm:$0xff]  ;;  %v819_v59 = vld [vmem:[#allocation2 + $0x40] sm:$0xff]  ;;  %v813_v45 = vld [vmem:[#allocation2 + $0x10] sm:$0xff]  ;;  %1026 = vmatprep.subr.bf16.mxu1 %v814_v52 }
 0x25f   :  { %915 = vmatprep.subr.bf16.mxu0 %v816_v63  ;;  %v824_v2 = vld [vmem:[#allocation2 + $0x68] sm:$0xff]  ;;  %v823_v44 = vld [vmem:[#allocation2 + $0x60] sm:$0xff]  ;;  %v818_v51 = vld [vmem:[#allocation2 + $0x38] sm:$0xff]  ;;  %1027 = vmatpush1.bf16.msra.mxu1 %v813_v45 }
 0x260   :  { %945 = vmatprep.mubr.bf16.mxu0 %v877_v24  ;;  %1058 = vmatprep.mubr.bf16.mxu1 %v877_v24  ;;  %v828_v24 = vld [vmem:[#allocation2 + $0x88] sm:$0xff]  ;;  %v817_v9 = vld [vmem:[#allocation2 + $0x30] sm:$0xff]  ;;  %v822_v8 = vld [vmem:[#allocation2 + $0x58] sm:$0xff] }
 0x261   :  { %1028 = vmatprep.subr.bf16.mxu1 %v818_v51  ;;  %v827_v63 = vld [vmem:[#allocation2 + $0x80] sm:$0xff]  ;;  %v832_v12 = vld [vmem:[#allocation2 + $0xa8] sm:$0xff]  ;;  %v825_v53 = vld [vmem:[#allocation2 + $0x70] sm:$0xff] }
 0x262   :  { %916 = vmatpush1.bf16.msra.mxu0 %v815_v25  ;;  %v826_v25 = vld [vmem:[#allocation2 + $0x78] sm:$0xff]  ;;  %v835_v45 = vld [vmem:[#allocation2 + $0xc0] sm:$0xff]  ;;  %v829_v51 = vld [vmem:[#allocation2 + $0x90] sm:$0xff] }
 0x263   :  { %917 = vmatprep.subr.bf16.mxu0 %v820_v10  ;;  %1029 = vmatpush1.bf16.msra.mxu1 %v817_v9  ;;  %v821_v10 = vld [vmem:[#allocation2 + $0x50] sm:$0xff]  ;;  %v830_v52 = vld [vmem:[#allocation2 + $0x98] sm:$0xff]  ;;  %v839_v9 = vld [vmem:[#allocation2 + $0xe0] sm:$0xff] }
 0x264   :  { %1030 = vmatprep.subr.bf16.mxu1 %v822_v8  ;;  %v844_v8 = vld [vmem:[#allocation2 + $0x108] sm:$0xff] }
 0x266   :  { %918 = vmatpush1.bf16.msra.mxu0 %v819_v59  ;;  %v831_v59 = vld [vmem:[#allocation2 + $0xa0] sm:$0xff] }
 0x267   :  { %919 = vmatprep.subr.bf16.mxu0 %v824_v2  ;;  %v836_v2 = vld [vmem:[#allocation2 + $0xc8] sm:$0xff]  ;;  %1031 = vmatpush1.bf16.msra.mxu1 %v821_v10  ;;  %v843_v10 = vld [vmem:[#allocation2 + $0x100] sm:$0xff] }
 0x268   :  { %1032 = vmatprep.subr.bf16.mxu1 %v826_v25  ;;  %v848_v25 = vld [vmem:[#allocation2 + $0x128] sm:$0xff] }
 0x26a   :  { %920 = vmatpush1.bf16.msra.mxu0 %v823_v44  ;;  %v840_v44 = vld [vmem:[#allocation2 + $0xe8] sm:$0xff] }
 0x26b   :  { %921 = vmatprep.subr.bf16.mxu0 %v828_v24  ;;  %1033 = vmatpush1.bf16.msra.mxu1 %v825_v53  ;;  %v834_v24 = vld [vmem:[#allocation2 + $0xb8] sm:$0xff]  ;;  %v847_v53 = vld [vmem:[#allocation2 + $0x120] sm:$0xff] }
 0x26c   :  { %1034 = vmatprep.subr.bf16.mxu1 %v830_v52  ;;  %v852_v52 = vld [vmem:[#allocation2 + $0x148] sm:$0xff] }
 0x26e   :  { %922 = vmatpush1.bf16.msra.mxu0 %v827_v63  ;;  %v833_v63 = vld [vmem:[#allocation2 + $0xb0] sm:$0xff] }
 0x26f   :  { %923 = vmatprep.subr.bf16.mxu0 %v832_v12  ;;  %1035 = vmatpush1.bf16.msra.mxu1 %v829_v51  ;;  %v838_v12 = vld [vmem:[#allocation2 + $0xd8] sm:$0xff]  ;;  %v851_v51 = vld [vmem:[#allocation2 + $0x140] sm:$0xff] }
 0x270   :  { %1036 = vmatprep.subr.bf16.mxu1 %v834_v24  ;;  %v856_v24 = vld [vmem:[#allocation2 + $0x168] sm:$0xff] }
 0x272   :  { %924 = vmatpush1.bf16.msra.mxu0 %v831_v59  ;;  %v837_v59 = vld [vmem:[#allocation2 + $0xd0] sm:$0xff] }
 0x273   :  { %925 = vmatprep.subr.bf16.mxu0 %v836_v2  ;;  %1037 = vmatpush1.bf16.msra.mxu1 %v833_v63  ;;  %v842_v2 = vld [vmem:[#allocation2 + $0xf8] sm:$0xff]  ;;  %v855_v63 = vld [vmem:[#allocation2 + $0x160] sm:$0xff] }
 0x274   :  { %1038 = vmatprep.subr.bf16.mxu1 %v838_v12  ;;  %v860_v12 = vld [vmem:[#allocation2 + $0x188] sm:$0xff] }
 0x276   :  { %926 = vmatpush1.bf16.msra.mxu0 %v835_v45  ;;  %v841_v45 = vld [vmem:[#allocation2 + $0xf0] sm:$0xff] }
 0x277   :  { %927 = vmatprep.subr.bf16.mxu0 %v840_v44  ;;  %1039 = vmatpush1.bf16.msra.mxu1 %v837_v59  ;;  %v846_v44 = vld [vmem:[#allocation2 + $0x118] sm:$0xff]  ;;  %v859_v59 = vld [vmem:[#allocation2 + $0x180] sm:$0xff] }
 0x278   :  { %1040 = vmatprep.subr.bf16.mxu1 %v842_v2  ;;  %v864_v2 = vld [vmem:[#allocation2 + $0x1a8] sm:$0xff] }
 0x27a   :  { %928 = vmatpush1.bf16.msra.mxu0 %v839_v9  ;;  %v845_v9 = vld [vmem:[#allocation2 + $0x110] sm:$0xff] }
 0x27b   :  { %929 = vmatprep.subr.bf16.mxu0 %v844_v8  ;;  %1041 = vmatpush1.bf16.msra.mxu1 %v841_v45  ;;  %v850_v8 = vld [vmem:[#allocation2 + $0x138] sm:$0xff]  ;;  %v863_v45 = vld [vmem:[#allocation2 + $0x1a0] sm:$0xff] }
 0x27c   :  { %1042 = vmatprep.subr.bf16.mxu1 %v846_v44  ;;  %v868_v44 = vld [vmem:[#allocation2 + $0x1c8] sm:$0xff] }
 0x27e   :  { %930 = vmatpush1.bf16.msra.mxu0 %v843_v10  ;;  %v849_v10 = vld [vmem:[#allocation2 + $0x130] sm:$0xff] }
 0x27f   :  { %931 = vmatprep.subr.bf16.mxu0 %v848_v25  ;;  %1043 = vmatpush1.bf16.msra.mxu1 %v845_v9  ;;  %v854_v25 = vld [vmem:[#allocation2 + $0x158] sm:$0xff]  ;;  %v867_v9 = vld [vmem:[#allocation2 + $0x1c0] sm:$0xff] }
 0x280   :  { %1044 = vmatprep.subr.bf16.mxu1 %v850_v8  ;;  %v872_v8 = vld [vmem:[#allocation2 + $0x1e8] sm:$0xff] }
 0x282   :  { %932 = vmatpush1.bf16.msra.mxu0 %v847_v53  ;;  %v853_v53 = vld [vmem:[#allocation2 + $0x150] sm:$0xff] }
 0x283   :  { %933 = vmatprep.subr.bf16.mxu0 %v852_v52  ;;  %1045 = vmatpush1.bf16.msra.mxu1 %v849_v10  ;;  %v858_v52 = vld [vmem:[#allocation2 + $0x178] sm:$0xff]  ;;  %v871_v10 = vld [vmem:[#allocation2 + $0x1e0] sm:$0xff] }
 0x284   :  { %1046 = vmatprep.subr.bf16.mxu1 %v854_v25  ;;  %v1268_v25 = vld [vmem:[#allocation2 + $0x208] sm:$0xff] }
 0x286   :  { %934 = vmatpush1.bf16.msra.mxu0 %v851_v51  ;;  %v857_v51 = vld [vmem:[#allocation2 + $0x170] sm:$0xff] }
 0x287   :  { %935 = vmatprep.subr.bf16.mxu0 %v856_v24  ;;  %1047 = vmatpush1.bf16.msra.mxu1 %v853_v53  ;;  %v862_v24 = vld [vmem:[#allocation2 + $0x198] sm:$0xff] }
 0x288   :  { %1048 = vmatprep.subr.bf16.mxu1 %v858_v52  ;;  %v865_v52 = vld [vmem:[#allocation2 + $0x1b0] sm:$0xff] }
 0x28a   :  { %936 = vmatpush1.bf16.msra.mxu0 %v855_v63  ;;  %v861_v63 = vld [vmem:[#allocation2 + $0x190] sm:$0xff] }
 0x28b   :  { %937 = vmatprep.subr.bf16.mxu0 %v860_v12  ;;  %1049 = vmatpush1.bf16.msra.mxu1 %v857_v51  ;;  %v866_v12 = vld [vmem:[#allocation2 + $0x1b8] sm:$0xff] }
 0x28c   :  { %1050 = vmatprep.subr.bf16.mxu1 %v862_v24  ;;  %v870_v24 = vld [vmem:[#allocation2 + $0x1d8] sm:$0xff] }
 0x28e   :  { %938 = vmatpush1.bf16.msra.mxu0 %v859_v59  ;;  %v12166_v59 = vmax.f32 %v8272_v58, %v8278_v55  ;;  %v869_v58 = vld [vmem:[#allocation2 + $0x1d0] sm:$0xff]  ;;  %v874_v55 = vld [vmem:[#allocation2 + $0x1f8] sm:$0xff] }
 0x28f   :  { %939 = vmatprep.subr.bf16.mxu0 %v864_v2  ;;  %1051 = vmatpush1.bf16.msra.mxu1 %v861_v63  ;;  %v12167_v2 = vmax.f32 %v8281_v38, %v8292_v61  ;;  %v1271_v38 = vld [vmem:[#allocation2 + $0x220] sm:$0xff]  ;;  %v1276_v61 = vld [vmem:[#allocation2 + $0x248] sm:$0xff]  ;;  %v12172_v63 = vmax.f32 %v8339_v33, %v8348_v39  ;;  %v1273_v39 = vld [vmem:[#allocation2 + $0x230] sm:$0xff] }
 0x290   :  { %1052 = vmatprep.subr.bf16.mxu1 %v866_v12  ;;  %v12173_v12 = vmax.f32 %v8351_v34, %v8361_v7  ;;  %v1284_v33 = vld [vmem:[#allocation2 + $0x288] sm:$0xff]  ;;  %v12174_v7 = vmax.f32 %v8336_v42, %v8342_v36  ;;  %v12175_v34 = vmax.f32 %v8345_v32, %v8356_v50  ;;  %v1277_v42 = vld [vmem:[#allocation2 + $0x250] sm:$0xff]  ;;  %v1282_v32 = vld [vmem:[#allocation2 + $0x278] sm:$0xff] }
 0x291   :  { %v876_v53 = vpack.c.bf16 %v12167_v2, %v12166_v59  ;;  %v1275_v59 = vld [vmem:[#allocation2 + $0x240] sm:$0xff]  ;;  %v1280_v2 = vld [vmem:[#allocation2 + $0x268] sm:$0xff] }
 0x292   :  { %940 = vmatpush1.bf16.msra.mxu0 %v863_v45  ;;  %v12168_v45 = vmax.f32 %v8307_v48, %v8316_v62  ;;  %v12170_v62 = vmax.f32 %v8304_v35, %v8310_v46  ;;  %v873_v48 = vld [vmem:[#allocation2 + $0x1f0] sm:$0xff]  ;;  %v1274_v46 = vld [vmem:[#allocation2 + $0x238] sm:$0xff]  ;;  %v1287_v36 = vld [vmem:[#allocation2 + $0x2a0] sm:$0xff] }
 0x293   :  { %941 = vmatprep.subr.bf16.mxu0 %v868_v44  ;;  %v12169_v44 = vmax.f32 %v8319_v47, %v8329_v43  ;;  %1053 = vmatpush1.bf16.msra.mxu1 %v865_v52  ;;  %v12171_v43 = vmax.f32 %v8313_v37, %v8324_v60  ;;  %v1269_v35 = vld [vmem:[#allocation2 + $0x210] sm:$0xff]  ;;  %v1279_v37 = vld [vmem:[#allocation2 + $0x260] sm:$0xff]  ;;  %v880_v60 = vpack.c.bf16 %v12175_v34, %v12174_v7 }
 0x294   :  { %1054 = vmatprep.subr.bf16.mxu1 %v870_v24  ;;  %v12176_v52 = vmax.f32 %v8371_v22, %v8380_v41  ;;  %v1288_v24 = vld [vmem:[#allocation2 + $0x2a8] sm:$0xff]  ;;  %v1281_v41 = vld [vmem:[#allocation2 + $0x270] sm:$0xff]  ;;  %v12195_v34 = vld [vmem:[#allocation107_spill] sm:$0xff] }
 0x295   :  { %v879_v51 = vpack.c.bf16 %v12169_v44, %v12168_v45  ;;  %v878_v47 = vpack.c.bf16 %v12171_v43, %v12170_v62  ;;  %v1278_v44 = vld [vmem:[#allocation2 + $0x258] sm:$0xff]  ;;  %v1292_v22 = vld [vmem:[#allocation2 + $0x2c8] sm:$0xff]  ;;  %v12184_v62 = vmax.f32 %v8435_v18, %v8444_v4  ;;  %v12185_v43 = vmax.f32 %v8447_v27, %v8457_v1  ;;  %v1297_v4 = vld [vmem:[#allocation2 + $0x2f0] sm:$0xff] }
 0x296   :  { %942 = vmatpush1.bf16.msra.mxu0 %v867_v9  ;;  %v1267_v9 = vld [vmem:[#allocation2 + $0x200] sm:$0xff]  ;;  %v1308_v18 = vld [vmem:[#allocation2 + $0x348] sm:$0xff]  ;;  %v12186_v1 = vmax.f32 %v8432_v11, %v8438_v19  ;;  %v12187_v27 = vmax.f32 %v8441_v26, %v8452_v14  ;;  %v1301_v11 = vld [vmem:[#allocation2 + $0x310] sm:$0xff] }
 0x297   :  { %943 = vmatprep.subr.bf16.mxu0 %v872_v8  ;;  %v1272_v8 = vld [vmem:[#allocation2 + $0x228] sm:$0xff]  ;;  %1055 = vmatpush1.bf16.msra.mxu1 %v869_v58  ;;  %v1306_v19 = vld [vmem:[#allocation2 + $0x338] sm:$0xff]  ;;  %v1311_v26 = vld [vmem:[#allocation2 + $0x360] sm:$0xff] }
 0x298   :  { %1056 = vmatprep.subr.bf16.mxu1 %v874_v55  ;;  %v1286_v55 = vld [vmem:[#allocation2 + $0x298] sm:$0xff]  ;;  %v1316_v14 = vld [vmem:[#allocation2 + $0x388] sm:$0xff] }
 0x29a   :  { %944 = vmatpush1.bf16.msra.mxu0 %v871_v10  ;;  %v881_v10 = vpack.c.bf16 %v12173_v12, %v12172_v63  ;;  %v1299_v63 = vld [vmem:[#allocation2 + $0x300] sm:$0xff]  ;;  %v1304_v12 = vld [vmem:[#allocation2 + $0x328] sm:$0xff] }
 0x29b   :  { %1449 = vmatprep.subr.bf16.mxu0 %v1268_v25  ;;  %v1270_v25 = vld [vmem:[#allocation2 + $0x218] sm:$0xff]  ;;  %1057 = vmatpush1.bf16.msra.mxu1 %v873_v48 }
 0x29c   :  { %1675 = vmatprep.subr.bf16.mxu1 %v1270_v25  ;;  %v1294_v48 = vld [vmem:[#allocation2 + $0x2d8] sm:$0xff]  ;;  %v12189_v25 = vld [vmem:[#allocation108_spill] sm:$0xff] }
 0x29d   :  { %946 = vmatmul.mubr.bf16.vlgmr.msra.gmra.mrb[16].mxu0 %v876_v53 }
 0x29e   :  { %955 = vmatprep.mubr.bf16.mxu0 %v879_v51  ;;  %1450 = vmatpush1.bf16.msra.mxu0 %v1267_v9  ;;  %v12180_v9 = vmax.f32 %v8403_v20, %v8412_v6  ;;  %v1300_v20 = vld [vmem:[#allocation2 + $0x308] sm:$0xff]  ;;  %v1289_v6 = vld [vmem:[#allocation2 + $0x2b0] sm:$0xff] }
 0x29f   :  { %1451 = vmatprep.subr.bf16.mxu0 %v1272_v8  ;;  %1059 = vmatmul.mubr.bf16.vlgmr.msra.gmra.mrb[32].mxu1 %v876_v53  ;;  %v12177_v53 = vmax.f32 %v8383_v31, %v8393_v5  ;;  %v12178_v5 = vmax.f32 %v8368_v15, %v8374_v23  ;;  %v12179_v31 = vmax.f32 %v8377_v30, %v8388_v49  ;;  %v1285_v15 = vld [vmem:[#allocation2 + $0x290] sm:$0xff]  ;;  %v1290_v23 = vld [vmem:[#allocation2 + $0x2b8] sm:$0xff]  ;;  %v1295_v30 = vld [vmem:[#allocation2 + $0x2e0] sm:$0xff] }
 0x2a0   :  { %1068 = vmatprep.mubr.bf16.mxu1 %v879_v51  ;;  %1676 = vmatpush1.bf16.msra.mxu1 %v1269_v35  ;;  %v1283_v51 = vld [vmem:[#allocation2 + $0x280] sm:$0xff]  ;;  %v12181_v8 = vmax.f32 %v8415_v29, %v8425_v3  ;;  %v12182_v3 = vmax.f32 %v8400_v13, %v8406_v21  ;;  %v12183_v29 = vmax.f32 %v8409_v28, %v8420_v40  ;;  %v1293_v13 = vld [vmem:[#allocation2 + $0x2d0] sm:$0xff]  ;;  %v1298_v21 = vld [vmem:[#allocation2 + $0x2f8] sm:$0xff] }
 0x2a1   :  { %1677 = vmatprep.subr.bf16.mxu1 %v1274_v46  ;;  %v883_v45 = vpack.c.bf16 %v12177_v53, %v12176_v52  ;;  %v882_v50 = vpack.c.bf16 %v12179_v31, %v12178_v5  ;;  %v1303_v28 = vld [vmem:[#allocation2 + $0x320] sm:$0xff]  ;;  %v886_v40 = vpack.c.bf16 %v12187_v27, %v12186_v1  ;;  %v1302_v46 = vld [vmem:[#allocation2 + $0x318] sm:$0xff]  ;;  %v1305_v53 = vld [vmem:[#allocation2 + $0x330] sm:$0xff] }
 0x2a2   :  { %1452 = vmatpush1.bf16.msra.mxu0 %v1271_v38  ;;  %v885_v58 = vpack.c.bf16 %v12181_v8, %v12180_v9  ;;  %v1291_v38 = vld [vmem:[#allocation2 + $0x2c0] sm:$0xff]  ;;  %v884_v49 = vpack.c.bf16 %v12183_v29, %v12182_v3  ;;  %v1317_v9 = vld [vmem:[#allocation2 + $0x390] sm:$0xff]  ;;  %v1320_v8 = vld [vmem:[#allocation2 + $0x3a8] sm:$0xff] }
 0x2a3   :  { %1453 = vmatprep.subr.bf16.mxu0 %v1276_v61  ;;  %v1296_v61 = vld [vmem:[#allocation2 + $0x2e8] sm:$0xff]  ;;  %v1330_v3 = vld [vmem:[#allocation2 + $0x3f8] sm:$0xff]  ;;  %v1327_v29 = vld [vmem:[#allocation2 + $0x3e0] sm:$0xff] }
 0x2a4   :  { %1678 = vmatpush1.bf16.msra.mxu1 %v1273_v39  ;;  %v12203_v5 = vld [vmem:[#allocation112_spill] sm:$0xff] }
 0x2a5   :  { %956 = vmatmul.mubr.bf16.gmra.mrb[20].mxu0 %v878_v47  ;;  %1679 = vmatprep.subr.bf16.mxu1 %v1278_v44  ;;  %v12199_v44 = vmax.f32 %v8511_v56, %v8521_v0  ;;  %v12204_v0 = vld [vmem:[#allocation113_spill] sm:$0xff] }
 0x2a6   :  { %965 = vmatprep.mubr.bf16.mxu0 %v881_v10  ;;  %1454 = vmatpush1.bf16.msra.mxu0 %v1275_v59  ;;  %v12205_v56 = vmax.f32 %v12203_v5, %v12204_v0  ;;  %v1336_v5 = vld [vmem:[#allocation2 + $0x428] sm:$0xff]  ;;  %v1338_v0 = vld [vmem:[#allocation2 + $0x438] sm:$0xff] }
 0x2a7   :  { %1455 = vmatprep.subr.bf16.mxu0 %v1280_v2  ;;  %1069 = vmatmul.mubr.bf16.gmra.mrb[36].mxu1 %v878_v47  ;;  %v887_v47 = vpack.c.bf16 %v12185_v43, %v12184_v62  ;;  %v12191_v2 = vmax.f32 %v8479_v57, %v8489_v54  ;;  %v12192_v57 = vld [vmem:[#allocation104_spill] sm:$0xff]  ;;  %v12193_v54 = vld [vmem:[#allocation106_spill] sm:$0xff] }
 0x2a8   :  { %1078 = vmatprep.mubr.bf16.mxu1 %v881_v10  ;;  %1680 = vmatpush1.bf16.msra.mxu1 %v1277_v42  ;;  %v12188_v10 = vld [vmem:[#allocation105_spill] sm:$0xff]  ;;  %v12194_v7 = vmax.f32 %v12192_v57, %v12193_v54  ;;  %v1315_v42 = vld [vmem:[#allocation2 + $0x380] sm:$0xff]  ;;  %v1334_v62 = vld [vmem:[#allocation2 + $0x418] sm:$0xff] }
 0x2a9   :  { %1681 = vmatprep.subr.bf16.mxu1 %v1282_v32  ;;  %v12190_v59 = vmax.f32 %v12188_v10, %v12189_v25  ;;  %v1309_v32 = vld [vmem:[#allocation2 + $0x350] sm:$0xff]  ;;  %v875_v43 = vld [vmem:[#allocation9 + $0x3] sm:$0xf] }
 0x2aa   :  { %1456 = vmatpush1.bf16.msra.mxu0 %v1279_v37  ;;  %v1307_v37 = vld [vmem:[#allocation2 + $0x340] sm:$0xff]  ;;  %v12208_v10 = vld [vmem:[#allocation101_spill] sm:$0xff] }
 0x2ab   :  { %1457 = vmatprep.subr.bf16.mxu0 %v1284_v33  ;;  %v889_v35 = vpack.c.bf16 %v12191_v2, %v12190_v59  ;;  %v1312_v33 = vld [vmem:[#allocation2 + $0x368] sm:$0xff]  ;;  %v8633_v25 = vsub.s32 2, %v12208_v10 }
 0x2ac   :  { %1682 = vmatpush1.bf16.msra.mxu1 %v1281_v41  ;;  %v1318_v41 = vld [vmem:[#allocation2 + $0x398] sm:$0xff] }
 0x2ad   :  { %966 = vmatmul.mubr.bf16.gmra.mrb[24].mxu0 %v880_v60  ;;  %1683 = vmatprep.subr.bf16.mxu1 %v1286_v55  ;;  %v1319_v55 = vld [vmem:[#allocation2 + $0x3a0] sm:$0xff]  ;;  %12209 = vst [vmem:[#allocation105_spill] sm:$0xff] %v8633_v25 }
 0x2ae   :  { %975 = vmatprep.mubr.bf16.mxu0 %v883_v45  ;;  %1458 = vmatpush1.bf16.msra.mxu0 %v1283_v51 }
 0x2af   :  { %1459 = vmatprep.subr.bf16.mxu0 %v1288_v24  ;;  %1079 = vmatmul.mubr.bf16.gmra.mrb[40].mxu1 %v880_v60  ;;  %v12196_v60 = vld [vmem:[#allocation109_spill] sm:$0xff]  ;;  %v1310_v24 = vld [vmem:[#allocation2 + $0x358] sm:$0xff] }
 0x2b0   :  { %1088 = vmatprep.mubr.bf16.mxu1 %v883_v45  ;;  %1684 = vmatpush1.bf16.msra.mxu1 %v1285_v15  ;;  %v12197_v39 = vmax.f32 %v12195_v34, %v12196_v60  ;;  %v12198_v45 = vmax.f32 %v8499_v17, %v8508_v16  ;;  %v12201_v17 = vld [vmem:[#allocation111_spill] sm:$0xff] }
 0x2b1   :  { %1685 = vmatprep.subr.bf16.mxu1 %v1290_v23  ;;  %v1326_v15 = vld [vmem:[#allocation2 + $0x3d8] sm:$0xff]  ;;  %v1323_v23 = vld [vmem:[#allocation2 + $0x3c0] sm:$0xff] }
 0x2b2   :  { %1460 = vmatpush1.bf16.msra.mxu0 %v1287_v36  ;;  %v888_v52 = vpack.c.bf16 %v12197_v39, %v12194_v7  ;;  %v891_v51 = vpack.c.bf16 %v12199_v44, %v12198_v45  ;;  %v1314_v36 = vld [vmem:[#allocation2 + $0x378] sm:$0xff] }
 0x2b3   :  { %1461 = vmatprep.subr.bf16.mxu0 %v1292_v22  ;;  %v12200_v22 = vld [vmem:[#allocation110_spill] sm:$0xff] }
 0x2b4   :  { %1686 = vmatpush1.bf16.msra.mxu1 %v1289_v6  ;;  %v12202_v16 = vmax.f32 %v12200_v22, %v12201_v17  ;;  %v1332_v6 = vld [vmem:[#allocation2 + $0x408] sm:$0xff] }
 0x2b5   :  { %976 = vmatmul.mubr.bf16.gmra.mrb[28].mxu0 %v882_v50  ;;  %1687 = vmatprep.subr.bf16.mxu1 %v1294_v48 }
 0x2b6   :  { %985 = vmatprep.mubr.bf16.mxu0 %v885_v58  ;;  %1462 = vmatpush1.bf16.msra.mxu0 %v1291_v38  ;;  %v890_v31 = vpack.c.bf16 %v12205_v56, %v12202_v16  ;;  %v1321_v38 = vld [vmem:[#allocation2 + $0x3b0] sm:$0xff] }
 0x2b7   :  { %1463 = vmatprep.subr.bf16.mxu0 %v1296_v61  ;;  %1089 = vmatmul.mubr.bf16.gmra.mrb[44].mxu1 %v882_v50  ;;  %v1313_v50 = vld [vmem:[#allocation2 + $0x370] sm:$0xff]  ;;  %v1324_v61 = vld [vmem:[#allocation2 + $0x3c8] sm:$0xff] }
 0x2b8   :  { %1098 = vmatprep.mubr.bf16.mxu1 %v885_v58  ;;  %1688 = vmatpush1.bf16.msra.mxu1 %v1293_v13  ;;  %v1322_v58 = vld [vmem:[#allocation2 + $0x3b8] sm:$0xff] }
 0x2b9   :  { %1689 = vmatprep.subr.bf16.mxu1 %v1298_v21 }
 0x2ba   :  { %1464 = vmatpush1.bf16.msra.mxu0 %v1295_v30  ;;  %v1325_v30 = vld [vmem:[#allocation2 + $0x3d0] sm:$0xff] }
 0x2bb   :  { %1465 = vmatprep.subr.bf16.mxu0 %v1300_v20  ;;  %v1328_v20 = vld [vmem:[#allocation2 + $0x3e8] sm:$0xff] }
 0x2bc   :  { %1690 = vmatpush1.bf16.msra.mxu1 %v1297_v4 }
 0x2bd   :  { %986 = vmatmul.mubr.bf16.gmra.mrb[32].mxu0 %v884_v49  ;;  %1691 = vmatprep.subr.bf16.mxu1 %v1302_v46 }
 0x2be   :  { %995 = vmatprep.mubr.bf16.mxu0 %v887_v47  ;;  %1466 = vmatpush1.bf16.msra.mxu0 %v1299_v63  ;;  %v12207_v63 = vld [vmem:[#allocation103_spill] sm:$0xff] }
 0x2bf   :  { %1467 = vmatprep.subr.bf16.mxu0 %v1304_v12  ;;  %1099 = vmatmul.mubr.bf16.gmra.mrb[48].mxu1 %v884_v49  ;;  %v1329_v49 = vld [vmem:[#allocation2 + $0x3f0] sm:$0xff]  ;;  %v8627_v12 = vrot.slane %v875_v43, %v12207_v63 }
 0x2c0   :  { %1108 = vmatprep.mubr.bf16.mxu1 %v887_v47  ;;  %1692 = vmatpush1.bf16.msra.mxu1 %v1301_v11  ;;  %v12206_v47 = vld [vmem:[#allocation102_spill] sm:$0xff] }
 0x2c1   :  { %1693 = vmatprep.subr.bf16.mxu1 %v1306_v19  ;;  %v8624_v48 = vrot.slane %v875_v43, %v12206_v47  ;;  %v8644_v19 = vrot.slane %v875_v43, %v8633_v25 }
 0x2c2   :  { %1468 = vmatpush1.bf16.msra.mxu0 %v1303_v28 }
 0x2c3   :  { %1469 = vmatprep.subr.bf16.mxu0 %v1308_v18 }
 0x2c4   :  { %1694 = vmatpush1.bf16.msra.mxu1 %v1305_v53 }
 0x2c5   :  { %996 = vmatmul.mubr.bf16.gmra.mrb[36].mxu0 %v886_v40  ;;  %1695 = vmatprep.subr.bf16.mxu1 %v1310_v24 }
 0x2c6   :  { %1005 = vmatprep.mubr.bf16.mxu0 %v889_v35  ;;  %1470 = vmatpush1.bf16.msra.mxu0 %v1307_v37 }
 0x2c7   :  { %1471 = vmatprep.subr.bf16.mxu0 %v1312_v33  ;;  %1109 = vmatmul.mubr.bf16.gmra.mrb[52].mxu1 %v886_v40 }
 0x2c8   :  { %1118 = vmatprep.mubr.bf16.mxu1 %v889_v35  ;;  %1696 = vmatpush1.bf16.msra.mxu1 %v1309_v32  ;;  %v8637_v35 = vsub.s32 3, %v12208_v10  ;;  %v1333_v32 = vld [vmem:[#allocation2 + $0x410] sm:$0xff] }
 0x2c9   :  { %1697 = vmatprep.subr.bf16.mxu1 %v1314_v36 }
 0x2ca   :  { %1472 = vmatpush1.bf16.msra.mxu0 %v1311_v26  ;;  %12210 = vst [vmem:[#allocation108_spill] sm:$0xff] %v8637_v35  ;;  %v8651_v54 = vrot.slane %v875_v43, %v8637_v35  ;;  %v1342_v43 = vld [vmem:[#allocation2 + $0x458] sm:$0xff] }
 0x2cb   :  { %1473 = vmatprep.subr.bf16.mxu0 %v1316_v14 }
 0x2cc   :  { %1698 = vmatpush1.bf16.msra.mxu1 %v1313_v50 }
 0x2cd   :  { %1006 = vmatmul.mubr.bf16.gmra.mrb[40].mxu0 %v888_v52  ;;  %1699 = vmatprep.subr.bf16.mxu1 %v1318_v41 }
 0x2ce   :  { %1015 = vmatprep.mubr.bf16.mxu0 %v891_v51  ;;  %1474 = vmatpush1.bf16.msra.mxu0 %v1315_v42  ;;  %v1331_v42 = vld [vmem:[#allocation2 + $0x400] sm:$0xff] }
 0x2cf   :  { %1119 = vmatmul.mubr.bf16.gmra.mrb[56].mxu1 %v888_v52  ;;  %1475 = vmatprep.subr.bf16.mxu0 %v1320_v8 }
 0x2d0   :  { %1128 = vmatprep.mubr.bf16.mxu1 %v891_v51  ;;  %1700 = vmatpush1.bf16.msra.mxu1 %v1317_v9 }
 0x2d1   :  { %1701 = vmatprep.subr.bf16.mxu1 %v1322_v58 }
 0x2d2   :  { %1476 = vmatpush1.bf16.msra.mxu0 %v1319_v55 }
 0x2d3   :  { %1477 = vmatprep.subr.bf16.mxu0 %v1324_v61 }
 0x2d4   :  { %1702 = vmatpush1.bf16.msra.mxu1 %v1321_v38 }
 0x2d5   :  { %1016 = vmatmul.mubr.bf16.gmra.mrb[44].mxu0 %v890_v31  ;;  %1703 = vmatprep.subr.bf16.mxu1 %v1326_v15 }
 0x2d6   :  { %1478 = vmatpush1.bf16.msra.mxu0 %v1323_v23  ;;  %v1335_v23 = vld [vmem:[#allocation2 + $0x420] sm:$0xff] }
 0x2d7   :  { %1129 = vmatmul.mubr.bf16.gmra.mrb[60].mxu1 %v890_v31  ;;  %1479 = vmatprep.subr.bf16.mxu0 %v1328_v20 }
 0x2d8   :  { %1704 = vmatpush1.bf16.msra.mxu1 %v1325_v30  ;;  %v1337_v30 = vld [vmem:[#allocation2 + $0x430] sm:$0xff] }
 0x2d9   :  { %1705 = vmatprep.subr.bf16.mxu1 %v1330_v3 }
 0x2da   :  { %1480 = vmatpush1.bf16.msra.mxu0 %v1327_v29 }
 0x2db   :  { %1562 = vmatprep.subr.bf16.mxu0 %v1332_v6 }
 0x2dc   :  { %1706 = vmatpush1.bf16.msra.mxu1 %v1329_v49 }
 0x2dd   :  { %1788 = vmatprep.subr.bf16.mxu1 %v1334_v62  ;;  %v1340_v62 = vld [vmem:[#allocation2 + $0x448] sm:$0xff] }
 0x370   :  { %v947_v13 = vpop.f32.mrb[16].mxu0 }
 0x371   :  { %v948_v21 = vadd.f32 %v947_v13, %v8624_v48  ;;  %v949_v28 = vpop.f32.mrb[17].mxu0 }
 0x372   :  { %v950_v18 = vadd.f32 %v949_v28, %v8627_v12  ;;  %v951_v1 = vpop.f32.mrb[18].mxu0  ;;  %v1060_v45 = vpop.f32.mrb[32].mxu1 }
 0x373   :  { %v1139_v27 = vmul.f32 0.01, %v948_v21  ;;  %v952_v40 = vadd.f32 %v951_v1, %v8624_v48  ;;  %v953_v4 = vpop.f32.mrb[19].mxu0  ;;  %v1061_v36 = vadd.f32 %v1060_v45, %v8644_v19  ;;  %v1062_v22 = vpop.f32.mrb[33].mxu1 }
 0x374   :  { %v1140_v59 = vmul.f32 0.01, %v950_v18  ;;  %v954_v2 = vadd.f32 %v953_v4, %v8627_v12  ;;  %v1063_v56 = vadd.f32 %v1062_v22, %v8651_v54  ;;  %v1064_v31 = vpop.f32.mrb[34].mxu1 }
 0x375   :  { %v1143_v46 = vmul.f32 0.01, %v952_v40  ;;  %v8639_v33 = vmax.f32 %v948_v21, %v1139_v27  ;;  %v1141_v41 = vmul.f32 0.01, %v1061_v36  ;;  %v1065_v9 = vadd.f32 %v1064_v31, %v8644_v19  ;;  %v1066_v8 = vpop.f32.mrb[35].mxu1 }
 0x376   :  { %v1144_v37 = vmul.f32 0.01, %v954_v2  ;;  %v8646_v26 = vmax.f32 %v950_v18, %v1140_v59  ;;  %v1142_v55 = vmul.f32 0.01, %v1063_v56  ;;  %v1067_v38 = vadd.f32 %v1066_v8, %v8651_v54 }
 0x377   :  { %12211 = vst [vmem:[#allocation104_spill] sm:$0xff] %v8639_v33  ;;  %v8641_v11 = vmax.f32 %v952_v40, %v1143_v46  ;;  %v8669_v20 = vmax.f32 %v1061_v36, %v1141_v41  ;;  %v1145_v3 = vmul.f32 0.01, %v1065_v9  ;;  %v1343_v41 = vld [vmem:[#allocation2 + $0x460] sm:$0xff] }
 0x378   :  { %12213 = vst [vmem:[#allocation107_spill] sm:$0xff] %v8646_v26  ;;  %v8648_v14 = vmax.f32 %v954_v2, %v1144_v37  ;;  %v957_v57 = vpop.f32.mrb[20].mxu0  ;;  %v8675_v13 = vmax.f32 %v1063_v56, %v1142_v55  ;;  %v1146_v21 = vmul.f32 0.01, %v1067_v38 }
 0x379   :  { %12212 = vst [vmem:[#allocation106_spill] sm:$0xff] %v8641_v11  ;;  %v1396_v7 = vpack.c.bf16 %v8641_v11, %v8639_v33  ;;  %v958_v34 = vadd.f32 %v957_v57, %v8624_v48  ;;  %v959_v60 = vpop.f32.mrb[21].mxu0  ;;  %12217 = vst [vmem:[#allocation112_spill] sm:$0xff] %v8669_v20  ;;  %v8680_v27 = vmax.f32 %v1065_v9, %v1145_v3  ;;  %v1345_v9 = vld [vmem:[#allocation2 + $0x470] sm:$0xff]  ;;  %v1350_v3 = vld [vmem:[#allocation2 + $0x498] sm:$0xff] }
 0x37a   :  { %12214 = vst [vmem:[#allocation109_spill] sm:$0xff] %v8648_v14  ;;  %v960_v39 = vadd.f32 %v959_v60, %v8627_v12  ;;  %v961_v52 = vpop.f32.mrb[22].mxu0  ;;  %v1397_v53 = vpack.c.bf16 %v8648_v14, %v8646_v26  ;;  %12220 = vst [vmem:[#allocation114_spill] sm:$0xff] %v8675_v13  ;;  %v8685_v59 = vmax.f32 %v1067_v38, %v1146_v21  ;;  %v1070_v2 = vpop.f32.mrb[36].mxu1 }
 0x37b   :  { %v1147_v44 = vmul.f32 0.01, %v958_v34  ;;  %v962_v51 = vadd.f32 %v961_v52, %v8624_v48  ;;  %v963_v24 = vpop.f32.mrb[23].mxu0  ;;  %12221 = vst [vmem:[#allocation115_spill] sm:$0xff] %v8680_v27  ;;  %v8690_v60 = vpack.c.bf16 %v8680_v27, %v8669_v20  ;;  %v1072_v52 = vpop.f32.mrb[37].mxu1 }
 0x37c   :  { %v1148_v17 = vmul.f32 0.01, %v960_v39  ;;  %v964_v16 = vadd.f32 %v963_v24, %v8627_v12  ;;  %1481 = vmatprep.mubr.bf16.mxu0 %v1397_v53  ;;  %1707 = vmatprep.mubr.bf16.mxu1 %v1397_v53  ;;  %12222 = vst [vmem:[#allocation116_spill] sm:$0xff] %v8685_v59  ;;  %v1073_v24 = vadd.f32 %v1072_v52, %v8651_v54 }
 0x37d   :  { %v1151_v50 = vmul.f32 0.01, %v962_v51  ;;  %1482 = vmatmul.mubr.bf16.vlgmr.msra.gmra.mrb[48].mxu0 %v1396_v7  ;;  %1708 = vmatmul.mubr.bf16.vlgmr.msra.gmra.mrb[64].mxu1 %v1396_v7  ;;  %v8665_v61 = vmax.f32 %v958_v34, %v1147_v44  ;;  %v1339_v7 = vld [vmem:[#allocation2 + $0x440] sm:$0xff]  ;;  %v1341_v34 = vld [vmem:[#allocation2 + $0x450] sm:$0xff]  ;;  %v1344_v44 = vld [vmem:[#allocation2 + $0x468] sm:$0xff] }
 0x37e   :  { %v1152_v58 = vmul.f32 0.01, %v964_v16  ;;  %1563 = vmatpush1.bf16.msra.mxu0 %v1331_v42  ;;  %1789 = vmatpush1.bf16.msra.mxu1 %v1333_v32  ;;  %v8671_v29 = vmax.f32 %v960_v39, %v1148_v17  ;;  %v1071_v39 = vadd.f32 %v1070_v2, %v8644_v19  ;;  %v1074_v42 = vpop.f32.mrb[38].mxu1  ;;  %v8697_v32 = vpack.c.bf16 %v8685_v59, %v8675_v13 }
 0x37f   :  { %12215 = vst [vmem:[#allocation110_spill] sm:$0xff] %v8665_v61  ;;  %v8667_v15 = vmax.f32 %v962_v51, %v1151_v50  ;;  %1564 = vmatprep.subr.bf16.mxu0 %v1336_v5  ;;  %1790 = vmatprep.subr.bf16.mxu1 %v1338_v0  ;;  %v1346_v51 = vld [vmem:[#allocation2 + $0x478] sm:$0xff]  ;;  %v1075_v17 = vadd.f32 %v1074_v42, %v8644_v19  ;;  %v1150_v0 = vmul.f32 0.01, %v1073_v24 }
 0x380   :  { %12218 = vst [vmem:[#allocation113_spill] sm:$0xff] %v8671_v29  ;;  %v8673_v49 = vmax.f32 %v964_v16, %v1152_v58  ;;  %v967_v6 = vpop.f32.mrb[24].mxu0  ;;  %v1149_v22 = vmul.f32 0.01, %v1071_v39  ;;  %v1076_v16 = vpop.f32.mrb[39].mxu1 }
 0x381   :  { %12216 = vst [vmem:[#allocation111_spill] sm:$0xff] %v8667_v15  ;;  %v968_v28 = vadd.f32 %v967_v6, %v8624_v48  ;;  %v969_v18 = vpop.f32.mrb[25].mxu0  ;;  %v1400_v1 = vpack.c.bf16 %v8667_v15, %v8665_v61  ;;  %v1077_v56 = vadd.f32 %v1076_v16, %v8651_v54  ;;  %v1153_v58 = vmul.f32 0.01, %v1075_v17 }
 0x382   :  { %12219 = vst [vmem:[#allocation101_spill] sm:$0xff] %v8673_v49  ;;  %v970_v40 = vadd.f32 %v969_v18, %v8627_v12  ;;  %1565 = vmatpush1.bf16.msra.mxu0 %v1335_v23  ;;  %v971_v4 = vpop.f32.mrb[26].mxu0  ;;  %1791 = vmatpush1.bf16.msra.mxu1 %v1337_v30  ;;  %v1401_v10 = vpack.c.bf16 %v8673_v49, %v8671_v29  ;;  %v1348_v30 = vld [vmem:[#allocation2 + $0x488] sm:$0xff]  ;;  %v1080_v2 = vpop.f32.mrb[40].mxu1 }
 0x383   :  { %v1155_v46 = vmul.f32 0.01, %v968_v28  ;;  %v972_v37 = vadd.f32 %v971_v4, %v8624_v48  ;;  %v973_v57 = vpop.f32.mrb[27].mxu0  ;;  %1566 = vmatprep.subr.bf16.mxu0 %v1340_v62  ;;  %1792 = vmatprep.subr.bf16.mxu1 %v1342_v43  ;;  %v8705_v8 = vmax.f32 %v1071_v39, %v1149_v22  ;;  %v8711_v6 = vmax.f32 %v1073_v24, %v1150_v0  ;;  %v1082_v52 = vpop.f32.mrb[41].mxu1  ;;  %v1354_v24 = vld [vmem:[#allocation2 + $0x4b8] sm:$0xff] }
 0x384   :  { %v1156_v53 = vmul.f32 0.01, %v970_v40  ;;  %v974_v45 = vadd.f32 %v973_v57, %v8627_v12  ;;  %1491 = vmatprep.mubr.bf16.mxu0 %v1401_v10  ;;  %1717 = vmatprep.mubr.bf16.mxu1 %v1401_v10  ;;  %v1154_v62 = vmul.f32 0.01, %v1077_v56  ;;  %v8716_v18 = vmax.f32 %v1075_v17, %v1153_v58 }
 0x385   :  { %v1159_v36 = vmul.f32 0.01, %v972_v37  ;;  %1492 = vmatmul.mubr.bf16.gmra.mrb[52].mxu0 %v1400_v1  ;;  %1718 = vmatmul.mubr.bf16.gmra.mrb[68].mxu1 %v1400_v1  ;;  %v8701_v31 = vmax.f32 %v968_v28, %v1155_v46  ;;  %12225 = vst [vmem:[#allocation119_spill] sm:$0xff] %v8705_v8  ;;  %12228 = vst [vmem:[#allocation122_spill] sm:$0xff] %v8711_v6  ;;  %v1081_v39 = vadd.f32 %v1080_v2, %v8644_v19  ;;  %v1356_v2 = vld [vmem:[#allocation2 + $0x4c8] sm:$0xff] }
 0x386   :  { %v1160_v5 = vmul.f32 0.01, %v974_v45  ;;  %1567 = vmatpush1.bf16.msra.mxu0 %v1339_v7  ;;  %1793 = vmatpush1.bf16.msra.mxu1 %v1341_v34  ;;  %v8707_v55 = vmax.f32 %v970_v40, %v1156_v53  ;;  %12229 = vst [vmem:[#allocation123_spill] sm:$0xff] %v8716_v18  ;;  %v8721_v10 = vmax.f32 %v1077_v56, %v1154_v62  ;;  %v1347_v7 = vld [vmem:[#allocation2 + $0x480] sm:$0xff]  ;;  %v1349_v34 = vld [vmem:[#allocation2 + $0x490] sm:$0xff] }
 0x387   :  { %12223 = vst [vmem:[#allocation117_spill] sm:$0xff] %v8701_v31  ;;  %v8703_v50 = vmax.f32 %v972_v37, %v1159_v36  ;;  %1568 = vmatprep.subr.bf16.mxu0 %v1344_v44  ;;  %1794 = vmatprep.subr.bf16.mxu1 %v1346_v51  ;;  %v8727_v53 = vpack.c.bf16 %v8716_v18, %v8705_v8  ;;  %v1352_v51 = vld [vmem:[#allocation2 + $0x4a8] sm:$0xff]  ;;  %v1084_v36 = vpop.f32.mrb[42].mxu1  ;;  %v1157_v16 = vmul.f32 0.01, %v1081_v39 }
 0x388   :  { %12226 = vst [vmem:[#allocation120_spill] sm:$0xff] %v8707_v55  ;;  %v8709_v38 = vmax.f32 %v974_v45, %v1160_v5  ;;  %v977_v23 = vpop.f32.mrb[28].mxu0  ;;  %12230 = vst [vmem:[#allocation124_spill] sm:$0xff] %v8721_v10  ;;  %v1083_v42 = vadd.f32 %v1082_v52, %v8651_v54  ;;  %v8733_v22 = vpack.c.bf16 %v8721_v10, %v8711_v6  ;;  %v1086_v0 = vpop.f32.mrb[43].mxu1 }
 0x389   :  { %12224 = vst [vmem:[#allocation118_spill] sm:$0xff] %v8703_v50  ;;  %v978_v43 = vadd.f32 %v977_v23, %v8624_v48  ;;  %v979_v21 = vpop.f32.mrb[29].mxu0  ;;  %v1404_v28 = vpack.c.bf16 %v8703_v50, %v8701_v31  ;;  %v1085_v5 = vadd.f32 %v1084_v36, %v8644_v19  ;;  %v8741_v62 = vmax.f32 %v1081_v39, %v1157_v16  ;;  %v1357_v16 = vld [vmem:[#allocation2 + $0x4d0] sm:$0xff]  ;;  %v1374_v50 = vld [vmem:[#allocation2 + $0x558] sm:$0xff] }
 0x38a   :  { %12227 = vst [vmem:[#allocation121_spill] sm:$0xff] %v8709_v38  ;;  %v980_v1 = vadd.f32 %v979_v21, %v8627_v12  ;;  %1569 = vmatpush1.bf16.msra.mxu0 %v1343_v41  ;;  %v981_v40 = vpop.f32.mrb[30].mxu0  ;;  %1795 = vmatpush1.bf16.msra.mxu1 %v1345_v9  ;;  %v1405_v4 = vpack.c.bf16 %v8709_v38, %v8707_v55  ;;  %v1158_v41 = vmul.f32 0.01, %v1083_v42 }
 0x38b   :  { %v1163_v46 = vmul.f32 0.01, %v978_v43  ;;  %v982_v37 = vadd.f32 %v981_v40, %v8624_v48  ;;  %v983_v57 = vpop.f32.mrb[31].mxu0  ;;  %1570 = vmatprep.subr.bf16.mxu0 %v1348_v30  ;;  %1796 = vmatprep.subr.bf16.mxu1 %v1350_v3  ;;  %v1087_v9 = vadd.f32 %v1086_v0, %v8651_v54  ;;  %v1351_v30 = vld [vmem:[#allocation2 + $0x4a0] sm:$0xff]  ;;  %v1353_v3 = vld [vmem:[#allocation2 + $0x4b0] sm:$0xff]  ;;  %12233 = vst [vmem:[#allocation127_spill] sm:$0xff] %v8741_v62 }
 0x38c   :  { %v1164_v45 = vmul.f32 0.01, %v980_v1  ;;  %v984_v44 = vadd.f32 %v983_v57, %v8627_v12  ;;  %1501 = vmatprep.mubr.bf16.mxu0 %v1405_v4  ;;  %1727 = vmatprep.mubr.bf16.mxu1 %v1405_v4  ;;  %v1161_v21 = vmul.f32 0.01, %v1085_v5  ;;  %v1358_v57 = vld [vmem:[#allocation2 + $0x4d8] sm:$0xff] }
 0x38d   :  { %v1167_v17 = vmul.f32 0.01, %v982_v37  ;;  %1502 = vmatmul.mubr.bf16.gmra.mrb[56].mxu0 %v1404_v28  ;;  %1728 = vmatmul.mubr.bf16.gmra.mrb[72].mxu1 %v1404_v28  ;;  %v8737_v58 = vmax.f32 %v978_v43, %v1163_v46  ;;  %v1162_v43 = vmul.f32 0.01, %v1087_v9 }
 0x38e   :  { %v1168_v56 = vmul.f32 0.01, %v984_v44  ;;  %1571 = vmatpush1.bf16.msra.mxu0 %v1347_v7  ;;  %1797 = vmatpush1.bf16.msra.mxu1 %v1349_v34  ;;  %v8743_v28 = vmax.f32 %v980_v1, %v1164_v45  ;;  %v8747_v7 = vmax.f32 %v1083_v42, %v1158_v41  ;;  %v8752_v52 = vmax.f32 %v1085_v5, %v1161_v21 }
 0x38f   :  { %12231 = vst [vmem:[#allocation125_spill] sm:$0xff] %v8737_v58  ;;  %v8739_v23 = vmax.f32 %v982_v37, %v1167_v17  ;;  %1572 = vmatprep.subr.bf16.mxu0 %v1352_v51  ;;  %1798 = vmatprep.subr.bf16.mxu1 %v1354_v24  ;;  %v1090_v51 = vpop.f32.mrb[44].mxu1  ;;  %v1355_v17 = vld [vmem:[#allocation2 + $0x4c0] sm:$0xff] }
 0x390   :  { %12234 = vst [vmem:[#allocation128_spill] sm:$0xff] %v8743_v28  ;;  %v8745_v40 = vmax.f32 %v984_v44, %v1168_v56  ;;  %v987_v4 = vpop.f32.mrb[32].mxu0  ;;  %12236 = vst [vmem:[#allocation130_spill] sm:$0xff] %v8747_v7  ;;  %v8757_v44 = vmax.f32 %v1087_v9, %v1162_v43  ;;  %v1091_v5 = vadd.f32 %v1090_v51, %v8644_v19  ;;  %v1092_v0 = vpop.f32.mrb[45].mxu1 }
 0x391   :  { %12232 = vst [vmem:[#allocation126_spill] sm:$0xff] %v8739_v23  ;;  %v988_v46 = vadd.f32 %v987_v4, %v8624_v48  ;;  %v989_v37 = vpop.f32.mrb[33].mxu0  ;;  %v1408_v34 = vpack.c.bf16 %v8739_v23, %v8737_v58  ;;  %12237 = vst [vmem:[#allocation131_spill] sm:$0xff] %v8752_v52  ;;  %v8763_v56 = vpack.c.bf16 %v8752_v52, %v8741_v62  ;;  %v1094_v4 = vpop.f32.mrb[46].mxu1  ;;  %v1359_v23 = vld [vmem:[#allocation2 + $0x4e0] sm:$0xff]  ;;  %v1366_v52 = vld [vmem:[#allocation2 + $0x518] sm:$0xff] }
 0x392   :  { %12235 = vst [vmem:[#allocation129_spill] sm:$0xff] %v8745_v40  ;;  %v990_v39 = vadd.f32 %v989_v37, %v8627_v12  ;;  %1573 = vmatpush1.bf16.msra.mxu0 %v1351_v30  ;;  %v991_v1 = vpop.f32.mrb[34].mxu0  ;;  %1799 = vmatpush1.bf16.msra.mxu1 %v1353_v3  ;;  %v1409_v45 = vpack.c.bf16 %v8745_v40, %v8743_v28  ;;  %12238 = vst [vmem:[#allocation132_spill] sm:$0xff] %v8757_v44  ;;  %v1360_v30 = vld [vmem:[#allocation2 + $0x4e8] sm:$0xff]  ;;  %v1362_v3 = vld [vmem:[#allocation2 + $0x4f8] sm:$0xff] }
 0x393   :  { %v1171_v24 = vmul.f32 0.01, %v988_v46  ;;  %v992_v42 = vadd.f32 %v991_v1, %v8624_v48  ;;  %v993_v36 = vpop.f32.mrb[35].mxu0  ;;  %1574 = vmatprep.subr.bf16.mxu0 %v1356_v2  ;;  %1800 = vmatprep.subr.bf16.mxu1 %v1358_v57  ;;  %v1093_v21 = vadd.f32 %v1092_v0, %v8651_v54  ;;  %v8769_v2 = vpack.c.bf16 %v8757_v44, %v8747_v7  ;;  %v1096_v1 = vpop.f32.mrb[47].mxu1  ;;  %v1361_v28 = vld [vmem:[#allocation2 + $0x4f0] sm:$0xff]  ;;  %v1382_v62 = vld [vmem:[#allocation2 + $0x598] sm:$0xff] }
 0x394   :  { %v1172_v41 = vmul.f32 0.01, %v990_v39  ;;  %v994_v9 = vadd.f32 %v993_v36, %v8627_v12  ;;  %1511 = vmatprep.mubr.bf16.mxu0 %v1409_v45  ;;  %1737 = vmatprep.mubr.bf16.mxu1 %v1409_v45  ;;  %v1165_v43 = vmul.f32 0.01, %v1091_v5  ;;  %v1095_v37 = vadd.f32 %v1094_v4, %v8644_v19 }
 0x395   :  { %v1175_v57 = vmul.f32 0.01, %v992_v42  ;;  %1512 = vmatmul.mubr.bf16.gmra.mrb[60].mxu0 %v1408_v34  ;;  %1738 = vmatmul.mubr.bf16.gmra.mrb[76].mxu1 %v1408_v34  ;;  %v1166_v45 = vmul.f32 0.01, %v1093_v21  ;;  %v1097_v36 = vadd.f32 %v1096_v1, %v8651_v54  ;;  %v8773_v40 = vmax.f32 %v988_v46, %v1171_v24 }
 0x396   :  { %v1176_v51 = vmul.f32 0.01, %v994_v9  ;;  %1575 = vmatpush1.bf16.msra.mxu0 %v1355_v17  ;;  %1801 = vmatpush1.bf16.msra.mxu1 %v1357_v16  ;;  %v8777_v58 = vmax.f32 %v1091_v5, %v1165_v43  ;;  %v1169_v34 = vmul.f32 0.01, %v1095_v37  ;;  %v8779_v44 = vmax.f32 %v990_v39, %v1172_v41  ;;  %v1364_v16 = vld [vmem:[#allocation2 + $0x508] sm:$0xff] }
 0x397   :  { %12239 = vst [vmem:[#allocation133_spill] sm:$0xff] %v8773_v40  ;;  %v8775_v0 = vmax.f32 %v992_v42, %v1175_v57  ;;  %1576 = vmatprep.subr.bf16.mxu0 %v1360_v30  ;;  %1802 = vmatprep.subr.bf16.mxu1 %v1362_v3  ;;  %v8783_v38 = vmax.f32 %v1093_v21, %v1166_v45  ;;  %v1170_v46 = vmul.f32 0.01, %v1097_v36  ;;  %v1100_v21 = vpop.f32.mrb[48].mxu1 }
 0x398   :  { %12241 = vst [vmem:[#allocation135_spill] sm:$0xff] %v8777_v58  ;;  %12242 = vst [vmem:[#allocation136_spill] sm:$0xff] %v8779_v44  ;;  %v8781_v4 = vmax.f32 %v994_v9, %v1176_v51  ;;  %v997_v17 = vpop.f32.mrb[36].mxu0  ;;  %v8788_v3 = vmax.f32 %v1095_v37, %v1169_v34  ;;  %v1363_v51 = vld [vmem:[#allocation2 + $0x500] sm:$0xff]  ;;  %v1365_v37 = vld [vmem:[#allocation2 + $0x510] sm:$0xff]  ;;  %v1101_v45 = vadd.f32 %v1100_v21, %v8644_v19  ;;  %v1102_v34 = vpop.f32.mrb[49].mxu1 }
 0x399   :  { %12240 = vst [vmem:[#allocation134_spill] sm:$0xff] %v8775_v0  ;;  %12244 = vst [vmem:[#allocation138_spill] sm:$0xff] %v8783_v38  ;;  %v998_v24 = vadd.f32 %v997_v17, %v8624_v48  ;;  %v999_v42 = vpop.f32.mrb[37].mxu0  ;;  %v1412_v30 = vpack.c.bf16 %v8775_v0, %v8773_v40  ;;  %v8793_v9 = vmax.f32 %v1097_v36, %v1170_v46  ;;  %v1368_v17 = vld [vmem:[#allocation2 + $0x528] sm:$0xff]  ;;  %v1370_v46 = vld [vmem:[#allocation2 + $0x538] sm:$0xff] }
 0x39a   :  { %12243 = vst [vmem:[#allocation137_spill] sm:$0xff] %v8781_v4  ;;  %12245 = vst [vmem:[#allocation139_spill] sm:$0xff] %v8788_v3  ;;  %v1000_v5 = vadd.f32 %v999_v42, %v8627_v12  ;;  %1577 = vmatpush1.bf16.msra.mxu0 %v1359_v23  ;;  %v1001_v39 = vpop.f32.mrb[38].mxu0  ;;  %1803 = vmatpush1.bf16.msra.mxu1 %v1361_v28  ;;  %v1413_v41 = vpack.c.bf16 %v8781_v4, %v8779_v44  ;;  %v1173_v21 = vmul.f32 0.01, %v1101_v45 }
 0x39b   :  { %12246 = vst [vmem:[#allocation140_spill] sm:$0xff] %v8793_v9  ;;  %v1179_v57 = vmul.f32 0.01, %v998_v24  ;;  %v1002_v43 = vadd.f32 %v1001_v39, %v8624_v48  ;;  %v1003_v1 = vpop.f32.mrb[39].mxu0  ;;  %1578 = vmatprep.subr.bf16.mxu0 %v1364_v16  ;;  %1804 = vmatprep.subr.bf16.mxu1 %v1366_v52  ;;  %v8799_v23 = vpack.c.bf16 %v8788_v3, %v8777_v58  ;;  %v1104_v16 = vpop.f32.mrb[50].mxu1  ;;  %v1369_v3 = vld [vmem:[#allocation2 + $0x530] sm:$0xff] }
 0x39c   :  { %v1180_v28 = vmul.f32 0.01, %v1000_v5  ;;  %v1004_v36 = vadd.f32 %v1003_v1, %v8627_v12  ;;  %1521 = vmatprep.mubr.bf16.mxu0 %v1413_v41  ;;  %1747 = vmatprep.mubr.bf16.mxu1 %v1413_v41  ;;  %v1103_v42 = vadd.f32 %v1102_v34, %v8651_v54  ;;  %v8805_v52 = vpack.c.bf16 %v8793_v9, %v8783_v38  ;;  %v1106_v0 = vpop.f32.mrb[51].mxu1  ;;  %v1367_v9 = vld [vmem:[#allocation2 + $0x520] sm:$0xff] }
 0x39d   :  { %v1183_v39 = vmul.f32 0.01, %v1002_v43  ;;  %1522 = vmatmul.mubr.bf16.gmra.mrb[64].mxu0 %v1412_v30  ;;  %1748 = vmatmul.mubr.bf16.gmra.mrb[80].mxu1 %v1412_v30  ;;  %v1105_v4 = vadd.f32 %v1104_v16, %v8644_v19  ;;  %v1107_v1 = vadd.f32 %v1106_v0, %v8651_v54  ;;  %v8809_v40 = vmax.f32 %v998_v24, %v1179_v57 }
 0x39e   :  { %v1184_v44 = vmul.f32 0.01, %v1004_v36  ;;  %1579 = vmatpush1.bf16.msra.mxu0 %v1363_v51  ;;  %1805 = vmatpush1.bf16.msra.mxu1 %v1365_v37  ;;  %v1174_v41 = vmul.f32 0.01, %v1103_v42  ;;  %v8813_v38 = vmax.f32 %v1101_v45, %v1173_v21  ;;  %v8815_v58 = vmax.f32 %v1000_v5, %v1180_v28  ;;  %v1372_v37 = vld [vmem:[#allocation2 + $0x548] sm:$0xff]  ;;  %v1371_v21 = vld [vmem:[#allocation2 + $0x540] sm:$0xff] }
 0x39f   :  { %12247 = vst [vmem:[#allocation141_spill] sm:$0xff] %v8809_v40  ;;  %v8811_v34 = vmax.f32 %v1002_v43, %v1183_v39  ;;  %1580 = vmatprep.subr.bf16.mxu0 %v1368_v17  ;;  %1806 = vmatprep.subr.bf16.mxu1 %v1370_v46  ;;  %v1177_v30 = vmul.f32 0.01, %v1105_v4  ;;  %v1178_v0 = vmul.f32 0.01, %v1107_v1 }
 0x3a0   :  { %12249 = vst [vmem:[#allocation143_spill] sm:$0xff] %v8813_v38  ;;  %12250 = vst [vmem:[#allocation144_spill] sm:$0xff] %v8815_v58  ;;  %v8817_v16 = vmax.f32 %v1004_v36, %v1184_v44  ;;  %v1007_v51 = vpop.f32.mrb[40].mxu0  ;;  %v8819_v7 = vmax.f32 %v1103_v42, %v1174_v41  ;;  %v1110_v36 = vpop.f32.mrb[52].mxu1 }
 0x3a1   :  { %12248 = vst [vmem:[#allocation142_spill] sm:$0xff] %v8811_v34  ;;  %v1008_v24 = vadd.f32 %v1007_v51, %v8624_v48  ;;  %v1009_v57 = vpop.f32.mrb[41].mxu0  ;;  %v1416_v43 = vpack.c.bf16 %v8811_v34, %v8809_v40  ;;  %v8824_v17 = vmax.f32 %v1105_v4, %v1177_v30  ;;  %v8829_v28 = vmax.f32 %v1107_v1, %v1178_v0  ;;  %v1373_v4 = vld [vmem:[#allocation2 + $0x550] sm:$0xff]  ;;  %v1112_v30 = vpop.f32.mrb[53].mxu1  ;;  %v1376_v51 = vld [vmem:[#allocation2 + $0x568] sm:$0xff]  ;;  %v1378_v0 = vld [vmem:[#allocation2 + $0x578] sm:$0xff] }
 0x3a2   :  { %12251 = vst [vmem:[#allocation145_spill] sm:$0xff] %v8817_v16  ;;  %12252 = vst [vmem:[#allocation146_spill] sm:$0xff] %v8819_v7  ;;  %v1010_v45 = vadd.f32 %v1009_v57, %v8627_v12  ;;  %1581 = vmatpush1.bf16.msra.mxu0 %v1367_v9  ;;  %v1011_v5 = vpop.f32.mrb[42].mxu0  ;;  %1807 = vmatpush1.bf16.msra.mxu1 %v1369_v3  ;;  %v1417_v44 = vpack.c.bf16 %v8817_v16, %v8815_v58 }
 0x3a3   :  { %12253 = vst [vmem:[#allocation147_spill] sm:$0xff] %v8824_v17  ;;  %12254 = vst [vmem:[#allocation148_spill] sm:$0xff] %v8829_v28  ;;  %v1187_v46 = vmul.f32 0.01, %v1008_v24  ;;  %v1012_v42 = vadd.f32 %v1011_v5, %v8624_v48  ;;  %v1013_v39 = vpop.f32.mrb[43].mxu0  ;;  %1582 = vmatprep.subr.bf16.mxu0 %v1372_v37  ;;  %1808 = vmatprep.subr.bf16.mxu1 %v1374_v50  ;;  %v1111_v41 = vadd.f32 %v1110_v36, %v8644_v19  ;;  %v1114_v37 = vpop.f32.mrb[54].mxu1 }
 0x3a4   :  { %v8835_v3 = vpack.c.bf16 %v8824_v17, %v8813_v38  ;;  %v1188_v9 = vmul.f32 0.01, %v1010_v45  ;;  %v1014_v1 = vadd.f32 %v1013_v39, %v8627_v12  ;;  %1531 = vmatprep.mubr.bf16.mxu0 %v1417_v44  ;;  %1757 = vmatprep.mubr.bf16.mxu1 %v1417_v44  ;;  %v1113_v57 = vadd.f32 %v1112_v30, %v8651_v54  ;;  %v1116_v34 = vpop.f32.mrb[55].mxu1  ;;  %v1377_v17 = vld [vmem:[#allocation2 + $0x570] sm:$0xff] }
 0x3a5   :  { %v8841_v50 = vpack.c.bf16 %v8829_v28, %v8819_v7  ;;  %v1191_v5 = vmul.f32 0.01, %v1012_v42  ;;  %1532 = vmatmul.mubr.bf16.gmra.mrb[68].mxu0 %v1416_v43  ;;  %1758 = vmatmul.mubr.bf16.gmra.mrb[84].mxu1 %v1416_v43  ;;  %v1181_v36 = vmul.f32 0.01, %v1111_v41  ;;  %v1115_v16 = vadd.f32 %v1114_v37, %v8644_v19  ;;  %v1375_v28 = vld [vmem:[#allocation2 + $0x560] sm:$0xff] }
 0x3a6   :  { %v1192_v58 = vmul.f32 0.01, %v1014_v1  ;;  %1583 = vmatpush1.bf16.msra.mxu0 %v1371_v21  ;;  %1809 = vmatpush1.bf16.msra.mxu1 %v1373_v4  ;;  %v1182_v44 = vmul.f32 0.01, %v1113_v57  ;;  %v1117_v39 = vadd.f32 %v1116_v34, %v8651_v54  ;;  %v8845_v40 = vmax.f32 %v1008_v24, %v1187_v46  ;;  %v1380_v4 = vld [vmem:[#allocation2 + $0x588] sm:$0xff] }
 0x3a7   :  { %v8847_v30 = vmax.f32 %v1012_v42, %v1191_v5  ;;  %1584 = vmatprep.subr.bf16.mxu0 %v1376_v51  ;;  %1810 = vmatprep.subr.bf16.mxu1 %v1378_v0  ;;  %v8849_v7 = vmax.f32 %v1111_v41, %v1181_v36  ;;  %v1185_v43 = vmul.f32 0.01, %v1115_v16  ;;  %v8851_v38 = vmax.f32 %v1010_v45, %v1188_v9  ;;  %v1379_v36 = vld [vmem:[#allocation2 + $0x580] sm:$0xff] }
 0x3a8   :  { %12255 = vst [vmem:[#allocation149_spill] sm:$0xff] %v8845_v40  ;;  %v8853_v37 = vmax.f32 %v1014_v1, %v1192_v58  ;;  %v1017_v21 = vpop.f32.mrb[44].mxu0  ;;  %v8855_v55 = vmax.f32 %v1113_v57, %v1182_v44  ;;  %v1186_v34 = vmul.f32 0.01, %v1117_v39  ;;  %v1120_v1 = vpop.f32.mrb[56].mxu1 }
 0x3a9   :  { %12256 = vst [vmem:[#allocation150_spill] sm:$0xff] %v8847_v30  ;;  %12257 = vst [vmem:[#allocation151_spill] sm:$0xff] %v8849_v7  ;;  %v1018_v24 = vadd.f32 %v1017_v21, %v8624_v48  ;;  %v1019_v46 = vpop.f32.mrb[45].mxu0  ;;  %v1420_v42 = vpack.c.bf16 %v8847_v30, %v8845_v40  ;;  %v8860_v51 = vmax.f32 %v1115_v16, %v1185_v43  ;;  %v1381_v16 = vld [vmem:[#allocation2 + $0x590] sm:$0xff]  ;;  %v1122_v43 = vpop.f32.mrb[57].mxu1  ;;  %v1384_v21 = vld [vmem:[#allocation2 + $0x5a8] sm:$0xff] }
 0x3aa   :  { %12258 = vst [vmem:[#allocation152_spill] sm:$0xff] %v8851_v38  ;;  %12259 = vst [vmem:[#allocation153_spill] sm:$0xff] %v8853_v37  ;;  %v1020_v41 = vadd.f32 %v1019_v46, %v8627_v12  ;;  %1585 = vmatpush1.bf16.msra.mxu0 %v1375_v28  ;;  %v1021_v45 = vpop.f32.mrb[46].mxu0  ;;  %1811 = vmatpush1.bf16.msra.mxu1 %v1377_v17  ;;  %v1421_v58 = vpack.c.bf16 %v8853_v37, %v8851_v38  ;;  %v1383_v38 = vld [vmem:[#allocation2 + $0x5a0] sm:$0xff]  ;;  %v1385_v40 = vld [vmem:[#allocation2 + $0x5b0] sm:$0xff] }
 0x3ab   :  { %12260 = vst [vmem:[#allocation154_spill] sm:$0xff] %v8855_v55  ;;  %12261 = vst [vmem:[#allocation155_spill] sm:$0xff] %v8860_v51  ;;  %v8865_v9 = vmax.f32 %v1117_v39, %v1186_v34  ;;  %v1195_v0 = vmul.f32 0.01, %v1018_v24  ;;  %v1022_v57 = vadd.f32 %v1021_v45, %v8624_v48  ;;  %v1023_v5 = vpop.f32.mrb[47].mxu0  ;;  %1586 = vmatprep.subr.bf16.mxu0 %v1380_v4  ;;  %1812 = vmatprep.subr.bf16.mxu1 %v1382_v62  ;;  %v1386_v34 = vld [vmem:[#allocation2 + $0x5b8] sm:$0xff] }
 0x3ac   :  { %v1121_v44 = vadd.f32 %v1120_v1, %v8644_v19  ;;  %v8871_v17 = vpack.c.bf16 %v8860_v51, %v8849_v7  ;;  %v1196_v28 = vmul.f32 0.01, %v1020_v41  ;;  %v1024_v39 = vadd.f32 %v1023_v5, %v8627_v12  ;;  %1541 = vmatprep.mubr.bf16.mxu0 %v1421_v58  ;;  %1767 = vmatprep.mubr.bf16.mxu1 %v1421_v58  ;;  %v1124_v4 = vpop.f32.mrb[58].mxu1 }
 0x3ad   :  { %12262 = vst [vmem:[#allocation156_spill] sm:$0xff] %v8865_v9  ;;  %v1123_v48 = vadd.f32 %v1122_v43, %v8651_v54  ;;  %v8877_v62 = vpack.c.bf16 %v8865_v9, %v8855_v55  ;;  %v1199_v46 = vmul.f32 0.01, %v1022_v57  ;;  %1542 = vmatmul.mubr.bf16.gmra.mrb[72].mxu0 %v1420_v42  ;;  %1768 = vmatmul.mubr.bf16.gmra.mrb[88].mxu1 %v1420_v42  ;;  %v1126_v37 = vpop.f32.mrb[59].mxu1 }
 0x3ae   :  { %v1189_v45 = vmul.f32 0.01, %v1121_v44  ;;  %v1125_v1 = vadd.f32 %v1124_v4, %v8644_v19  ;;  %v1200_v30 = vmul.f32 0.01, %v1024_v39  ;;  %1587 = vmatpush1.bf16.msra.mxu0 %v1379_v36  ;;  %1813 = vmatpush1.bf16.msra.mxu1 %v1381_v16  ;;  %v1127_v58 = vadd.f32 %v1126_v37, %v8651_v54  ;;  %v1388_v36 = vld [vmem:[#allocation2 + $0x5c8] sm:$0xff]  ;;  %v1390_v16 = vld [vmem:[#allocation2 + $0x5d8] sm:$0xff] }
 0x3af   :  { %v1190_v12 = vmul.f32 0.01, %v1123_v48  ;;  %v8881_v5 = vmax.f32 %v1018_v24, %v1195_v0  ;;  %v8883_v43 = vmax.f32 %v1022_v57, %v1199_v46  ;;  %1588 = vmatprep.subr.bf16.mxu0 %v1384_v21  ;;  %1814 = vmatprep.subr.bf16.mxu1 %v1386_v34  ;;  %v8887_v51 = vmax.f32 %v1020_v41, %v1196_v28  ;;  %v1130_v41 = vpop.f32.mrb[60].mxu1  ;;  %v1389_v28 = vld [vmem:[#allocation2 + $0x5d0] sm:$0xff]  ;;  %v1392_v46 = vld [vmem:[#allocation2 + $0x5e8] sm:$0xff] }
 0x3b0   :  { %v8885_v9 = vmax.f32 %v1121_v44, %v1189_v45  ;;  %v1193_v42 = vmul.f32 0.01, %v1125_v1  ;;  %v8889_v4 = vmax.f32 %v1024_v39, %v1200_v30  ;;  %v1194_v37 = vmul.f32 0.01, %v1127_v58  ;;  %v1387_v30 = vld [vmem:[#allocation2 + $0x5c0] sm:$0xff]  ;;  %v1132_v21 = vpop.f32.mrb[61].mxu1 }
 0x3b1   :  { %12263 = vst [vmem:[#allocation157_spill] sm:$0xff] %v8881_v5  ;;  %12264 = vst [vmem:[#allocation158_spill] sm:$0xff] %v8883_v43  ;;  %v8891_v55 = vmax.f32 %v1123_v48, %v1190_v12  ;;  %v1424_v24 = vpack.c.bf16 %v8883_v43, %v8881_v5  ;;  %v1131_v39 = vadd.f32 %v1130_v41, %v8644_v19  ;;  %v1394_v45 = vld [vmem:[#allocation2 + $0x5f8] sm:$0xff] }
 0x3b2   :  { %12265 = vst [vmem:[#allocation159_spill] sm:$0xff] %v8885_v9  ;;  %12266 = vst [vmem:[#allocation160_spill] sm:$0xff] %v8887_v51  ;;  %v8895_v0 = vmax.f32 %v1125_v1, %v1193_v42  ;;  %1589 = vmatpush1.bf16.msra.mxu0 %v1383_v38  ;;  %1815 = vmatpush1.bf16.msra.mxu1 %v1385_v40  ;;  %v1425_v57 = vpack.c.bf16 %v8889_v4, %v8887_v51  ;;  %v1134_v40 = vpop.f32.mrb[62].mxu1 }
 0x3b3   :  { %12267 = vst [vmem:[#allocation161_spill] sm:$0xff] %v8889_v4  ;;  %12268 = vst [vmem:[#allocation162_spill] sm:$0xff] %v8891_v55  ;;  %v8899_v44 = vmax.f32 %v1127_v58, %v1194_v37  ;;  %1590 = vmatprep.subr.bf16.mxu0 %v1388_v36  ;;  %1816 = vmatprep.subr.bf16.mxu1 %v1390_v16  ;;  %v1133_v38 = vadd.f32 %v1132_v21, %v8651_v54  ;;  %v1197_v1 = vmul.f32 0.01, %v1131_v39  ;;  %v1136_v58 = vpop.f32.mrb[63].mxu1  ;;  %v1391_v16 = vld [vmem:[#allocation2 + $0x5e0] sm:$0xff] }
 0x3b4   :  { %12269 = vst [vmem:[#allocation163_spill] sm:$0xff] %v8895_v0  ;;  %v8904_v34 = vpack.c.bf16 %v8895_v0, %v8885_v9  ;;  %1551 = vmatprep.mubr.bf16.mxu0 %v1425_v57  ;;  %1777 = vmatprep.mubr.bf16.mxu1 %v1425_v57  ;;  %v1135_v12 = vadd.f32 %v1134_v40, %v8644_v19  ;;  %v1393_v37 = vld [vmem:[#allocation2 + $0x5f0] sm:$0xff]  ;;  %v2030_v21 = vld [vmem:[#allocation2 + $0x608] sm:$0xff] }
 0x3b5   :  { %12270 = vst [vmem:[#allocation164_spill] sm:$0xff] %v8899_v44  ;;  %v8909_v48 = vpack.c.bf16 %v8899_v44, %v8891_v55  ;;  %1552 = vmatmul.mubr.bf16.gmra.mrb[76].mxu0 %v1424_v24  ;;  %1778 = vmatmul.mubr.bf16.gmra.mrb[92].mxu1 %v1424_v24  ;;  %v1198_v42 = vmul.f32 0.01, %v1133_v38  ;;  %v1137_v36 = vadd.f32 %v1136_v58, %v8651_v54  ;;  %v2031_v40 = vld [vmem:[#allocation2 + $0x610] sm:$0xff]  ;;  %v2038_v58 = vld [vmem:[#allocation2 + $0x648] sm:$0xff] }
 0x3b6   :  { %1591 = vmatpush1.bf16.msra.mxu0 %v1387_v30  ;;  %1817 = vmatpush1.bf16.msra.mxu1 %v1389_v28  ;;  %v8915_v57 = vmax.f32 %v1131_v39, %v1197_v1  ;;  %v1201_v24 = vmul.f32 0.01, %v1135_v12  ;;  %v2032_v30 = vld [vmem:[#allocation2 + $0x618] sm:$0xff]  ;;  %v2033_v1 = vld [vmem:[#allocation2 + $0x620] sm:$0xff] }
 0x3b7   :  { %1594 = vmatprep.mubr.bf16.mxu0 %v8697_v32  ;;  %1820 = vmatprep.mubr.bf16.mxu1 %v8697_v32  ;;  %v8917_v41 = vmax.f32 %v1133_v38, %v1198_v42  ;;  %v1202_v19 = vmul.f32 0.01, %v1137_v36  ;;  %v2029_v38 = vld [vmem:[#allocation2 + $0x600] sm:$0xff]  ;;  %v2040_v42 = vld [vmem:[#allocation2 + $0x658] sm:$0xff] }
 0x3b8   :  { %12271 = vst [vmem:[#allocation165_spill] sm:$0xff] %v8915_v57  ;;  %1592 = vmatprep.subr.bf16.mxu0 %v1392_v46  ;;  %1818 = vmatprep.subr.bf16.mxu1 %v1394_v45  ;;  %v8919_v28 = vmax.f32 %v1135_v12, %v1201_v24  ;;  %v2034_v46 = vld [vmem:[#allocation2 + $0x628] sm:$0xff]  ;;  %v2036_v45 = vld [vmem:[#allocation2 + $0x638] sm:$0xff]  ;;  %v2035_v12 = vld [vmem:[#allocation2 + $0x630] sm:$0xff] }
 0x3b9   :  { %12272 = vst [vmem:[#allocation166_spill] sm:$0xff] %v8917_v41  ;;  %v8921_v54 = vmax.f32 %v1137_v36, %v1202_v19  ;;  %v2037_v36 = vld [vmem:[#allocation2 + $0x640] sm:$0xff]  ;;  %v2043_v24 = vld [vmem:[#allocation2 + $0x670] sm:$0xff]  ;;  %v2046_v19 = vld [vmem:[#allocation2 + $0x688] sm:$0xff] }
 0x3ba   :  { %12273 = vst [vmem:[#allocation167_spill] sm:$0xff] %v8919_v28  ;;  %1593 = vmatpush1.bf16.msra.mxu0 %v1391_v16  ;;  %1819 = vmatpush1.bf16.msra.mxu1 %v1393_v37  ;;  %v8925_v32 = vpack.c.bf16 %v8919_v28, %v8915_v57  ;;  %v2042_v16 = vld [vmem:[#allocation2 + $0x668] sm:$0xff]  ;;  %v2041_v37 = vld [vmem:[#allocation2 + $0x660] sm:$0xff] }
 0x3bb   :  { %12274 = vst [vmem:[#allocation168_spill] sm:$0xff] %v8921_v54  ;;  %2131 = vmatprep.subr.bf16.mxu0 %v2030_v21  ;;  %2244 = vmatprep.subr.bf16.mxu1 %v2032_v30  ;;  %v8929_v39 = vpack.c.bf16 %v8921_v54, %v8917_v41  ;;  %v2048_v21 = vld [vmem:[#allocation2 + $0x698] sm:$0xff]  ;;  %v2045_v30 = vld [vmem:[#allocation2 + $0x680] sm:$0xff] }
 0x3bd   :  { %1595 = vmatmul.mubr.bf16.vlgmr.msra.gmra.mrb[48].mxu0 %v8690_v60  ;;  %1821 = vmatmul.mubr.bf16.vlgmr.msra.gmra.mrb[64].mxu1 %v8690_v60  ;;  %v2039_v60 = vld [vmem:[#allocation2 + $0x650] sm:$0xff] }
 0x3be   :  { %1604 = vmatprep.mubr.bf16.mxu0 %v8733_v22  ;;  %1830 = vmatprep.mubr.bf16.mxu1 %v8733_v22  ;;  %v2044_v22 = vld [vmem:[#allocation2 + $0x678] sm:$0xff] }
 0x3bf   :  { %2132 = vmatpush1.bf16.msra.mxu0 %v2029_v38  ;;  %2245 = vmatpush1.bf16.msra.mxu1 %v2031_v40  ;;  %v2050_v38 = vld [vmem:[#allocation2 + $0x6a8] sm:$0xff]  ;;  %v2049_v40 = vld [vmem:[#allocation2 + $0x6a0] sm:$0xff] }
 0x3c0   :  { %2133 = vmatprep.subr.bf16.mxu0 %v2034_v46  ;;  %2246 = vmatprep.subr.bf16.mxu1 %v2036_v45  ;;  %v2051_v46 = vld [vmem:[#allocation2 + $0x6b0] sm:$0xff]  ;;  %v2054_v45 = vld [vmem:[#allocation2 + $0x6c8] sm:$0xff] }
 0x3c3   :  { %2134 = vmatpush1.bf16.msra.mxu0 %v2033_v1  ;;  %2247 = vmatpush1.bf16.msra.mxu1 %v2035_v12  ;;  %v2056_v1 = vld [vmem:[#allocation2 + $0x6d8] sm:$0xff]  ;;  %v2053_v12 = vld [vmem:[#allocation2 + $0x6c0] sm:$0xff] }
 0x3c4   :  { %2135 = vmatprep.subr.bf16.mxu0 %v2038_v58  ;;  %2248 = vmatprep.subr.bf16.mxu1 %v2040_v42  ;;  %v2058_v58 = vld [vmem:[#allocation2 + $0x6e8] sm:$0xff]  ;;  %v2057_v42 = vld [vmem:[#allocation2 + $0x6e0] sm:$0xff] }
 0x3c5   :  { %1605 = vmatmul.mubr.bf16.gmra.mrb[52].mxu0 %v8727_v53  ;;  %1831 = vmatmul.mubr.bf16.gmra.mrb[68].mxu1 %v8727_v53  ;;  %v2047_v53 = vld [vmem:[#allocation2 + $0x690] sm:$0xff] }
 0x3c6   :  { %1614 = vmatprep.mubr.bf16.mxu0 %v8769_v2  ;;  %1840 = vmatprep.mubr.bf16.mxu1 %v8769_v2  ;;  %v2052_v2 = vld [vmem:[#allocation2 + $0x6b8] sm:$0xff] }
 0x3c7   :  { %2136 = vmatpush1.bf16.msra.mxu0 %v2037_v36  ;;  %2249 = vmatpush1.bf16.msra.mxu1 %v2039_v60  ;;  %v2059_v36 = vld [vmem:[#allocation2 + $0x6f0] sm:$0xff]  ;;  %v2062_v60 = vld [vmem:[#allocation2 + $0x708] sm:$0xff] }
 0x3c8   :  { %2137 = vmatprep.subr.bf16.mxu0 %v2042_v16  ;;  %2250 = vmatprep.subr.bf16.mxu1 %v2044_v22  ;;  %v2064_v16 = vld [vmem:[#allocation2 + $0x718] sm:$0xff]  ;;  %v2061_v22 = vld [vmem:[#allocation2 + $0x700] sm:$0xff] }
 0x3cb   :  { %2138 = vmatpush1.bf16.msra.mxu0 %v2041_v37  ;;  %2251 = vmatpush1.bf16.msra.mxu1 %v2043_v24  ;;  %v2066_v37 = vld [vmem:[#allocation2 + $0x728] sm:$0xff]  ;;  %v2065_v24 = vld [vmem:[#allocation2 + $0x720] sm:$0xff] }
 0x3cc   :  { %2139 = vmatprep.subr.bf16.mxu0 %v2046_v19  ;;  %2252 = vmatprep.subr.bf16.mxu1 %v2048_v21  ;;  %v2067_v19 = vld [vmem:[#allocation2 + $0x730] sm:$0xff]  ;;  %v2070_v21 = vld [vmem:[#allocation2 + $0x748] sm:$0xff] }
 0x3cd   :  { %1615 = vmatmul.mubr.bf16.gmra.mrb[56].mxu0 %v8763_v56  ;;  %1841 = vmatmul.mubr.bf16.gmra.mrb[72].mxu1 %v8763_v56  ;;  %v2055_v56 = vld [vmem:[#allocation2 + $0x6d0] sm:$0xff] }
 0x3ce   :  { %1624 = vmatprep.mubr.bf16.mxu0 %v8805_v52  ;;  %1850 = vmatprep.mubr.bf16.mxu1 %v8805_v52  ;;  %v2060_v52 = vld [vmem:[#allocation2 + $0x6f8] sm:$0xff] }
 0x3cf   :  { %2140 = vmatpush1.bf16.msra.mxu0 %v2045_v30  ;;  %2253 = vmatpush1.bf16.msra.mxu1 %v2047_v53  ;;  %v2072_v30 = vld [vmem:[#allocation2 + $0x758] sm:$0xff]  ;;  %v2069_v53 = vld [vmem:[#allocation2 + $0x740] sm:$0xff] }
 0x3d0   :  { %2141 = vmatprep.subr.bf16.mxu0 %v2050_v38  ;;  %2254 = vmatprep.subr.bf16.mxu1 %v2052_v2  ;;  %v2074_v38 = vld [vmem:[#allocation2 + $0x768] sm:$0xff]  ;;  %v2073_v2 = vld [vmem:[#allocation2 + $0x760] sm:$0xff] }
 0x3d3   :  { %2142 = vmatpush1.bf16.msra.mxu0 %v2049_v40  ;;  %2255 = vmatpush1.bf16.msra.mxu1 %v2051_v46  ;;  %v2075_v40 = vld [vmem:[#allocation2 + $0x770] sm:$0xff]  ;;  %v2078_v46 = vld [vmem:[#allocation2 + $0x788] sm:$0xff] }
 0x3d4   :  { %2143 = vmatprep.subr.bf16.mxu0 %v2054_v45  ;;  %2256 = vmatprep.subr.bf16.mxu1 %v2056_v1  ;;  %v2080_v45 = vld [vmem:[#allocation2 + $0x798] sm:$0xff]  ;;  %v2077_v1 = vld [vmem:[#allocation2 + $0x780] sm:$0xff] }
 0x3d5   :  { %1625 = vmatmul.mubr.bf16.gmra.mrb[60].mxu0 %v8799_v23  ;;  %1851 = vmatmul.mubr.bf16.gmra.mrb[76].mxu1 %v8799_v23  ;;  %v2063_v23 = vld [vmem:[#allocation2 + $0x710] sm:$0xff] }
 0x3d6   :  { %1634 = vmatprep.mubr.bf16.mxu0 %v8841_v50  ;;  %1860 = vmatprep.mubr.bf16.mxu1 %v8841_v50  ;;  %v2068_v50 = vld [vmem:[#allocation2 + $0x738] sm:$0xff] }
 0x3d7   :  { %2144 = vmatpush1.bf16.msra.mxu0 %v2053_v12  ;;  %2257 = vmatpush1.bf16.msra.mxu1 %v2055_v56  ;;  %v2084_v12 = vld [vmem:[#allocation2 + $0x7b8] sm:$0xff]  ;;  %v2081_v56 = vld [vmem:[#allocation2 + $0x7a0] sm:$0xff] }
 0x3d8   :  { %2145 = vmatprep.subr.bf16.mxu0 %v2058_v58  ;;  %2258 = vmatprep.subr.bf16.mxu1 %v2060_v52  ;;  %v2083_v58 = vld [vmem:[#allocation2 + $0x7b0] sm:$0xff]  ;;  %v2086_v52 = vld [vmem:[#allocation2 + $0x7c8] sm:$0xff] }
 0x3db   :  { %2146 = vmatpush1.bf16.msra.mxu0 %v2057_v42  ;;  %2259 = vmatpush1.bf16.msra.mxu1 %v2059_v36  ;;  %v2085_v42 = vld [vmem:[#allocation2 + $0x7c0] sm:$0xff]  ;;  %v2090_v36 = vld [vmem:[#allocation2 + $0x7e8] sm:$0xff] }
 0x3dc   :  { %2147 = vmatprep.subr.bf16.mxu0 %v2062_v60  ;;  %2260 = vmatprep.subr.bf16.mxu1 %v2064_v16  ;;  %v2092_v60 = vld [vmem:[#allocation2 + $0x7f8] sm:$0xff]  ;;  %v2091_v16 = vld [vmem:[#allocation2 + $0x7f0] sm:$0xff] }
 0x3dd   :  { %1635 = vmatmul.mubr.bf16.gmra.mrb[64].mxu0 %v8835_v3  ;;  %1861 = vmatmul.mubr.bf16.gmra.mrb[80].mxu1 %v8835_v3  ;;  %v2071_v3 = vld [vmem:[#allocation2 + $0x750] sm:$0xff] }
 0x3de   :  { %1644 = vmatprep.mubr.bf16.mxu0 %v8877_v62  ;;  %1870 = vmatprep.mubr.bf16.mxu1 %v8877_v62  ;;  %v2076_v62 = vld [vmem:[#allocation2 + $0x778] sm:$0xff] }
 0x3df   :  { %2148 = vmatpush1.bf16.msra.mxu0 %v2061_v22  ;;  %2261 = vmatpush1.bf16.msra.mxu1 %v2063_v23  ;;  %v1395_v22 = vld [vmem:[#allocation9 + $0x7] sm:$0xf] }
 0x3e0   :  { %2149 = vmatprep.subr.bf16.mxu0 %v2066_v37  ;;  %2262 = vmatprep.subr.bf16.mxu1 %v2068_v50  ;;  %v8962_v23 = vrot.slane %v1395_v22, %v12206_v47  ;;  %v8965_v37 = vrot.slane %v1395_v22, %v8633_v25  ;;  %v8968_v50 = vrot.slane %v1395_v22, %v12207_v63 }
 0x3e3   :  { %2150 = vmatpush1.bf16.msra.mxu0 %v2065_v24  ;;  %2263 = vmatpush1.bf16.msra.mxu1 %v2067_v19  ;;  %v8971_v24 = vrot.slane %v1395_v22, %v8637_v35 }
 0x3e4   :  { %2151 = vmatprep.subr.bf16.mxu0 %v2070_v21  ;;  %2264 = vmatprep.subr.bf16.mxu1 %v2072_v30 }
 0x3e5   :  { %1645 = vmatmul.mubr.bf16.gmra.mrb[68].mxu0 %v8871_v17  ;;  %1871 = vmatmul.mubr.bf16.gmra.mrb[84].mxu1 %v8871_v17  ;;  %v2079_v17 = vld [vmem:[#allocation2 + $0x790] sm:$0xff] }
 0x3e6   :  { %1654 = vmatprep.mubr.bf16.mxu0 %v8909_v48  ;;  %1880 = vmatprep.mubr.bf16.mxu1 %v8909_v48  ;;  %v2082_v48 = vld [vmem:[#allocation2 + $0x7a8] sm:$0xff] }
 0x3e7   :  { %2152 = vmatpush1.bf16.msra.mxu0 %v2069_v53  ;;  %2265 = vmatpush1.bf16.msra.mxu1 %v2071_v3 }
 0x3e8   :  { %2153 = vmatprep.subr.bf16.mxu0 %v2074_v38  ;;  %2266 = vmatprep.subr.bf16.mxu1 %v2076_v62 }
 0x3eb   :  { %2154 = vmatpush1.bf16.msra.mxu0 %v2073_v2  ;;  %2267 = vmatpush1.bf16.msra.mxu1 %v2075_v40 }
 0x3ec   :  { %2155 = vmatprep.subr.bf16.mxu0 %v2078_v46  ;;  %2268 = vmatprep.subr.bf16.mxu1 %v2080_v45 }
 0x3ed   :  { %1655 = vmatmul.mubr.bf16.gmra.mrb[72].mxu0 %v8904_v34  ;;  %1881 = vmatmul.mubr.bf16.gmra.mrb[88].mxu1 %v8904_v34  ;;  %v2088_v34 = vld [vmem:[#allocation2 + $0x7d8] sm:$0xff] }
 0x3ee   :  { %1664 = vmatprep.mubr.bf16.mxu0 %v8929_v39  ;;  %1890 = vmatprep.mubr.bf16.mxu1 %v8929_v39  ;;  %v2087_v39 = vld [vmem:[#allocation2 + $0x7d0] sm:$0xff] }
 0x3ef   :  { %2156 = vmatpush1.bf16.msra.mxu0 %v2077_v1  ;;  %2269 = vmatpush1.bf16.msra.mxu1 %v2079_v17 }
 0x3f0   :  { %2157 = vmatprep.subr.bf16.mxu0 %v2082_v48  ;;  %2270 = vmatprep.subr.bf16.mxu1 %v2084_v12 }
 0x3f3   :  { %2158 = vmatpush1.bf16.msra.mxu0 %v2081_v56  ;;  %2271 = vmatpush1.bf16.msra.mxu1 %v2083_v58 }
 0x3f4   :  { %2159 = vmatprep.subr.bf16.mxu0 %v2086_v52  ;;  %2272 = vmatprep.subr.bf16.mxu1 %v2088_v34 }
 0x3f5   :  { %1665 = vmatmul.mubr.bf16.gmra.mrb[76].mxu0 %v8925_v32  ;;  %1891 = vmatmul.mubr.bf16.gmra.mrb[92].mxu1 %v8925_v32  ;;  %v2089_v32 = vld [vmem:[#allocation2 + $0x7e0] sm:$0xff] }
 0x3f7   :  { %2160 = vmatpush1.bf16.msra.mxu0 %v2085_v42  ;;  %2273 = vmatpush1.bf16.msra.mxu1 %v2087_v39 }
 0x3f8   :  { %2161 = vmatprep.subr.bf16.mxu0 %v2090_v36  ;;  %2274 = vmatprep.subr.bf16.mxu1 %v2092_v60 }
 0x3fb   :  { %2162 = vmatpush1.bf16.msra.mxu0 %v2089_v32  ;;  %2275 = vmatpush1.bf16.msra.mxu1 %v2091_v16 }
 0x490   :  { %v1596_v19 = vpop.f32.mrb[48].mxu0  ;;  %v1822_v21 = vpop.f32.mrb[64].mxu1 }
 0x491   :  { %v7243_v30 = vadd.f32 %v1596_v19, %v8962_v23  ;;  %v8975_v53 = vadd.f32 %v1822_v21, %v8965_v37  ;;  %v1598_v3 = vpop.f32.mrb[49].mxu0  ;;  %v1824_v38 = vpop.f32.mrb[65].mxu1 }
 0x492   :  { %v7244_v62 = vadd.f32 %v1598_v3, %v8968_v50  ;;  %v8979_v2 = vadd.f32 %v1824_v38, %v8971_v24  ;;  %v1600_v40 = vpop.f32.mrb[50].mxu0  ;;  %v1826_v46 = vpop.f32.mrb[66].mxu1 }
 0x493   :  { %12275 = vst [vmem:[#allocation169_spill] sm:$0xff] %v8975_v53  ;;  %v1901_v45 = vmul.f32 0.01, %v7243_v30  ;;  %v8982_v1 = vmul.f32 0.01, %v8975_v53  ;;  %v7245_v17 = vadd.f32 %v1600_v40, %v8962_v23  ;;  %v8986_v48 = vadd.f32 %v1826_v46, %v8965_v37  ;;  %v1602_v12 = vpop.f32.mrb[51].mxu0 }
 0x494   :  { %12276 = vst [vmem:[#allocation170_spill] sm:$0xff] %v8979_v2  ;;  %v1828_v56 = vpop.f32.mrb[67].mxu1  ;;  %v1902_v58 = vmul.f32 0.01, %v7244_v62  ;;  %v8989_v52 = vmul.f32 0.01, %v8979_v2  ;;  %v7246_v34 = vadd.f32 %v1602_v12, %v8968_v50 }
 0x495   :  { %12277 = vst [vmem:[#allocation171_spill] sm:$0xff] %v8982_v1  ;;  %12278 = vst [vmem:[#allocation172_spill] sm:$0xff] %v8986_v48  ;;  %v8993_v42 = vadd.f32 %v1828_v56, %v8971_v24  ;;  %v1905_v36 = vmul.f32 0.01, %v7245_v17  ;;  %v8998_v60 = vmul.f32 0.01, %v8986_v48  ;;  %v1965_v19 = vmax.f32 %v7243_v30, %v1901_v45 }
 0x496   :  { %12279 = vst [vmem:[#allocation173_spill] sm:$0xff] %v8989_v52  ;;  %v1906_v16 = vmul.f32 0.01, %v7246_v34  ;;  %v1966_v38 = vmax.f32 %v7244_v62, %v1902_v58 }
 0x497   :  { %12280 = vst [vmem:[#allocation174_spill] sm:$0xff] %v8993_v42  ;;  %12281 = vst [vmem:[#allocation175_spill] sm:$0xff] %v8998_v60  ;;  %v9003_v22 = vmul.f32 0.01, %v8993_v42  ;;  %v1969_v21 = vmax.f32 %v7245_v17, %v1905_v36 }
 0x498   :  { %v1970_v40 = vmax.f32 %v7246_v34, %v1906_v16  ;;  %v1606_v12 = vpop.f32.mrb[52].mxu0  ;;  %v1832_v56 = vpop.f32.mrb[68].mxu1 }
 0x499   :  { %12282 = vst [vmem:[#allocation176_spill] sm:$0xff] %v9003_v22  ;;  %v2094_v39 = vpack.c.bf16 %v1969_v21, %v1965_v19  ;;  %v7247_v54 = vadd.f32 %v1606_v12, %v8962_v23  ;;  %v9011_v32 = vadd.f32 %v1832_v56, %v8965_v37  ;;  %v1608_v28 = vpop.f32.mrb[53].mxu0  ;;  %v1834_v4 = vpop.f32.mrb[69].mxu1 }
 0x49a   :  { %v7248_v30 = vadd.f32 %v1608_v28, %v8968_v50  ;;  %v9015_v45 = vadd.f32 %v1834_v4, %v8971_v24  ;;  %v1610_v62 = vpop.f32.mrb[54].mxu0  ;;  %v1836_v17 = vpop.f32.mrb[70].mxu1  ;;  %v2095_v58 = vpack.c.bf16 %v1970_v40, %v1966_v38 }
 0x49b   :  { %12283 = vst [vmem:[#allocation177_spill] sm:$0xff] %v9011_v32  ;;  %v1909_v34 = vmul.f32 0.01, %v7247_v54  ;;  %v9018_v36 = vmul.f32 0.01, %v9011_v32  ;;  %v7249_v16 = vadd.f32 %v1610_v62, %v8962_v23  ;;  %v9022_v19 = vadd.f32 %v1836_v17, %v8965_v37  ;;  %v1612_v21 = vpop.f32.mrb[55].mxu0 }
 0x49c   :  { %12284 = vst [vmem:[#allocation178_spill] sm:$0xff] %v9015_v45  ;;  %v1838_v12 = vpop.f32.mrb[71].mxu1  ;;  %v1910_v56 = vmul.f32 0.01, %v7248_v30  ;;  %v9025_v28 = vmul.f32 0.01, %v9015_v45  ;;  %v7250_v4 = vadd.f32 %v1612_v21, %v8968_v50  ;;  %2163 = vmatprep.mubr.bf16.mxu0 %v2095_v58  ;;  %2276 = vmatprep.mubr.bf16.mxu1 %v2095_v58 }
 0x49d   :  { %12285 = vst [vmem:[#allocation179_spill] sm:$0xff] %v9018_v36  ;;  %12286 = vst [vmem:[#allocation180_spill] sm:$0xff] %v9022_v19  ;;  %v9029_v3 = vadd.f32 %v1838_v12, %v8971_v24  ;;  %v1913_v40 = vmul.f32 0.01, %v7249_v16  ;;  %v9034_v62 = vmul.f32 0.01, %v9022_v19  ;;  %2164 = vmatmul.mubr.bf16.vlgmr.msra.gmra.mrb[80].mxu0 %v2094_v39  ;;  %2277 = vmatmul.mubr.bf16.vlgmr.msra.gmra.mrb[96].mxu1 %v2094_v39 }
 0x49e   :  { %12287 = vst [vmem:[#allocation181_spill] sm:$0xff] %v9025_v28  ;;  %v1914_v46 = vmul.f32 0.01, %v7250_v4  ;;  %v1973_v12 = vmax.f32 %v7247_v54, %v1909_v34  ;;  %v1974_v41 = vmax.f32 %v7248_v30, %v1910_v56 }
 0x49f   :  { %12288 = vst [vmem:[#allocation182_spill] sm:$0xff] %v9029_v3  ;;  %12289 = vst [vmem:[#allocation183_spill] sm:$0xff] %v9034_v62  ;;  %v9039_v21 = vmul.f32 0.01, %v9029_v3  ;;  %v1977_v43 = vmax.f32 %v7249_v16, %v1913_v40 }
 0x4a0   :  { %v1978_v38 = vmax.f32 %v7250_v4, %v1914_v46  ;;  %v1616_v51 = vpop.f32.mrb[56].mxu0  ;;  %v1842_v5 = vpop.f32.mrb[72].mxu1 }
 0x4a1   :  { %12290 = vst [vmem:[#allocation184_spill] sm:$0xff] %v9039_v21  ;;  %v7251_v39 = vadd.f32 %v1616_v51, %v8962_v23  ;;  %v9047_v17 = vadd.f32 %v1842_v5, %v8965_v37  ;;  %v1618_v44 = vpop.f32.mrb[57].mxu0  ;;  %v1844_v0 = vpop.f32.mrb[73].mxu1  ;;  %v2096_v55 = vpack.c.bf16 %v1977_v43, %v1973_v12 }
 0x4a2   :  { %v7252_v54 = vadd.f32 %v1618_v44, %v8968_v50  ;;  %v9051_v34 = vadd.f32 %v1844_v0, %v8971_v24  ;;  %v1620_v30 = vpop.f32.mrb[58].mxu0  ;;  %v1846_v46 = vpop.f32.mrb[74].mxu1  ;;  %v2097_v16 = vpack.c.bf16 %v1978_v38, %v1974_v41 }
 0x4a3   :  { %12291 = vst [vmem:[#allocation185_spill] sm:$0xff] %v9047_v17  ;;  %v1917_v56 = vmul.f32 0.01, %v7251_v39  ;;  %v9054_v4 = vmul.f32 0.01, %v9047_v17  ;;  %v7253_v51 = vadd.f32 %v1620_v30, %v8962_v23  ;;  %v9058_v5 = vadd.f32 %v1846_v46, %v8965_v37  ;;  %v1622_v40 = vpop.f32.mrb[59].mxu0 }
 0x4a4   :  { %12292 = vst [vmem:[#allocation186_spill] sm:$0xff] %v9051_v34  ;;  %v1848_v58 = vpop.f32.mrb[75].mxu1  ;;  %v1918_v43 = vmul.f32 0.01, %v7252_v54  ;;  %v9061_v44 = vmul.f32 0.01, %v9051_v34  ;;  %v7254_v0 = vadd.f32 %v1622_v40, %v8968_v50  ;;  %2173 = vmatprep.mubr.bf16.mxu0 %v2097_v16  ;;  %2286 = vmatprep.mubr.bf16.mxu1 %v2097_v16 }
 0x4a5   :  { %12293 = vst [vmem:[#allocation187_spill] sm:$0xff] %v9054_v4  ;;  %12294 = vst [vmem:[#allocation188_spill] sm:$0xff] %v9058_v5  ;;  %v9065_v12 = vadd.f32 %v1848_v58, %v8971_v24  ;;  %v1921_v38 = vmul.f32 0.01, %v7253_v51  ;;  %v9070_v30 = vmul.f32 0.01, %v9058_v5  ;;  %2174 = vmatmul.mubr.bf16.gmra.mrb[84].mxu0 %v2096_v55  ;;  %2287 = vmatmul.mubr.bf16.gmra.mrb[100].mxu1 %v2096_v55 }
 0x4a6   :  { %12295 = vst [vmem:[#allocation189_spill] sm:$0xff] %v9061_v44  ;;  %v1922_v57 = vmul.f32 0.01, %v7254_v0  ;;  %v1981_v58 = vmax.f32 %v7251_v39, %v1917_v56  ;;  %v1982_v7 = vmax.f32 %v7252_v54, %v1918_v43 }
 0x4a7   :  { %12296 = vst [vmem:[#allocation190_spill] sm:$0xff] %v9065_v12  ;;  %12297 = vst [vmem:[#allocation191_spill] sm:$0xff] %v9070_v30  ;;  %v9075_v40 = vmul.f32 0.01, %v9065_v12  ;;  %v1985_v9 = vmax.f32 %v7253_v51, %v1921_v38 }
 0x4a8   :  { %v1986_v41 = vmax.f32 %v7254_v0, %v1922_v57  ;;  %v1626_v10 = vpop.f32.mrb[60].mxu0  ;;  %v1852_v18 = vpop.f32.mrb[76].mxu1 }
 0x4a9   :  { %12298 = vst [vmem:[#allocation192_spill] sm:$0xff] %v9075_v40  ;;  %v7255_v55 = vadd.f32 %v1626_v10, %v8962_v23  ;;  %v9083_v46 = vadd.f32 %v1852_v18, %v8965_v37  ;;  %v1628_v49 = vpop.f32.mrb[61].mxu0  ;;  %v1854_v15 = vpop.f32.mrb[77].mxu1  ;;  %v2098_v6 = vpack.c.bf16 %v1985_v9, %v1981_v58 }
 0x4aa   :  { %v7256_v39 = vadd.f32 %v1628_v49, %v8968_v50  ;;  %v9087_v56 = vadd.f32 %v1854_v15, %v8971_v24  ;;  %v1630_v54 = vpop.f32.mrb[62].mxu0  ;;  %v1856_v57 = vpop.f32.mrb[78].mxu1  ;;  %v2099_v51 = vpack.c.bf16 %v1986_v41, %v1982_v7 }
 0x4ab   :  { %12299 = vst [vmem:[#allocation193_spill] sm:$0xff] %v9083_v46  ;;  %v1925_v43 = vmul.f32 0.01, %v7255_v55  ;;  %v9090_v0 = vmul.f32 0.01, %v9083_v46  ;;  %v7257_v10 = vadd.f32 %v1630_v54, %v8962_v23  ;;  %v9094_v18 = vadd.f32 %v1856_v57, %v8965_v37  ;;  %v1632_v38 = vpop.f32.mrb[63].mxu0 }
 0x4ac   :  { %12300 = vst [vmem:[#allocation194_spill] sm:$0xff] %v9087_v56  ;;  %v1858_v16 = vpop.f32.mrb[79].mxu1  ;;  %v1926_v9 = vmul.f32 0.01, %v7256_v39  ;;  %v9097_v49 = vmul.f32 0.01, %v9087_v56  ;;  %v7258_v15 = vadd.f32 %v1632_v38, %v8968_v50  ;;  %2183 = vmatprep.mubr.bf16.mxu0 %v2099_v51  ;;  %2296 = vmatprep.mubr.bf16.mxu1 %v2099_v51 }
 0x4ad   :  { %12301 = vst [vmem:[#allocation195_spill] sm:$0xff] %v9090_v0  ;;  %12302 = vst [vmem:[#allocation196_spill] sm:$0xff] %v9094_v18  ;;  %v9101_v58 = vadd.f32 %v1858_v16, %v8971_v24  ;;  %v1929_v41 = vmul.f32 0.01, %v7257_v10  ;;  %v9106_v54 = vmul.f32 0.01, %v9094_v18  ;;  %2184 = vmatmul.mubr.bf16.gmra.mrb[88].mxu0 %v2098_v6  ;;  %2297 = vmatmul.mubr.bf16.gmra.mrb[104].mxu1 %v2098_v6 }
 0x4ae   :  { %12303 = vst [vmem:[#allocation197_spill] sm:$0xff] %v9097_v49  ;;  %v1930_v31 = vmul.f32 0.01, %v7258_v15  ;;  %v1989_v16 = vmax.f32 %v7255_v55, %v1925_v43  ;;  %v1990_v29 = vmax.f32 %v7256_v39, %v1926_v9 }
 0x4af   :  { %12304 = vst [vmem:[#allocation198_spill] sm:$0xff] %v9101_v58  ;;  %12305 = vst [vmem:[#allocation199_spill] sm:$0xff] %v9106_v54  ;;  %v9111_v38 = vmul.f32 0.01, %v9101_v58  ;;  %v1993_v8 = vmax.f32 %v7257_v10, %v1929_v41 }
 0x4b0   :  { %v1994_v7 = vmax.f32 %v7258_v15, %v1930_v31  ;;  %v1636_v13 = vpop.f32.mrb[64].mxu0  ;;  %v1862_v20 = vpop.f32.mrb[80].mxu1 }
 0x4b1   :  { %12306 = vst [vmem:[#allocation200_spill] sm:$0xff] %v9111_v38  ;;  %v7259_v6 = vadd.f32 %v1636_v13, %v8962_v23  ;;  %v9119_v57 = vadd.f32 %v1862_v20, %v8965_v37  ;;  %v1638_v26 = vpop.f32.mrb[65].mxu0  ;;  %v1864_v33 = vpop.f32.mrb[81].mxu1  ;;  %v2100_v59 = vpack.c.bf16 %v1993_v8, %v1989_v16 }
 0x4b2   :  { %v7260_v55 = vadd.f32 %v1638_v26, %v8968_v50  ;;  %v9123_v43 = vadd.f32 %v1864_v33, %v8971_v24  ;;  %v1640_v39 = vpop.f32.mrb[66].mxu0  ;;  %v1866_v31 = vpop.f32.mrb[82].mxu1  ;;  %v2101_v10 = vpack.c.bf16 %v1994_v7, %v1990_v29 }
 0x4b3   :  { %12307 = vst [vmem:[#allocation201_spill] sm:$0xff] %v9119_v57  ;;  %v1933_v9 = vmul.f32 0.01, %v7259_v6  ;;  %v9126_v15 = vmul.f32 0.01, %v9119_v57  ;;  %v7261_v13 = vadd.f32 %v1640_v39, %v8962_v23  ;;  %v9130_v20 = vadd.f32 %v1866_v31, %v8965_v37  ;;  %v1642_v41 = vpop.f32.mrb[67].mxu0 }
 0x4b4   :  { %12308 = vst [vmem:[#allocation202_spill] sm:$0xff] %v9123_v43  ;;  %v1868_v51 = vpop.f32.mrb[83].mxu1  ;;  %v1934_v8 = vmul.f32 0.01, %v7260_v55  ;;  %v9133_v26 = vmul.f32 0.01, %v9123_v43  ;;  %v7262_v33 = vadd.f32 %v1642_v41, %v8968_v50  ;;  %2193 = vmatprep.mubr.bf16.mxu0 %v2101_v10  ;;  %2306 = vmatprep.mubr.bf16.mxu1 %v2101_v10 }
 0x4b5   :  { %12309 = vst [vmem:[#allocation203_spill] sm:$0xff] %v9126_v15  ;;  %12310 = vst [vmem:[#allocation204_spill] sm:$0xff] %v9130_v20  ;;  %v9137_v16 = vadd.f32 %v1868_v51, %v8971_v24  ;;  %v1937_v7 = vmul.f32 0.01, %v7261_v13  ;;  %v9142_v39 = vmul.f32 0.01, %v9130_v20  ;;  %2194 = vmatmul.mubr.bf16.gmra.mrb[92].mxu0 %v2100_v59  ;;  %2307 = vmatmul.mubr.bf16.gmra.mrb[108].mxu1 %v2100_v59 }
 0x4b6   :  { %12311 = vst [vmem:[#allocation205_spill] sm:$0xff] %v9133_v26  ;;  %v1938_v61 = vmul.f32 0.01, %v7262_v33  ;;  %v1997_v51 = vmax.f32 %v7259_v6, %v1933_v9  ;;  %v1998_v14 = vmax.f32 %v7260_v55, %v1934_v8 }
 0x4b7   :  { %12312 = vst [vmem:[#allocation206_spill] sm:$0xff] %v9137_v16  ;;  %12313 = vst [vmem:[#allocation207_spill] sm:$0xff] %v9142_v39  ;;  %v9147_v41 = vmul.f32 0.01, %v9137_v16  ;;  %v2001_v27 = vmax.f32 %v7261_v13, %v1937_v7 }
 0x4b8   :  { %v2002_v29 = vmax.f32 %v7262_v33, %v1938_v61  ;;  %v1646_v15 = vpop.f32.mrb[68].mxu0  ;;  %v1872_v57 = vpop.f32.mrb[84].mxu1 }
 0x4b9   :  { %12314 = vst [vmem:[#allocation208_spill] sm:$0xff] %v9147_v41  ;;  %v7263_v59 = vadd.f32 %v1646_v15, %v8962_v23  ;;  %v9155_v31 = vadd.f32 %v1872_v57, %v8965_v37  ;;  %v1648_v26 = vpop.f32.mrb[69].mxu0  ;;  %v1874_v43 = vpop.f32.mrb[85].mxu1  ;;  %v2102_v54 = vpack.c.bf16 %v2001_v27, %v1997_v51 }
 0x4ba   :  { %v7264_v6 = vadd.f32 %v1648_v26, %v8968_v50  ;;  %v9159_v9 = vadd.f32 %v1874_v43, %v8971_v24  ;;  %v1650_v55 = vpop.f32.mrb[70].mxu0  ;;  %v1876_v61 = vpop.f32.mrb[86].mxu1  ;;  %v2103_v13 = vpack.c.bf16 %v2002_v29, %v1998_v14 }
 0x4bb   :  { %12315 = vst [vmem:[#allocation209_spill] sm:$0xff] %v9155_v31  ;;  %v1941_v8 = vmul.f32 0.01, %v7263_v59  ;;  %v9162_v33 = vmul.f32 0.01, %v9155_v31  ;;  %v7265_v15 = vadd.f32 %v1650_v55, %v8962_v23  ;;  %v9166_v57 = vadd.f32 %v1876_v61, %v8965_v37  ;;  %v1652_v7 = vpop.f32.mrb[71].mxu0 }
 0x4bc   :  { %12316 = vst [vmem:[#allocation210_spill] sm:$0xff] %v9159_v9  ;;  %v1878_v10 = vpop.f32.mrb[87].mxu1  ;;  %v1942_v27 = vmul.f32 0.01, %v7264_v6  ;;  %v9169_v26 = vmul.f32 0.01, %v9159_v9  ;;  %v7266_v43 = vadd.f32 %v1652_v7, %v8968_v50  ;;  %2203 = vmatprep.mubr.bf16.mxu0 %v2103_v13  ;;  %2316 = vmatprep.mubr.bf16.mxu1 %v2103_v13 }
 0x4bd   :  { %12317 = vst [vmem:[#allocation211_spill] sm:$0xff] %v9162_v33  ;;  %12318 = vst [vmem:[#allocation212_spill] sm:$0xff] %v9166_v57  ;;  %v9173_v51 = vadd.f32 %v1878_v10, %v8971_v24  ;;  %v1945_v29 = vmul.f32 0.01, %v7265_v15  ;;  %v9178_v55 = vmul.f32 0.01, %v9166_v57  ;;  %2204 = vmatmul.mubr.bf16.gmra.mrb[96].mxu0 %v2102_v54  ;;  %2317 = vmatmul.mubr.bf16.gmra.mrb[112].mxu1 %v2102_v54 }
 0x4be   :  { %12319 = vst [vmem:[#allocation213_spill] sm:$0xff] %v9169_v26  ;;  %v1946_v11 = vmul.f32 0.01, %v7266_v43  ;;  %v2005_v10 = vmax.f32 %v7263_v59, %v1941_v8  ;;  %v2006_v20 = vmax.f32 %v7264_v6, %v1942_v27 }
 0x4bf   :  { %12320 = vst [vmem:[#allocation214_spill] sm:$0xff] %v9173_v51  ;;  %12321 = vst [vmem:[#allocation215_spill] sm:$0xff] %v9178_v55  ;;  %v9183_v7 = vmul.f32 0.01, %v9173_v51  ;;  %v2009_v39 = vmax.f32 %v7265_v15, %v1945_v29 }
 0x4c0   :  { %v2010_v14 = vmax.f32 %v7266_v43, %v1946_v11  ;;  %v1656_v31 = vpop.f32.mrb[72].mxu0  ;;  %v1882_v41 = vpop.f32.mrb[88].mxu1 }
 0x4c1   :  { %12322 = vst [vmem:[#allocation216_spill] sm:$0xff] %v9183_v7  ;;  %v7267_v54 = vadd.f32 %v1656_v31, %v8962_v23  ;;  %v9191_v61 = vadd.f32 %v1882_v41, %v8965_v37  ;;  %v1658_v26 = vpop.f32.mrb[73].mxu0  ;;  %v1884_v9 = vpop.f32.mrb[89].mxu1  ;;  %v2104_v16 = vpack.c.bf16 %v2009_v39, %v2005_v10 }
 0x4c2   :  { %v7268_v59 = vadd.f32 %v1658_v26, %v8968_v50  ;;  %v9195_v8 = vadd.f32 %v1884_v9, %v8971_v24  ;;  %v1660_v6 = vpop.f32.mrb[74].mxu0  ;;  %v1886_v11 = vpop.f32.mrb[90].mxu1  ;;  %v2105_v15 = vpack.c.bf16 %v2010_v14, %v2006_v20 }
 0x4c3   :  { %12323 = vst [vmem:[#allocation217_spill] sm:$0xff] %v9191_v61  ;;  %v1949_v27 = vmul.f32 0.01, %v7267_v54  ;;  %v9198_v43 = vmul.f32 0.01, %v9191_v61  ;;  %v7269_v31 = vadd.f32 %v1660_v6, %v8962_v23  ;;  %v9202_v41 = vadd.f32 %v1886_v11, %v8965_v37  ;;  %v1662_v29 = vpop.f32.mrb[75].mxu0 }
 0x4c4   :  { %12324 = vst [vmem:[#allocation218_spill] sm:$0xff] %v9195_v8  ;;  %v1888_v13 = vpop.f32.mrb[91].mxu1  ;;  %v1950_v39 = vmul.f32 0.01, %v7268_v59  ;;  %v9205_v26 = vmul.f32 0.01, %v9195_v8  ;;  %v7270_v9 = vadd.f32 %v1662_v29, %v8968_v50  ;;  %2213 = vmatprep.mubr.bf16.mxu0 %v2105_v15  ;;  %2326 = vmatprep.mubr.bf16.mxu1 %v2105_v15 }
 0x4c5   :  { %12325 = vst [vmem:[#allocation219_spill] sm:$0xff] %v9198_v43  ;;  %12326 = vst [vmem:[#allocation220_spill] sm:$0xff] %v9202_v41  ;;  %v9209_v10 = vadd.f32 %v1888_v13, %v8971_v24  ;;  %v1953_v14 = vmul.f32 0.01, %v7269_v31  ;;  %v9214_v6 = vmul.f32 0.01, %v9202_v41  ;;  %2214 = vmatmul.mubr.bf16.gmra.mrb[100].mxu0 %v2104_v16  ;;  %2327 = vmatmul.mubr.bf16.gmra.mrb[116].mxu1 %v2104_v16 }
 0x4c6   :  { %12327 = vst [vmem:[#allocation221_spill] sm:$0xff] %v9205_v26  ;;  %v1954_v33 = vmul.f32 0.01, %v7270_v9  ;;  %v2013_v13 = vmax.f32 %v7267_v54, %v1949_v27  ;;  %v2014_v57 = vmax.f32 %v7268_v59, %v1950_v39 }
 0x4c7   :  { %12328 = vst [vmem:[#allocation222_spill] sm:$0xff] %v9209_v10  ;;  %12329 = vst [vmem:[#allocation223_spill] sm:$0xff] %v9214_v6  ;;  %v9219_v29 = vmul.f32 0.01, %v9209_v10  ;;  %v2017_v55 = vmax.f32 %v7269_v31, %v1953_v14 }
 0x4c8   :  { %v2018_v20 = vmax.f32 %v7270_v9, %v1954_v33  ;;  %v1666_v61 = vpop.f32.mrb[76].mxu0  ;;  %v1892_v7 = vpop.f32.mrb[92].mxu1 }
 0x4c9   :  { %12330 = vst [vmem:[#allocation224_spill] sm:$0xff] %v9219_v29  ;;  %v7271_v16 = vadd.f32 %v1666_v61, %v8962_v23  ;;  %v9227_v11 = vadd.f32 %v1892_v7, %v8965_v37  ;;  %v1668_v26 = vpop.f32.mrb[77].mxu0  ;;  %v1894_v8 = vpop.f32.mrb[93].mxu1  ;;  %v2106_v51 = vpack.c.bf16 %v2017_v55, %v2013_v13 }
 0x4ca   :  { %v7272_v54 = vadd.f32 %v1668_v26, %v8968_v50  ;;  %v9231_v27 = vadd.f32 %v1894_v8, %v8971_v24  ;;  %v1670_v59 = vpop.f32.mrb[78].mxu0  ;;  %v1896_v33 = vpop.f32.mrb[94].mxu1  ;;  %v2107_v31 = vpack.c.bf16 %v2018_v20, %v2014_v57 }
 0x4cb   :  { %12331 = vst [vmem:[#allocation225_spill] sm:$0xff] %v9227_v11  ;;  %v1957_v39 = vmul.f32 0.01, %v7271_v16  ;;  %v9234_v9 = vmul.f32 0.01, %v9227_v11  ;;  %v7273_v61 = vadd.f32 %v1670_v59, %v8962_v23  ;;  %v9238_v7 = vadd.f32 %v1896_v33, %v8965_v37  ;;  %v1672_v14 = vpop.f32.mrb[79].mxu0 }
 0x4cc   :  { %12332 = vst [vmem:[#allocation226_spill] sm:$0xff] %v9231_v27  ;;  %v1898_v15 = vpop.f32.mrb[95].mxu1  ;;  %v1958_v55 = vmul.f32 0.01, %v7272_v54  ;;  %v9241_v26 = vmul.f32 0.01, %v9231_v27  ;;  %v7274_v8 = vadd.f32 %v1672_v14, %v8968_v50  ;;  %2223 = vmatprep.mubr.bf16.mxu0 %v2107_v31  ;;  %2336 = vmatprep.mubr.bf16.mxu1 %v2107_v31 }
 0x4cd   :  { %12333 = vst [vmem:[#allocation227_spill] sm:$0xff] %v9234_v9  ;;  %12334 = vst [vmem:[#allocation228_spill] sm:$0xff] %v9238_v7  ;;  %v9245_v13 = vadd.f32 %v1898_v15, %v8971_v24  ;;  %v1961_v23 = vmul.f32 0.01, %v7273_v61  ;;  %v9250_v37 = vmul.f32 0.01, %v9238_v7  ;;  %2224 = vmatmul.mubr.bf16.gmra.mrb[104].mxu0 %v2106_v51  ;;  %2337 = vmatmul.mubr.bf16.gmra.mrb[120].mxu1 %v2106_v51 }
 0x4ce   :  { %12335 = vst [vmem:[#allocation229_spill] sm:$0xff] %v9241_v26  ;;  %v1962_v59 = vmul.f32 0.01, %v7274_v8  ;;  %v2021_v24 = vmax.f32 %v7271_v16, %v1957_v39  ;;  %v2022_v31 = vmax.f32 %v7272_v54, %v1958_v55  ;;  %v2093_v51 = vld [vmem:[#allocation9 + $0xb] sm:$0xf] }
 0x4cf   :  { %12336 = vst [vmem:[#allocation230_spill] sm:$0xff] %v9245_v13  ;;  %12337 = vst [vmem:[#allocation231_spill] sm:$0xff] %v9250_v37  ;;  %v9255_v50 = vmul.f32 0.01, %v9245_v13  ;;  %v2025_v15 = vmax.f32 %v7273_v61, %v1961_v23  ;;  %v9262_v20 = vrot.slane %v2093_v51, %v12206_v47  ;;  %v9265_v16 = vrot.slane %v2093_v51, %v8633_v25 }
 0x4d0   :  { %v2026_v14 = vmax.f32 %v7274_v8, %v1962_v59  ;;  %v9268_v39 = vrot.slane %v2093_v51, %v12207_v63  ;;  %v9271_v54 = vrot.slane %v2093_v51, %v8637_v35 }
 0x4d1   :  { %12338 = vst [vmem:[#allocation232_spill] sm:$0xff] %v9255_v50  ;;  %v2108_v43 = vpack.c.bf16 %v2025_v15, %v2021_v24 }
 0x4d2   :  { %v2109_v9 = vpack.c.bf16 %v2026_v14, %v2022_v31 }
 0x4d4   :  { %2233 = vmatprep.mubr.bf16.mxu0 %v2109_v9  ;;  %2346 = vmatprep.mubr.bf16.mxu1 %v2109_v9 }
 0x4d5   :  { %2234 = vmatmul.mubr.bf16.gmra.mrb[108].mxu0 %v2108_v43  ;;  %2347 = vmatmul.mubr.bf16.gmra.mrb[124].mxu1 %v2108_v43 }
 0x570   :  { %v2165_v61 = vpop.f32.mrb[80].mxu0  ;;  %v2278_v55 = vpop.f32.mrb[96].mxu1 }
 0x571   :  { %v9274_v8 = vadd.f32 %v2165_v61, %v9262_v20  ;;  %v9277_v43 = vadd.f32 %v2278_v55, %v9265_v16  ;;  %v2167_v9 = vpop.f32.mrb[81].mxu0  ;;  %v2280_v23 = vpop.f32.mrb[97].mxu1 }
 0x572   :  { %v9280_v59 = vadd.f32 %v2167_v9, %v9268_v39  ;;  %v9283_v24 = vadd.f32 %v2280_v23, %v9271_v54  ;;  %v2169_v15 = vpop.f32.mrb[82].mxu0  ;;  %v2282_v31 = vpop.f32.mrb[98].mxu1 }
 0x573   :  { %v9286_v14 = vmul.f32 0.01, %v9274_v8  ;;  %v9289_v51 = vmul.f32 0.01, %v9277_v43  ;;  %v9292_v61 = vadd.f32 %v2169_v15, %v9262_v20  ;;  %v9295_v55 = vadd.f32 %v2282_v31, %v9265_v16  ;;  %v2171_v33 = vpop.f32.mrb[83].mxu0  ;;  %v2284_v9 = vpop.f32.mrb[99].mxu1 }
 0x574   :  { %v9298_v57 = vmul.f32 0.01, %v9280_v59  ;;  %v9301_v23 = vmul.f32 0.01, %v9283_v24  ;;  %v9304_v35 = vadd.f32 %v2171_v33, %v9268_v39  ;;  %v9307_v25 = vadd.f32 %v2284_v9, %v9271_v54 }
 0x575   :  { %v9314_v63 = vmul.f32 0.01, %v9292_v61  ;;  %v9317_v47 = vmul.f32 0.01, %v9295_v55 }
 0x576   :  { %v9324_v9 = vmul.f32 0.01, %v9304_v35  ;;  %v9327_v15 = vmul.f32 0.01, %v9307_v25 }
 0x578   :  { %v2175_v50 = vpop.f32.mrb[84].mxu0  ;;  %v2288_v33 = vpop.f32.mrb[100].mxu1 }
 0x579   :  { %v9338_v13 = vadd.f32 %v2175_v50, %v9262_v20  ;;  %v9341_v26 = vadd.f32 %v2288_v33, %v9265_v16  ;;  %v2177_v27 = vpop.f32.mrb[85].mxu0  ;;  %v2290_v6 = vpop.f32.mrb[101].mxu1 }
 0x57a   :  { %v9344_v31 = vadd.f32 %v2177_v27, %v9268_v39  ;;  %v9347_v7 = vadd.f32 %v2290_v6, %v9271_v54  ;;  %v2179_v11 = vpop.f32.mrb[86].mxu0  ;;  %v2292_v41 = vpop.f32.mrb[102].mxu1 }
 0x57b   :  { %v9350_v37 = vmul.f32 0.01, %v9338_v13  ;;  %v9353_v29 = vmul.f32 0.01, %v9341_v26  ;;  %v9356_v50 = vadd.f32 %v2179_v11, %v9262_v20  ;;  %v9359_v33 = vadd.f32 %v2292_v41, %v9265_v16  ;;  %v2181_v10 = vpop.f32.mrb[87].mxu0  ;;  %v2294_v27 = vpop.f32.mrb[103].mxu1 }
 0x57c   :  { %v9362_v18 = vmul.f32 0.01, %v9344_v31  ;;  %v9365_v6 = vmul.f32 0.01, %v9347_v7  ;;  %v9368_v0 = vadd.f32 %v2181_v10, %v9268_v39  ;;  %v9371_v46 = vadd.f32 %v2294_v27, %v9271_v54 }
 0x57d   :  { %v9378_v38 = vmul.f32 0.01, %v9356_v50  ;;  %v9381_v58 = vmul.f32 0.01, %v9359_v33 }
 0x57e   :  { %v9388_v27 = vmul.f32 0.01, %v9368_v0  ;;  %v9391_v11 = vmul.f32 0.01, %v9371_v46 }
 0x580   :  { %v2185_v5 = vpop.f32.mrb[88].mxu0  ;;  %v2298_v10 = vpop.f32.mrb[104].mxu1 }
 0x581   :  { %v9402_v4 = vadd.f32 %v2185_v5, %v9262_v20  ;;  %v9405_v17 = vadd.f32 %v2298_v10, %v9265_v16  ;;  %v2187_v40 = vpop.f32.mrb[89].mxu0  ;;  %v2300_v12 = vpop.f32.mrb[105].mxu1 }
 0x582   :  { %v9408_v41 = vadd.f32 %v2187_v40, %v9268_v39  ;;  %v9411_v56 = vadd.f32 %v2300_v12, %v9271_v54  ;;  %v2189_v30 = vpop.f32.mrb[90].mxu0  ;;  %v2302_v44 = vpop.f32.mrb[106].mxu1 }
 0x583   :  { %12339 = vst [vmem:[#allocation233_spill] sm:$0xff] %v9405_v17  ;;  %v9414_v49 = vmul.f32 0.01, %v9402_v4  ;;  %v9417_v34 = vmul.f32 0.01, %v9405_v17  ;;  %v9420_v5 = vadd.f32 %v2189_v30, %v9262_v20  ;;  %v9423_v10 = vadd.f32 %v2302_v44, %v9265_v16  ;;  %v2191_v62 = vpop.f32.mrb[91].mxu0 }
 0x584   :  { %v2304_v40 = vpop.f32.mrb[107].mxu1  ;;  %v9426_v19 = vmul.f32 0.01, %v9408_v41  ;;  %v9429_v12 = vmul.f32 0.01, %v9411_v56  ;;  %v9432_v36 = vadd.f32 %v2191_v62, %v9268_v39 }
 0x585   :  { %12340 = vst [vmem:[#allocation234_spill] sm:$0xff] %v9414_v49  ;;  %12341 = vst [vmem:[#allocation235_spill] sm:$0xff] %v9417_v34  ;;  %v9435_v32 = vadd.f32 %v2304_v40, %v9271_v54  ;;  %v9442_v21 = vmul.f32 0.01, %v9420_v5  ;;  %v9445_v3 = vmul.f32 0.01, %v9423_v10 }
 0x586   :  { %12342 = vst [vmem:[#allocation236_spill] sm:$0xff] %v9420_v5  ;;  %12343 = vst [vmem:[#allocation237_spill] sm:$0xff] %v9423_v10  ;;  %v9452_v40 = vmul.f32 0.01, %v9432_v36 }
 0x587   :  { %12344 = vst [vmem:[#allocation238_spill] sm:$0xff] %v9442_v21  ;;  %12345 = vst [vmem:[#allocation239_spill] sm:$0xff] %v9445_v3  ;;  %v9455_v30 = vmul.f32 0.01, %v9435_v32 }
 0x588   :  { %v2195_v48 = vpop.f32.mrb[92].mxu0  ;;  %v2308_v62 = vpop.f32.mrb[108].mxu1 }
 0x589   :  { %v9466_v1 = vadd.f32 %v2195_v48, %v9262_v20  ;;  %v9469_v53 = vadd.f32 %v2308_v62, %v9265_v16  ;;  %v2197_v22 = vpop.f32.mrb[93].mxu0  ;;  %v2310_v42 = vpop.f32.mrb[109].mxu1 }
 0x58a   :  { %v9472_v44 = vadd.f32 %v2197_v22, %v9268_v39  ;;  %v9475_v45 = vadd.f32 %v2310_v42, %v9271_v54  ;;  %v2199_v60 = vpop.f32.mrb[94].mxu0  ;;  %v2312_v52 = vpop.f32.mrb[110].mxu1 }
 0x58b   :  { %12346 = vst [vmem:[#allocation240_spill] sm:$0xff] %v9466_v1  ;;  %12347 = vst [vmem:[#allocation241_spill] sm:$0xff] %v9469_v53  ;;  %v9478_v28 = vmul.f32 0.01, %v9466_v1  ;;  %v9481_v2 = vmul.f32 0.01, %v9469_v53  ;;  %v9484_v48 = vadd.f32 %v2199_v60, %v9262_v20  ;;  %v9487_v62 = vadd.f32 %v2312_v52, %v9265_v16 }
 0x58c   :  { %12348 = vst [vmem:[#allocation242_spill] sm:$0xff] %v9472_v44  ;;  %12349 = vst [vmem:[#allocation243_spill] sm:$0xff] %v9475_v45  ;;  %v2201_v3 = vpop.f32.mrb[95].mxu0  ;;  %v2314_v22 = vpop.f32.mrb[111].mxu1  ;;  %v9490_v10 = vmul.f32 0.01, %v9472_v44 }
 0x58d   :  { %12350 = vst [vmem:[#allocation244_spill] sm:$0xff] %v9478_v28  ;;  %12351 = vst [vmem:[#allocation245_spill] sm:$0xff] %v9481_v2  ;;  %v9493_v42 = vmul.f32 0.01, %v9475_v45  ;;  %v9496_v34 = vadd.f32 %v2201_v3, %v9268_v39  ;;  %v9499_v17 = vadd.f32 %v2314_v22, %v9271_v54  ;;  %v9506_v21 = vmul.f32 0.01, %v9484_v48 }
 0x58e   :  { %12352 = vst [vmem:[#allocation246_spill] sm:$0xff] %v9484_v48  ;;  %12353 = vst [vmem:[#allocation247_spill] sm:$0xff] %v9487_v62  ;;  %v9509_v5 = vmul.f32 0.01, %v9487_v62 }
 0x58f   :  { %12354 = vst [vmem:[#allocation248_spill] sm:$0xff] %v9490_v10  ;;  %12355 = vst [vmem:[#allocation249_spill] sm:$0xff] %v9493_v42  ;;  %v9516_v22 = vmul.f32 0.01, %v9496_v34  ;;  %v9519_v60 = vmul.f32 0.01, %v9499_v17 }
 0x590   :  { %12356 = vst [vmem:[#allocation250_spill] sm:$0xff] %v9496_v34  ;;  %12357 = vst [vmem:[#allocation251_spill] sm:$0xff] %v9499_v17  ;;  %v2205_v28 = vpop.f32.mrb[96].mxu0  ;;  %v2318_v3 = vpop.f32.mrb[112].mxu1 }
 0x591   :  { %12358 = vst [vmem:[#allocation252_spill] sm:$0xff] %v9506_v21  ;;  %12359 = vst [vmem:[#allocation253_spill] sm:$0xff] %v9509_v5  ;;  %v9530_v1 = vadd.f32 %v2205_v28, %v9262_v20  ;;  %v9533_v42 = vadd.f32 %v2318_v3, %v9265_v16  ;;  %v2207_v45 = vpop.f32.mrb[97].mxu0  ;;  %v2320_v10 = vpop.f32.mrb[113].mxu1 }
 0x592   :  { %12360 = vst [vmem:[#allocation254_spill] sm:$0xff] %v9516_v22  ;;  %12361 = vst [vmem:[#allocation255_spill] sm:$0xff] %v9519_v60  ;;  %v9536_v52 = vadd.f32 %v2207_v45, %v9268_v39  ;;  %v9539_v2 = vadd.f32 %v2320_v10, %v9271_v54  ;;  %v2209_v53 = vpop.f32.mrb[98].mxu0  ;;  %v2322_v5 = vpop.f32.mrb[114].mxu1 }
 0x593   :  { %12362 = vst [vmem:[#allocation256_spill] sm:$0xff] %v9530_v1  ;;  %12363 = vst [vmem:[#allocation257_spill] sm:$0xff] %v9533_v42  ;;  %v9542_v49 = vmul.f32 0.01, %v9530_v1  ;;  %v9545_v62 = vmul.f32 0.01, %v9533_v42  ;;  %v9548_v28 = vadd.f32 %v2209_v53, %v9262_v20  ;;  %v9551_v3 = vadd.f32 %v2322_v5, %v9265_v16 }
 0x594   :  { %12364 = vst [vmem:[#allocation258_spill] sm:$0xff] %v9536_v52  ;;  %12365 = vst [vmem:[#allocation259_spill] sm:$0xff] %v9539_v2  ;;  %v2211_v21 = vpop.f32.mrb[99].mxu0  ;;  %v2324_v45 = vpop.f32.mrb[115].mxu1  ;;  %v9554_v48 = vmul.f32 0.01, %v9536_v52 }
 0x595   :  { %12366 = vst [vmem:[#allocation260_spill] sm:$0xff] %v9542_v49  ;;  %12367 = vst [vmem:[#allocation261_spill] sm:$0xff] %v9545_v62  ;;  %v9557_v10 = vmul.f32 0.01, %v9539_v2  ;;  %v9560_v60 = vadd.f32 %v2211_v21, %v9268_v39  ;;  %v9563_v17 = vadd.f32 %v2324_v45, %v9271_v54  ;;  %v9570_v22 = vmul.f32 0.01, %v9548_v28 }
 0x596   :  { %12368 = vst [vmem:[#allocation262_spill] sm:$0xff] %v9548_v28  ;;  %12369 = vst [vmem:[#allocation263_spill] sm:$0xff] %v9551_v3  ;;  %v9573_v34 = vmul.f32 0.01, %v9551_v3 }
 0x597   :  { %12370 = vst [vmem:[#allocation264_spill] sm:$0xff] %v9554_v48  ;;  %12371 = vst [vmem:[#allocation265_spill] sm:$0xff] %v9557_v10  ;;  %v9580_v45 = vmul.f32 0.01, %v9560_v60  ;;  %v9583_v53 = vmul.f32 0.01, %v9563_v17 }
 0x598   :  { %12372 = vst [vmem:[#allocation266_spill] sm:$0xff] %v9560_v60  ;;  %12373 = vst [vmem:[#allocation267_spill] sm:$0xff] %v9563_v17  ;;  %v2215_v49 = vpop.f32.mrb[100].mxu0  ;;  %v2328_v21 = vpop.f32.mrb[116].mxu1 }
 0x599   :  { %12374 = vst [vmem:[#allocation268_spill] sm:$0xff] %v9570_v22  ;;  %12375 = vst [vmem:[#allocation269_spill] sm:$0xff] %v9573_v34  ;;  %v9594_v1 = vadd.f32 %v2215_v49, %v9262_v20  ;;  %v9597_v10 = vadd.f32 %v2328_v21, %v9265_v16  ;;  %v2217_v2 = vpop.f32.mrb[101].mxu0  ;;  %v2330_v48 = vpop.f32.mrb[117].mxu1 }
 0x59a   :  { %12376 = vst [vmem:[#allocation270_spill] sm:$0xff] %v9580_v45  ;;  %12377 = vst [vmem:[#allocation271_spill] sm:$0xff] %v9583_v53  ;;  %v9600_v5 = vadd.f32 %v2217_v2, %v9268_v39  ;;  %v9603_v62 = vadd.f32 %v2330_v48, %v9271_v54  ;;  %v2219_v42 = vpop.f32.mrb[102].mxu0  ;;  %v2332_v34 = vpop.f32.mrb[118].mxu1 }
 0x59b   :  { %12378 = vst [vmem:[#allocation272_spill] sm:$0xff] %v9594_v1  ;;  %12379 = vst [vmem:[#allocation273_spill] sm:$0xff] %v9597_v10  ;;  %v9606_v44 = vmul.f32 0.01, %v9594_v1  ;;  %v9609_v3 = vmul.f32 0.01, %v9597_v10  ;;  %v9612_v49 = vadd.f32 %v2219_v42, %v9262_v20  ;;  %v9615_v21 = vadd.f32 %v2332_v34, %v9265_v16 }
 0x59c   :  { %12380 = vst [vmem:[#allocation274_spill] sm:$0xff] %v9600_v5  ;;  %12381 = vst [vmem:[#allocation275_spill] sm:$0xff] %v9603_v62  ;;  %v2221_v22 = vpop.f32.mrb[103].mxu0  ;;  %v2334_v2 = vpop.f32.mrb[119].mxu1  ;;  %v9618_v28 = vmul.f32 0.01, %v9600_v5 }
 0x59d   :  { %12382 = vst [vmem:[#allocation276_spill] sm:$0xff] %v9606_v44  ;;  %12383 = vst [vmem:[#allocation277_spill] sm:$0xff] %v9609_v3  ;;  %v9621_v48 = vmul.f32 0.01, %v9603_v62  ;;  %v9624_v53 = vadd.f32 %v2221_v22, %v9268_v39  ;;  %v9627_v17 = vadd.f32 %v2334_v2, %v9271_v54  ;;  %v9634_v45 = vmul.f32 0.01, %v9612_v49 }
 0x59e   :  { %12384 = vst [vmem:[#allocation278_spill] sm:$0xff] %v9612_v49  ;;  %12385 = vst [vmem:[#allocation279_spill] sm:$0xff] %v9615_v21  ;;  %v9637_v60 = vmul.f32 0.01, %v9615_v21 }
 0x59f   :  { %12386 = vst [vmem:[#allocation280_spill] sm:$0xff] %v9618_v28  ;;  %12387 = vst [vmem:[#allocation281_spill] sm:$0xff] %v9621_v48  ;;  %v9644_v2 = vmul.f32 0.01, %v9624_v53  ;;  %v9647_v42 = vmul.f32 0.01, %v9627_v17 }
 0x5a0   :  { %12388 = vst [vmem:[#allocation282_spill] sm:$0xff] %v9624_v53  ;;  %12389 = vst [vmem:[#allocation283_spill] sm:$0xff] %v9627_v17  ;;  %v2225_v44 = vpop.f32.mrb[104].mxu0  ;;  %v2338_v22 = vpop.f32.mrb[120].mxu1 }
 0x5a1   :  { %12390 = vst [vmem:[#allocation284_spill] sm:$0xff] %v9634_v45  ;;  %12391 = vst [vmem:[#allocation285_spill] sm:$0xff] %v9637_v60  ;;  %v9658_v1 = vadd.f32 %v2225_v44, %v9262_v20  ;;  %v9661_v48 = vadd.f32 %v2338_v22, %v9265_v16  ;;  %v2227_v62 = vpop.f32.mrb[105].mxu0  ;;  %v2340_v28 = vpop.f32.mrb[121].mxu1 }
 0x5a2   :  { %12392 = vst [vmem:[#allocation286_spill] sm:$0xff] %v9644_v2  ;;  %12393 = vst [vmem:[#allocation287_spill] sm:$0xff] %v9647_v42  ;;  %v9664_v34 = vadd.f32 %v2227_v62, %v9268_v39  ;;  %v9667_v3 = vadd.f32 %v2340_v28, %v9271_v54  ;;  %v2229_v10 = vpop.f32.mrb[106].mxu0  ;;  %v2342_v60 = vpop.f32.mrb[122].mxu1 }
 0x5a3   :  { %12394 = vst [vmem:[#allocation288_spill] sm:$0xff] %v9658_v1  ;;  %12395 = vst [vmem:[#allocation289_spill] sm:$0xff] %v9661_v48  ;;  %v9670_v52 = vmul.f32 0.01, %v9658_v1  ;;  %v9673_v21 = vmul.f32 0.01, %v9661_v48  ;;  %v9676_v44 = vadd.f32 %v2229_v10, %v9262_v20  ;;  %v9679_v22 = vadd.f32 %v2342_v60, %v9265_v16 }
 0x5a4   :  { %12396 = vst [vmem:[#allocation290_spill] sm:$0xff] %v9667_v3  ;;  %v2231_v45 = vpop.f32.mrb[107].mxu0  ;;  %v2344_v62 = vpop.f32.mrb[123].mxu1  ;;  %v9682_v49 = vmul.f32 0.01, %v9664_v34 }
 0x5a5   :  { %12397 = vst [vmem:[#allocation291_spill] sm:$0xff] %v9670_v52  ;;  %12398 = vst [vmem:[#allocation292_spill] sm:$0xff] %v9673_v21  ;;  %v9685_v28 = vmul.f32 0.01, %v9667_v3  ;;  %v9688_v42 = vadd.f32 %v2231_v45, %v9268_v39  ;;  %v9691_v17 = vadd.f32 %v2344_v62, %v9271_v54  ;;  %v9698_v2 = vmul.f32 0.01, %v9676_v44 }
 0x5a6   :  { %12399 = vst [vmem:[#allocation293_spill] sm:$0xff] %v9676_v44  ;;  %12400 = vst [vmem:[#allocation294_spill] sm:$0xff] %v9679_v22  ;;  %v9701_v53 = vmul.f32 0.01, %v9679_v22 }
 0x5a7   :  { %12401 = vst [vmem:[#allocation295_spill] sm:$0xff] %v9682_v49  ;;  %12402 = vst [vmem:[#allocation296_spill] sm:$0xff] %v9685_v28  ;;  %v9708_v62 = vmul.f32 0.01, %v9688_v42  ;;  %v9711_v10 = vmul.f32 0.01, %v9691_v17 }
 0x5a8   :  { %12403 = vst [vmem:[#allocation297_spill] sm:$0xff] %v9691_v17  ;;  %12404 = vst [vmem:[#allocation298_spill] sm:$0xff] %v9698_v2  ;;  %v2235_v52 = vpop.f32.mrb[108].mxu0  ;;  %v2348_v45 = vpop.f32.mrb[124].mxu1 }
 0x5a9   :  { %12405 = vst [vmem:[#allocation299_spill] sm:$0xff] %v9701_v53  ;;  %12406 = vst [vmem:[#allocation300_spill] sm:$0xff] %v9708_v62  ;;  %v9722_v1 = vadd.f32 %v2235_v52, %v9262_v20  ;;  %v9725_v28 = vadd.f32 %v2348_v45, %v9265_v16  ;;  %v2237_v3 = vpop.f32.mrb[109].mxu0  ;;  %v2350_v49 = vpop.f32.mrb[125].mxu1 }
 0x5aa   :  { %12407 = vst [vmem:[#allocation301_spill] sm:$0xff] %v9711_v10  ;;  %v9728_v60 = vadd.f32 %v2237_v3, %v9268_v39  ;;  %v9731_v21 = vadd.f32 %v2350_v49, %v9271_v54  ;;  %v2239_v48 = vpop.f32.mrb[110].mxu0  ;;  %v2352_v53 = vpop.f32.mrb[126].mxu1 }
 0x5ab   :  { %12408 = vst [vmem:[#allocation302_spill] sm:$0xff] %v9725_v28  ;;  %v9734_v5 = vmul.f32 0.01, %v9722_v1  ;;  %v9737_v22 = vmul.f32 0.01, %v9725_v28  ;;  %v9740_v52 = vadd.f32 %v2239_v48, %v9262_v20  ;;  %v9743_v45 = vadd.f32 %v2352_v53, %v9265_v16  ;;  %v2241_v2 = vpop.f32.mrb[111].mxu0 }
 0x5ac   :  { %v2354_v3 = vpop.f32.mrb[127].mxu1  ;;  %v9746_v44 = vmul.f32 0.01, %v9728_v60  ;;  %v9749_v49 = vmul.f32 0.01, %v9731_v21  ;;  %v9752_v10 = vadd.f32 %v2241_v2, %v9268_v39  ;;  %v12414_v39 = vld [vmem:[#allocation45_spill] sm:$0xff] }
 0x5ad   :  { %12409 = vst [vmem:[#allocation303_spill] sm:$0xff] %v9737_v22  ;;  %12410 = vst [vmem:[#allocation304_spill] sm:$0xff] %v9743_v45  ;;  %v9755_v17 = vadd.f32 %v2354_v3, %v9271_v54  ;;  %v9762_v53 = vmul.f32 0.01, %v9740_v52  ;;  %v9765_v48 = vmul.f32 0.01, %v9743_v45  ;;  %6995 = vmatprep.subr.bf16.mxu1 %v12414_v39 }
 0x5ae   :  { %v9772_v54 = vmul.f32 0.01, %v9752_v10  ;;  %v12413_v22 = vld [vmem:[#allocation29_spill] sm:$0xff] }
 0x5af   :  { %12411 = vst [vmem:[#allocation305_spill] sm:$0xff] %v9762_v53  ;;  %12412 = vst [vmem:[#allocation306_spill] sm:$0xff] %v9765_v48  ;;  %v9775_v2 = vmul.f32 0.01, %v9755_v17  ;;  %6931 = vmatprep.subr.bf16.mxu0 %v12413_v22 }
 0x5b0   :  { %7658 = dma.done.wait [#allocation6 + $0x1], 10240 }
 0x5b1   :  { %7659 = vsyncadd [#allocation6 + $0x1], 4294957056  ;;  %v12415_v28 = vmax.f32 %v9280_v59, %v9298_v57  ;;  %v12416_v3 = vmax.f32 %v9304_v35, %v9324_v9  ;;  %v12417_v16 = vmax.f32 %v9283_v24, %v9301_v23  ;;  %v12418_v20 = vmax.f32 %v9307_v25, %v9327_v15  ;;  %v12419_v48 = vld [vmem:[#allocation21_spill] sm:$0xff]  ;;  %v12421_v39 = vld [vmem:[#allocation30_spill] sm:$0xff] }
 0x5b2   :  { %6932 = vmatpush3.bf16.msra.mxu0 %v12419_v48  ;;  %v12420_v22 = vld [vmem:[#allocation37_spill] sm:$0xff]  ;;  %v12422_v45 = vld [vmem:[#allocation46_spill] sm:$0xff]  ;;  %v12423_v57 = vmov 0   ;;  %v12426_v24 = vld [vmem:[#allocation31_spill] sm:$0xff]  ;;  %vm3539_vm1 = vcmask 523264   ;;  %vm3874_vm2 = vcmask 7168  }
 0x5b3   :  { %v2523_v53 = vpack.c.bf16 %v12416_v3, %v12415_v28  ;;  %v2525_v62 = vpack.c.bf16 %v12418_v20, %v12417_v16  ;;  %6996 = vmatpush3.bf16.msra.mxu1 %v12420_v22  ;;  %6933 = vmatprep.subr.bf16.mxu0 %v12421_v39  ;;  %v12424_v35 = vld [vmem:[#allocation22_spill] sm:$0xff]  ;;  %v12427_v25 = vld [vmem:[#allocation47_spill] sm:$0xff]  ;;  %v12430_v9 = vld [vmem:[#allocation32_spill] sm:$0xff] }
 0x5b4   :  { %6997 = vmatprep.subr.bf16.mxu1 %v12422_v45  ;;  %7555 = vset.pattern.permute.xlu1 %v12423_v57  ;;  %v12425_v59 = vld [vmem:[#allocation38_spill] sm:$0xff]  ;;  %v12428_v23 = vld [vmem:[#allocation23_spill] sm:$0xff]  ;;  %v12431_v28 = vld [vmem:[#allocation48_spill] sm:$0xff] }
 0x5b5   :  { %2592 = vmatprep.mubr.bf16.mxu0 %v2523_v53  ;;  %2689 = vmatprep.mubr.bf16.mxu1 %v2525_v62  ;;  %v12429_v15 = vld [vmem:[#allocation39_spill] sm:$0xff]  ;;  %v12432_v62 = vld [vmem:[#allocation24_spill] sm:$0xff]  ;;  %v12434_v20 = vld [vmem:[#allocation33_spill] sm:$0xff] }
 0x5b6   :  { %6934 = vmatpush3.bf16.msra.mxu0 %v12424_v35  ;;  %7554 = vset.pattern.permute.xlu0 %v12423_v57  ;;  %v12433_v45 = vld [vmem:[#allocation40_spill] sm:$0xff]  ;;  %v12435_v16 = vld [vmem:[#allocation49_spill] sm:$0xff]  ;;  %v12438_v3 = vld [vmem:[#allocation34_spill] sm:$0xff] }
 0x5b7   :  { %6998 = vmatpush3.bf16.msra.mxu1 %v12425_v59  ;;  %6935 = vmatprep.subr.bf16.mxu0 %v12426_v24  ;;  %v12436_v53 = vld [vmem:[#allocation25_spill] sm:$0xff]  ;;  %v12439_v22 = vld [vmem:[#allocation50_spill] sm:$0xff]  ;;  %v12442_v59 = vld [vmem:[#allocation35_spill] sm:$0xff] }
 0x5b8   :  { %6999 = vmatprep.subr.bf16.mxu1 %v12427_v25  ;;  %v12437_v48 = vld [vmem:[#allocation41_spill] sm:$0xff]  ;;  %v12440_v39 = vld [vmem:[#allocation26_spill] sm:$0xff]  ;;  %v12443_v24 = vld [vmem:[#allocation51_spill] sm:$0xff] }
 0x5b9   :  { %v12441_v35 = vld [vmem:[#allocation42_spill] sm:$0xff]  ;;  %v12444_v25 = vld [vmem:[#allocation27_spill] sm:$0xff] }
 0x5ba   :  { %6936 = vmatpush3.bf16.msra.mxu0 %v12428_v23  ;;  %v12445_v23 = vld [vmem:[#allocation43_spill] sm:$0xff] }
 0x5bb   :  { %7000 = vmatpush3.bf16.msra.mxu1 %v12429_v15  ;;  %6937 = vmatprep.subr.bf16.mxu0 %v12430_v9  ;;  %v12446_v15 = vld [vmem:[#allocation36_spill] sm:$0xff] }
 0x5bc   :  { %7001 = vmatprep.subr.bf16.mxu1 %v12431_v28  ;;  %v12447_v9 = vld [vmem:[#allocation52_spill] sm:$0xff] }
 0x5bd   :  { %v2787_v28 = vld [vmem:[#allocation2 + $0x808] sm:$0xff] }
 0x5be   :  { %6938 = vmatpush3.bf16.msra.mxu0 %v12432_v62  ;;  %v2789_v62 = vld [vmem:[#allocation2 + $0x818] sm:$0xff] }
 0x5bf   :  { %7002 = vmatpush3.bf16.msra.mxu1 %v12433_v45  ;;  %6939 = vmatprep.subr.bf16.mxu0 %v12434_v20  ;;  %v12448_v45 = vmax.f32 %v9274_v8, %v9286_v14  ;;  %v12449_v20 = vmax.f32 %v9292_v61, %v9314_v63  ;;  %v12455_v8 = vmax.f32 %v9368_v0, %v9388_v27  ;;  %v2786_v63 = vld [vmem:[#allocation2 + $0x800] sm:$0xff]  ;;  %v2791_v61 = vld [vmem:[#allocation2 + $0x828] sm:$0xff] }
 0x5c0   :  { %7003 = vmatprep.subr.bf16.mxu1 %v12435_v16  ;;  %v2790_v0 = vld [vmem:[#allocation2 + $0x820] sm:$0xff]  ;;  %v12461_v27 = vmax.f32 %v9359_v33, %v9381_v58  ;;  %v2797_v33 = vld [vmem:[#allocation2 + $0x858] sm:$0xff] }
 0x5c1   :  { %v2522_v16 = vpack.c.bf16 %v12449_v20, %v12448_v45  ;;  %v12474_v45 = vld [vmem:[#allocation237_spill] sm:$0xff]  ;;  %v12475_v20 = vld [vmem:[#allocation239_spill] sm:$0xff] }
 0x5c2   :  { %6940 = vmatpush3.bf16.msra.mxu0 %v12436_v53  ;;  %v12450_v53 = vmax.f32 %v9277_v43, %v9289_v51  ;;  %v12456_v43 = vmax.f32 %v9347_v7, %v9365_v6  ;;  %v12458_v7 = vmax.f32 %v9338_v13, %v9350_v37  ;;  %v12463_v13 = vmax.f32 %v9432_v36, %v9452_v40  ;;  %v2798_v36 = vld [vmem:[#allocation2 + $0x860] sm:$0xff]  ;;  %v2803_v40 = vld [vmem:[#allocation2 + $0x888] sm:$0xff] }
 0x5c3   :  { %7004 = vmatpush3.bf16.msra.mxu1 %v12437_v48  ;;  %6941 = vmatprep.subr.bf16.mxu0 %v12438_v3  ;;  %v12451_v48 = vmax.f32 %v9295_v55, %v9317_v47  ;;  %v12457_v47 = vmax.f32 %v9371_v46, %v9391_v11  ;;  %v2788_v55 = vld [vmem:[#allocation2 + $0x810] sm:$0xff]  ;;  %v12459_v46 = vmax.f32 %v9356_v50, %v9378_v38  ;;  %v2794_v38 = vld [vmem:[#allocation2 + $0x840] sm:$0xff] }
 0x5c4   :  { %7005 = vmatprep.subr.bf16.mxu1 %v12439_v22  ;;  %v12452_v22 = vld [vmem:[#allocation28_spill] sm:$0xff]  ;;  %v12460_v11 = vmax.f32 %v9341_v26, %v9353_v29  ;;  %v12464_v50 = vmax.f32 %v9411_v56, %v9429_v12  ;;  %v12465_v29 = vmax.f32 %v9435_v32, %v9455_v30  ;;  %v12466_v56 = vld [vmem:[#allocation234_spill] sm:$0xff] }
 0x5c5   :  { %v2524_v3 = vpack.c.bf16 %v12451_v48, %v12450_v53  ;;  %v2529_v51 = vpack.c.bf16 %v12457_v47, %v12456_v43  ;;  %v2526_v6 = vpack.c.bf16 %v12459_v46, %v12458_v7  ;;  %v2799_v26 = vld [vmem:[#allocation2 + $0x868] sm:$0xff]  ;;  %v12467_v12 = vmax.f32 %v9402_v4, %v12466_v56  ;;  %v12469_v32 = vld [vmem:[#allocation238_spill] sm:$0xff]  ;;  %v2806_v46 = vld [vmem:[#allocation2 + $0x8a0] sm:$0xff] }
 0x5c6   :  { %6942 = vmatpush3.bf16.msra.mxu0 %v12440_v39  ;;  %v12453_v39 = vld [vmem:[#allocation44_spill] sm:$0xff]  ;;  %v2533_v58 = vpack.c.bf16 %v12465_v29, %v12464_v50  ;;  %v12477_v48 = vld [vmem:[#allocation242_spill] sm:$0xff]  ;;  %v12484_v43 = vld [vmem:[#allocation249_spill] sm:$0xff] }
 0x5c7   :  { %7006 = vmatpush3.bf16.msra.mxu1 %v12441_v35  ;;  %6943 = vmatprep.subr.bf16.mxu0 %v12442_v59  ;;  %v12454_v35 = vmax.f32 %v9344_v31, %v9362_v18  ;;  %v2793_v18 = vld [vmem:[#allocation2 + $0x838] sm:$0xff]  ;;  %v2795_v31 = vld [vmem:[#allocation2 + $0x848] sm:$0xff]  ;;  %v2528_v59 = vpack.c.bf16 %v12461_v27, %v12460_v11 }
 0x5c8   :  { %7007 = vmatprep.subr.bf16.mxu1 %v12443_v24  ;;  %v2792_v24 = vld [vmem:[#allocation2 + $0x830] sm:$0xff]  ;;  %v2805_v7 = vld [vmem:[#allocation2 + $0x898] sm:$0xff]  ;;  %v12489_v11 = vld [vmem:[#allocation240_spill] sm:$0xff] }
 0x5c9   :  { %v2527_v14 = vpack.c.bf16 %v12455_v8, %v12454_v35  ;;  %v12481_v35 = vld [vmem:[#allocation254_spill] sm:$0xff]  ;;  %v12490_v27 = vld [vmem:[#allocation244_spill] sm:$0xff]  ;;  %v12496_v50 = vld [vmem:[#allocation245_spill] sm:$0xff] }
 0x5ca   :  { %6944 = vmatpush3.bf16.msra.mxu0 %v12444_v25  ;;  %v12462_v25 = vmax.f32 %v9408_v41, %v9426_v19  ;;  %v2796_v19 = vld [vmem:[#allocation2 + $0x850] sm:$0xff]  ;;  %v2801_v41 = vld [vmem:[#allocation2 + $0x878] sm:$0xff] }
 0x5cb   :  { %7008 = vmatpush3.bf16.msra.mxu1 %v12445_v23  ;;  %6945 = vmatprep.subr.bf16.mxu0 %v12446_v15  ;;  %v12468_v23 = vld [vmem:[#allocation236_spill] sm:$0xff] }
 0x5cc   :  { %7009 = vmatprep.subr.bf16.mxu1 %v12447_v9  ;;  %v2531_v37 = vpack.c.bf16 %v12463_v13, %v12462_v25  ;;  %v12470_v30 = vmax.f32 %v12468_v23, %v12469_v32  ;;  %v12471_v9 = vld [vmem:[#allocation233_spill] sm:$0xff]  ;;  %v12493_v25 = vld [vmem:[#allocation252_spill] sm:$0xff]  ;;  %v12505_v23 = vld [vmem:[#allocation270_spill] sm:$0xff] }
 0x5ce   :  { %6946 = vmatpush3.bf16.msra.mxu0 %v12452_v22  ;;  %v2530_v15 = vpack.c.bf16 %v12470_v30, %v12467_v12  ;;  %v12504_v12 = vld [vmem:[#allocation266_spill] sm:$0xff] }
 0x5cf   :  { %7010 = vmatpush3.bf16.msra.mxu1 %v12453_v39  ;;  %2888 = vmatprep.subr.bf16.mxu0 %v2787_v28  ;;  %v12472_v28 = vld [vmem:[#allocation235_spill] sm:$0xff]  ;;  %v12480_v39 = vld [vmem:[#allocation250_spill] sm:$0xff]  ;;  %v12506_v32 = vmax.f32 %v12504_v12, %v12505_v23  ;;  %v2827_v23 = vld [vmem:[#allocation2 + $0x948] sm:$0xff] }
 0x5d0   :  { %3001 = vmatprep.subr.bf16.mxu1 %v2789_v62  ;;  %v12473_v62 = vmax.f32 %v12471_v9, %v12472_v28  ;;  %v12482_v8 = vmax.f32 %v12480_v39, %v12481_v35  ;;  %v12507_v9 = vld [vmem:[#allocation259_spill] sm:$0xff]  ;;  %v12508_v28 = vld [vmem:[#allocation265_spill] sm:$0xff] }
 0x5d1   :  { %2593 = vmatmul.mubr.bf16.vlgmr.msra.gmra.mrb[112].mxu0 %v2522_v16  ;;  %v12476_v16 = vmax.f32 %v12474_v45, %v12475_v20  ;;  %v12510_v45 = vld [vmem:[#allocation267_spill] sm:$0xff] }
 0x5d2   :  { %2690 = vmatmul.mubr.bf16.vlgmr.msra.gmra.mrb[128].mxu1 %v2524_v3  ;;  %2889 = vmatpush1.bf16.msra.mxu0 %v2786_v63  ;;  %v12478_v3 = vld [vmem:[#allocation248_spill] sm:$0xff]  ;;  %v12483_v63 = vld [vmem:[#allocation243_spill] sm:$0xff] }
 0x5d3   :  { %2600 = vmatprep.mubr.bf16.mxu0 %v2527_v14  ;;  %2890 = vmatprep.subr.bf16.mxu0 %v2791_v61  ;;  %v2532_v53 = vpack.c.bf16 %v12476_v16, %v12473_v62  ;;  %v12479_v22 = vmax.f32 %v12477_v48, %v12478_v3  ;;  %v2802_v14 = vld [vmem:[#allocation2 + $0x880] sm:$0xff]  ;;  %v12485_v47 = vmax.f32 %v12483_v63, %v12484_v43  ;;  %v2815_v48 = vld [vmem:[#allocation2 + $0x8e8] sm:$0xff]  ;;  %v2809_v3 = vld [vmem:[#allocation2 + $0x8b8] sm:$0xff] }
 0x5d4   :  { %2697 = vmatprep.mubr.bf16.mxu1 %v2529_v51  ;;  %3002 = vmatpush1.bf16.msra.mxu1 %v2788_v55  ;;  %v12486_v51 = vld [vmem:[#allocation251_spill] sm:$0xff]  ;;  %v12509_v62 = vmax.f32 %v12507_v9, %v12508_v28  ;;  %v12516_v43 = vld [vmem:[#allocation262_spill] sm:$0xff]  ;;  %v12541_v28 = vld [vmem:[#allocation284_spill] sm:$0xff] }
 0x5d5   :  { %3003 = vmatprep.subr.bf16.mxu1 %v2793_v18  ;;  %v2535_v4 = vpack.c.bf16 %v12482_v8, %v12479_v22  ;;  %v12487_v61 = vld [vmem:[#allocation255_spill] sm:$0xff]  ;;  %v2808_v22 = vld [vmem:[#allocation2 + $0x8b0] sm:$0xff]  ;;  %v2819_v8 = vld [vmem:[#allocation2 + $0x908] sm:$0xff] }
 0x5d6   :  { %2891 = vmatpush1.bf16.msra.mxu0 %v2790_v0  ;;  %v12488_v55 = vmax.f32 %v12486_v51, %v12487_v61  ;;  %v2807_v0 = vld [vmem:[#allocation2 + $0x8a8] sm:$0xff]  ;;  %v12511_v20 = vld [vmem:[#allocation271_spill] sm:$0xff]  ;;  %v12540_v9 = vld [vmem:[#allocation278_spill] sm:$0xff] }
 0x5d7   :  { %2892 = vmatprep.subr.bf16.mxu0 %v2795_v31  ;;  %v2800_v31 = vld [vmem:[#allocation2 + $0x870] sm:$0xff]  ;;  %v12512_v16 = vmax.f32 %v12510_v45, %v12511_v20  ;;  %v2814_v39 = vld [vmem:[#allocation2 + $0x8e0] sm:$0xff]  ;;  %v2813_v35 = vld [vmem:[#allocation2 + $0x8d8] sm:$0xff] }
 0x5d8   :  { %3004 = vmatpush1.bf16.msra.mxu1 %v2792_v24  ;;  %v2537_v18 = vpack.c.bf16 %v12488_v55, %v12485_v47  ;;  %v12492_v24 = vld [vmem:[#allocation246_spill] sm:$0xff]  ;;  %v12517_v47 = vld [vmem:[#allocation268_spill] sm:$0xff]  ;;  %v12519_v55 = vld [vmem:[#allocation257_spill] sm:$0xff] }
 0x5d9   :  { %2601 = vmatmul.mubr.bf16.gmra.mrb[116].mxu0 %v2526_v6  ;;  %3005 = vmatprep.subr.bf16.mxu1 %v2797_v33  ;;  %v2811_v6 = vld [vmem:[#allocation2 + $0x8c8] sm:$0xff]  ;;  %v12494_v13 = vmax.f32 %v12492_v24, %v12493_v25  ;;  %v12518_v51 = vmax.f32 %v12516_v43, %v12517_v47  ;;  %v12528_v24 = vld [vmem:[#allocation282_spill] sm:$0xff]  ;;  %v2822_v12 = vld [vmem:[#allocation2 + $0x920] sm:$0xff] }
 0x5da   :  { %2698 = vmatmul.mubr.bf16.gmra.mrb[132].mxu1 %v2528_v59  ;;  %2893 = vmatpush1.bf16.msra.mxu0 %v2794_v38  ;;  %v12491_v59 = vmax.f32 %v12489_v11, %v12490_v27  ;;  %v12495_v38 = vld [vmem:[#allocation241_spill] sm:$0xff]  ;;  %v12525_v11 = vld [vmem:[#allocation274_spill] sm:$0xff]  ;;  %v12526_v27 = vld [vmem:[#allocation280_spill] sm:$0xff] }
 0x5db   :  { %2608 = vmatprep.mubr.bf16.mxu0 %v2531_v37  ;;  %2894 = vmatprep.subr.bf16.mxu0 %v2799_v26  ;;  %v12497_v29 = vmax.f32 %v12495_v38, %v12496_v50  ;;  %v12499_v26 = vld [vmem:[#allocation253_spill] sm:$0xff]  ;;  %v12529_v25 = vld [vmem:[#allocation286_spill] sm:$0xff]  ;;  %v2818_v38 = vld [vmem:[#allocation2 + $0x900] sm:$0xff] }
 0x5dc   :  { %2705 = vmatprep.mubr.bf16.mxu1 %v2533_v58  ;;  %3006 = vmatpush1.bf16.msra.mxu1 %v2796_v19  ;;  %v2534_v37 = vpack.c.bf16 %v12494_v13, %v12491_v59  ;;  %v12498_v58 = vld [vmem:[#allocation247_spill] sm:$0xff]  ;;  %v12527_v59 = vmax.f32 %v12525_v11, %v12526_v27  ;;  %v12530_v13 = vmax.f32 %v12528_v24, %v12529_v25  ;;  %v12543_v20 = vld [vmem:[#allocation273_spill] sm:$0xff] }
 0x5dd   :  { %3007 = vmatprep.subr.bf16.mxu1 %v2801_v41  ;;  %v12500_v33 = vmax.f32 %v12498_v58, %v12499_v26  ;;  %v12501_v41 = vld [vmem:[#allocation258_spill] sm:$0xff]  ;;  %v12531_v50 = vld [vmem:[#allocation275_spill] sm:$0xff]  ;;  %v2835_v27 = vld [vmem:[#allocation2 + $0x988] sm:$0xff] }
 0x5de   :  { %2895 = vmatpush1.bf16.msra.mxu0 %v2798_v36  ;;  %v2804_v36 = vld [vmem:[#allocation2 + $0x890] sm:$0xff]  ;;  %v12534_v26 = vld [vmem:[#allocation283_spill] sm:$0xff] }
 0x5df   :  { %2896 = vmatprep.subr.bf16.mxu0 %v2803_v40  ;;  %v2536_v19 = vpack.c.bf16 %v12500_v33, %v12497_v29  ;;  %v12502_v40 = vld [vmem:[#allocation264_spill] sm:$0xff]  ;;  %v12532_v29 = vld [vmem:[#allocation281_spill] sm:$0xff]  ;;  %v12535_v33 = vld [vmem:[#allocation287_spill] sm:$0xff] }
 0x5e0   :  { %3008 = vmatpush1.bf16.msra.mxu1 %v2800_v31  ;;  %v12503_v56 = vmax.f32 %v12501_v41, %v12502_v40  ;;  %v12522_v31 = vld [vmem:[#allocation263_spill] sm:$0xff]  ;;  %v12533_v58 = vmax.f32 %v12531_v50, %v12532_v29  ;;  %v2823_v41 = vld [vmem:[#allocation2 + $0x928] sm:$0xff]  ;;  %v2812_v40 = vld [vmem:[#allocation2 + $0x8d0] sm:$0xff] }
 0x5e1   :  { %2609 = vmatmul.mubr.bf16.gmra.mrb[120].mxu0 %v2530_v15  ;;  %3009 = vmatprep.subr.bf16.mxu1 %v2805_v7  ;;  %v2810_v15 = vld [vmem:[#allocation2 + $0x8c0] sm:$0xff]  ;;  %v12523_v7 = vld [vmem:[#allocation269_spill] sm:$0xff]  ;;  %v2825_v11 = vld [vmem:[#allocation2 + $0x938] sm:$0xff] }
 0x5e2   :  { %2706 = vmatmul.mubr.bf16.gmra.mrb[136].mxu1 %v2532_v53  ;;  %2897 = vmatpush1.bf16.msra.mxu0 %v2802_v14  ;;  %v2539_v30 = vpack.c.bf16 %v12506_v32, %v12503_v56  ;;  %v2541_v53 = vpack.c.bf16 %v12512_v16, %v12509_v62  ;;  %v12514_v14 = vld [vmem:[#allocation260_spill] sm:$0xff]  ;;  %v2817_v56 = vld [vmem:[#allocation2 + $0x8f8] sm:$0xff]  ;;  %v12542_v62 = vmax.f32 %v12540_v9, %v12541_v28  ;;  %v12544_v16 = vld [vmem:[#allocation277_spill] sm:$0xff] }
 0x5e3   :  { %2616 = vmatprep.mubr.bf16.mxu0 %v2535_v4  ;;  %2898 = vmatprep.subr.bf16.mxu0 %v2807_v0  ;;  %v12513_v4 = vld [vmem:[#allocation256_spill] sm:$0xff]  ;;  %v12560_v24 = vld [vmem:[#allocation291_spill] sm:$0xff]  ;;  %v12565_v29 = vld [vmem:[#allocation289_spill] sm:$0xff] }
 0x5e4   :  { %2713 = vmatprep.mubr.bf16.mxu1 %v2537_v18  ;;  %3010 = vmatpush1.bf16.msra.mxu1 %v2804_v36  ;;  %v12515_v63 = vmax.f32 %v12513_v4, %v12514_v14  ;;  %v12520_v18 = vld [vmem:[#allocation261_spill] sm:$0xff]  ;;  %v12537_v32 = vld [vmem:[#allocation272_spill] sm:$0xff] }
 0x5e5   :  { %3011 = vmatprep.subr.bf16.mxu1 %v2809_v3  ;;  %v12521_v0 = vmax.f32 %v12519_v55, %v12520_v18  ;;  %v12547_v3 = vld [vmem:[#allocation285_spill] sm:$0xff]  ;;  %v12551_v14 = vld [vmem:[#allocation300_spill] sm:$0xff] }
 0x5e6   :  { %2899 = vmatpush1.bf16.msra.mxu0 %v2806_v46  ;;  %v2538_v61 = vpack.c.bf16 %v12518_v51, %v12515_v63  ;;  %v12524_v46 = vmax.f32 %v12522_v31, %v12523_v7  ;;  %v12552_v63 = vmax.f32 %v9688_v42, %v12551_v14  ;;  %v2826_v47 = vld [vmem:[#allocation2 + $0x940] sm:$0xff]  ;;  %v12553_v51 = vld [vmem:[#allocation290_spill] sm:$0xff]  ;;  %v12556_v18 = vld [vmem:[#allocation297_spill] sm:$0xff] }
 0x5e7   :  { %2900 = vmatprep.subr.bf16.mxu0 %v2811_v6  ;;  %v2830_v42 = vld [vmem:[#allocation2 + $0x960] sm:$0xff]  ;;  %v2839_v9 = vld [vmem:[#allocation2 + $0x9a8] sm:$0xff]  ;;  %v2824_v28 = vld [vmem:[#allocation2 + $0x930] sm:$0xff] }
 0x5e8   :  { %v2540_v6 = vpack.c.bf16 %v12524_v46, %v12521_v0  ;;  %3012 = vmatpush1.bf16.msra.mxu1 %v2808_v22  ;;  %v12557_v0 = vld [vmem:[#allocation301_spill] sm:$0xff] }
 0x5e9   :  { %2617 = vmatmul.mubr.bf16.gmra.mrb[124].mxu0 %v2534_v37  ;;  %v2543_v37 = vpack.c.bf16 %v12530_v13, %v12527_v59  ;;  %3013 = vmatprep.subr.bf16.mxu1 %v2813_v35  ;;  %v2816_v35 = vld [vmem:[#allocation2 + $0x8f0] sm:$0xff]  ;;  %v12558_v31 = vmax.f32 %v12556_v18, %v12557_v0  ;;  %v2831_v46 = vld [vmem:[#allocation2 + $0x968] sm:$0xff] }
 0x5ea   :  { %2714 = vmatmul.mubr.bf16.gmra.mrb[140].mxu1 %v2536_v19  ;;  %2901 = vmatpush1.bf16.msra.mxu0 %v2810_v15  ;;  %v12536_v19 = vmax.f32 %v12534_v26, %v12535_v33  ;;  %v12559_v59 = vld [vmem:[#allocation288_spill] sm:$0xff]  ;;  %v12562_v13 = vld [vmem:[#allocation293_spill] sm:$0xff]  ;;  %v12568_v33 = vld [vmem:[#allocation294_spill] sm:$0xff] }
 0x5eb   :  { %2624 = vmatprep.mubr.bf16.mxu0 %v2539_v30  ;;  %2902 = vmatprep.subr.bf16.mxu0 %v2815_v48  ;;  %v12538_v30 = vld [vmem:[#allocation276_spill] sm:$0xff]  ;;  %v12546_v48 = vld [vmem:[#allocation279_spill] sm:$0xff]  ;;  %v12561_v25 = vmax.f32 %v12559_v59, %v12560_v24 }
 0x5ec   :  { %2721 = vmatprep.mubr.bf16.mxu1 %v2541_v53  ;;  %v2545_v36 = vpack.c.bf16 %v12536_v19, %v12533_v58  ;;  %3014 = vmatpush1.bf16.msra.mxu1 %v2812_v40  ;;  %v12539_v15 = vmax.f32 %v12537_v32, %v12538_v30  ;;  %v12545_v53 = vmax.f32 %v12543_v20, %v12544_v16  ;;  %v12566_v58 = vld [vmem:[#allocation292_spill] sm:$0xff]  ;;  %v12569_v19 = vld [vmem:[#allocation299_spill] sm:$0xff]  ;;  %v12582_v16 = vld [vmem:[#allocation306_spill] sm:$0xff] }
 0x5ed   :  { %v12548_v22 = vmax.f32 %v12546_v48, %v12547_v3  ;;  %3015 = vmatprep.subr.bf16.mxu1 %v2817_v56  ;;  %v12567_v26 = vmax.f32 %v12565_v29, %v12566_v58  ;;  %v12571_v40 = vmax.f32 %v9728_v60, %v9746_v44  ;;  %v12572_v56 = vmax.f32 %v9752_v10, %v9772_v54  ;;  %v2829_v44 = vld [vmem:[#allocation2 + $0x958] sm:$0xff]  ;;  %v2838_v10 = vld [vmem:[#allocation2 + $0x9a0] sm:$0xff]  ;;  %v2843_v60 = vld [vmem:[#allocation2 + $0x9c8] sm:$0xff] }
 0x5ee   :  { %2903 = vmatpush1.bf16.msra.mxu0 %v2814_v39  ;;  %v2542_v45 = vpack.c.bf16 %v12542_v62, %v12539_v15  ;;  %v12573_v32 = vmax.f32 %v9731_v21, %v9749_v49  ;;  %v12574_v30 = vmax.f32 %v9755_v17, %v9775_v2  ;;  %v12575_v54 = vmax.f32 %v9722_v1, %v9734_v5  ;;  %v12576_v21 = vld [vmem:[#allocation305_spill] sm:$0xff]  ;;  %v12578_v2 = vld [vmem:[#allocation302_spill] sm:$0xff]  ;;  %v12579_v62 = vld [vmem:[#allocation303_spill] sm:$0xff] }
 0x5ef   :  { %2904 = vmatprep.subr.bf16.mxu0 %v2819_v8  ;;  %v2544_v39 = vpack.c.bf16 %v12548_v22, %v12545_v53  ;;  %v12549_v8 = vld [vmem:[#allocation295_spill] sm:$0xff]  ;;  %v12577_v49 = vmax.f32 %v9740_v52, %v12576_v21  ;;  %v12581_v20 = vld [vmem:[#allocation304_spill] sm:$0xff]  ;;  %v2828_v3 = vld [vmem:[#allocation2 + $0x950] sm:$0xff] }
 0x5f0   :  { %v12550_v4 = vmax.f32 %v9664_v34, %v12549_v8  ;;  %3016 = vmatpush1.bf16.msra.mxu1 %v2816_v35  ;;  %v2820_v34 = vld [vmem:[#allocation2 + $0x910] sm:$0xff]  ;;  %v2553_v15 = vpack.c.bf16 %v12574_v30, %v12573_v32  ;;  %v12583_v53 = vmax.f32 %v12581_v20, %v12582_v16  ;;  %v2842_v52 = vld [vmem:[#allocation2 + $0x9c0] sm:$0xff]  ;;  %v2847_v14 = vld [vmem:[#allocation2 + $0x9e8] sm:$0xff] }
 0x5f1   :  { %2625 = vmatmul.mubr.bf16.gmra.mrb[128].mxu0 %v2538_v61  ;;  %v12554_v61 = vld [vmem:[#allocation296_spill] sm:$0xff]  ;;  %v2550_v17 = vpack.c.bf16 %v12577_v49, %v12575_v54  ;;  %v12584_v22 = vld [vmem:[#allocation170_spill] sm:$0xff]  ;;  %v12603_v29 = vld [vmem:[#allocation53_spill] sm:$0xff] }
 0x5f2   :  { %2722 = vmatmul.mubr.bf16.gmra.mrb[144].mxu1 %v2540_v6  ;;  %2905 = vmatpush1.bf16.msra.mxu0 %v2818_v38  ;;  %v2547_v43 = vpack.c.bf16 %v12552_v63, %v12550_v4  ;;  %v12555_v55 = vmax.f32 %v12553_v51, %v12554_v61  ;;  %v2821_v6 = vld [vmem:[#allocation2 + $0x918] sm:$0xff]  ;;  %v12588_v4 = vld [vmem:[#allocation176_spill] sm:$0xff]  ;;  %v12590_v61 = vld [vmem:[#allocation169_spill] sm:$0xff] }
 0x5f3   :  { %2632 = vmatprep.mubr.bf16.mxu0 %v2543_v37  ;;  %2906 = vmatprep.subr.bf16.mxu0 %v2823_v41  ;;  %v12563_v37 = vld [vmem:[#allocation298_spill] sm:$0xff]  ;;  %v2846_v51 = vld [vmem:[#allocation2 + $0x9e0] sm:$0xff]  ;;  %v12612_v32 = vld [vmem:[#allocation189_spill] sm:$0xff] }
 0x5f4   :  { %2729 = vmatprep.mubr.bf16.mxu1 %v2545_v36  ;;  %v2549_v7 = vpack.c.bf16 %v12558_v31, %v12555_v55  ;;  %3017 = vmatprep.subr.bf16.mxu1 %v2821_v6  ;;  %v12564_v38 = vmax.f32 %v12562_v13, %v12563_v37  ;;  %v12570_v36 = vmax.f32 %v12568_v33, %v12569_v19  ;;  %v12587_v8 = vld [vmem:[#allocation174_spill] sm:$0xff]  ;;  %v12591_v55 = vld [vmem:[#allocation171_spill] sm:$0xff]  ;;  %v12593_v0 = vld [vmem:[#allocation172_spill] sm:$0xff] }
 0x5f5   :  { %3018 = vmatpush1.bf16.msra.mxu1 %v2820_v34  ;;  %v12589_v1 = vmax.f32 %v12587_v8, %v12588_v4  ;;  %v2833_v63 = vld [vmem:[#allocation2 + $0x978] sm:$0xff]  ;;  %v12592_v18 = vmax.f32 %v12590_v61, %v12591_v55  ;;  %v2836_v6 = vld [vmem:[#allocation2 + $0x990] sm:$0xff]  ;;  %v12600_v59 = vld [vmem:[#allocation184_spill] sm:$0xff] }
 0x5f6   :  { %2907 = vmatpush1.bf16.msra.mxu0 %v2822_v12  ;;  %v2546_v50 = vpack.c.bf16 %v12564_v38, %v12561_v25  ;;  %v2548_v41 = vpack.c.bf16 %v12570_v36, %v12567_v26  ;;  %v2551_v12 = vpack.c.bf16 %v12572_v56, %v12571_v40  ;;  %3019 = vmatprep.subr.bf16.mxu1 %v2825_v11  ;;  %v12594_v31 = vld [vmem:[#allocation175_spill] sm:$0xff]  ;;  %v12596_v34 = vld [vmem:[#allocation178_spill] sm:$0xff]  ;;  %v12602_v37 = vld [vmem:[#allocation61_spill] sm:$0xff] }
 0x5f7   :  { %2908 = vmatprep.subr.bf16.mxu0 %v2827_v23  ;;  %v2834_v23 = vld [vmem:[#allocation2 + $0x980] sm:$0xff]  ;;  %v2841_v13 = vld [vmem:[#allocation2 + $0x9b8] sm:$0xff]  ;;  %v2840_v38 = vld [vmem:[#allocation2 + $0x9b0] sm:$0xff] }
 0x5f8   :  { %v12604_v58 = vld [vmem:[#allocation62_spill] sm:$0xff]  ;;  %v12605_v26 = vld [vmem:[#allocation177_spill] sm:$0xff]  ;;  %v12606_v33 = vld [vmem:[#allocation179_spill] sm:$0xff] }
 0x5f9   :  { %2633 = vmatmul.mubr.bf16.gmra.mrb[132].mxu0 %v2542_v45  ;;  %3020 = vmatpush1.bf16.msra.mxu1 %v2824_v28  ;;  %v12580_v45 = vmax.f32 %v12578_v2, %v12579_v62  ;;  %v12607_v19 = vmax.f32 %v12605_v26, %v12606_v33  ;;  %v12608_v36 = vld [vmem:[#allocation180_spill] sm:$0xff]  ;;  %v12618_v54 = vld [vmem:[#allocation63_spill] sm:$0xff]  ;;  %v2848_v21 = vld [vmem:[#allocation2 + $0x9f0] sm:$0xff] }
 0x5fa   :  { %2730 = vmatmul.mubr.bf16.gmra.mrb[148].mxu1 %v2544_v39  ;;  %2909 = vmatpush1.bf16.msra.mxu0 %v2826_v47  ;;  %v12585_v39 = vld [vmem:[#allocation173_spill] sm:$0xff]  ;;  %v2837_v47 = vld [vmem:[#allocation2 + $0x998] sm:$0xff]  ;;  %v12624_v20 = vld [vmem:[#allocation188_spill] sm:$0xff] }
 0x5fb   :  { %2640 = vmatprep.mubr.bf16.mxu0 %v2547_v43  ;;  %2910 = vmatprep.subr.bf16.mxu0 %v2831_v46  ;;  %v2552_v48 = vpack.c.bf16 %v12583_v53, %v12580_v45  ;;  %v12586_v35 = vmax.f32 %v12584_v22, %v12585_v39  ;;  %v2832_v43 = vld [vmem:[#allocation2 + $0x970] sm:$0xff]  ;;  %v12619_v49 = vld [vmem:[#allocation55_spill] sm:$0xff]  ;;  %v12631_v8 = vld [vmem:[#allocation200_spill] sm:$0xff] }
 0x5fc   :  { %2737 = vmatprep.mubr.bf16.mxu1 %v2549_v7  ;;  %3021 = vmatprep.subr.bf16.mxu1 %v2829_v44  ;;  %v12595_v7 = vmax.f32 %v12593_v0, %v12594_v31  ;;  %v12621_v2 = vld [vmem:[#allocation185_spill] sm:$0xff]  ;;  %v12622_v62 = vld [vmem:[#allocation187_spill] sm:$0xff]  ;;  %v12640_v61 = vld [vmem:[#allocation196_spill] sm:$0xff] }
 0x5fd   :  { %v2852_v5 = vpack.c.bf16 %v12589_v1, %v12586_v35  ;;  %3022 = vmatpush1.bf16.msra.mxu1 %v2828_v3  ;;  %v12623_v45 = vmax.f32 %v12621_v2, %v12622_v62  ;;  %v12625_v16 = vld [vmem:[#allocation191_spill] sm:$0xff]  ;;  %v12627_v3 = vld [vmem:[#allocation194_spill] sm:$0xff]  ;;  %v12628_v22 = vld [vmem:[#allocation197_spill] sm:$0xff] }
 0x5fe   :  { %2911 = vmatpush1.bf16.msra.mxu0 %v2830_v42  ;;  %3023 = vmatprep.subr.bf16.mxu1 %v2833_v63  ;;  %v2851_v46 = vpack.c.bf16 %v12595_v7, %v12592_v18  ;;  %v12597_v42 = vld [vmem:[#allocation181_spill] sm:$0xff]  ;;  %v12626_v53 = vmax.f32 %v12624_v20, %v12625_v16  ;;  %v12629_v39 = vmax.f32 %v12627_v3, %v12628_v22  ;;  %v12630_v35 = vld [vmem:[#allocation198_spill] sm:$0xff]  ;;  %v12641_v55 = vld [vmem:[#allocation199_spill] sm:$0xff] }
 0x5ff   :  { %2912 = vmatprep.subr.bf16.mxu0 %v2835_v27  ;;  %v12598_v11 = vmax.f32 %v12596_v34, %v12597_v42  ;;  %v12599_v27 = vld [vmem:[#allocation182_spill] sm:$0xff]  ;;  %v12632_v4 = vmax.f32 %v12630_v35, %v12631_v8  ;;  %v12642_v18 = vmax.f32 %v12640_v61, %v12641_v55  ;;  %v12644_v7 = vld [vmem:[#allocation205_spill] sm:$0xff]  ;;  %v12647_v34 = vld [vmem:[#allocation208_spill] sm:$0xff] }
 0x600   :  { %v12601_v24 = vmax.f32 %v12599_v27, %v12600_v59  ;;  %v12636_v63 = vld [vmem:[#allocation66_spill] sm:$0xff]  ;;  %v12650_v59 = vld [vmem:[#allocation67_spill] sm:$0xff]  ;;  %v12686_v8 = vld [vmem:[#allocation229_spill] sm:$0xff] }
 0x601   :  { %2641 = vmatmul.mubr.bf16.gmra.mrb[136].mxu0 %v2546_v50  ;;  %3024 = vmatpush1.bf16.msra.mxu1 %v2832_v43  ;;  %v2845_v50 = vld [vmem:[#allocation2 + $0x9d8] sm:$0xff]  ;;  %v2858_v1 = vpack.c.bf16 %v12632_v4, %v12629_v39  ;;  %v12637_v43 = vld [vmem:[#allocation193_spill] sm:$0xff] }
 0x602   :  { %2738 = vmatmul.mubr.bf16.gmra.mrb[152].mxu1 %v2548_v41  ;;  %2913 = vmatpush1.bf16.msra.mxu0 %v2834_v23  ;;  %v2854_v25 = vpack.c.bf16 %v12601_v24, %v12598_v11  ;;  %v12609_v41 = vld [vmem:[#allocation183_spill] sm:$0xff]  ;;  %v12611_v23 = vld [vmem:[#allocation186_spill] sm:$0xff]  ;;  %v12684_v39 = vld [vmem:[#allocation77_spill] sm:$0xff] }
 0x603   :  { %2648 = vmatprep.mubr.bf16.mxu0 %v2551_v12  ;;  %2914 = vmatprep.subr.bf16.mxu0 %v2839_v9  ;;  %v12610_v40 = vmax.f32 %v12608_v36, %v12609_v41  ;;  %v2844_v12 = vld [vmem:[#allocation2 + $0x9d0] sm:$0xff]  ;;  %v12613_v30 = vmax.f32 %v12611_v23, %v12612_v32  ;;  %v12615_v9 = vld [vmem:[#allocation192_spill] sm:$0xff]  ;;  %v12651_v24 = vld [vmem:[#allocation59_spill] sm:$0xff] }
 0x604   :  { %2745 = vmatprep.mubr.bf16.mxu1 %v2553_v15  ;;  %3025 = vmatprep.subr.bf16.mxu1 %v2837_v47  ;;  %v12614_v15 = vld [vmem:[#allocation190_spill] sm:$0xff]  ;;  %v12638_v47 = vld [vmem:[#allocation195_spill] sm:$0xff]  ;;  %v12665_v23 = vld [vmem:[#allocation60_spill] sm:$0xff] }
 0x605   :  { %3026 = vmatpush1.bf16.msra.mxu1 %v2836_v6  ;;  %v2853_v56 = vpack.c.bf16 %v12610_v40, %v12607_v19  ;;  %v12616_v28 = vmax.f32 %v12614_v15, %v12615_v9  ;;  %v12643_v31 = vld [vmem:[#allocation202_spill] sm:$0xff]  ;;  %v12660_v19 = vld [vmem:[#allocation213_spill] sm:$0xff]  ;;  %v12663_v40 = vld [vmem:[#allocation216_spill] sm:$0xff] }
 0x606   :  { %2915 = vmatpush1.bf16.msra.mxu0 %v2838_v10  ;;  %3027 = vmatprep.subr.bf16.mxu1 %v2841_v13  ;;  %v2849_v10 = vld [vmem:[#allocation2 + $0x9f8] sm:$0xff]  ;;  %v12653_v13 = vld [vmem:[#allocation201_spill] sm:$0xff]  ;;  %v12669_v9 = vld [vmem:[#allocation212_spill] sm:$0xff] }
 0x607   :  { %2916 = vmatprep.subr.bf16.mxu0 %v2843_v60  ;;  %v2856_v44 = vpack.c.bf16 %v12616_v28, %v12613_v30  ;;  %v12617_v60 = vld [vmem:[#allocation54_spill] sm:$0xff]  ;;  %v12666_v32 = vld [vmem:[#allocation209_spill] sm:$0xff]  ;;  %v12667_v30 = vld [vmem:[#allocation211_spill] sm:$0xff] }
 0x608   :  { %v12646_v6 = vld [vmem:[#allocation206_spill] sm:$0xff]  ;;  %v12668_v15 = vmax.f32 %v12666_v32, %v12667_v30  ;;  %v12670_v28 = vld [vmem:[#allocation215_spill] sm:$0xff] }
 0x609   :  { %2649 = vmatmul.mubr.bf16.gmra.mrb[140].mxu0 %v2550_v17  ;;  %3028 = vmatpush1.bf16.msra.mxu1 %v2840_v38  ;;  %v12620_v17 = vld [vmem:[#allocation64_spill] sm:$0xff]  ;;  %v12648_v42 = vmax.f32 %v12646_v6, %v12647_v34  ;;  %v12649_v27 = vld [vmem:[#allocation58_spill] sm:$0xff]  ;;  %v12679_v20 = vld [vmem:[#allocation219_spill] sm:$0xff] }
 0x60a   :  { %2746 = vmatmul.mubr.bf16.gmra.mrb[156].mxu1 %v2552_v48  ;;  %2917 = vmatpush1.bf16.msra.mxu0 %v2842_v52  ;;  %v2855_v48 = vpack.c.bf16 %v12626_v53, %v12623_v45  ;;  %v12634_v52 = vld [vmem:[#allocation65_spill] sm:$0xff]  ;;  %v12659_v33 = vld [vmem:[#allocation210_spill] sm:$0xff]  ;;  %v12681_v53 = vld [vmem:[#allocation220_spill] sm:$0xff] }
 0x60b   :  { %2920 = vmatprep.mubr.bf16.mxu0 %v2852_v5  ;;  %2918 = vmatprep.subr.bf16.mxu0 %v2847_v14  ;;  %v12635_v14 = vld [vmem:[#allocation57_spill] sm:$0xff]  ;;  %v12661_v36 = vmax.f32 %v12659_v33, %v12660_v19  ;;  %v12662_v41 = vld [vmem:[#allocation214_spill] sm:$0xff]  ;;  %v12695_v61 = vld [vmem:[#allocation231_spill] sm:$0xff] }
 0x60c   :  { %3033 = vmatprep.mubr.bf16.mxu1 %v2852_v5  ;;  %3029 = vmatprep.subr.bf16.mxu1 %v2845_v50  ;;  %v12633_v5 = vld [vmem:[#allocation56_spill] sm:$0xff]  ;;  %v12678_v45 = vld [vmem:[#allocation217_spill] sm:$0xff]  ;;  %v12685_v35 = vld [vmem:[#allocation226_spill] sm:$0xff] }
 0x60d   :  { %3030 = vmatpush1.bf16.msra.mxu1 %v2844_v12  ;;  %v12656_v50 = vld [vmem:[#allocation204_spill] sm:$0xff]  ;;  %v12680_v16 = vmax.f32 %v12678_v45, %v12679_v20  ;;  %v12687_v4 = vmax.f32 %v12685_v35, %v12686_v8 }
 0x60e   :  { %2919 = vmatpush1.bf16.msra.mxu0 %v2846_v51  ;;  %3031 = vmatprep.subr.bf16.mxu1 %v2849_v10  ;;  %v12639_v51 = vmax.f32 %v12637_v43, %v12638_v47  ;;  %v12692_v43 = vld [vmem:[#allocation227_spill] sm:$0xff] }
 0x60f   :  { %7059 = vmatprep.subr.bf16.mxu0 %v12602_v37 }
 0x610   :  { %v2857_v0 = vpack.c.bf16 %v12642_v18, %v12639_v51  ;;  %v12694_v51 = vld [vmem:[#allocation228_spill] sm:$0xff] }
 0x611   :  { %2921 = vmatmul.mubr.bf16.vlgmr.msra.gmra.mrb[144].mxu0 %v2851_v46  ;;  %3032 = vmatpush1.bf16.msra.mxu1 %v2848_v21  ;;  %v12696_v55 = vmax.f32 %v12694_v51, %v12695_v61 }
 0x612   :  { %2930 = vmatprep.mubr.bf16.mxu0 %v2854_v25  ;;  %7060 = vmatpush3.bf16.msra.mxu0 %v12603_v29 }
 0x613   :  { %7061 = vmatprep.subr.bf16.mxu0 %v12604_v58  ;;  %7227 = vmatprep.subr.bf16.mxu1 %v12602_v37  ;;  %v12654_v37 = vld [vmem:[#allocation203_spill] sm:$0xff] }
 0x614   :  { %3034 = vmatmul.mubr.bf16.vlgmr.msra.gmra.mrb[160].mxu1 %v2851_v46  ;;  %v12645_v46 = vmax.f32 %v12643_v31, %v12644_v7  ;;  %v12655_v38 = vmax.f32 %v12653_v13, %v12654_v37 }
 0x615   :  { %3043 = vmatprep.mubr.bf16.mxu1 %v2854_v25  ;;  %7235 = vmatpush3.bf16.msra.mxu1 %v12603_v29  ;;  %v12652_v25 = vld [vmem:[#allocation68_spill] sm:$0xff]  ;;  %v12657_v29 = vld [vmem:[#allocation207_spill] sm:$0xff] }
 0x616   :  { %7062 = vmatpush3.bf16.msra.mxu0 %v12617_v60  ;;  %7228 = vmatprep.subr.bf16.mxu1 %v12604_v58  ;;  %v2860_v11 = vpack.c.bf16 %v12648_v42, %v12645_v46  ;;  %v12658_v58 = vmax.f32 %v12656_v50, %v12657_v29  ;;  %v10140_v46 = vld [vmem:[#allocation9 + $0xf] ss:$0 sm:$0xff] }
 0x617   :  { %7063 = vmatprep.subr.bf16.mxu0 %v12618_v54 }
 0x618   :  { %v2859_v26 = vpack.c.bf16 %v12658_v58, %v12655_v38 }
 0x619   :  { %2931 = vmatmul.mubr.bf16.gmra.mrb[148].mxu0 %v2853_v56  ;;  %7236 = vmatpush3.bf16.msra.mxu1 %v12617_v60  ;;  %v12672_v60 = vld [vmem:[#allocation218_spill] sm:$0xff] }
 0x61a   :  { %2940 = vmatprep.mubr.bf16.mxu0 %v2856_v44  ;;  %7064 = vmatpush3.bf16.msra.mxu0 %v12619_v49 }
 0x61b   :  { %7065 = vmatprep.subr.bf16.mxu0 %v12620_v17  ;;  %7229 = vmatprep.subr.bf16.mxu1 %v12618_v54  ;;  %v12673_v54 = vld [vmem:[#allocation221_spill] sm:$0xff] }
 0x61c   :  { %3044 = vmatmul.mubr.bf16.gmra.mrb[164].mxu1 %v2853_v56  ;;  %v12664_v56 = vmax.f32 %v12662_v41, %v12663_v40  ;;  %v12674_v21 = vmax.f32 %v12672_v60, %v12673_v54  ;;  %v10144_v40 = vld [vmem:[#allocation9 + $0x16] ss:$0 sm:$0xff] }
 0x61d   :  { %3053 = vmatprep.mubr.bf16.mxu1 %v2856_v44  ;;  %7237 = vmatpush3.bf16.msra.mxu1 %v12619_v49  ;;  %v12671_v44 = vmax.f32 %v12669_v9, %v12670_v28  ;;  %v12675_v49 = vld [vmem:[#allocation222_spill] sm:$0xff] }
 0x61e   :  { %7066 = vmatpush3.bf16.msra.mxu0 %v12633_v5  ;;  %7230 = vmatprep.subr.bf16.mxu1 %v12620_v17  ;;  %v2862_v12 = vpack.c.bf16 %v12664_v56, %v12661_v36  ;;  %v12676_v17 = vld [vmem:[#allocation224_spill] sm:$0xff] }
 0x61f   :  { %7067 = vmatprep.subr.bf16.mxu0 %v12634_v52  ;;  %v2861_v10 = vpack.c.bf16 %v12671_v44, %v12668_v15  ;;  %v12677_v2 = vmax.f32 %v12675_v49, %v12676_v17 }
 0x621   :  { %2941 = vmatmul.mubr.bf16.gmra.mrb[152].mxu0 %v2855_v48  ;;  %7238 = vmatpush3.bf16.msra.mxu1 %v12633_v5  ;;  %v2864_v62 = vpack.c.bf16 %v12677_v2, %v12674_v21  ;;  %v12689_v5 = vld [vmem:[#allocation232_spill] sm:$0xff] }
 0x622   :  { %2950 = vmatprep.mubr.bf16.mxu0 %v2858_v1  ;;  %7068 = vmatpush3.bf16.msra.mxu0 %v12635_v14 }
 0x623   :  { %7069 = vmatprep.subr.bf16.mxu0 %v12636_v63  ;;  %7231 = vmatprep.subr.bf16.mxu1 %v12634_v52 }
 0x624   :  { %3054 = vmatmul.mubr.bf16.gmra.mrb[168].mxu1 %v2855_v48  ;;  %v12682_v48 = vld [vmem:[#allocation223_spill] sm:$0xff] }
 0x625   :  { %3063 = vmatprep.mubr.bf16.mxu1 %v2858_v1  ;;  %7239 = vmatpush3.bf16.msra.mxu1 %v12635_v14  ;;  %v12683_v3 = vmax.f32 %v12681_v53, %v12682_v48  ;;  %v12688_v1 = vld [vmem:[#allocation230_spill] sm:$0xff] }
 0x626   :  { %7070 = vmatpush3.bf16.msra.mxu0 %v12649_v27  ;;  %7232 = vmatprep.subr.bf16.mxu1 %v12636_v63  ;;  %v12690_v52 = vmax.f32 %v12688_v1, %v12689_v5  ;;  %v12691_v63 = vld [vmem:[#allocation225_spill] sm:$0xff] }
 0x627   :  { %7071 = vmatprep.subr.bf16.mxu0 %v12650_v59  ;;  %v2863_v22 = vpack.c.bf16 %v12683_v3, %v12680_v16  ;;  %v12693_v47 = vmax.f32 %v12691_v63, %v12692_v43 }
 0x628   :  { %v2866_v14 = vpack.c.bf16 %v12690_v52, %v12687_v4 }
 0x629   :  { %2951 = vmatmul.mubr.bf16.gmra.mrb[156].mxu0 %v2857_v0  ;;  %7240 = vmatpush3.bf16.msra.mxu1 %v12649_v27  ;;  %v2865_v18 = vpack.c.bf16 %v12696_v55, %v12693_v47 }
 0x62a   :  { %2960 = vmatprep.mubr.bf16.mxu0 %v2860_v11  ;;  %7072 = vmatpush3.bf16.msra.mxu0 %v12651_v24 }
 0x62b   :  { %7073 = vmatprep.subr.bf16.mxu0 %v12652_v25  ;;  %7233 = vmatprep.subr.bf16.mxu1 %v12650_v59 }
 0x62c   :  { %3064 = vmatmul.mubr.bf16.gmra.mrb[172].mxu1 %v2857_v0  ;;  %v7558_v0 = vld [vmem:[#allocation7 + $0x14] ss:$8 sps:$4 sm:$0xff]  }
 0x62d   :  { %3073 = vmatprep.mubr.bf16.mxu1 %v2860_v11  ;;  %7241 = vmatpush3.bf16.msra.mxu1 %v12651_v24 }
 0x62e   :  { %7074 = vmatpush3.bf16.msra.mxu0 %v12665_v23  ;;  %7234 = vmatprep.subr.bf16.mxu1 %v12652_v25 }
 0x62f   :  { %4507 = vmatprep.subr.bf16.mxu0 %v7558_v0 }
 0x631   :  { %2961 = vmatmul.mubr.bf16.gmra.mrb[160].mxu0 %v2859_v26  ;;  %7242 = vmatpush3.bf16.msra.mxu1 %v12665_v23 }
 0x632   :  { %2970 = vmatprep.mubr.bf16.mxu0 %v2862_v12  ;;  %7123 = vmatprep.subr.bf16.mxu1 %v12684_v39 }
 0x634   :  { %3074 = vmatmul.mubr.bf16.gmra.mrb[176].mxu1 %v2859_v26 }
 0x635   :  { %3083 = vmatprep.mubr.bf16.mxu1 %v2862_v12 }
 0x639   :  { %2971 = vmatmul.mubr.bf16.gmra.mrb[164].mxu0 %v2861_v10 }
 0x63a   :  { %2980 = vmatprep.mubr.bf16.mxu0 %v2864_v62 }
 0x63c   :  { %3084 = vmatmul.mubr.bf16.gmra.mrb[180].mxu1 %v2861_v10 }
 0x63d   :  { %3093 = vmatprep.mubr.bf16.mxu1 %v2864_v62 }
 0x641   :  { %2981 = vmatmul.mubr.bf16.gmra.mrb[168].mxu0 %v2863_v22 }
 0x642   :  { %2990 = vmatprep.mubr.bf16.mxu0 %v2866_v14 }
 0x644   :  { %3094 = vmatmul.mubr.bf16.gmra.mrb[184].mxu1 %v2863_v22 }
 0x645   :  { %3103 = vmatprep.mubr.bf16.mxu1 %v2866_v14 }
 0x649   :  { %2991 = vmatmul.mubr.bf16.gmra.mrb[172].mxu0 %v2865_v18 }
 0x64c   :  { %3104 = vmatmul.mubr.bf16.gmra.mrb[188].mxu1 %v2865_v18 }
 0x6a4   :  { %v6947_v31 = vpop.f32.mrb[112].mxu0 }
 0x6a5   :  { %v7011_v7 = vpop.f32.mrb[128].mxu1  ;;  %v6948_v6 = vpop.f32.mrb[113].mxu0 }
 0x6a6   :  { %v7012_v34 = vpop.f32.mrb[129].mxu1  ;;  %v6949_v42 = vadd.f32 %v6948_v6, %v6947_v31  ;;  %v6950_v11 = vpop.f32.mrb[114].mxu0 }
 0x6a7   :  { %v7013_v27 = vadd.f32 %v7012_v34, %v7011_v7  ;;  %v7014_v59 = vpop.f32.mrb[130].mxu1  ;;  %v6951_v24 = vpop.f32.mrb[115].mxu0 }
 0x6a8   :  { %v7015_v25 = vpop.f32.mrb[131].mxu1  ;;  %v2595_v13 = vadd.f32 %v6949_v42, %v10140_v46  ;;  %v6952_v37 = vadd.f32 %v6951_v24, %v6950_v11 }
 0x6a9   :  { %v7016_v38 = vadd.f32 %v7015_v25, %v7014_v59 }
 0x6aa   :  { %v2598_v50 = vadd.f32 %v6952_v37, %v10140_v46  ;;  %v2692_v29 = vadd.f32 %v7013_v27, %v2595_v13 }
 0x6ac   :  { %v2754_v58 = vmul.f32 0.01, %v2692_v29  ;;  %v2695_v26 = vadd.f32 %v7016_v38, %v2598_v50  ;;  %v6953_v33 = vpop.f32.mrb[116].mxu0 }
 0x6ad   :  { %v7017_v19 = vpop.f32.mrb[132].mxu1  ;;  %v6954_v36 = vpop.f32.mrb[117].mxu0 }
 0x6ae   :  { %v7018_v41 = vpop.f32.mrb[133].mxu1  ;;  %v2755_v56 = vmul.f32 0.01, %v2695_v26  ;;  %v6955_v12 = vadd.f32 %v6954_v36, %v6953_v33  ;;  %v6956_v23 = vpop.f32.mrb[118].mxu0  ;;  %v2770_v15 = vmax.f32 %v2692_v29, %v2754_v58 }
 0x6af   :  { %v7019_v32 = vadd.f32 %v7018_v41, %v7017_v19  ;;  %v7020_v30 = vpop.f32.mrb[134].mxu1  ;;  %v6957_v9 = vpop.f32.mrb[119].mxu0 }
 0x6b0   :  { %v7021_v28 = vpop.f32.mrb[135].mxu1  ;;  %v2603_v44 = vadd.f32 %v6955_v12, %v10140_v46  ;;  %v6958_v10 = vadd.f32 %v6957_v9, %v6956_v23  ;;  %v3700_v54 = vmul.f32 %v10144_v40, %v2770_v15  ;;  %v2771_v21 = vmax.f32 %v2695_v26, %v2755_v56 }
 0x6b1   :  { %v7022_v60 = vadd.f32 %v7021_v28, %v7020_v30  ;;  %v3540_v62 = vsel %vm3539_vm1, %v2770_v15, 0.0 }
 0x6b2   :  { %v2606_v49 = vadd.f32 %v6958_v10, %v10140_v46  ;;  %v2700_v17 = vadd.f32 %v7019_v32, %v2603_v44  ;;  %v3716_v2 = vsel %vm3539_vm1, %v3700_v54, 0.0  ;;  %v3541_v45 = vsel %vm3539_vm1, %v2771_v21, 0.0 }
 0x6b3   :  { %3717 = vadd.xlane.f32.xlu0 %v3716_v2  ;;  %v3701_v20 = vmul.f32 %v10144_v40, %v2771_v21  ;;  %v3542_v22 = vadd.f32 %v3541_v45, %v3540_v62 }
 0x6b4   :  { %v2756_v16 = vmul.f32 0.01, %v2700_v17  ;;  %v2703_v53 = vadd.f32 %v7022_v60, %v2606_v49  ;;  %v6959_v48 = vpop.f32.mrb[120].mxu0 }
 0x6b5   :  { %v7023_v3 = vpop.f32.mrb[136].mxu1  ;;  %v6960_v39 = vpop.f32.mrb[121].mxu0  ;;  %v3719_v8 = vsel %vm3539_vm1, %v3701_v20, 0.0  ;;  %v3543_v14 = vrot.slane %v3542_v22, 4 }
 0x6b6   :  { %v7024_v35 = vpop.f32.mrb[137].mxu1  ;;  %v2757_v4 = vmul.f32 0.01, %v2703_v53  ;;  %v6961_v1 = vadd.f32 %v6960_v39, %v6959_v48  ;;  %v6962_v5 = vpop.f32.mrb[122].mxu0  ;;  %v2772_v51 = vmax.f32 %v2700_v17, %v2756_v16 }
 0x6b7   :  { %v7025_v52 = vadd.f32 %v7024_v35, %v7023_v3  ;;  %v7026_v63 = vpop.f32.mrb[138].mxu1  ;;  %v6963_v43 = vpop.f32.mrb[123].mxu0  ;;  %3720 = vadd.xlane.f32.xlu0 %v3719_v8  ;;  %v3544_v18 = vadd.f32 %v3543_v14, %v3542_v22 }
 0x6b8   :  { %v7027_v47 = vpop.f32.mrb[139].mxu1  ;;  %v2611_v61 = vadd.f32 %v6961_v1, %v10140_v46  ;;  %v6964_v55 = vadd.f32 %v6963_v43, %v6962_v5  ;;  %v3702_v31 = vmul.f32 %v10144_v40, %v2772_v51  ;;  %v2773_v7 = vmax.f32 %v2703_v53, %v2757_v4 }
 0x6b9   :  { %v7028_v0 = vadd.f32 %v7027_v47, %v7026_v63  ;;  %v3545_v42 = vrot.slane %v3544_v18, 2  ;;  %v3549_v27 = vsel %vm3539_vm1, %v2772_v51, 0.0 }
 0x6ba   :  { %v2614_v6 = vadd.f32 %v6964_v55, %v10140_v46  ;;  %v2708_v34 = vadd.f32 %v7025_v52, %v2611_v61  ;;  %v3722_v11 = vsel %vm3539_vm1, %v3702_v31, 0.0  ;;  %v3550_v59 = vsel %vm3539_vm1, %v2773_v7, 0.0 }
 0x6bb   :  { %v3703_v24 = vmul.f32 %v10144_v40, %v2773_v7  ;;  %v3546_v13 = vadd.f32 %v3545_v42, %v3544_v18  ;;  %3723 = vadd.xlane.f32.xlu1 %v3722_v11  ;;  %v3551_v29 = vadd.f32 %v3550_v59, %v3549_v27 }
 0x6bc   :  { %v2758_v25 = vmul.f32 0.01, %v2708_v34  ;;  %v2711_v37 = vadd.f32 %v7028_v0, %v2614_v6  ;;  %v6965_v38 = vpop.f32.mrb[124].mxu0 }
 0x6bd   :  { %v7029_v50 = vpop.f32.mrb[140].mxu1  ;;  %v6966_v58 = vpop.f32.mrb[125].mxu0  ;;  %v3547_v33 = vrot.slane %v3546_v13, 1  ;;  %v3725_v32 = vsel %vm3539_vm1, %v3703_v24, 0.0  ;;  %v3552_v30 = vrot.slane %v3551_v29, 4 }
 0x6be   :  { %v7030_v26 = vpop.f32.mrb[141].mxu1  ;;  %v2759_v19 = vmul.f32 0.01, %v2711_v37  ;;  %v6967_v36 = vadd.f32 %v6966_v58, %v6965_v38  ;;  %v6968_v41 = vpop.f32.mrb[126].mxu0  ;;  %v2774_v9 = vmax.f32 %v2708_v34, %v2758_v25 }
 0x6bf   :  { %v7031_v56 = vadd.f32 %v7030_v26, %v7029_v50  ;;  %v7032_v12 = vpop.f32.mrb[142].mxu1  ;;  %v6969_v23 = vpop.f32.mrb[127].mxu0  ;;  %v3548_v28 = vadd.f32 %v3547_v33, %v3546_v13  ;;  %3726 = vadd.xlane.f32.xlu1 %v3725_v32  ;;  %v3553_v54 = vadd.f32 %v3552_v30, %v3551_v29 }
 0x6c0   :  { %v7033_v15 = vpop.f32.mrb[143].mxu1  ;;  %v2619_v44 = vadd.f32 %v6967_v36, %v10140_v46  ;;  %v6970_v10 = vadd.f32 %v6969_v23, %v6968_v41  ;;  %v3704_v21 = vmul.f32 %v10144_v40, %v2774_v9  ;;  %v2775_v49 = vmax.f32 %v2711_v37, %v2759_v19 }
 0x6c1   :  { %v7034_v60 = vadd.f32 %v7033_v15, %v7032_v12  ;;  %v10164_v17 = vmul.f32 0.0625, %v3548_v28  ;;  %v3558_v45 = vsel %vm3539_vm1, %v2774_v9, 0.0  ;;  %v3554_v20 = vrot.slane %v3553_v54, 2 }
 0x6c2   :  { %v2622_v2 = vadd.f32 %v6970_v10, %v10140_v46  ;;  %v2716_v62 = vadd.f32 %v7031_v56, %v2619_v44  ;;  %v3728_v16 = vsel %vm3539_vm1, %v3704_v21, 0.0  ;;  %v3559_v53 = vsel %vm3539_vm1, %v2775_v49, 0.0 }
 0x6c3   :  { %12697 = vst [vmem:[#allocation29_spill] sm:$0xff] %v10164_v17  ;;  %v3705_v48 = vmul.f32 %v10144_v40, %v2775_v49  ;;  %3729 = vadd.xlane.f32.xlu0 %v3728_v16  ;;  %v3560_v35 = vadd.f32 %v3559_v53, %v3558_v45  ;;  %v3555_v4 = vadd.f32 %v3554_v20, %v3553_v54 }
 0x6c4   :  { %v2760_v3 = vmul.f32 0.01, %v2716_v62  ;;  %v2719_v22 = vadd.f32 %v7034_v60, %v2622_v2  ;;  %v6971_v39 = vpop.f32.mrb[128].mxu0 }
 0x6c5   :  { %v7035_v8 = vpop.f32.mrb[144].mxu1  ;;  %v6972_v1 = vpop.f32.mrb[129].mxu0  ;;  %v3731_v5 = vsel %vm3539_vm1, %v3705_v48, 0.0  ;;  %v3561_v43 = vrot.slane %v3560_v35, 4  ;;  %v3556_v55 = vrot.slane %v3555_v4, 1 }
 0x6c6   :  { %v7036_v52 = vpop.f32.mrb[145].mxu1  ;;  %v2761_v14 = vmul.f32 0.01, %v2719_v22  ;;  %v6973_v63 = vadd.f32 %v6972_v1, %v6971_v39  ;;  %3732 = vadd.xlane.f32.xlu1 %v3731_v5  ;;  %v6974_v47 = vpop.f32.mrb[130].mxu0  ;;  %v2776_v31 = vmax.f32 %v2716_v62, %v2760_v3 }
 0x6c7   :  { %v7037_v51 = vadd.f32 %v7036_v52, %v7035_v8  ;;  %v7038_v61 = vpop.f32.mrb[146].mxu1  ;;  %v6975_v18 = vpop.f32.mrb[131].mxu0  ;;  %v3562_v6 = vadd.f32 %v3561_v43, %v3560_v35  ;;  %v3557_v11 = vadd.f32 %v3556_v55, %v3555_v4 }
 0x6c8   :  { %v7039_v0 = vpop.f32.mrb[147].mxu1  ;;  %v2627_v7 = vadd.f32 %v6973_v63, %v10140_v46  ;;  %v6976_v34 = vadd.f32 %v6975_v18, %v6974_v47  ;;  %v3706_v27 = vmul.f32 %v10144_v40, %v2776_v31  ;;  %v2777_v59 = vmax.f32 %v2719_v22, %v2761_v14 }
 0x6c9   :  { %v7040_v42 = vadd.f32 %v7039_v0, %v7038_v61  ;;  %v3563_v24 = vrot.slane %v3562_v6, 2  ;;  %v3567_v37 = vsel %vm3539_vm1, %v2776_v31, 0.0  ;;  %v10176_v38 = vmul.f32 0.0625, %v3557_v11 }
 0x6ca   :  { %v2630_v25 = vadd.f32 %v6976_v34, %v10140_v46  ;;  %v2724_v13 = vadd.f32 %v7037_v51, %v2627_v7  ;;  %v3734_v50 = vsel %vm3539_vm1, %v3706_v27, 0.0  ;;  %v3568_v29 = vsel %vm3539_vm1, %v2777_v59, 0.0 }
 0x6cb   :  { %12698 = vst [vmem:[#allocation45_spill] sm:$0xff] %v10176_v38  ;;  %v3707_v58 = vmul.f32 %v10144_v40, %v2777_v59  ;;  %v3564_v26 = vadd.f32 %v3563_v24, %v3562_v6  ;;  %3735 = vadd.xlane.f32.xlu0 %v3734_v50  ;;  %v3569_v41 = vadd.f32 %v3568_v29, %v3567_v37 }
 0x6cc   :  { %v2762_v33 = vmul.f32 0.01, %v2724_v13  ;;  %v2727_v19 = vadd.f32 %v7040_v42, %v2630_v25  ;;  %v6977_v36 = vpop.f32.mrb[132].mxu0 }
 0x6cd   :  { %v7041_v56 = vpop.f32.mrb[148].mxu1  ;;  %v6978_v12 = vpop.f32.mrb[133].mxu0  ;;  %v3737_v23 = vsel %vm3539_vm1, %v3707_v58, 0.0  ;;  %v3565_v30 = vrot.slane %v3564_v26, 1  ;;  %v3570_v28 = vrot.slane %v3569_v41, 4 }
 0x6ce   :  { %v7042_v32 = vpop.f32.mrb[149].mxu1  ;;  %v2763_v15 = vmul.f32 0.01, %v2727_v19  ;;  %v6979_v9 = vadd.f32 %v6978_v12, %v6977_v36  ;;  %3738 = vadd.xlane.f32.xlu1 %v3737_v23  ;;  %v6980_v44 = vpop.f32.mrb[134].mxu0  ;;  %v2778_v49 = vmax.f32 %v2724_v13, %v2762_v33 }
 0x6cf   :  { %v7044_v10 = vpop.f32.mrb[150].mxu1  ;;  %v6981_v60 = vpop.f32.mrb[135].mxu0  ;;  %v7043_v54 = vadd.f32 %v7042_v32, %v7041_v56  ;;  %v3566_v2 = vadd.f32 %v3565_v30, %v3564_v26  ;;  %v3571_v45 = vadd.f32 %v3570_v28, %v3569_v41 }
 0x6d0   :  { %v7045_v21 = vpop.f32.mrb[151].mxu1  ;;  %v2635_v62 = vadd.f32 %v6979_v9, %v10140_v46  ;;  %v6982_v20 = vadd.f32 %v6981_v60, %v6980_v44  ;;  %v3708_v53 = vmul.f32 %v10144_v40, %v2778_v49  ;;  %v2779_v48 = vmax.f32 %v2727_v19, %v2763_v15  ;;  %v10201_v60 = vld [vmem:[#allocation9 + $0x10] sm:$0xf] }
 0x6d1   :  { %v7046_v16 = vadd.f32 %v7045_v21, %v7044_v10  ;;  %v10184_v3 = vmul.f32 0.0625, %v3566_v2  ;;  %v3572_v22 = vrot.slane %v3571_v45, 2  ;;  %v3576_v8 = vsel %vm3539_vm1, %v2778_v49, 0.0 }
 0x6d2   :  { %v2638_v39 = vadd.f32 %v6982_v20, %v10140_v46  ;;  %v2732_v35 = vadd.f32 %v7043_v54, %v2635_v62  ;;  %v3740_v4 = vsel %vm3539_vm1, %v3708_v53, 0.0  ;;  %v3577_v1 = vsel %vm3539_vm1, %v2779_v48, 0.0 }
 0x6d3   :  { %12699 = vst [vmem:[#allocation21_spill] sm:$0xff] %v10184_v3  ;;  %v3709_v5 = vmul.f32 %v10144_v40, %v2779_v48  ;;  %v3573_v52 = vadd.f32 %v3572_v22, %v3571_v45  ;;  %3741 = vadd.xlane.f32.xlu0 %v3740_v4  ;;  %v3578_v47 = vadd.f32 %v3577_v1, %v3576_v8  ;;  %v12701_v8 = vld [vmem:[#allocation102_spill] sm:$0xff] }
 0x6d4   :  { %v2764_v14 = vmul.f32 0.01, %v2732_v35  ;;  %v2735_v63 = vadd.f32 %v7046_v16, %v2638_v39  ;;  %v6983_v43 = vpop.f32.mrb[136].mxu0  ;;  %v10206_v4 = vrot.slane %v10201_v60, %v12701_v8 }
 0x6d5   :  { %v7047_v51 = vpop.f32.mrb[152].mxu1  ;;  %v6984_v61 = vpop.f32.mrb[137].mxu0  ;;  %v3743_v55 = vsel %vm3539_vm1, %v3709_v5, 0.0  ;;  %v3574_v0 = vrot.slane %v3573_v52, 1  ;;  %v3579_v6 = vrot.slane %v3578_v47, 4 }
 0x6d6   :  { %v7048_v18 = vpop.f32.mrb[153].mxu1  ;;  %v2765_v31 = vmul.f32 0.01, %v2735_v63  ;;  %v6985_v7 = vadd.f32 %v6984_v61, %v6983_v43  ;;  %3744 = vadd.xlane.f32.xlu1 %v3743_v55  ;;  %v6986_v34 = vpop.f32.mrb[138].mxu0  ;;  %v2780_v24 = vmax.f32 %v2732_v35, %v2764_v14 }
 0x6d7   :  { %v7050_v42 = vpop.f32.mrb[154].mxu1  ;;  %v6987_v11 = vpop.f32.mrb[139].mxu0  ;;  %v7049_v27 = vadd.f32 %v7048_v18, %v7047_v51  ;;  %v3575_v25 = vadd.f32 %v3574_v0, %v3573_v52  ;;  %v3580_v37 = vadd.f32 %v3579_v6, %v3578_v47  ;;  %v12702_v47 = vld [vmem:[#allocation103_spill] sm:$0xff] }
 0x6d8   :  { %v7051_v59 = vpop.f32.mrb[155].mxu1  ;;  %v2643_v13 = vadd.f32 %v6985_v7, %v10140_v46  ;;  %v6988_v50 = vadd.f32 %v6987_v11, %v6986_v34  ;;  %v3710_v58 = vmul.f32 %v10144_v40, %v2780_v24  ;;  %v2781_v26 = vmax.f32 %v2735_v63, %v2765_v31 }
 0x6d9   :  { %v7052_v29 = vadd.f32 %v7051_v59, %v7050_v42  ;;  %v10194_v33 = vmul.f32 0.0625, %v3575_v25  ;;  %v3581_v19 = vrot.slane %v3580_v37, 2  ;;  %v3585_v56 = vsel %vm3539_vm1, %v2780_v24, 0.0 }
 0x6da   :  { %v2646_v36 = vadd.f32 %v6988_v50, %v10140_v46  ;;  %v2740_v41 = vadd.f32 %v7049_v27, %v2643_v13  ;;  %v3746_v12 = vsel %vm3539_vm1, %v3710_v58, 0.0  ;;  %v3586_v23 = vsel %vm3539_vm1, %v2781_v26, 0.0 }
 0x6db   :  { %12700 = vst [vmem:[#allocation37_spill] sm:$0xff] %v10194_v33  ;;  %v3711_v32 = vmul.f32 %v10144_v40, %v2781_v26  ;;  %v3582_v30 = vadd.f32 %v3581_v19, %v3580_v37  ;;  %3747 = vadd.xlane.f32.xlu0 %v3746_v12  ;;  %v3587_v44 = vadd.f32 %v3586_v23, %v3585_v56 }
 0x6dc   :  { %v2766_v15 = vmul.f32 0.01, %v2740_v41  ;;  %v2743_v9 = vadd.f32 %v7052_v29, %v2646_v36  ;;  %v6989_v28 = vpop.f32.mrb[140].mxu0  ;;  %v10212_v51 = vrot.slane %v10201_v60, %v12702_v47 }
 0x6dd   :  { %v7053_v10 = vpop.f32.mrb[156].mxu1  ;;  %v6990_v54 = vpop.f32.mrb[141].mxu0  ;;  %v3749_v21 = vsel %vm3539_vm1, %v3711_v32, 0.0  ;;  %v3583_v2 = vrot.slane %v3582_v30, 1  ;;  %v3588_v20 = vrot.slane %v3587_v44, 4 }
 0x6de   :  { %v7054_v49 = vpop.f32.mrb[157].mxu1  ;;  %v2767_v62 = vmul.f32 0.01, %v2743_v9  ;;  %v6991_v45 = vadd.f32 %v6990_v54, %v6989_v28  ;;  %3750 = vadd.xlane.f32.xlu1 %v3749_v21  ;;  %v6992_v16 = vpop.f32.mrb[142].mxu0  ;;  %v2782_v35 = vmax.f32 %v2740_v41, %v2766_v15  ;;  %v12705_v21 = vld [vmem:[#allocation105_spill] sm:$0xff] }
 0x6df   :  { %v7056_v53 = vpop.f32.mrb[158].mxu1  ;;  %v6993_v48 = vpop.f32.mrb[143].mxu0  ;;  %v7055_v22 = vadd.f32 %v7054_v49, %v7053_v10  ;;  %v3584_v1 = vadd.f32 %v3583_v2, %v3582_v30  ;;  %v3589_v52 = vadd.f32 %v3588_v20, %v3587_v44  ;;  %v10231_v49 = vrot.slane %v10201_v60, %v12705_v21 }
 0x6e0   :  { %v7057_v39 = vpop.f32.mrb[159].mxu1  ;;  %v2651_v5 = vadd.f32 %v6991_v45, %v10140_v46  ;;  %v6994_v14 = vadd.f32 %v6993_v48, %v6992_v16  ;;  %v3712_v43 = vmul.f32 %v10144_v40, %v2782_v35  ;;  %v2783_v61 = vmax.f32 %v2743_v9, %v2767_v62 }
 0x6e1   :  { %v7058_v63 = vadd.f32 %v7057_v39, %v7056_v53  ;;  %v10214_v55 = vmul.f32 0.0625, %v3584_v1  ;;  %v3590_v18 = vrot.slane %v3589_v52, 2  ;;  %v3594_v7 = vsel %vm3539_vm1, %v2782_v35, 0.0 }
 0x6e2   :  { %v2654_v0 = vadd.f32 %v6994_v14, %v10140_v46  ;;  %v2748_v31 = vadd.f32 %v7055_v22, %v2651_v5  ;;  %v3752_v6 = vsel %vm3539_vm1, %v3712_v43, 0.0  ;;  %v3595_v34 = vsel %vm3539_vm1, %v2783_v61, 0.0 }
 0x6e3   :  { %12703 = vst [vmem:[#allocation30_spill] sm:$0xff] %v10214_v55  ;;  %v3713_v42 = vmul.f32 %v10144_v40, %v2783_v61  ;;  %v3591_v11 = vadd.f32 %v3590_v18, %v3589_v52  ;;  %3753 = vadd.xlane.f32.xlu0 %v3752_v6  ;;  %v3596_v25 = vadd.f32 %v3595_v34, %v3594_v7 }
 0x6e4   :  { %v2768_v27 = vmul.f32 0.01, %v2748_v31  ;;  %v2751_v59 = vadd.f32 %v7058_v63, %v2654_v0  ;;  %v2922_v24 = vpop.f32.mrb[144].mxu0 }
 0x6e5   :  { %v2923_v13 = vadd.f32 %v2922_v24, %v10206_v4  ;;  %v2924_v37 = vpop.f32.mrb[145].mxu0  ;;  %v3755_v46 = vsel %vm3539_vm1, %v3713_v42, 0.0  ;;  %v3592_v50 = vrot.slane %v3591_v11, 1  ;;  %v3597_v58 = vrot.slane %v3596_v25, 4 }
 0x6e6   :  { %v2925_v29 = vadd.f32 %v2924_v37, %v10212_v51  ;;  %3756 = vadd.xlane.f32.xlu1 %v3755_v46  ;;  %v2926_v26 = vpop.f32.mrb[146].mxu0  ;;  %v2769_v19 = vmul.f32 0.01, %v2751_v59  ;;  %v2784_v12 = vmax.f32 %v2748_v31, %v2768_v27  ;;  %v7556_v31 = vld [vmem:[#allocation7 + $0x10] ss:$8 sps:$4 sm:$0xff]  }
 0x6e7   :  { %v3114_v36 = vmul.f32 0.01, %v2923_v13  ;;  %v2927_v41 = vadd.f32 %v2926_v26, %v10206_v4  ;;  %v2928_v56 = vpop.f32.mrb[147].mxu0  ;;  %v3593_v23 = vadd.f32 %v3592_v50, %v3591_v11  ;;  %v3598_v30 = vadd.f32 %v3597_v58, %v3596_v25  ;;  %v12706_v11 = vld [vmem:[#allocation108_spill] sm:$0xff] }
 0x6e8   :  { %v3115_v32 = vmul.f32 0.01, %v2925_v29  ;;  %v2929_v15 = vadd.f32 %v2928_v56, %v10212_v51  ;;  %v3714_v28 = vmul.f32 %v10144_v40, %v2784_v12  ;;  %v2785_v20 = vmax.f32 %v2751_v59, %v2769_v19 }
 0x6e9   :  { %v3118_v9 = vmul.f32 0.01, %v2927_v41  ;;  %v10227_v44 = vmul.f32 0.0625, %v3593_v23  ;;  %v3599_v10 = vrot.slane %v3598_v30, 2  ;;  %v3178_v2 = vmax.f32 %v2923_v13, %v3114_v36 }
 0x6ea   :  { %v3119_v54 = vmul.f32 0.01, %v2929_v15  ;;  %v3758_v45 = vsel %vm3539_vm1, %v3714_v28, 0.0  ;;  %v3179_v16 = vmax.f32 %v2925_v29, %v3115_v32  ;;  %v3603_v22 = vsel %vm3539_vm1, %v2784_v12, 0.0  ;;  %v3035_v29 = vpop.f32.mrb[160].mxu1 }
 0x6eb   :  { %12704 = vst [vmem:[#allocation46_spill] sm:$0xff] %v10227_v44  ;;  %v3182_v62 = vmax.f32 %v2927_v41, %v3118_v9  ;;  %v3600_v53 = vadd.f32 %v3599_v10, %v3598_v30  ;;  %3759 = vadd.xlane.f32.xlu0 %v3758_v45  ;;  %v3604_v52 = vsel %vm3539_vm1, %v2785_v20, 0.0  ;;  %v3715_v14 = vmul.f32 %v10144_v40, %v2785_v20  ;;  %v3037_v19 = vpop.f32.mrb[161].mxu1 }
 0x6ec   :  { %v3183_v48 = vmax.f32 %v2929_v15, %v3119_v54  ;;  %v2932_v39 = vpop.f32.mrb[148].mxu0  ;;  %v3605_v61 = vadd.f32 %v3604_v52, %v3603_v22  ;;  %v10243_v27 = vrot.slane %v10201_v60, %v12706_v11  ;;  %v3036_v60 = vadd.f32 %v3035_v29, %v10231_v49  ;;  %v3039_v32 = vpop.f32.mrb[162].mxu1 }
 0x6ed   :  { %v3275_v35 = vpack.c.bf16 %v3182_v62, %v3178_v2  ;;  %v2933_v1 = vadd.f32 %v2932_v39, %v10206_v4  ;;  %v2934_v5 = vpop.f32.mrb[149].mxu0  ;;  %v3601_v63 = vrot.slane %v3600_v53, 1  ;;  %v3761_v6 = vsel %vm3539_vm1, %v3715_v14, 0.0  ;;  %v3041_v54 = vpop.f32.mrb[163].mxu1  ;;  %v4460_v39 = vld [vmem:[%s11804_s1 + $0x8] sm:$0xff] }
 0x6ee   :  { %v2935_v43 = vadd.f32 %v2934_v5, %v10212_v51  ;;  %v2936_v18 = vpop.f32.mrb[150].mxu0  ;;  %v3276_v0 = vpack.c.bf16 %v3183_v48, %v3179_v16  ;;  %v3606_v40 = vrot.slane %v3605_v61, 4  ;;  %3762 = vadd.xlane.f32.xlu1 %v3761_v6  ;;  %v10251_v23 = vadd.f32 %v3037_v19, %v10243_v27  ;;  %v4459_v16 = vld [vmem:[%s11804_s1] sm:$0xff] }
 0x6ef   :  { %v3122_v7 = vmul.f32 0.01, %v2933_v1  ;;  %v2937_v34 = vadd.f32 %v2936_v18, %v10206_v4  ;;  %v2938_v42 = vpop.f32.mrb[151].mxu0  ;;  %v3602_v59 = vadd.f32 %v3601_v63, %v3600_v53  ;;  %v3116_v28 = vmul.f32 0.01, %v3036_v60 }
 0x6f0   :  { %v3123_v24 = vmul.f32 0.01, %v2935_v43  ;;  %v2939_v25 = vadd.f32 %v2938_v42, %v10212_v51  ;;  %3345 = vmatprep.mubr.bf16.mxu0 %v3276_v0  ;;  %v3607_v46 = vadd.f32 %v3606_v40, %v3605_v61  ;;  %v3040_v10 = vadd.f32 %v3039_v32, %v10231_v49  ;;  %v3045_v42 = vpop.f32.mrb[164].mxu1 }
 0x6f1   :  { %v3126_v13 = vmul.f32 0.01, %v2937_v34  ;;  %3346 = vmatmul.mubr.bf16.vlgmr.msra.gmra.mrb[176].mxu0 %v3275_v35  ;;  %v10246_v37 = vmul.f32 0.0625, %v3602_v59  ;;  %v3186_v58 = vmax.f32 %v2933_v1, %v3122_v7  ;;  %v3180_v35 = vmax.f32 %v3036_v60, %v3116_v28  ;;  %v10281_v28 = vld [vmem:[%s11804_s1 + $0x10] sm:$0xff] }
 0x6f2   :  { %v3127_v50 = vmul.f32 0.01, %v2939_v25  ;;  %4508 = vmatpush1.bf16.msra.mxu0 %v7556_v31  ;;  %v3187_v36 = vmax.f32 %v2935_v43, %v3123_v24  ;;  %v3608_v41 = vrot.slane %v3607_v46, 2  ;;  %v3120_v1 = vmul.f32 0.01, %v3040_v10 }
 0x6f3   :  { %12707 = vst [vmem:[#allocation22_spill] sm:$0xff] %v10246_v37  ;;  %v3190_v26 = vmax.f32 %v2937_v34, %v3126_v13  ;;  %4758 = vmatprep.subr.bf16.mxu0 %v12423_v57  ;;  %v3117_v63 = vmul.f32 0.01, %v10251_v23  ;;  %v3042_v0 = vadd.f32 %v3041_v54, %v10243_v27  ;;  %v4470_v34 = vpack.c.bf16 %v4460_v39, %v4459_v16  ;;  %v3047_v13 = vpop.f32.mrb[165].mxu1  ;;  %v4614_v39 = vld [vmem:[#allocation2 + $0xa10] sm:$0xff] }
 0x6f4   :  { %v3191_v56 = vmax.f32 %v2939_v25, %v3127_v50  ;;  %v2942_v12 = vpop.f32.mrb[152].mxu0  ;;  %v3609_v2 = vadd.f32 %v3608_v41, %v3607_v46  ;;  %v3184_v18 = vmax.f32 %v3040_v10, %v3120_v1  ;;  %v3046_v25 = vadd.f32 %v3045_v42, %v10231_v49  ;;  %v3049_v60 = vpop.f32.mrb[166].mxu1 }
 0x6f5   :  { %v2943_v30 = vadd.f32 %v2942_v12, %v10206_v4  ;;  %v2944_v15 = vpop.f32.mrb[153].mxu0  ;;  %v3279_v9 = vpack.c.bf16 %v3190_v26, %v3186_v58  ;;  %v3121_v40 = vmul.f32 0.01, %v3042_v0  ;;  %v3181_v58 = vmax.f32 %v10251_v23, %v3117_v63  ;;  %v3051_v32 = vpop.f32.mrb[167].mxu1 }
 0x6f6   :  { %v2945_v62 = vadd.f32 %v2944_v15, %v10212_v51  ;;  %v2946_v45 = vpop.f32.mrb[154].mxu0  ;;  %v3280_v20 = vpack.c.bf16 %v3191_v56, %v3187_v36  ;;  %v3610_v5 = vrot.slane %v3609_v2, 1  ;;  %v10267_v24 = vpack.c.bf16 %v3184_v18, %v3180_v35 }
 0x6f7   :  { %v3130_v53 = vmul.f32 0.01, %v2943_v30  ;;  %v2947_v48 = vadd.f32 %v2946_v45, %v10206_v4  ;;  %v2948_v22 = vpop.f32.mrb[155].mxu0  ;;  %v10274_v26 = vadd.f32 %v3047_v13, %v10243_v27  ;;  %v3185_v56 = vmax.f32 %v3042_v0, %v3121_v40  ;;  %v3055_v0 = vpop.f32.mrb[168].mxu1 }
 0x6f8   :  { %v3131_v52 = vmul.f32 0.01, %v2945_v62  ;;  %v2949_v14 = vadd.f32 %v2948_v22, %v10212_v51  ;;  %3353 = vmatprep.mubr.bf16.mxu0 %v3280_v20  ;;  %v3611_v31 = vadd.f32 %v3610_v5, %v3609_v2  ;;  %v3124_v12 = vmul.f32 0.01, %v3046_v25  ;;  %v3057_v42 = vpop.f32.mrb[169].mxu1 }
 0x6f9   :  { %v3194_v43 = vmax.f32 %v2943_v30, %v3130_v53  ;;  %v3134_v61 = vmul.f32 0.01, %v2947_v48  ;;  %3354 = vmatmul.mubr.bf16.gmra.mrb[180].mxu0 %v3279_v9  ;;  %v3050_v23 = vadd.f32 %v3049_v60, %v10231_v49  ;;  %v10291_v45 = vmul.f32 0.01, %v10274_v26 }
 0x6fa   :  { %v3195_v7 = vmax.f32 %v2945_v62, %v3131_v52  ;;  %v3135_v6 = vmul.f32 0.01, %v2949_v14  ;;  %4539 = vmatprep.mubr.bf16.mxu0 %v12423_v57  ;;  %v10270_v46 = vmul.f32 0.0625, %v3611_v31  ;;  %v10288_v62 = vld [vmem:[%s11804_s1 + $0x18] sm:$0xff]  ;;  %v10294_v20 = vadd.f32 %v3051_v32, %v10243_v27 }
 0x6fb   :  { %v3198_v59 = vmax.f32 %v2947_v48, %v3134_v61  ;;  %v3188_v48 = vmax.f32 %v3046_v25, %v3124_v12  ;;  %v3128_v22 = vmul.f32 0.01, %v3050_v23  ;;  %v10299_v52 = vpack.c.bf16 %v3185_v56, %v3181_v58  ;;  %v12709_v61 = vld [vmem:[#allocation69_spill] sm:$0xff] }
 0x6fc   :  { %12708 = vst [vmem:[#allocation38_spill] sm:$0xff] %v10270_v46  ;;  %v3199_v50 = vmax.f32 %v2949_v14, %v3135_v6  ;;  %v2952_v29 = vpop.f32.mrb[156].mxu0  ;;  %v3129_v5 = vmul.f32 0.01, %v10294_v20  ;;  %v3189_v6 = vmax.f32 %v10274_v26, %v10291_v45  ;;  %v3058_v13 = vadd.f32 %v3057_v42, %v10243_v27  ;;  %v4617_v58 = vld [vmem:[#allocation2 + $0xa30] sm:$0xff] }
 0x6fd   :  { %v3283_v19 = vpack.c.bf16 %v3198_v59, %v3194_v43  ;;  %v2953_v36 = vadd.f32 %v2952_v29, %v10206_v4  ;;  %v2954_v41 = vpop.f32.mrb[157].mxu0  ;;  %v4471_v43 = vpack.c.bf16 %v10288_v62, %v10281_v28  ;;  %v3192_v18 = vmax.f32 %v3050_v23, %v3128_v22  ;;  %v4620_v22 = vld [vmem:[#allocation2 + $0xa50] sm:$0xff] }
 0x6fe   :  { %v2955_v30 = vadd.f32 %v2954_v41, %v10212_v51  ;;  %v2956_v15 = vpop.f32.mrb[158].mxu0  ;;  %v3284_v9 = vpack.c.bf16 %v3199_v50, %v3195_v7  ;;  %v12710_v7 = vld [vmem:[#allocation78_spill] sm:$0xff]  ;;  %v3193_v25 = vmax.f32 %v10294_v20, %v3129_v5  ;;  %v3059_v50 = vpop.f32.mrb[170].mxu1  ;;  %v4464_v5 = vld [vmem:[%s11804_s1 + $0x28] sm:$0xff] }
 0x6ff   :  { %v3138_v10 = vmul.f32 0.01, %v2953_v36  ;;  %v2957_v54 = vadd.f32 %v2956_v15, %v10206_v4  ;;  %v2958_v2 = vpop.f32.mrb[159].mxu0  ;;  %v10311_v29 = vpack.c.bf16 %v3192_v18, %v3188_v48  ;;  %v3060_v41 = vadd.f32 %v3059_v50, %v10231_v49  ;;  %v3061_v56 = vpop.f32.mrb[171].mxu1  ;;  %v12711_v15 = vld [vmem:[#allocation70_spill] sm:$0xff] }
 0x700   :  { %v3139_v16 = vmul.f32 0.01, %v2955_v30  ;;  %v2959_v53 = vadd.f32 %v2958_v2, %v10212_v51  ;;  %3361 = vmatprep.mubr.bf16.mxu1 %v3284_v9  ;;  %v3133_v9 = vmul.f32 0.01, %v3058_v13  ;;  %v3062_v28 = vadd.f32 %v3061_v56, %v10243_v27  ;;  %v12712_v2 = vld [vmem:[#allocation79_spill] sm:$0xff] }
 0x701   :  { %v3202_v35 = vmax.f32 %v2953_v36, %v3138_v10  ;;  %v3142_v1 = vmul.f32 0.01, %v2957_v54  ;;  %3362 = vmatmul.mubr.bf16.vlgmr.msra.gmra.mrb[192].mxu1 %v3283_v19  ;;  %6905 = vmatmul.mubr.msk.bf16.vlgmr.msra.gmra.mrb[184].mxu0 %vm360_vm0, %v4470_v34  ;;  %v3056_v34 = vadd.f32 %v3055_v0, %v10231_v49  ;;  %v3136_v45 = vmul.f32 0.01, %v3060_v41  ;;  %v12713_v0 = vld [vmem:[#allocation71_spill] sm:$0xff] }
 0x702   :  { %v3203_v14 = vmax.f32 %v2955_v30, %v3139_v16  ;;  %v3143_v63 = vmul.f32 0.01, %v2959_v53  ;;  %4549 = vmatprep.mubr.bf16.mxu0 %v12423_v57  ;;  %7124 = vmatpush3.bf16.msra.mxu1 %v12709_v61  ;;  %v3137_v48 = vmul.f32 0.01, %v3062_v28 }
 0x703   :  { %v3206_v31 = vmax.f32 %v2957_v54, %v3142_v1  ;;  %7125 = vmatprep.subr.bf16.mxu1 %v12710_v7  ;;  %4759 = vmatpush1.bf16.msra.mxu0 %v4614_v39  ;;  %v3132_v36 = vmul.f32 0.01, %v3056_v34  ;;  %v4463_v1 = vld [vmem:[%s11804_s1 + $0x20] sm:$0xff]  ;;  %v3065_v7 = vpop.f32.mrb[172].mxu1 }
 0x704   :  { %v3207_v59 = vmax.f32 %v2959_v53, %v3143_v63  ;;  %v2962_v40 = vpop.f32.mrb[160].mxu0  ;;  %4760 = vmatprep.subr.bf16.mxu0 %v12423_v57  ;;  %v3197_v53 = vmax.f32 %v3058_v13, %v3133_v9  ;;  %v10330_v63 = vpack.c.bf16 %v3193_v25, %v3189_v6  ;;  %v3066_v42 = vadd.f32 %v3065_v7, %v10231_v49  ;;  %v12717_v7 = vld [vmem:[#allocation73_spill] sm:$0xff] }
 0x705   :  { %v2963_v60 = vadd.f32 %v2962_v40, %v10206_v4  ;;  %v2964_v19 = vpop.f32.mrb[161].mxu0  ;;  %v3287_v26 = vpack.c.bf16 %v3206_v31, %v3202_v35  ;;  %v3196_v62 = vmax.f32 %v3056_v34, %v3132_v36  ;;  %v3201_v31 = vmax.f32 %v3062_v28, %v3137_v48  ;;  %v12714_v34 = vld [vmem:[#allocation80_spill] sm:$0xff] }
 0x706   :  { %v2965_v12 = vadd.f32 %v2964_v19, %v10212_v51  ;;  %v2966_v32 = vpop.f32.mrb[162].mxu0  ;;  %v3288_v30 = vpack.c.bf16 %v3207_v59, %v3203_v14  ;;  %7126 = vmatpush3.bf16.msra.mxu1 %v12711_v15  ;;  %v3200_v14 = vmax.f32 %v3060_v41, %v3136_v45  ;;  %v3067_v59 = vpop.f32.mrb[173].mxu1  ;;  %v4472_v25 = vpack.c.bf16 %v4464_v5, %v4463_v1  ;;  %v4623_v19 = vld [vmem:[#allocation2 + $0xa70] sm:$0xff]  ;;  %v12715_v28 = vld [vmem:[#allocation72_spill] sm:$0xff] }
 0x707   :  { %v3146_v23 = vmul.f32 0.01, %v2963_v60  ;;  %v2967_v10 = vadd.f32 %v2966_v32, %v10206_v4  ;;  %v2968_v54 = vpop.f32.mrb[163].mxu0  ;;  %7127 = vmatprep.subr.bf16.mxu1 %v12712_v2  ;;  %4761 = vmatpush1.bf16.msra.mxu0 %v4617_v58  ;;  %v3068_v50 = vadd.f32 %v3067_v59, %v10243_v27  ;;  %v3069_v58 = vpop.f32.mrb[174].mxu1  ;;  %v3140_v56 = vmul.f32 0.01, %v3066_v42 }
 0x708   :  { %v3147_v20 = vmul.f32 0.01, %v2965_v12  ;;  %v2969_v16 = vadd.f32 %v2968_v54, %v10212_v51  ;;  %3369 = vmatprep.mubr.bf16.mxu1 %v3288_v30  ;;  %4762 = vmatprep.subr.bf16.mxu0 %v12423_v57  ;;  %v10336_v40 = vpack.c.bf16 %v3200_v14, %v3196_v62  ;;  %v3071_v32 = vpop.f32.mrb[175].mxu1  ;;  %v12716_v45 = vld [vmem:[#allocation81_spill] sm:$0xff]  ;;  %v12718_v59 = vld [vmem:[#allocation82_spill] sm:$0xff] }
 0x709   :  { %v3210_v39 = vmax.f32 %v2963_v60, %v3146_v23  ;;  %v3150_v35 = vmul.f32 0.01, %v2967_v10  ;;  %3370 = vmatmul.mubr.bf16.gmra.mrb[196].mxu1 %v3287_v26  ;;  %6906 = vmatmul.mubr.msk.bf16.gmra.mrb[188].mxu0 %vm360_vm0, %v4471_v43  ;;  %v10339_v60 = vpack.c.bf16 %v3201_v31, %v3197_v53  ;;  %v3141_v23 = vmul.f32 0.01, %v3068_v50  ;;  %v4465_v14 = vld [vmem:[%s11804_s1 + $0x30] sm:$0xff] }
 0x70a   :  { %v3211_v61 = vmax.f32 %v2965_v12, %v3147_v20  ;;  %v3151_v18 = vmul.f32 0.01, %v2969_v16  ;;  %4559 = vmatprep.mubr.bf16.mxu0 %v12423_v57  ;;  %7128 = vmatpush3.bf16.msra.mxu1 %v12713_v0  ;;  %v3070_v12 = vadd.f32 %v3069_v58, %v10231_v49  ;;  %v3204_v20 = vmax.f32 %v3066_v42, %v3140_v56 }
 0x70b   :  { %v3214_v43 = vmax.f32 %v2967_v10, %v3150_v35  ;;  %7129 = vmatprep.subr.bf16.mxu1 %v12714_v34  ;;  %4763 = vmatpush1.bf16.msra.mxu0 %v4620_v22  ;;  %v3072_v10 = vadd.f32 %v3071_v32, %v10243_v27  ;;  %v3205_v22 = vmax.f32 %v3068_v50, %v3141_v23  ;;  %v4626_v35 = vld [vmem:[#allocation2 + $0xa90] sm:$0xff]  ;;  %v3075_v34 = vpop.f32.mrb[176].mxu1 }
 0x70c   :  { %v3215_v13 = vmax.f32 %v2969_v16, %v3151_v18  ;;  %v2972_v6 = vpop.f32.mrb[164].mxu0  ;;  %4764 = vmatprep.subr.bf16.mxu0 %v12423_v57  ;;  %v3144_v16 = vmul.f32 0.01, %v3070_v12 }
 0x70d   :  { %v2973_v26 = vadd.f32 %v2972_v6, %v10206_v4  ;;  %v2974_v36 = vpop.f32.mrb[165].mxu0  ;;  %v3291_v41 = vpack.c.bf16 %v3214_v43, %v3210_v39  ;;  %v3145_v39 = vmul.f32 0.01, %v3072_v10  ;;  %v3077_v6 = vpop.f32.mrb[177].mxu1 }
 0x70e   :  { %v2975_v30 = vadd.f32 %v2974_v36, %v10212_v51  ;;  %v2976_v15 = vpop.f32.mrb[166].mxu0  ;;  %v3292_v9 = vpack.c.bf16 %v3215_v13, %v3211_v61  ;;  %7130 = vmatpush3.bf16.msra.mxu1 %v12715_v28  ;;  %v4466_v61 = vld [vmem:[%s11804_s1 + $0x38] sm:$0xff]  ;;  %v3208_v18 = vmax.f32 %v3070_v12, %v3144_v16  ;;  %v3076_v13 = vadd.f32 %v3075_v34, %v10231_v49  ;;  %v3079_v36 = vpop.f32.mrb[178].mxu1 }
 0x70f   :  { %v3154_v54 = vmul.f32 0.01, %v2973_v26  ;;  %v2977_v2 = vadd.f32 %v2976_v15, %v10206_v4  ;;  %v2978_v62 = vpop.f32.mrb[167].mxu0  ;;  %7131 = vmatprep.subr.bf16.mxu1 %v12716_v45  ;;  %4765 = vmatpush1.bf16.msra.mxu0 %v4623_v19  ;;  %v3209_v43 = vmax.f32 %v3072_v10, %v3145_v39  ;;  %v4473_v19 = vpack.c.bf16 %v4466_v61, %v4465_v14 }
 0x710   :  { %v3155_v53 = vmul.f32 0.01, %v2975_v30  ;;  %v2979_v48 = vadd.f32 %v2978_v62, %v10212_v51  ;;  %3377 = vmatprep.mubr.bf16.mxu1 %v3292_v9  ;;  %4766 = vmatprep.subr.bf16.mxu0 %v12423_v57  ;;  %v3080_v15 = vadd.f32 %v3079_v36, %v10231_v49  ;;  %v3081_v9 = vpop.f32.mrb[179].mxu1 }
 0x711   :  { %v3218_v1 = vmax.f32 %v2973_v26, %v3154_v54  ;;  %v3158_v5 = vmul.f32 0.01, %v2977_v2  ;;  %3378 = vmatmul.mubr.bf16.gmra.mrb[200].mxu1 %v3291_v41  ;;  %6907 = vmatmul.mubr.msk.bf16.gmra.mrb[192].mxu0 %vm360_vm0, %v4472_v25  ;;  %v10362_v25 = vpack.c.bf16 %v3208_v18, %v3204_v20  ;;  %v3078_v26 = vadd.f32 %v3077_v6, %v10243_v27  ;;  %v12719_v54 = vld [vmem:[#allocation74_spill] sm:$0xff]  ;;  %v3085_v34 = vpop.f32.mrb[180].mxu1 }
 0x712   :  { %v3219_v0 = vmax.f32 %v2975_v30, %v3155_v53  ;;  %v3159_v31 = vmul.f32 0.01, %v2979_v48  ;;  %4569 = vmatprep.mubr.bf16.mxu0 %v12423_v57  ;;  %7132 = vmatpush3.bf16.msra.mxu1 %v12717_v7  ;;  %v10365_v41 = vpack.c.bf16 %v3209_v43, %v3205_v22  ;;  %v3148_v30 = vmul.f32 0.01, %v3076_v13  ;;  %v12720_v53 = vld [vmem:[#allocation83_spill] sm:$0xff]  ;;  %v3087_v6 = vpop.f32.mrb[181].mxu1 }
 0x713   :  { %v3222_v42 = vmax.f32 %v2977_v2, %v3158_v5  ;;  %7133 = vmatprep.subr.bf16.mxu1 %v12718_v59  ;;  %4767 = vmatpush1.bf16.msra.mxu0 %v4626_v35  ;;  %v3149_v2 = vmul.f32 0.01, %v3078_v26  ;;  %v3082_v62 = vadd.f32 %v3081_v9, %v10243_v27  ;;  %v3152_v22 = vmul.f32 0.01, %v3080_v15  ;;  %v12721_v7 = vld [vmem:[#allocation75_spill] sm:$0xff]  ;;  %v12722_v59 = vld [vmem:[#allocation84_spill] sm:$0xff] }
 0x714   :  { %v3223_v50 = vmax.f32 %v2979_v48, %v3159_v31  ;;  %v2982_v58 = vpop.f32.mrb[168].mxu0  ;;  %4768 = vmatprep.subr.bf16.mxu0 %v12423_v57  ;;  %v3212_v48 = vmax.f32 %v3076_v13, %v3148_v30  ;;  %v3086_v13 = vadd.f32 %v3085_v34, %v10231_v49  ;;  %v3088_v36 = vadd.f32 %v3087_v6, %v10243_v27 }
 0x715   :  { %v2983_v56 = vadd.f32 %v2982_v58, %v10206_v4  ;;  %v2984_v12 = vpop.f32.mrb[169].mxu0  ;;  %v3295_v32 = vpack.c.bf16 %v3222_v42, %v3218_v1  ;;  %v3213_v1 = vmax.f32 %v3078_v26, %v3149_v2  ;;  %v3153_v5 = vmul.f32 0.01, %v3082_v62 }
 0x716   :  { %v2985_v28 = vadd.f32 %v2984_v12, %v10212_v51  ;;  %v2986_v23 = vpop.f32.mrb[170].mxu0  ;;  %v3296_v10 = vpack.c.bf16 %v3223_v50, %v3219_v0  ;;  %7134 = vmatpush3.bf16.msra.mxu1 %v12719_v54  ;;  %v3216_v18 = vmax.f32 %v3080_v15, %v3152_v22  ;;  %v4613_v12 = vld [vmem:[#allocation2 + $0xa08] sm:$0xff]  ;;  %v3156_v9 = vmul.f32 0.01, %v3086_v13 }
 0x717   :  { %v3162_v45 = vmul.f32 0.01, %v2983_v56  ;;  %v2987_v20 = vadd.f32 %v2986_v23, %v10206_v4  ;;  %v2988_v16 = vpop.f32.mrb[171].mxu0  ;;  %7135 = vmatprep.subr.bf16.mxu1 %v12720_v53  ;;  %v3217_v43 = vmax.f32 %v3082_v62, %v3153_v5  ;;  %v12723_v62 = vld [vmem:[#allocation76_spill] sm:$0xff] }
 0x718   :  { %v3163_v39 = vmul.f32 0.01, %v2985_v28  ;;  %v2989_v35 = vadd.f32 %v2988_v16, %v10212_v51  ;;  %3385 = vmatprep.mubr.bf16.mxu1 %v3296_v10  ;;  %v10380_v50 = vpack.c.bf16 %v3216_v18, %v3212_v48  ;;  %v3220_v22 = vmax.f32 %v3086_v13, %v3156_v9 }
 0x719   :  { %v3226_v14 = vmax.f32 %v2983_v56, %v3162_v45  ;;  %v3166_v61 = vmul.f32 0.01, %v2987_v20  ;;  %3386 = vmatmul.mubr.bf16.gmra.mrb[204].mxu1 %v3295_v32  ;;  %6908 = vmatmul.mubr.msk.bf16.gmra.mrb[196].mxu0 %vm360_vm0, %v4473_v19  ;;  %v3089_v19 = vpop.f32.mrb[182].mxu1  ;;  %v10383_v56 = vpack.c.bf16 %v3217_v43, %v3213_v1  ;;  %v3157_v45 = vmul.f32 0.01, %v3088_v36 }
 0x71a   :  { %v3227_v0 = vmax.f32 %v2985_v28, %v3163_v39  ;;  %v3167_v31 = vmul.f32 0.01, %v2989_v35  ;;  %7136 = vmatpush3.bf16.msra.mxu1 %v12721_v7  ;;  %v3090_v28 = vadd.f32 %v3089_v19, %v10231_v49  ;;  %v3091_v23 = vpop.f32.mrb[183].mxu1 }
 0x71b   :  { %v3230_v42 = vmax.f32 %v2987_v20, %v3166_v61  ;;  %7137 = vmatprep.subr.bf16.mxu1 %v12722_v59  ;;  %v3092_v20 = vadd.f32 %v3091_v23, %v10243_v27  ;;  %v3221_v5 = vmax.f32 %v3088_v36, %v3157_v45  ;;  %v3095_v34 = vpop.f32.mrb[184].mxu1 }
 0x71c   :  { %v3231_v58 = vmax.f32 %v2989_v35, %v3167_v31  ;;  %v2992_v26 = vpop.f32.mrb[172].mxu0  ;;  %v3160_v39 = vmul.f32 0.01, %v3090_v28  ;;  %v3097_v59 = vpop.f32.mrb[185].mxu1 }
 0x71d   :  { %v2993_v32 = vadd.f32 %v2992_v26, %v10206_v4  ;;  %v2994_v30 = vpop.f32.mrb[173].mxu0  ;;  %v3299_v15 = vpack.c.bf16 %v3230_v42, %v3226_v14  ;;  %v3161_v14 = vmul.f32 0.01, %v3092_v20 }
 0x71e   :  { %v2995_v10 = vadd.f32 %v2994_v30, %v10212_v51  ;;  %v2996_v54 = vpop.f32.mrb[174].mxu0  ;;  %v3300_v2 = vpack.c.bf16 %v3231_v58, %v3227_v0  ;;  %7138 = vmatpush3.bf16.msra.mxu1 %v12723_v62  ;;  %v3224_v0 = vmax.f32 %v3090_v28, %v3160_v39  ;;  %v3099_v58 = vpop.f32.mrb[186].mxu1 }
 0x71f   :  { %v3170_v16 = vmul.f32 0.01, %v2993_v32  ;;  %v2997_v53 = vadd.f32 %v2996_v54, %v10206_v4  ;;  %v2998_v48 = vpop.f32.mrb[175].mxu0  ;;  %4685 = vmatprep.subr.bf16.mxu1 %v4613_v12  ;;  %v3225_v43 = vmax.f32 %v3092_v20, %v3161_v14  ;;  %v3096_v4 = vadd.f32 %v3095_v34, %v10231_v49 }
 0x720   :  { %v3171_v35 = vmul.f32 0.01, %v2995_v10  ;;  %v2999_v1 = vadd.f32 %v2998_v48, %v10212_v51  ;;  %3393 = vmatprep.mubr.bf16.mxu1 %v3300_v2  ;;  %v10393_v13 = vpack.c.bf16 %v3224_v0, %v3220_v22  ;;  %v3098_v51 = vadd.f32 %v3097_v59, %v10243_v27  ;;  %v4612_v0 = vld [vmem:[#allocation2 + $0xa00] sm:$0xff] }
 0x721   :  { %v3234_v61 = vmax.f32 %v2993_v32, %v3170_v16  ;;  %v3174_v18 = vmul.f32 0.01, %v2997_v53  ;;  %3394 = vmatmul.mubr.bf16.gmra.mrb[208].mxu1 %v3299_v15  ;;  %v10396_v26 = vpack.c.bf16 %v3225_v43, %v3221_v5  ;;  %v3164_v19 = vmul.f32 0.01, %v3096_v4  ;;  %v3101_v32 = vpop.f32.mrb[187].mxu1  ;;  %v4616_v43 = vld [vmem:[#allocation2 + $0xa28] sm:$0xff] }
 0x722   :  { %v3235_v31 = vmax.f32 %v2995_v10, %v3171_v35  ;;  %v3175_v7 = vmul.f32 0.01, %v2999_v1  ;;  %v3100_v12 = vadd.f32 %v3099_v58, %v10231_v49  ;;  %v3165_v15 = vmul.f32 0.01, %v3098_v51  ;;  %v3105_v45 = vpop.f32.mrb[188].mxu1  ;;  %v4624_v58 = vld [vmem:[#allocation2 + $0xa80] sm:$0xff] }
 0x723   :  { %v3238_v42 = vmax.f32 %v2997_v53, %v3174_v18  ;;  %v3102_v9 = vadd.f32 %v3101_v32, %v10243_v27  ;;  %v3228_v28 = vmax.f32 %v3096_v4, %v3164_v19  ;;  %v3106_v20 = vadd.f32 %v3105_v45, %v10231_v49  ;;  %v3107_v16 = vpop.f32.mrb[189].mxu1  ;;  %v4627_v19 = vld [vmem:[#allocation2 + $0xaa0] sm:$0xff]  ;;  %v4634_v32 = vld [vmem:[#allocation2 + $0xae8] sm:$0xff] }
 0x724   :  { %v3239_v6 = vmax.f32 %v2999_v1, %v3175_v7  ;;  %v3168_v23 = vmul.f32 0.01, %v3100_v12  ;;  %v3229_v10 = vmax.f32 %v3098_v51, %v3165_v15  ;;  %v3108_v48 = vadd.f32 %v3107_v16, %v10243_v27  ;;  %v3109_v22 = vpop.f32.mrb[190].mxu1  ;;  %v4622_v51 = vld [vmem:[#allocation2 + $0xa68] sm:$0xff]  ;;  %v4636_v15 = vld [vmem:[#allocation2 + $0xb00] sm:$0xff] }
 0x725   :  { %v3303_v36 = vpack.c.bf16 %v3238_v42, %v3234_v61  ;;  %v3169_v54 = vmul.f32 0.01, %v3102_v9  ;;  %v3172_v35 = vmul.f32 0.01, %v3106_v20  ;;  %v3110_v1 = vadd.f32 %v3109_v22, %v10231_v49  ;;  %v3111_v5 = vpop.f32.mrb[191].mxu1  ;;  %v4615_v49 = vld [vmem:[#allocation2 + $0xa20] sm:$0xff] }
 0x726   :  { %v3304_v30 = vpack.c.bf16 %v3239_v6, %v3235_v31  ;;  %v3232_v2 = vmax.f32 %v3100_v12, %v3168_v23  ;;  %v3173_v14 = vmul.f32 0.01, %v3108_v48  ;;  %v3112_v61 = vadd.f32 %v3111_v5, %v10243_v27  ;;  %v4619_v27 = vld [vmem:[#allocation2 + $0xa48] sm:$0xff]  ;;  %v4618_v6 = vld [vmem:[#allocation2 + $0xa40] sm:$0xff]  ;;  %v4641_v23 = vld [vmem:[#allocation2 + $0xb30] sm:$0xff] }
 0x727   :  { %v3233_v62 = vmax.f32 %v3102_v9, %v3169_v54  ;;  %v3176_v18 = vmul.f32 0.01, %v3110_v1  ;;  %v4631_v12 = vld [vmem:[#allocation2 + $0xac8] sm:$0xff]  ;;  %v4635_v9 = vld [vmem:[#allocation2 + $0xaf0] sm:$0xff] }
 0x728   :  { %3401 = vmatprep.mubr.bf16.mxu1 %v3304_v30  ;;  %v10402_v53 = vpack.c.bf16 %v3232_v2, %v3228_v28  ;;  %v3237_v31 = vmax.f32 %v3108_v48, %v3173_v14  ;;  %v3177_v7 = vmul.f32 0.01, %v3112_v61  ;;  %v4632_v30 = vld [vmem:[#allocation2 + $0xad0] sm:$0xff]  ;;  %v4639_v28 = vld [vmem:[#allocation2 + $0xb20] sm:$0xff]  ;;  %v4646_v54 = vld [vmem:[#allocation2 + $0xb68] sm:$0xff] }
 0x729   :  { %3402 = vmatmul.mubr.bf16.gmra.mrb[212].mxu1 %v3303_v36  ;;  %v10405_v39 = vpack.c.bf16 %v3233_v62, %v3229_v10  ;;  %v3240_v34 = vmax.f32 %v3110_v1, %v3176_v18  ;;  %v4628_v36 = vld [vmem:[#allocation2 + $0xaa8] sm:$0xff]  ;;  %v4644_v10 = vld [vmem:[#allocation2 + $0xb50] sm:$0xff]  ;;  %v4645_v2 = vld [vmem:[#allocation2 + $0xb60] sm:$0xff] }
 0x72a   :  { %3442 = vmatprep.mubr.bf16.mxu1 %v10299_v52  ;;  %v3236_v52 = vmax.f32 %v3106_v20, %v3172_v35  ;;  %v3241_v42 = vmax.f32 %v3112_v61, %v3177_v7  ;;  %v4647_v62 = vld [vmem:[#allocation2 + $0xb70] sm:$0xff] }
 0x72c   :  { %v10411_v4 = vpack.c.bf16 %v3240_v34, %v3236_v52  ;;  %v10413_v59 = vpack.c.bf16 %v3241_v42, %v3237_v31  ;;  %v4872_v42 = vld [vmem:[#allocation2 + $0xb88] sm:$0xff] }
 0x731   :  { %3443 = vmatmul.mubr.bf16.vlgmr.msra.gmra.mrb[216].mxu1 %v10267_v24  ;;  %v4621_v24 = vld [vmem:[#allocation2 + $0xa60] sm:$0xff] }
 0x732   :  { %3450 = vmatprep.mubr.bf16.mxu1 %v10330_v63  ;;  %4686 = vmatpush1.bf16.msra.mxu1 %v4612_v0  ;;  %v4625_v63 = vld [vmem:[#allocation2 + $0xa88] sm:$0xff] }
 0x733   :  { %4687 = vmatprep.subr.bf16.mxu1 %v4616_v43 }
 0x736   :  { %4688 = vmatpush1.bf16.msra.mxu1 %v4615_v49 }
 0x737   :  { %4689 = vmatprep.subr.bf16.mxu1 %v4619_v27 }
 0x739   :  { %3451 = vmatmul.mubr.bf16.gmra.mrb[220].mxu1 %v10311_v29  ;;  %v4630_v29 = vld [vmem:[#allocation2 + $0xac0] sm:$0xff] }
 0x73a   :  { %3458 = vmatprep.mubr.bf16.mxu1 %v10339_v60  ;;  %4690 = vmatpush1.bf16.msra.mxu1 %v4618_v6  ;;  %v4629_v60 = vld [vmem:[#allocation2 + $0xab0] sm:$0xff] }
 0x73b   :  { %4691 = vmatprep.subr.bf16.mxu1 %v4622_v51  ;;  %4769 = vmatpush1.bf16.msra.mxu0 %v4629_v60 }
 0x73c   :  { %4770 = vmatprep.subr.bf16.mxu0 %v12423_v57 }
 0x73e   :  { %4692 = vmatpush1.bf16.msra.mxu1 %v4621_v24 }
 0x73f   :  { %4693 = vmatprep.subr.bf16.mxu1 %v4625_v63  ;;  %4771 = vmatpush1.bf16.msra.mxu0 %v4632_v30 }
 0x740   :  { %4772 = vmatprep.subr.bf16.mxu0 %v12423_v57 }
 0x741   :  { %3459 = vmatmul.mubr.bf16.gmra.mrb[224].mxu1 %v10336_v40  ;;  %v4633_v40 = vld [vmem:[#allocation2 + $0xae0] sm:$0xff] }
 0x742   :  { %3466 = vmatprep.mubr.bf16.mxu1 %v10365_v41  ;;  %4694 = vmatpush1.bf16.msra.mxu1 %v4624_v58  ;;  %v4637_v41 = vld [vmem:[#allocation2 + $0xb08] sm:$0xff] }
 0x743   :  { %4695 = vmatprep.subr.bf16.mxu1 %v4628_v36  ;;  %4773 = vmatpush1.bf16.msra.mxu0 %v4635_v9 }
 0x744   :  { %4774 = vmatprep.subr.bf16.mxu0 %v12423_v57 }
 0x746   :  { %4696 = vmatpush1.bf16.msra.mxu1 %v4627_v19 }
 0x747   :  { %4697 = vmatprep.subr.bf16.mxu1 %v4631_v12 }
 0x749   :  { %3467 = vmatmul.mubr.bf16.gmra.mrb[228].mxu1 %v10362_v25  ;;  %v4640_v25 = vld [vmem:[#allocation2 + $0xb28] sm:$0xff] }
 0x74a   :  { %3474 = vmatprep.mubr.bf16.mxu1 %v10383_v56  ;;  %4698 = vmatpush1.bf16.msra.mxu1 %v4630_v29  ;;  %v4638_v56 = vld [vmem:[#allocation2 + $0xb10] sm:$0xff] }
 0x74b   :  { %4699 = vmatprep.subr.bf16.mxu1 %v4634_v32  ;;  %4775 = vmatpush1.bf16.msra.mxu0 %v4638_v56 }
 0x74c   :  { %4776 = vmatprep.subr.bf16.mxu0 %v12423_v57 }
 0x74e   :  { %4700 = vmatpush1.bf16.msra.mxu1 %v4633_v40 }
 0x74f   :  { %4701 = vmatprep.subr.bf16.mxu1 %v4637_v41  ;;  %4777 = vmatpush1.bf16.msra.mxu0 %v4641_v23 }
 0x750   :  { %4778 = vmatprep.subr.bf16.mxu0 %v12423_v57 }
 0x751   :  { %3475 = vmatmul.mubr.bf16.gmra.mrb[232].mxu1 %v10380_v50  ;;  %v4643_v50 = vld [vmem:[#allocation2 + $0xb48] sm:$0xff] }
 0x752   :  { %3482 = vmatprep.mubr.bf16.mxu1 %v10396_v26  ;;  %4702 = vmatpush1.bf16.msra.mxu1 %v4636_v15  ;;  %v4642_v26 = vld [vmem:[#allocation2 + $0xb40] sm:$0xff] }
 0x753   :  { %4703 = vmatprep.subr.bf16.mxu1 %v4640_v25  ;;  %4779 = vmatpush1.bf16.msra.mxu0 %v4644_v10 }
 0x754   :  { %4780 = vmatprep.subr.bf16.mxu0 %v12423_v57 }
 0x756   :  { %4704 = vmatpush1.bf16.msra.mxu1 %v4639_v28 }
 0x757   :  { %4705 = vmatprep.subr.bf16.mxu1 %v4643_v50  ;;  %4781 = vmatpush1.bf16.msra.mxu0 %v4647_v62 }
 0x759   :  { %3483 = vmatmul.mubr.bf16.gmra.mrb[236].mxu1 %v10393_v13 }
 0x75a   :  { %3490 = vmatprep.mubr.bf16.mxu1 %v10405_v39  ;;  %4706 = vmatpush1.bf16.msra.mxu1 %v4642_v26 }
 0x75b   :  { %4707 = vmatprep.subr.bf16.mxu1 %v4646_v54 }
 0x75e   :  { %4708 = vmatpush1.bf16.msra.mxu1 %v4645_v2 }
 0x75f   :  { %5001 = vmatprep.subr.bf16.mxu1 %v4872_v42  ;;  %v4875_v42 = vld [vmem:[#allocation2 + $0xba0] sm:$0xff] }
 0x761   :  { %3491 = vmatmul.mubr.bf16.gmra.mrb[240].mxu1 %v10402_v53  ;;  %v4469_v53 = vld [vmem:[#allocation9 + $0x18] sm:$0x3] }
 0x762   :  { %3498 = vmatprep.mubr.bf16.mxu1 %v10413_v59  ;;  %v10443_v52 = vrot.slane %v4469_v53, %v12701_v8  ;;  %v10446_v18 = vrot.slane %v4469_v53, %v12702_v47 }
 0x769   :  { %3499 = vmatmul.mubr.bf16.gmra.mrb[244].mxu1 %v10411_v4  ;;  %v4874_v4 = vld [vmem:[#allocation2 + $0xb98] sm:$0xff] }
 0x76a   :  { %5147 = vmatprep.subr.bf16.mxu0 %v4874_v4  ;;  %v4877_v4 = vld [vmem:[#allocation2 + $0xbb0] sm:$0xff] }
 0x7c4   :  { %v7075_v13 = vpop.f32.mrb[176].mxu0 }
 0x7c5   :  { %v7076_v45 = vpop.f32.mrb[177].mxu0 }
 0x7c6   :  { %v10434_v20 = vadd.f32 %v7076_v45, %v7075_v13  ;;  %v7078_v16 = vpop.f32.mrb[178].mxu0 }
 0x7c7   :  { %v7079_v48 = vpop.f32.mrb[179].mxu0 }
 0x7c8   :  { %v10436_v22 = vadd.f32 %v7079_v48, %v7078_v16  ;;  %v4871_v48 = vld [vmem:[#allocation2 + $0xb80] sm:$0xff] }
 0x7cc   :  { %v7081_v39 = vpop.f32.mrb[180].mxu0 }
 0x7cd   :  { %v7082_v35 = vpop.f32.mrb[181].mxu0 }
 0x7ce   :  { %v10438_v1 = vadd.f32 %v7082_v35, %v7081_v39  ;;  %v7084_v5 = vpop.f32.mrb[182].mxu0  ;;  %v4873_v39 = vld [vmem:[#allocation2 + $0xb90] sm:$0xff] }
 0x7cf   :  { %v7085_v14 = vpop.f32.mrb[183].mxu0 }
 0x7d0   :  { %v10440_v61 = vadd.f32 %v7085_v14, %v7084_v5  ;;  %v4876_v14 = vld [vmem:[#allocation2 + $0xba8] sm:$0xff] }
 0x7d4   :  { %v4541_v0 = vpop.f32.mrb[184].mxu0  ;;  %v7087_v31 = vpop.f32.mrb[192].mxu1 }
 0x7d5   :  { %v4542_v7 = vadd.f32 %v4541_v0, %v10443_v52  ;;  %v4543_v43 = vpop.f32.mrb[185].mxu0  ;;  %v7088_v34 = vpop.f32.mrb[193].mxu1  ;;  %v4878_v0 = vld [vmem:[#allocation2 + $0xbb8] sm:$0xff] }
 0x7d6   :  { %v4544_v49 = vadd.f32 %v4543_v43, %v10446_v18  ;;  %v4545_v59 = vpop.f32.mrb[186].mxu0  ;;  %v10450_v27 = vadd.f32 %v7088_v34, %v7087_v31  ;;  %v7090_v6 = vpop.f32.mrb[194].mxu1 }
 0x7d7   :  { %v4580_v51 = vmul.f32 0.01, %v4542_v7  ;;  %v4546_v24 = vadd.f32 %v4545_v59, %v10443_v52  ;;  %v4547_v63 = vpop.f32.mrb[187].mxu0  ;;  %v7091_v58 = vpop.f32.mrb[195].mxu1 }
 0x7d8   :  { %v4581_v36 = vmul.f32 0.01, %v4544_v49  ;;  %v4548_v19 = vadd.f32 %v4547_v63, %v10446_v18  ;;  %v10454_v12 = vadd.f32 %v7091_v58, %v7090_v6  ;;  %v4882_v63 = vld [vmem:[#allocation2 + $0xbd8] sm:$0xff] }
 0x7d9   :  { %v4582_v29 = vmul.f32 0.01, %v4546_v24  ;;  %v4596_v32 = vmax.f32 %v4542_v7, %v4580_v51 }
 0x7da   :  { %v4583_v60 = vmul.f32 0.01, %v4548_v19  ;;  %v4597_v40 = vmax.f32 %v4544_v49, %v4581_v36 }
 0x7db   :  { %v4598_v30 = vmax.f32 %v4546_v24, %v4582_v29  ;;  %v4880_v24 = vld [vmem:[#allocation2 + $0xbc8] sm:$0xff] }
 0x7dc   :  { %v4599_v41 = vmax.f32 %v4548_v19, %v4583_v60  ;;  %v4551_v15 = vpop.f32.mrb[188].mxu0  ;;  %v7093_v9 = vpop.f32.mrb[196].mxu1 }
 0x7dd   :  { %v4649_v25 = vpack.c.bf16 %v4598_v30, %v4596_v32  ;;  %v4552_v56 = vadd.f32 %v4551_v15, %v10443_v52  ;;  %v4553_v28 = vpop.f32.mrb[189].mxu0  ;;  %v7094_v23 = vpop.f32.mrb[197].mxu1 }
 0x7de   :  { %v4650_v50 = vpack.c.bf16 %v4599_v41, %v4597_v40  ;;  %v4554_v26 = vadd.f32 %v4553_v28, %v10446_v18  ;;  %v4555_v10 = vpop.f32.mrb[190].mxu0  ;;  %v10458_v54 = vadd.f32 %v7094_v23, %v7093_v9  ;;  %v7096_v2 = vpop.f32.mrb[198].mxu1  ;;  %v4879_v28 = vld [vmem:[#allocation2 + $0xbc0] sm:$0xff]  ;;  %v4881_v23 = vld [vmem:[#allocation2 + $0xbd0] sm:$0xff] }
 0x7df   :  { %v4584_v62 = vmul.f32 0.01, %v4552_v56  ;;  %v4556_v13 = vadd.f32 %v4555_v10, %v10443_v52  ;;  %v4557_v45 = vpop.f32.mrb[191].mxu0  ;;  %v7097_v16 = vpop.f32.mrb[199].mxu1 }
 0x7e0   :  { %v4585_v35 = vmul.f32 0.01, %v4554_v26  ;;  %v4558_v5 = vadd.f32 %v4557_v45, %v10446_v18  ;;  %6909 = vmatprep.mubr.msk.bf16.mxu1 %vm3539_vm1, %v4650_v50  ;;  %6913 = vmatprep.mubr.msk.bf16.mxu0 %vm3539_vm1, %v4650_v50  ;;  %v10464_v53 = vadd.f32 %v7097_v16, %v7096_v2  ;;  %v4884_v2 = vld [vmem:[#allocation2 + $0xbe8] sm:$0xff] }
 0x7e1   :  { %v4586_v31 = vmul.f32 0.01, %v4556_v13  ;;  %4718 = vmatmul.mubr.bf16.vlgmr.msra.gmra.mrb[248].mxu1 %v4649_v25  ;;  %4791 = vmatmul.mubr.bf16.vlgmr.msra.gmra.mrb[200].mxu0 %v4649_v25  ;;  %v4600_v43 = vmax.f32 %v4552_v56, %v4584_v62  ;;  %v4886_v62 = vld [vmem:[#allocation2 + $0xbf8] sm:$0xff] }
 0x7e2   :  { %v4587_v7 = vmul.f32 0.01, %v4558_v5  ;;  %5002 = vmatpush1.bf16.msra.mxu1 %v4871_v48  ;;  %5148 = vmatpush1.bf16.msra.mxu0 %v4873_v39  ;;  %v4601_v49 = vmax.f32 %v4554_v26, %v4585_v35  ;;  %v4883_v39 = vld [vmem:[#allocation2 + $0xbe0] sm:$0xff]  ;;  %v4885_v35 = vld [vmem:[#allocation2 + $0xbf0] sm:$0xff] }
 0x7e3   :  { %v4602_v34 = vmax.f32 %v4556_v13, %v4586_v31  ;;  %5003 = vmatprep.subr.bf16.mxu1 %v4876_v14  ;;  %5149 = vmatprep.subr.bf16.mxu0 %v4878_v0 }
 0x7e4   :  { %v4603_v59 = vmax.f32 %v4558_v5, %v4587_v7  ;;  %v4561_v6 = vpop.f32.mrb[192].mxu0  ;;  %v7099_v51 = vpop.f32.mrb[200].mxu1  ;;  %v4888_v7 = vld [vmem:[#allocation2 + $0xc08] sm:$0xff] }
 0x7e5   :  { %v4562_v58 = vadd.f32 %v4561_v6, %v10443_v52  ;;  %v4563_v36 = vpop.f32.mrb[193].mxu0  ;;  %v4651_v19 = vpack.c.bf16 %v4602_v34, %v4600_v43  ;;  %v7100_v29 = vpop.f32.mrb[201].mxu1  ;;  %v4890_v43 = vld [vmem:[#allocation2 + $0xc18] sm:$0xff] }
 0x7e6   :  { %v4652_v60 = vpack.c.bf16 %v4603_v59, %v4601_v49  ;;  %v4564_v32 = vadd.f32 %v4563_v36, %v10446_v18  ;;  %v4565_v30 = vpop.f32.mrb[194].mxu0  ;;  %v10468_v40 = vadd.f32 %v7100_v29, %v7099_v51  ;;  %v7102_v41 = vpop.f32.mrb[202].mxu1  ;;  %5004 = vmatpush1.bf16.msra.mxu1 %v4875_v42  ;;  %5150 = vmatpush1.bf16.msra.mxu0 %v4877_v4 }
 0x7e7   :  { %v4588_v15 = vmul.f32 0.01, %v4562_v58  ;;  %v4566_v9 = vadd.f32 %v4565_v30, %v10443_v52  ;;  %v4567_v25 = vpop.f32.mrb[195].mxu0  ;;  %v7103_v56 = vpop.f32.mrb[203].mxu1  ;;  %5005 = vmatprep.subr.bf16.mxu1 %v4880_v24  ;;  %5151 = vmatprep.subr.bf16.mxu0 %v4882_v63 }
 0x7e8   :  { %v4589_v50 = vmul.f32 0.01, %v4564_v32  ;;  %v4568_v26 = vadd.f32 %v4567_v25, %v10446_v18  ;;  %6910 = vmatprep.mubr.msk.bf16.mxu1 %vm3539_vm1, %v4652_v60  ;;  %6914 = vmatprep.mubr.msk.bf16.mxu0 %vm3539_vm1, %v4652_v60  ;;  %v10474_v10 = vadd.f32 %v7103_v56, %v7102_v41  ;;  %v4887_v60 = vld [vmem:[#allocation2 + $0xc00] sm:$0xff]  ;;  %v4894_v25 = vld [vmem:[#allocation2 + $0xc38] sm:$0xff] }
 0x7e9   :  { %v4590_v13 = vmul.f32 0.01, %v4566_v9  ;;  %4728 = vmatmul.mubr.bf16.gmra.mrb[252].mxu1 %v4651_v19  ;;  %4799 = vmatmul.mubr.bf16.gmra.mrb[204].mxu0 %v4651_v19  ;;  %v4604_v16 = vmax.f32 %v4562_v58, %v4588_v15 }
 0x7ea   :  { %v4591_v45 = vmul.f32 0.01, %v4568_v26  ;;  %5006 = vmatpush1.bf16.msra.mxu1 %v4879_v28  ;;  %5152 = vmatpush1.bf16.msra.mxu0 %v4881_v23  ;;  %v4605_v5 = vmax.f32 %v4564_v32, %v4589_v50  ;;  %v4889_v32 = vld [vmem:[#allocation2 + $0xc10] sm:$0xff]  ;;  %v4891_v50 = vld [vmem:[#allocation2 + $0xc20] sm:$0xff] }
 0x7eb   :  { %v4606_v48 = vmax.f32 %v4566_v9, %v4590_v13  ;;  %5007 = vmatprep.subr.bf16.mxu1 %v4884_v2  ;;  %5153 = vmatprep.subr.bf16.mxu0 %v4886_v62  ;;  %v4892_v9 = vld [vmem:[#allocation2 + $0xc28] sm:$0xff] }
 0x7ec   :  { %v4607_v14 = vmax.f32 %v4568_v26, %v4591_v45  ;;  %v4571_v0 = vpop.f32.mrb[196].mxu0  ;;  %v7105_v31 = vpop.f32.mrb[204].mxu1  ;;  %v4896_v13 = vld [vmem:[#allocation2 + $0xc48] sm:$0xff]  ;;  %v4898_v45 = vld [vmem:[#allocation2 + $0xc58] sm:$0xff] }
 0x7ed   :  { %v4572_v34 = vadd.f32 %v4571_v0, %v10443_v52  ;;  %v4573_v42 = vpop.f32.mrb[197].mxu0  ;;  %v4653_v4 = vpack.c.bf16 %v4606_v48, %v4604_v16  ;;  %v7106_v49 = vpop.f32.mrb[205].mxu1  ;;  %v4895_v0 = vld [vmem:[#allocation2 + $0xc40] sm:$0xff] }
 0x7ee   :  { %v4654_v59 = vpack.c.bf16 %v4607_v14, %v4605_v5  ;;  %v4574_v6 = vadd.f32 %v4573_v42, %v10446_v18  ;;  %v4575_v51 = vpop.f32.mrb[198].mxu0  ;;  %v10478_v24 = vadd.f32 %v7106_v49, %v7105_v31  ;;  %v7108_v63 = vpop.f32.mrb[206].mxu1  ;;  %5008 = vmatpush1.bf16.msra.mxu1 %v4883_v39  ;;  %5154 = vmatpush1.bf16.msra.mxu0 %v4885_v35  ;;  %v4897_v31 = vld [vmem:[#allocation2 + $0xc50] sm:$0xff]  ;;  %v4899_v42 = vld [vmem:[#allocation2 + $0xc60] sm:$0xff] }
 0x7ef   :  { %v4592_v58 = vmul.f32 0.01, %v4572_v34  ;;  %v4576_v36 = vadd.f32 %v4575_v51, %v10443_v52  ;;  %v4577_v19 = vpop.f32.mrb[199].mxu0  ;;  %v7109_v29 = vpop.f32.mrb[207].mxu1  ;;  %5009 = vmatprep.subr.bf16.mxu1 %v4888_v7  ;;  %5155 = vmatprep.subr.bf16.mxu0 %v4890_v43  ;;  %v4900_v43 = vld [vmem:[#allocation2 + $0xc68] sm:$0xff] }
 0x7f0   :  { %v4593_v30 = vmul.f32 0.01, %v4574_v6  ;;  %v4578_v41 = vadd.f32 %v4577_v19, %v10446_v18  ;;  %6911 = vmatprep.mubr.msk.bf16.mxu1 %vm3539_vm1, %v4654_v59  ;;  %6915 = vmatprep.mubr.msk.bf16.mxu0 %vm3539_vm1, %v4654_v59  ;;  %v10484_v15 = vadd.f32 %v7109_v29, %v7108_v63  ;;  %v4893_v18 = vld [vmem:[#allocation2 + $0xc30] sm:$0xff] }
 0x7f1   :  { %v4594_v56 = vmul.f32 0.01, %v4576_v36  ;;  %4738 = vmatmul.mubr.bf16.gmra.mrb[0].mxu1 %v4653_v4  ;;  %4807 = vmatmul.mubr.bf16.gmra.mrb[208].mxu0 %v4653_v4  ;;  %v4608_v28 = vmax.f32 %v4572_v34, %v4592_v58  ;;  %v4902_v34 = vld [vmem:[#allocation2 + $0xc78] sm:$0xff]  ;;  %v4901_v4 = vld [vmem:[#allocation2 + $0xc70] sm:$0xff] }
 0x7f2   :  { %v4595_v52 = vmul.f32 0.01, %v4578_v41  ;;  %5010 = vmatpush1.bf16.msra.mxu1 %v4887_v60  ;;  %5156 = vmatpush1.bf16.msra.mxu0 %v4889_v32  ;;  %v4609_v26 = vmax.f32 %v4574_v6, %v4593_v30 }
 0x7f3   :  { %v4610_v23 = vmax.f32 %v4576_v36, %v4594_v56  ;;  %5011 = vmatprep.subr.bf16.mxu1 %v4892_v9  ;;  %5157 = vmatprep.subr.bf16.mxu0 %v4894_v25  ;;  %v10496_v36 = vld [vmem:[#allocation9 + $0x14] ss:$0 sm:$0xff] }
 0x7f4   :  { %v4611_v2 = vmax.f32 %v4578_v41, %v4595_v52  ;;  %v7111_v62 = vpop.f32.mrb[208].mxu1  ;;  %v3348_v60 = vadd.f32 %v10434_v20, %v10496_v36  ;;  %v3351_v9 = vadd.f32 %v10436_v22, %v10496_v36  ;;  %v3359_v22 = vadd.f32 %v10440_v61, %v10496_v36 }
 0x7f5   :  { %v4655_v16 = vpack.c.bf16 %v4610_v23, %v4608_v28  ;;  %v7112_v48 = vpop.f32.mrb[209].mxu1  ;;  %v10502_v23 = vld [vmem:[#allocation9 + $0x17] ss:$0 sm:$0xff] }
 0x7f6   :  { %v4656_v39 = vpack.c.bf16 %v4611_v2, %v4609_v26  ;;  %v10486_v35 = vadd.f32 %v7112_v48, %v7111_v62  ;;  %v7114_v5 = vpop.f32.mrb[210].mxu1  ;;  %5012 = vmatpush1.bf16.msra.mxu1 %v4891_v50  ;;  %5158 = vmatpush1.bf16.msra.mxu0 %v4893_v18  ;;  %v3356_v62 = vadd.f32 %v10438_v1, %v10496_v36 }
 0x7f7   :  { %v7115_v14 = vpop.f32.mrb[211].mxu1  ;;  %5013 = vmatprep.subr.bf16.mxu1 %v4896_v13  ;;  %5159 = vmatprep.subr.bf16.mxu0 %v4898_v45 }
 0x7f8   :  { %6912 = vmatprep.mubr.msk.bf16.mxu1 %vm3539_vm1, %v4656_v39  ;;  %6916 = vmatprep.mubr.msk.bf16.mxu0 %vm3539_vm1, %v4656_v39  ;;  %v10490_v7 = vadd.f32 %v7115_v14, %v7114_v5 }
 0x7f9   :  { %4748 = vmatmul.mubr.bf16.gmra.mrb[4].mxu1 %v4655_v16  ;;  %4815 = vmatmul.mubr.bf16.gmra.mrb[212].mxu0 %v4655_v16 }
 0x7fa   :  { %5014 = vmatpush1.bf16.msra.mxu1 %v4895_v0  ;;  %5160 = vmatpush1.bf16.msra.mxu0 %v4897_v31 }
 0x7fb   :  { %5015 = vmatprep.subr.bf16.mxu1 %v4900_v43  ;;  %5161 = vmatprep.subr.bf16.mxu0 %v4902_v34 }
 0x7fc   :  { %v7117_v49 = vpop.f32.mrb[212].mxu1 }
 0x7fd   :  { %v7118_v59 = vpop.f32.mrb[213].mxu1 }
 0x7fe   :  { %v10492_v6 = vadd.f32 %v7118_v59, %v7117_v49  ;;  %v7120_v51 = vpop.f32.mrb[214].mxu1  ;;  %5016 = vmatpush1.bf16.msra.mxu1 %v4899_v42  ;;  %5162 = vmatpush1.bf16.msra.mxu0 %v4901_v4 }
 0x7ff   :  { %v7121_v63 = vpop.f32.mrb[215].mxu1 }
 0x800   :  { %v10494_v58 = vadd.f32 %v7121_v63, %v7120_v51 }
 0x804   :  { %v7139_v19 = vpop.f32.mrb[216].mxu1 }
 0x805   :  { %v7140_v29 = vpop.f32.mrb[217].mxu1 }
 0x806   :  { %v7141_v32 = vadd.f32 %v7140_v29, %v7139_v19  ;;  %v7142_v30 = vpop.f32.mrb[218].mxu1  ;;  %v3364_v29 = vadd.f32 %v10450_v27, %v10496_v36 }
 0x807   :  { %v7143_v41 = vpop.f32.mrb[219].mxu1 }
 0x808   :  { %v3445_v25 = vadd.f32 %v7141_v32, %v3348_v60  ;;  %v7144_v56 = vadd.f32 %v7143_v41, %v7142_v30 }
 0x80a   :  { %v3507_v52 = vmul.f32 0.01, %v3445_v25  ;;  %v3448_v28 = vadd.f32 %v7144_v56, %v3351_v9  ;;  %v3367_v9 = vadd.f32 %v10454_v12, %v10496_v36 }
 0x80c   :  { %v3508_v50 = vmul.f32 0.01, %v3448_v28  ;;  %v7145_v18 = vpop.f32.mrb[220].mxu1  ;;  %v3523_v26 = vmax.f32 %v3445_v25, %v3507_v52 }
 0x80d   :  { %v7146_v2 = vpop.f32.mrb[221].mxu1 }
 0x80e   :  { %v7147_v20 = vadd.f32 %v7146_v2, %v7145_v18  ;;  %v7148_v13 = vpop.f32.mrb[222].mxu1  ;;  %v3771_v45 = vmul.f32 %v10502_v23, %v3523_v26  ;;  %v3524_v16 = vmax.f32 %v3448_v28, %v3508_v50  ;;  %v3621_v39 = vsel %vm3539_vm1, %v3523_v26, -inf }
 0x80f   :  { %v7149_v48 = vpop.f32.mrb[223].mxu1 }
 0x810   :  { %v3453_v5 = vadd.f32 %v7147_v20, %v3356_v62  ;;  %v7150_v14 = vadd.f32 %v7149_v48, %v7148_v13  ;;  %v3787_v0 = vsel %vm3539_vm1, %v3771_v45, 0.0  ;;  %v3622_v31 = vsel %vm3539_vm1, %v3524_v16, -inf }
 0x811   :  { %3788 = vadd.xlane.f32.xlu0 %v3787_v0  ;;  %v3623_v43 = vmax.f32 %v3621_v39, %v3622_v31  ;;  %v3772_v1 = vmul.f32 %v10502_v23, %v3524_v16  ;;  %v3372_v31 = vadd.f32 %v10458_v54, %v10496_v36 }
 0x812   :  { %v3509_v34 = vmul.f32 0.01, %v3453_v5  ;;  %v3456_v42 = vadd.f32 %v7150_v14, %v3359_v22 }
 0x813   :  { %v3624_v4 = vrot.slane %v3623_v43, 4  ;;  %v3790_v49 = vsel %vm3539_vm1, %v3772_v1, 0.0 }
 0x814   :  { %v3510_v59 = vmul.f32 0.01, %v3456_v42  ;;  %3791 = vadd.xlane.f32.xlu1 %v3790_v49  ;;  %v7151_v61 = vpop.f32.mrb[224].mxu1  ;;  %v3525_v51 = vmax.f32 %v3453_v5, %v3509_v34 }
 0x815   :  { %v3625_v63 = vmax.f32 %v3623_v43, %v3624_v4  ;;  %v7152_v19 = vpop.f32.mrb[225].mxu1  ;;  %v3375_v4 = vadd.f32 %v10464_v53, %v10496_v36 }
 0x816   :  { %v7153_v60 = vadd.f32 %v7152_v19, %v7151_v61  ;;  %v7154_v32 = vpop.f32.mrb[226].mxu1  ;;  %v3773_v30 = vmul.f32 %v10502_v23, %v3525_v51  ;;  %v3526_v41 = vmax.f32 %v3456_v42, %v3510_v59  ;;  %v3630_v52 = vsel %vm3539_vm1, %v3525_v51, -inf }
 0x817   :  { %v3626_v25 = vrot.slane %v3625_v63, 2  ;;  %v7155_v56 = vpop.f32.mrb[227].mxu1 }
 0x818   :  { %v3461_v28 = vadd.f32 %v7153_v60, %v3364_v29  ;;  %v7156_v50 = vadd.f32 %v7155_v56, %v7154_v32  ;;  %v3793_v18 = vsel %vm3539_vm1, %v3773_v30, 0.0  ;;  %v3631_v26 = vsel %vm3539_vm1, %v3526_v41, -inf  ;;  %v4904_v56 = vld [vmem:[#allocation2 + $0xc88] sm:$0xff] }
 0x819   :  { %v3627_v2 = vmax.f32 %v3625_v63, %v3626_v25  ;;  %3794 = vadd.xlane.f32.xlu0 %v3793_v18  ;;  %v3632_v27 = vmax.f32 %v3630_v52, %v3631_v26  ;;  %v3774_v62 = vmul.f32 %v10502_v23, %v3526_v41  ;;  %v4906_v52 = vld [vmem:[#allocation2 + $0xc98] sm:$0xff]  ;;  %5017 = vmatprep.subr.bf16.mxu1 %v4904_v56  ;;  %v4903_v26 = vld [vmem:[#allocation2 + $0xc80] sm:$0xff] }
 0x81a   :  { %v3511_v20 = vmul.f32 0.01, %v3461_v28  ;;  %v3464_v13 = vadd.f32 %v7156_v50, %v3367_v9  ;;  %5163 = vmatprep.subr.bf16.mxu0 %v4906_v52  ;;  %5018 = vmatpush1.bf16.msra.mxu1 %v4903_v26 }
 0x81b   :  { %v3628_v45 = vrot.slane %v3627_v2, 1  ;;  %v3633_v16 = vrot.slane %v3632_v27, 4  ;;  %v3796_v12 = vsel %vm3539_vm1, %v3774_v62, 0.0 }
 0x81c   :  { %v3512_v22 = vmul.f32 0.01, %v3464_v13  ;;  %3797 = vadd.xlane.f32.xlu1 %v3796_v12  ;;  %v7157_v48 = vpop.f32.mrb[228].mxu1  ;;  %v3527_v39 = vmax.f32 %v3461_v28, %v3511_v20 }
 0x81d   :  { %v10524_v5 = vmax.f32 %v3627_v2, %v3628_v45  ;;  %v3634_v14 = vmax.f32 %v3632_v27, %v3633_v16  ;;  %v7158_v0 = vpop.f32.mrb[229].mxu1  ;;  %v4905_v2 = vld [vmem:[#allocation2 + $0xc90] sm:$0xff] }
 0x81e   :  { %v7159_v43 = vadd.f32 %v7158_v0, %v7157_v48  ;;  %v7160_v1 = vpop.f32.mrb[230].mxu1  ;;  %v3775_v34 = vmul.f32 %v10502_v23, %v3527_v39  ;;  %v3528_v42 = vmax.f32 %v3464_v13, %v3512_v22  ;;  %v3639_v61 = vsel %vm3539_vm1, %v3527_v39, -inf  ;;  %5164 = vmatpush1.bf16.msra.mxu0 %v4905_v2 }
 0x81f   :  { %12724 = vst [vmem:[#allocation31_spill] sm:$0xff] %v10524_v5  ;;  %v3635_v49 = vrot.slane %v3634_v14, 2  ;;  %v7161_v59 = vpop.f32.mrb[231].mxu1  ;;  %v3380_v13 = vadd.f32 %v10468_v40, %v10496_v36  ;;  %v3383_v48 = vadd.f32 %v10474_v10, %v10496_v36  ;;  %v4946_v5 = vld [vmem:[#allocation2 + $0xdd8] sm:$0xff] }
 0x820   :  { %v3469_v51 = vadd.f32 %v7159_v43, %v3372_v31  ;;  %v7162_v63 = vadd.f32 %v7161_v59, %v7160_v1  ;;  %v3799_v19 = vsel %vm3539_vm1, %v3775_v34, 0.0  ;;  %v3640_v29 = vsel %vm3539_vm1, %v3528_v42, -inf  ;;  %v4908_v31 = vld [vmem:[#allocation2 + $0xca8] sm:$0xff]  ;;  %v4910_v43 = vld [vmem:[#allocation2 + $0xcb8] sm:$0xff] }
 0x821   :  { %v3636_v60 = vmax.f32 %v3634_v14, %v3635_v49  ;;  %3800 = vadd.xlane.f32.xlu0 %v3799_v19  ;;  %v3641_v54 = vmax.f32 %v3639_v61, %v3640_v29  ;;  %v3776_v32 = vmul.f32 %v10502_v23, %v3528_v42  ;;  %5019 = vmatprep.subr.bf16.mxu1 %v4908_v31  ;;  %v4909_v49 = vld [vmem:[#allocation2 + $0xcb0] sm:$0xff] }
 0x822   :  { %v3513_v30 = vmul.f32 0.01, %v3469_v51  ;;  %v3472_v41 = vadd.f32 %v7162_v63, %v3375_v4  ;;  %5165 = vmatprep.subr.bf16.mxu0 %v4910_v43  ;;  %v4907_v4 = vld [vmem:[#allocation2 + $0xca0] sm:$0xff]  ;;  %v4917_v31 = vld [vmem:[#allocation2 + $0xcf0] sm:$0xff] }
 0x823   :  { %v3637_v9 = vrot.slane %v3636_v60, 1  ;;  %v3642_v25 = vrot.slane %v3641_v54, 4  ;;  %v3802_v53 = vsel %vm3539_vm1, %v3776_v32, 0.0  ;;  %5020 = vmatpush1.bf16.msra.mxu1 %v4907_v4  ;;  %5166 = vmatpush1.bf16.msra.mxu0 %v4909_v49  ;;  %v4914_v32 = vld [vmem:[#allocation2 + $0xcd8] sm:$0xff] }
 0x824   :  { %v3514_v28 = vmul.f32 0.01, %v3472_v41  ;;  %3803 = vadd.xlane.f32.xlu1 %v3802_v53  ;;  %v7163_v50 = vpop.f32.mrb[232].mxu1  ;;  %v3529_v18 = vmax.f32 %v3469_v51, %v3513_v30  ;;  %v4913_v53 = vld [vmem:[#allocation2 + $0xcd0] sm:$0xff]  ;;  %5167 = vmatprep.subr.bf16.mxu0 %v4914_v32 }
 0x825   :  { %v10536_v27 = vmax.f32 %v3636_v60, %v3637_v9  ;;  %v3643_v62 = vmax.f32 %v3641_v54, %v3642_v25  ;;  %v7164_v20 = vpop.f32.mrb[233].mxu1  ;;  %v4912_v54 = vld [vmem:[#allocation2 + $0xcc8] sm:$0xff]  ;;  %v4911_v25 = vld [vmem:[#allocation2 + $0xcc0] sm:$0xff] }
 0x826   :  { %v7165_v45 = vadd.f32 %v7164_v20, %v7163_v50  ;;  %v7166_v16 = vpop.f32.mrb[234].mxu1  ;;  %v3777_v12 = vmul.f32 %v10502_v23, %v3529_v18  ;;  %v3530_v22 = vmax.f32 %v3472_v41, %v3514_v28  ;;  %v3648_v0 = vsel %vm3539_vm1, %v3529_v18, -inf  ;;  %5021 = vmatprep.subr.bf16.mxu1 %v4912_v54 }
 0x827   :  { %12725 = vst [vmem:[#allocation47_spill] sm:$0xff] %v10536_v27  ;;  %v3644_v39 = vrot.slane %v3643_v62, 2  ;;  %v7167_v14 = vpop.f32.mrb[235].mxu1  ;;  %5022 = vmatpush1.bf16.msra.mxu1 %v4911_v25  ;;  %v3388_v50 = vadd.f32 %v10478_v24, %v10496_v36  ;;  %5168 = vmatpush1.bf16.msra.mxu0 %v4913_v53  ;;  %v3391_v20 = vadd.f32 %v10484_v15, %v10496_v36 }
 0x828   :  { %v3477_v1 = vadd.f32 %v7165_v45, %v3380_v13  ;;  %v7168_v34 = vadd.f32 %v7167_v14, %v7166_v16  ;;  %v3805_v42 = vsel %vm3539_vm1, %v3777_v12, 0.0  ;;  %v3649_v40 = vsel %vm3539_vm1, %v3530_v22, -inf  ;;  %v4916_v12 = vld [vmem:[#allocation2 + $0xce8] sm:$0xff] }
 0x829   :  { %v3645_v59 = vmax.f32 %v3643_v62, %v3644_v39  ;;  %3806 = vadd.xlane.f32.xlu0 %v3805_v42  ;;  %v3650_v61 = vmax.f32 %v3648_v0, %v3649_v40  ;;  %v3778_v10 = vmul.f32 %v10502_v23, %v3530_v22  ;;  %v4918_v22 = vld [vmem:[#allocation2 + $0xcf8] sm:$0xff]  ;;  %5023 = vmatprep.subr.bf16.mxu1 %v4916_v12  ;;  %v4915_v0 = vld [vmem:[#allocation2 + $0xce0] sm:$0xff] }
 0x82a   :  { %v3515_v51 = vmul.f32 0.01, %v3477_v1  ;;  %v3480_v63 = vadd.f32 %v7168_v34, %v3383_v48  ;;  %5169 = vmatprep.subr.bf16.mxu0 %v4918_v22 }
 0x82b   :  { %v3646_v19 = vrot.slane %v3645_v59, 1  ;;  %v3651_v29 = vrot.slane %v3650_v61, 4  ;;  %v3808_v60 = vsel %vm3539_vm1, %v3778_v10, 0.0  ;;  %5024 = vmatpush1.bf16.msra.mxu1 %v4915_v0  ;;  %5170 = vmatpush1.bf16.msra.mxu0 %v4917_v31 }
 0x82c   :  { %v3516_v30 = vmul.f32 0.01, %v3480_v63  ;;  %3809 = vadd.xlane.f32.xlu1 %v3808_v60  ;;  %v7169_v41 = vpop.f32.mrb[236].mxu1  ;;  %v3531_v9 = vmax.f32 %v3477_v1, %v3515_v51 }
 0x82d   :  { %v10548_v56 = vmax.f32 %v3645_v59, %v3646_v19  ;;  %v3652_v52 = vmax.f32 %v3650_v61, %v3651_v29  ;;  %v7170_v28 = vpop.f32.mrb[237].mxu1  ;;  %v4920_v59 = vld [vmem:[#allocation2 + $0xd08] sm:$0xff]  ;;  %v4922_v61 = vld [vmem:[#allocation2 + $0xd18] sm:$0xff]  ;;  %v4919_v19 = vld [vmem:[#allocation2 + $0xd00] sm:$0xff] }
 0x82e   :  { %v7171_v18 = vadd.f32 %v7170_v28, %v7169_v41  ;;  %v7172_v26 = vpop.f32.mrb[238].mxu1  ;;  %v3779_v2 = vmul.f32 %v10502_v23, %v3531_v9  ;;  %v3532_v62 = vmax.f32 %v3480_v63, %v3516_v30  ;;  %v3657_v16 = vsel %vm3539_vm1, %v3531_v9, -inf  ;;  %5025 = vmatprep.subr.bf16.mxu1 %v4920_v59  ;;  %v4921_v29 = vld [vmem:[#allocation2 + $0xd10] sm:$0xff]  ;;  %5171 = vmatprep.subr.bf16.mxu0 %v4922_v61 }
 0x82f   :  { %12726 = vst [vmem:[#allocation23_spill] sm:$0xff] %v10548_v56  ;;  %v3653_v13 = vrot.slane %v3652_v52, 2  ;;  %v7173_v45 = vpop.f32.mrb[239].mxu1  ;;  %5026 = vmatpush1.bf16.msra.mxu1 %v4919_v19  ;;  %v3396_v30 = vadd.f32 %v10486_v35, %v10496_v36  ;;  %5172 = vmatpush1.bf16.msra.mxu0 %v4921_v29  ;;  %v4929_v19 = vld [vmem:[#allocation2 + $0xd50] sm:$0xff]  ;;  %v3407_v29 = vadd.f32 %v10494_v58, %v10496_v36 }
 0x830   :  { %v3485_v48 = vadd.f32 %v7171_v18, %v3388_v50  ;;  %v7174_v39 = vadd.f32 %v7173_v45, %v7172_v26  ;;  %v3811_v14 = vsel %vm3539_vm1, %v3779_v2, 0.0  ;;  %v3658_v24 = vsel %vm3539_vm1, %v3532_v62, -inf  ;;  %v4924_v26 = vld [vmem:[#allocation2 + $0xd28] sm:$0xff]  ;;  %v4926_v2 = vld [vmem:[#allocation2 + $0xd38] sm:$0xff]  ;;  %v4923_v45 = vld [vmem:[#allocation2 + $0xd20] sm:$0xff] }
 0x831   :  { %v3654_v43 = vmax.f32 %v3652_v52, %v3653_v13  ;;  %3812 = vadd.xlane.f32.xlu0 %v3811_v14  ;;  %v3659_v1 = vmax.f32 %v3657_v16, %v3658_v24  ;;  %v3780_v15 = vmul.f32 %v10502_v23, %v3532_v62  ;;  %v3399_v52 = vadd.f32 %v10490_v7, %v10496_v36  ;;  %v4925_v16 = vld [vmem:[#allocation2 + $0xd30] sm:$0xff] }
 0x832   :  { %v3517_v34 = vmul.f32 0.01, %v3485_v48  ;;  %v3488_v42 = vadd.f32 %v7174_v39, %v3391_v20  ;;  %5027 = vmatprep.subr.bf16.mxu1 %v4924_v26  ;;  %5173 = vmatprep.subr.bf16.mxu0 %v4926_v2 }
 0x833   :  { %v3655_v40 = vrot.slane %v3654_v43, 1  ;;  %v3660_v4 = vrot.slane %v3659_v1, 4  ;;  %v3814_v49 = vsel %vm3539_vm1, %v3780_v15, 0.0  ;;  %5028 = vmatpush1.bf16.msra.mxu1 %v4923_v45  ;;  %5174 = vmatpush1.bf16.msra.mxu0 %v4925_v16  ;;  %v3404_v15 = vadd.f32 %v10492_v6, %v10496_v36  ;;  %v4933_v45 = vld [vmem:[#allocation2 + $0xd70] sm:$0xff] }
 0x834   :  { %v3518_v10 = vmul.f32 0.01, %v3488_v42  ;;  %3815 = vadd.xlane.f32.xlu1 %v3814_v49  ;;  %v7175_v51 = vpop.f32.mrb[240].mxu1  ;;  %v3533_v63 = vmax.f32 %v3485_v48, %v3517_v34  ;;  %v4930_v49 = vld [vmem:[#allocation2 + $0xd58] sm:$0xff] }
 0x835   :  { %v10560_v60 = vmax.f32 %v3654_v43, %v3655_v40  ;;  %v3661_v54 = vmax.f32 %v3659_v1, %v3660_v4  ;;  %v7176_v32 = vpop.f32.mrb[241].mxu1  ;;  %v4928_v4 = vld [vmem:[#allocation2 + $0xd48] sm:$0xff]  ;;  %5175 = vmatprep.subr.bf16.mxu0 %v4930_v49 }
 0x836   :  { %v7177_v41 = vadd.f32 %v7176_v32, %v7175_v51  ;;  %v7178_v9 = vpop.f32.mrb[242].mxu1  ;;  %v3781_v25 = vmul.f32 %v10502_v23, %v3533_v63  ;;  %v3534_v53 = vmax.f32 %v3488_v42, %v3518_v10  ;;  %v3666_v18 = vsel %vm3539_vm1, %v3533_v63, -inf  ;;  %5029 = vmatprep.subr.bf16.mxu1 %v4928_v4  ;;  %v4927_v63 = vld [vmem:[#allocation2 + $0xd40] sm:$0xff]  ;;  %v4938_v4 = vld [vmem:[#allocation2 + $0xd98] sm:$0xff] }
 0x837   :  { %12727 = vst [vmem:[#allocation39_spill] sm:$0xff] %v10560_v60  ;;  %v3662_v28 = vrot.slane %v3661_v54, 2  ;;  %v7179_v50 = vpop.f32.mrb[243].mxu1  ;;  %5030 = vmatpush1.bf16.msra.mxu1 %v4927_v63  ;;  %5176 = vmatpush1.bf16.msra.mxu0 %v4929_v19  ;;  %v3724_v19 = vpop.xlane.xlu1 %3723 }
 0x838   :  { %v3493_v62 = vadd.f32 %v7177_v41, %v3396_v30  ;;  %v7180_v20 = vadd.f32 %v7179_v50, %v7178_v9  ;;  %v3817_v13 = vsel %vm3539_vm1, %v3781_v25, 0.0  ;;  %v3667_v35 = vsel %vm3539_vm1, %v3534_v53, -inf  ;;  %v4932_v50 = vld [vmem:[#allocation2 + $0xd68] sm:$0xff] }
 0x839   :  { %v3663_v12 = vmax.f32 %v3661_v54, %v3662_v28  ;;  %3818 = vadd.xlane.f32.xlu0 %v3817_v13  ;;  %v3668_v22 = vmax.f32 %v3666_v18, %v3667_v35  ;;  %v3782_v7 = vmul.f32 %v10502_v23, %v3534_v53  ;;  %v4934_v18 = vld [vmem:[#allocation2 + $0xd78] sm:$0xff]  ;;  %5031 = vmatprep.subr.bf16.mxu1 %v4932_v50  ;;  %v4931_v35 = vld [vmem:[#allocation2 + $0xd60] sm:$0xff] }
 0x83a   :  { %v3519_v48 = vmul.f32 0.01, %v3493_v62  ;;  %v3496_v39 = vadd.f32 %v7180_v20, %v3399_v52  ;;  %5177 = vmatprep.subr.bf16.mxu0 %v4934_v18 }
 0x83b   :  { %v3664_v14 = vrot.slane %v3663_v12, 1  ;;  %v3669_v24 = vrot.slane %v3668_v22, 4  ;;  %v3820_v0 = vsel %vm3539_vm1, %v3782_v7, 0.0  ;;  %5032 = vmatpush1.bf16.msra.mxu1 %v4931_v35  ;;  %5178 = vmatpush1.bf16.msra.mxu0 %v4933_v45 }
 0x83c   :  { %v3520_v31 = vmul.f32 0.01, %v3496_v39  ;;  %3821 = vadd.xlane.f32.xlu1 %v3820_v0  ;;  %v7181_v43 = vpop.f32.mrb[244].mxu1  ;;  %v3535_v1 = vmax.f32 %v3493_v62, %v3519_v48  ;;  %5220 = vmatprep.subr.bf16.mxu0 %v4938_v4  ;;  %v4648_v4 = vld [vmem:[#allocation9 + $0x1a] sm:$0x7] }
 0x83d   :  { %v10574_v34 = vmax.f32 %v3663_v12, %v3664_v14  ;;  %v3670_v42 = vmax.f32 %v3668_v22, %v3669_v24  ;;  %v7182_v40 = vpop.f32.mrb[245].mxu1 }
 0x83e   :  { %v7183_v59 = vadd.f32 %v7182_v40, %v7181_v43  ;;  %v7184_v61 = vpop.f32.mrb[246].mxu1  ;;  %v3783_v10 = vmul.f32 %v10502_v23, %v3535_v1  ;;  %v3536_v51 = vmax.f32 %v3496_v39, %v3520_v31  ;;  %v3675_v32 = vsel %vm3539_vm1, %v3535_v1, -inf  ;;  %v4936_v40 = vld [vmem:[#allocation2 + $0xd88] sm:$0xff] }
 0x83f   :  { %12728 = vst [vmem:[#allocation32_spill] sm:$0xff] %v10574_v34  ;;  %v3671_v54 = vrot.slane %v3670_v42, 2  ;;  %v7185_v6 = vpop.f32.mrb[247].mxu1  ;;  %5074 = vmatprep.subr.bf16.mxu1 %v4936_v40 }
 0x840   :  { %v3501_v30 = vadd.f32 %v7183_v59, %v3404_v15  ;;  %v7186_v41 = vadd.f32 %v7185_v6, %v7184_v61  ;;  %v3823_v9 = vsel %vm3539_vm1, %v3783_v10, 0.0  ;;  %v3676_v25 = vsel %vm3539_vm1, %v3536_v51, -inf }
 0x841   :  { %v3672_v53 = vmax.f32 %v3670_v42, %v3671_v54  ;;  %3824 = vadd.xlane.f32.xlu0 %v3823_v9  ;;  %v3677_v52 = vmax.f32 %v3675_v32, %v3676_v25  ;;  %v3784_v28 = vmul.f32 %v10502_v23, %v3536_v51  ;;  %v3727_v54 = vpop.xlane.xlu1 %3726 }
 0x842   :  { %v3521_v58 = vmul.f32 0.01, %v3501_v30  ;;  %v3504_v36 = vadd.f32 %v7186_v41, %v3407_v29 }
 0x843   :  { %v3673_v26 = vrot.slane %v3672_v53, 1  ;;  %v3678_v2 = vrot.slane %v3677_v52, 4  ;;  %v3826_v62 = vsel %vm3539_vm1, %v3784_v28, 0.0 }
 0x844   :  { %v3522_v20 = vmul.f32 0.01, %v3504_v36  ;;  %3827 = vadd.xlane.f32.xlu1 %v3826_v62  ;;  %v3537_v13 = vmax.f32 %v3501_v30, %v3521_v58 }
 0x845   :  { %v10584_v16 = vmax.f32 %v3672_v53, %v3673_v26  ;;  %v3679_v12 = vmax.f32 %v3677_v52, %v3678_v2  ;;  %v3733_v32 = vpop.xlane.xlu1 %3732  ;;  %v10616_v26 = vld [vmem:[#allocation9 + $0x15] ss:$0 sm:$0xff] }
 0x846   :  { %v3785_v22 = vmul.f32 %v10502_v23, %v3537_v13  ;;  %v3538_v7 = vmax.f32 %v3504_v36, %v3522_v20  ;;  %v3684_v39 = vsel %vm3539_vm1, %v3537_v13, -inf }
 0x847   :  { %12729 = vst [vmem:[#allocation48_spill] sm:$0xff] %v10584_v16  ;;  %v3680_v48 = vrot.slane %v3679_v12, 2 }
 0x848   :  { %v3829_v14 = vsel %vm3539_vm1, %v3785_v22, 0.0  ;;  %v3685_v24 = vsel %vm3539_vm1, %v3538_v7, -inf  ;;  %v3786_v0 = vmul.f32 %v10502_v23, %v3538_v7  ;;  %v3718_v23 = vpop.xlane.xlu0 %3717 }
 0x849   :  { %v3681_v31 = vmax.f32 %v3679_v12, %v3680_v48  ;;  %3830 = vadd.xlane.f32.xlu0 %v3829_v14  ;;  %v3686_v43 = vmax.f32 %v3684_v39, %v3685_v24  ;;  %v10598_v41 = vpop.xlane.xlu1 %3738 }
 0x84a   :  { %v3832_v1 = vsel %vm3539_vm1, %v3786_v0, 0.0 }
 0x84b   :  { %v3682_v15 = vrot.slane %v3681_v31, 1  ;;  %v3687_v42 = vrot.slane %v3686_v43, 4  ;;  %3833 = vadd.xlane.f32.xlu1 %v3832_v1 }
 0x84c   :  { %v3721_v29 = vpop.xlane.xlu0 %3720 }
 0x84d   :  { %v10592_v49 = vmax.f32 %v3681_v31, %v3682_v15  ;;  %v3688_v59 = vmax.f32 %v3686_v43, %v3687_v42  ;;  %v10602_v25 = vpop.xlane.xlu1 %3744 }
 0x84f   :  { %12730 = vst [vmem:[#allocation24_spill] sm:$0xff] %v10592_v49  ;;  %v3689_v61 = vrot.slane %v3688_v59, 2 }
 0x850   :  { %v3730_v6 = vpop.xlane.xlu0 %3729 }
 0x851   :  { %v3690_v10 = vmax.f32 %v3688_v59, %v3689_v61  ;;  %v10606_v52 = vpop.xlane.xlu1 %3750 }
 0x853   :  { %v3691_v51 = vrot.slane %v3690_v10, 1 }
 0x854   :  { %v10596_v30 = vpop.xlane.xlu0 %3735 }
 0x855   :  { %v10594_v63 = vmax.f32 %v3690_v10, %v3691_v51  ;;  %v10610_v50 = vpop.xlane.xlu1 %3756 }
 0x857   :  { %12731 = vst [vmem:[#allocation40_spill] sm:$0xff] %v10594_v63 }
 0x858   :  { %v10600_v9 = vpop.xlane.xlu0 %3741 }
 0x859   :  { %v10614_v58 = vpop.xlane.xlu1 %3762 }
 0x85c   :  { %v10604_v53 = vpop.xlane.xlu0 %3747 }
 0x860   :  { %v10608_v28 = vpop.xlane.xlu0 %3753 }
 0x864   :  { %v10612_v18 = vpop.xlane.xlu0 %3759 }
 0x89e   :  { %v3789_v36 = vpop.xlane.xlu0 %3788 }
 0x89f   :  { %v3835_v2 = vadd.f32 %v3789_v36, %v3718_v23 }
 0x8a1   :  { %v3792_v62 = vpop.xlane.xlu1 %3791  ;;  %v3858_v20 = vadd.f32 %v10616_v26, %v3835_v2  ;;  %v10639_v2 = vrot.slane %v4648_v4, %v12705_v21 }
 0x8a2   :  { %v3836_v13 = vadd.f32 %v3792_v62, %v3721_v29  ;;  %v10633_v29 = vrot.slane %v4648_v4, %v12701_v8  ;;  %v10642_v62 = vrot.slane %v4648_v4, %v12702_v47 }
 0x8a3   :  { %v3875_v45 = vsel %vm3874_vm2, %v3858_v20, -inf }
 0x8a4   :  { %v3859_v35 = vadd.f32 %v10616_v26, %v3836_v13 }
 0x8a6   :  { %v3876_v12 = vsel %vm3874_vm2, %v3859_v35, -inf  ;;  %v3795_v22 = vpop.xlane.xlu0 %3794 }
 0x8a7   :  { %v3877_v7 = vmax.f32 %v3875_v45, %v3876_v12  ;;  %v3837_v48 = vadd.f32 %v3795_v22, %v3724_v19 }
 0x8a9   :  { %v3878_v39 = vrot.slane %v3877_v7, 4  ;;  %v3798_v14 = vpop.xlane.xlu1 %3797  ;;  %v10623_v24 = vadd.f32 %v10616_v26, %v3837_v48 }
 0x8aa   :  { %v3838_v0 = vadd.f32 %v3798_v14, %v3727_v54 }
 0x8ab   :  { %v3879_v31 = vmax.f32 %v3877_v7, %v3878_v39  ;;  %v3884_v15 = vsel %vm3874_vm2, %v10623_v24, -inf }
 0x8ac   :  { %v10626_v43 = vadd.f32 %v10616_v26, %v3838_v0 }
 0x8ad   :  { %v3880_v1 = vrot.slane %v3879_v31, 2 }
 0x8ae   :  { %v3885_v42 = vsel %vm3874_vm2, %v10626_v43, -inf  ;;  %v3801_v40 = vpop.xlane.xlu0 %3800 }
 0x8af   :  { %v3881_v59 = vmax.f32 %v3879_v31, %v3880_v1  ;;  %v3886_v61 = vmax.f32 %v3884_v15, %v3885_v42  ;;  %v3839_v10 = vadd.f32 %v3801_v40, %v3730_v6 }
 0x8b1   :  { %v3882_v51 = vrot.slane %v3881_v59, 1  ;;  %v3887_v23 = vrot.slane %v3886_v61, 4  ;;  %v3804_v19 = vpop.xlane.xlu1 %3803  ;;  %v10636_v54 = vadd.f32 %v10616_v26, %v3839_v10 }
 0x8b2   :  { %v3840_v36 = vadd.f32 %v3804_v19, %v3733_v32 }
 0x8b3   :  { %v3883_v13 = vmax.f32 %v3881_v59, %v3882_v51  ;;  %v3888_v45 = vmax.f32 %v3886_v61, %v3887_v23  ;;  %v3893_v31 = vsel %vm3874_vm2, %v10636_v54, -inf }
 0x8b4   :  { %v10645_v6 = vadd.f32 %v10616_v26, %v3840_v36  ;;  %v4719_v12 = vpop.f32.mrb[248].mxu1  ;;  %v4792_v22 = vpop.f32.mrb[200].mxu0 }
 0x8b5   :  { %v3947_v7 = vsub.f32 %v3858_v20, %v3883_v13  ;;  %v3948_v48 = vsub.f32 %v3859_v35, %v3883_v13  ;;  %v3889_v39 = vrot.slane %v3888_v45, 2  ;;  %v4720_v14 = vadd.f32 %v4719_v12, %v10633_v29  ;;  %v4721_v0 = vpop.f32.mrb[249].mxu1  ;;  %v4794_v32 = vpop.f32.mrb[201].mxu0 }
 0x8b6   :  { %v3894_v1 = vsel %vm3874_vm2, %v10645_v6, -inf  ;;  %v4793_v15 = vadd.f32 %v4792_v22, %v10639_v2  ;;  %v10654_v42 = vadd.f32 %v4721_v0, %v10642_v62  ;;  %v4723_v40 = vpop.f32.mrb[250].mxu1  ;;  %v4795_v4 = vpop.f32.mrb[202].mxu0 }
 0x8b7   :  { %v3963_v20 = vmul.f32 1.442695, %v3947_v7  ;;  %v3965_v35 = vmul.f32 1.442695, %v3948_v48  ;;  %v3890_v59 = vmax.f32 %v3888_v45, %v3889_v39  ;;  %v3895_v61 = vmax.f32 %v3893_v31, %v3894_v1  ;;  %v4725_v10 = vpop.f32.mrb[251].mxu1  ;;  %v3807_v13 = vpop.xlane.xlu0 %3806 }
 0x8b8   :  { %v4823_v51 = vmul.f32 0.01, %v4720_v14  ;;  %v4825_v23 = vmul.f32 0.01, %v4793_v15  ;;  %v10657_v19 = vmul.f32 0.01, %v10654_v42  ;;  %v4724_v36 = vadd.f32 %v4723_v40, %v10633_v29 }
 0x8b9   :  { %7559 = vpow2.f32 %v3963_v20  ;;  %v3891_v12 = vrot.slane %v3890_v59, 1  ;;  %v3896_v22 = vrot.slane %v3895_v61, 4  ;;  %v4796_v0 = vadd.f32 %v4795_v4, %v10639_v2  ;;  %v4797_v32 = vpop.f32.mrb[203].mxu0  ;;  %v3810_v46 = vpop.xlane.xlu1 %3809 }
 0x8ba   :  { %7561 = vpow2.f32 %v3965_v35  ;;  %v4847_v7 = vmax.f32 %v4720_v14, %v4823_v51  ;;  %v4849_v45 = vmax.f32 %v4793_v15, %v4825_v23  ;;  %v4826_v31 = vmul.f32 0.01, %v4724_v36 }
 0x8bb   :  { %v3892_v48 = vmax.f32 %v3890_v59, %v3891_v12  ;;  %v3897_v39 = vmax.f32 %v3895_v61, %v3896_v22  ;;  %v4828_v1 = vmul.f32 0.01, %v4796_v0  ;;  %v3841_v40 = vadd.f32 %v3807_v13, %v10596_v30 }
 0x8bc   :  { %v10665_v20 = vadd.f32 %v4725_v10, %v10642_v62  ;;  %v3842_v44 = vadd.f32 %v3810_v46, %v10598_v41  ;;  %v4729_v4 = vpop.f32.mrb[252].mxu1  ;;  %v4800_v32 = vpop.f32.mrb[204].mxu0  ;;  %v4850_v59 = vmax.f32 %v4724_v36, %v4826_v31  ;;  %v12732_v33 = vmax.f32 %v10654_v42, %v10657_v19  ;;  %v4940_v19 = vld [vmem:[#allocation2 + $0xda8] sm:$0xff] }
 0x8bd   :  { %v3949_v35 = vsub.f32 %v10623_v24, %v3892_v48  ;;  %v3950_v14 = vsub.f32 %v10626_v43, %v3892_v48  ;;  %v3898_v15 = vrot.slane %v3897_v39, 2  ;;  %v4731_v61 = vpop.f32.mrb[253].mxu1  ;;  %v4802_v51 = vpop.f32.mrb[205].mxu0  ;;  %v4852_v23 = vmax.f32 %v4796_v0, %v4828_v1 }
 0x8be   :  { %v10671_v12 = vadd.f32 %v10616_v26, %v3841_v40  ;;  %v4827_v30 = vmul.f32 0.01, %v10665_v20  ;;  %v10675_v10 = vadd.f32 %v10616_v26, %v3842_v44  ;;  %v4733_v46 = vpop.f32.mrb[254].mxu1  ;;  %v4803_v41 = vpop.f32.mrb[206].mxu0  ;;  %v10677_v37 = vpack.c.bf16 %v4850_v59, %v4847_v7 }
 0x8bf   :  { %v3967_v13 = vmul.f32 1.442695, %v3949_v35  ;;  %v3969_v22 = vmul.f32 1.442695, %v3950_v14  ;;  %v3899_v24 = vmax.f32 %v3897_v39, %v3898_v15  ;;  %v4735_v43 = vpop.f32.mrb[255].mxu1  ;;  %v10679_v36 = vpack.c.bf16 %v4852_v23, %v4849_v45  ;;  %v4805_v44 = vpop.f32.mrb[207].mxu0 }
 0x8c0   :  { %v3902_v0 = vsel %vm3874_vm2, %v10671_v12, -inf  ;;  %v4851_v48 = vmax.f32 %v10665_v20, %v4827_v30  ;;  %v3903_v31 = vsel %vm3874_vm2, %v10675_v10, -inf  ;;  %v10687_v35 = vadd.f32 %v4729_v4, %v10633_v29  ;;  %v3813_v7 = vpop.xlane.xlu0 %3812 }
 0x8c1   :  { %7563 = vpow2.f32 %v3967_v13  ;;  %v3900_v1 = vrot.slane %v3899_v24, 1  ;;  %v3904_v40 = vmax.f32 %v3902_v0, %v3903_v31  ;;  %v10690_v45 = vadd.f32 %v4800_v32, %v10639_v2 }
 0x8c2   :  { %7565 = vpow2.f32 %v3969_v22  ;;  %v10693_v39 = vadd.f32 %v4731_v61, %v10642_v62  ;;  %v10696_v20 = vadd.f32 %v4733_v46, %v10633_v29  ;;  %v10701_v51 = vmul.f32 0.01, %v10687_v35 }
 0x8c3   :  { %v10698_v14 = vpop.eup %7559  ;;  %v3901_v15 = vmax.f32 %v3899_v24, %v3900_v1  ;;  %v3905_v59 = vrot.slane %v3904_v40, 4  ;;  %v10704_v4 = vadd.f32 %v4803_v41, %v10639_v2  ;;  %v10711_v61 = vmul.f32 0.01, %v10690_v45 }
 0x8c4   :  { %v10706_v23 = vpop.eup %7561  ;;  %v3995_v32 = vsel %vm3874_vm2, %v10698_v14, 0.0  ;;  %v10714_v30 = vmul.f32 0.01, %v10693_v39  ;;  %v3843_v46 = vadd.f32 %v3813_v7, %v10600_v9  ;;  %v4739_v13 = vpop.f32.mrb[0].mxu1 }
 0x8c5   :  { %v3996_v22 = vsel %vm3874_vm2, %v10706_v23, 0.0  ;;  %v3951_v41 = vsub.f32 %v10636_v54, %v3901_v15  ;;  %v3952_v24 = vsub.f32 %v10645_v6, %v3901_v15  ;;  %v3906_v0 = vmax.f32 %v3904_v40, %v3905_v59  ;;  %v4808_v31 = vpop.f32.mrb[208].mxu0  ;;  %v4741_v44 = vpop.f32.mrb[1].mxu1 }
 0x8c6   :  { %v10721_v1 = vadd.f32 %v3996_v22, %v3995_v32  ;;  %v4810_v7 = vpop.f32.mrb[209].mxu0  ;;  %v4743_v3 = vpop.f32.mrb[2].mxu1  ;;  %v10730_v6 = vadd.f32 %v10616_v26, %v3843_v46  ;;  %v10736_v59 = vmul.f32 0.01, %v10696_v20  ;;  %v10739_v32 = vmul.f32 0.01, %v10704_v4 }
 0x8c7   :  { %v3971_v38 = vmul.f32 1.442695, %v3951_v41  ;;  %v3973_v54 = vmul.f32 1.442695, %v3952_v24  ;;  %v3907_v17 = vrot.slane %v3906_v0, 2  ;;  %v10732_v40 = vpop.f32.mrb[210].mxu0  ;;  %v10742_v22 = vadd.f32 %v4735_v43, %v10642_v62  ;;  %v3816_v7 = vpop.xlane.xlu1 %3815 }
 0x8c8   :  { %v10744_v41 = vpop.f32.mrb[3].mxu1  ;;  %v3911_v46 = vsel %vm3874_vm2, %v10730_v6, -inf  ;;  %v4969_v15 = vpack.c.bf16 %v4851_v48, %v12732_v33  ;;  %v4813_v55 = vpop.f32.mrb[211].mxu0  ;;  %v3844_v33 = vadd.f32 %v3816_v7, %v10602_v25  ;;  %v10765_v42 = vadd.f32 %v4808_v31, %v10639_v2  ;;  %v4942_v48 = vld [vmem:[#allocation2 + $0xdb8] sm:$0xff]  ;;  %v4939_v31 = vld [vmem:[#allocation2 + $0xda0] sm:$0xff] }
 0x8c9   :  { %7567 = vpow2.f32 %v3971_v38  ;;  %v3908_v24 = vmax.f32 %v3906_v0, %v3907_v17  ;;  %v10756_v63 = vmul.f32 0.01, %v10742_v22  ;;  %v4935_v38 = vld [vmem:[#allocation2 + $0xd80] sm:$0xff]  ;;  %v4937_v17 = vld [vmem:[#allocation2 + $0xd90] sm:$0xff]  ;;  %v10762_v55 = vadd.f32 %v4739_v13, %v10633_v29 }
 0x8ca   :  { %7569 = vpow2.f32 %v3973_v54  ;;  %5033 = vmatprep.mubr.bf16.mxu1 %v4969_v15  ;;  %5179 = vmatprep.mubr.bf16.mxu0 %v4969_v15  ;;  %v10776_v25 = vadd.f32 %v4741_v44, %v10642_v62  ;;  %v10779_v13 = vadd.f32 %v4743_v3, %v10633_v29  ;;  %v4941_v44 = vld [vmem:[#allocation2 + $0xdb0] sm:$0xff]  ;;  %v10798_v56 = vmul.f32 0.01, %v10765_v42 }
 0x8cb   :  { %v10758_v0 = vpop.eup %7563  ;;  %v3909_v49 = vrot.slane %v3908_v24, 1  ;;  %v4857_v9 = vmax.f32 %v10742_v22, %v10756_v63  ;;  %5034 = vmatmul.mubr.bf16.vlgmr.msra.gmra.mrb[8].mxu1 %v10677_v37  ;;  %5180 = vmatmul.mubr.bf16.vlgmr.msra.gmra.mrb[216].mxu0 %v10677_v37  ;;  %v10788_v63 = vadd.f32 %v10616_v26, %v3844_v33  ;;  %v10791_v37 = vmul.f32 0.01, %v10762_v55 }
 0x8cc   :  { %12733 = vst [vmem:[#allocation33_spill] sm:$0xff] %v10758_v0  ;;  %v10767_v54 = vpop.eup %7565  ;;  %v4004_v43 = vsel %vm3874_vm2, %v10758_v0, 0.0  ;;  %v10781_v15 = vpop.f32.mrb[4].mxu1  ;;  %5075 = vmatpush1.bf16.msra.mxu1 %v4935_v38  ;;  %5221 = vmatpush1.bf16.msra.mxu0 %v4937_v17  ;;  %v10801_v27 = vmul.f32 0.01, %v10776_v25  ;;  %v10827_v0 = vadd.f32 %v10732_v40, %v10639_v2 }
 0x8cd   :  { %12734 = vst [vmem:[#allocation49_spill] sm:$0xff] %v10767_v54  ;;  %v10783_v7 = vpop.f32.mrb[212].mxu0  ;;  %v4005_v16 = vsel %vm3874_vm2, %v10767_v54, 0.0  ;;  %v3910_v34 = vmax.f32 %v3908_v24, %v3909_v49  ;;  %v10793_v3 = vpop.f32.mrb[5].mxu1  ;;  %5076 = vmatprep.subr.bf16.mxu1 %v4940_v19  ;;  %5222 = vmatprep.subr.bf16.mxu0 %v4942_v48  ;;  %v10804_v49 = vmul.f32 0.01, %v10779_v13  ;;  %v12738_v48 = vmax.f32 %v10762_v55, %v10791_v37 }
 0x8ce   :  { %v4818_v22 = vpop.f32.mrb[213].mxu0  ;;  %v10795_v60 = vadd.f32 %v4005_v16, %v4004_v43  ;;  %v3819_v24 = vpop.xlane.xlu0 %3818  ;;  %v3912_v16 = vsel %vm3874_vm2, %v10788_v63, -inf  ;;  %v10840_v40 = vmul.f32 0.01, %v10827_v0  ;;  %v4961_v37 = vld [vmem:[#allocation2 + $0xe50] sm:$0xff] }
 0x8cf   :  { %v3822_v38 = vpop.xlane.xlu1 %3821  ;;  %v3953_v17 = vsub.f32 %v10671_v12, %v3910_v34  ;;  %v3954_v33 = vsub.f32 %v10675_v10, %v3910_v34  ;;  %v4944_v22 = vld [vmem:[#allocation2 + $0xdc8] sm:$0xff]  ;;  %v10812_v11 = vpop.f32.mrb[6].mxu1  ;;  %v3913_v47 = vmax.f32 %v3911_v46, %v3912_v16  ;;  %v4860_v34 = vmax.f32 %v10776_v25, %v10801_v27 }
 0x8d0   :  { %v10814_v19 = vpop.f32.mrb[214].mxu0  ;;  %v10821_v10 = vpop.f32.mrb[7].mxu1  ;;  %v4862_v54 = vmax.f32 %v10779_v13, %v10804_v49  ;;  %5077 = vmatpush1.bf16.msra.mxu1 %v4939_v31  ;;  %5223 = vmatpush1.bf16.msra.mxu0 %v4941_v44  ;;  %v3845_v16 = vadd.f32 %v3819_v24, %v10604_v53  ;;  %v10832_v12 = vadd.f32 %v10744_v41, %v10642_v62  ;;  %v4943_v24 = vld [vmem:[#allocation2 + $0xdc0] sm:$0xff] }
 0x8d1   :  { %v4821_v21 = vpop.f32.mrb[215].mxu0  ;;  %v3975_v8 = vmul.f32 1.442695, %v3953_v17  ;;  %v3977_v43 = vmul.f32 1.442695, %v3954_v33  ;;  %v3914_v46 = vrot.slane %v3913_v47, 4  ;;  %5078 = vmatprep.subr.bf16.mxu1 %v4944_v22  ;;  %5224 = vmatprep.subr.bf16.mxu0 %v4946_v5  ;;  %v3846_v31 = vadd.f32 %v3822_v38, %v10606_v52 }
 0x8d2   :  { %v12735_v21 = vmax.f32 %v10693_v39, %v10714_v30  ;;  %v12736_v53 = vmax.f32 %v10687_v35, %v10701_v51  ;;  %v12737_v41 = vmax.f32 %v10696_v20, %v10736_v59  ;;  %v4945_v39 = vld [vmem:[#allocation2 + $0xdd0] sm:$0xff]  ;;  %v4948_v52 = vld [vmem:[#allocation2 + $0xde8] sm:$0xff]  ;;  %v4950_v35 = vld [vmem:[#allocation2 + $0xdf8] sm:$0xff]  ;;  %v4839_v59 = vmul.f32 0.01, %v10832_v12 }
 0x8d3   :  { %v10837_v33 = vpop.eup %7567  ;;  %7571 = vpow2.f32 %v3975_v8  ;;  %v3915_v8 = vmax.f32 %v3913_v47, %v3914_v46  ;;  %v10862_v38 = vadd.f32 %v10616_v26, %v3846_v31  ;;  %v10870_v46 = vadd.f32 %v10781_v15, %v10633_v29 }
 0x8d4   :  { %v4972_v17 = vpack.c.bf16 %v4857_v9, %v12735_v21  ;;  %v4971_v44 = vpack.c.bf16 %v12737_v41, %v12736_v53  ;;  %v10849_v30 = vpop.eup %7569  ;;  %v4013_v5 = vsel %vm3874_vm2, %v10837_v33, 0.0  ;;  %7573 = vpow2.f32 %v3977_v43  ;;  %5079 = vmatpush1.bf16.msra.mxu1 %v4943_v24  ;;  %5225 = vmatpush1.bf16.msra.mxu0 %v4945_v39  ;;  %v4947_v53 = vld [vmem:[#allocation2 + $0xde0] sm:$0xff]  ;;  %v4949_v41 = vld [vmem:[#allocation2 + $0xdf0] sm:$0xff] }
 0x8d5   :  { %v10854_v9 = vadd.f32 %v10616_v26, %v3845_v16  ;;  %v4014_v20 = vsel %vm3874_vm2, %v10849_v30, 0.0  ;;  %v3916_v43 = vrot.slane %v3915_v8, 2  ;;  %v4863_v16 = vmax.f32 %v10832_v12, %v4839_v59  ;;  %5080 = vmatprep.subr.bf16.mxu1 %v4948_v52  ;;  %5226 = vmatprep.subr.bf16.mxu0 %v4950_v35 }
 0x8d6   :  { %5043 = vmatprep.mubr.bf16.mxu1 %v4972_v17  ;;  %5189 = vmatprep.mubr.bf16.mxu0 %v4972_v17  ;;  %v10864_v47 = vadd.f32 %v4014_v20, %v4013_v5  ;;  %v3921_v21 = vsel %vm3874_vm2, %v10862_v38, -inf  ;;  %v10877_v17 = vadd.f32 %v10783_v7, %v10639_v2  ;;  %v10881_v31 = vadd.f32 %v10793_v3, %v10642_v62  ;;  %v4952_v5 = vld [vmem:[#allocation2 + $0xe08] sm:$0xff]  ;;  %v4954_v20 = vld [vmem:[#allocation2 + $0xe18] sm:$0xff] }
 0x8d7   :  { %5044 = vmatmul.mubr.bf16.gmra.mrb[12].mxu1 %v4971_v44  ;;  %5190 = vmatmul.mubr.bf16.gmra.mrb[220].mxu0 %v4971_v44  ;;  %v3920_v22 = vsel %vm3874_vm2, %v10854_v9, -inf  ;;  %v3825_v44 = vpop.xlane.xlu0 %3824  ;;  %v3917_v24 = vmax.f32 %v3915_v8, %v3916_v43  ;;  %v10885_v39 = vmul.f32 0.01, %v10870_v46  ;;  %v10895_v52 = vadd.f32 %v10812_v11, %v10633_v29 }
 0x8d8   :  { %v3922_v12 = vmax.f32 %v3920_v22, %v3921_v21  ;;  %v10888_v7 = vmul.f32 0.01, %v10877_v17  ;;  %v10891_v3 = vmul.f32 0.01, %v10881_v31  ;;  %v10899_v35 = vadd.f32 %v10814_v19, %v10639_v2  ;;  %5081 = vmatpush1.bf16.msra.mxu1 %v4947_v53  ;;  %5227 = vmatpush1.bf16.msra.mxu0 %v4949_v41  ;;  %v3828_v21 = vpop.xlane.xlu1 %3827  ;;  %v4951_v19 = vld [vmem:[#allocation2 + $0xe00] sm:$0xff]  ;;  %v4953_v53 = vld [vmem:[#allocation2 + $0xe10] sm:$0xff] }
 0x8d9   :  { %v3918_v8 = vrot.slane %v3917_v24, 1  ;;  %v4865_v43 = vmax.f32 %v10870_v46, %v10885_v39  ;;  %v3847_v22 = vadd.f32 %v3825_v44, %v10608_v28  ;;  %v10909_v29 = vmul.f32 0.01, %v10895_v52  ;;  %5082 = vmatprep.subr.bf16.mxu1 %v4952_v5  ;;  %5228 = vmatprep.subr.bf16.mxu0 %v4954_v20  ;;  %v4958_v20 = vld [vmem:[#allocation2 + $0xe38] sm:$0xff] }
 0x8da   :  { %v3923_v59 = vrot.slane %v3922_v12, 4  ;;  %v4866_v11 = vmax.f32 %v10881_v31, %v10891_v3  ;;  %v10912_v2 = vmul.f32 0.01, %v10899_v35  ;;  %v4756_v44 = vadd.f32 %v10821_v10, %v10642_v62 }
 0x8db   :  { %v3919_v41 = vmax.f32 %v3917_v24, %v3918_v8  ;;  %v10915_v28 = vadd.f32 %v10616_v26, %v3847_v22  ;;  %v4868_v31 = vmax.f32 %v10895_v52, %v10909_v29  ;;  %v4975_v5 = vpack.c.bf16 %v4863_v16, %v4860_v34  ;;  %v3831_v22 = vpop.xlane.xlu0 %3830  ;;  %v4955_v16 = vld [vmem:[#allocation2 + $0xe20] sm:$0xff] }
 0x8dc   :  { %v3924_v15 = vmax.f32 %v3922_v12, %v3923_v59  ;;  %v3848_v24 = vadd.f32 %v3828_v21, %v10610_v50  ;;  %v4956_v12 = vld [vmem:[#allocation2 + $0xe28] sm:$0xff]  ;;  %5083 = vmatpush1.bf16.msra.mxu1 %v4951_v19  ;;  %5229 = vmatpush1.bf16.msra.mxu0 %v4953_v53  ;;  %v4845_v25 = vmul.f32 0.01, %v4756_v44  ;;  %v3834_v53 = vpop.xlane.xlu1 %3833  ;;  %v12740_v46 = vrot.slane %v10795_v60, 4 }
 0x8dd   :  { %v10919_v51 = vpop.eup %7571  ;;  %v3955_v10 = vsub.f32 %v10730_v6, %v3919_v41  ;;  %v3956_v52 = vsub.f32 %v10788_v63, %v3919_v41  ;;  %v3929_v50 = vsel %vm3874_vm2, %v10915_v28, -inf  ;;  %5053 = vmatprep.mubr.bf16.mxu1 %v4975_v5  ;;  %5199 = vmatprep.mubr.bf16.mxu0 %v4975_v5  ;;  %v4957_v6 = vld [vmem:[#allocation2 + $0xe30] sm:$0xff]  ;;  %v4974_v5 = vpack.c.bf16 %v4862_v54, %v12738_v48  ;;  %v4959_v54 = vld [vmem:[#allocation2 + $0xe40] sm:$0xff] }
 0x8de   :  { %v10929_v8 = vpop.eup %7573  ;;  %v4022_v62 = vsel %vm3874_vm2, %v10919_v51, 0.0  ;;  %v3925_v59 = vrot.slane %v3924_v15, 2  ;;  %v10940_v34 = vadd.f32 %v10616_v26, %v3848_v24  ;;  %5084 = vmatprep.subr.bf16.mxu1 %v4956_v12  ;;  %5230 = vmatprep.subr.bf16.mxu0 %v4958_v20  ;;  %v4869_v41 = vmax.f32 %v4756_v44, %v4845_v25  ;;  %v4966_v20 = vld [vmem:[#allocation2 + $0xe78] sm:$0xff] }
 0x8df   :  { %v4023_v27 = vsel %vm3874_vm2, %v10929_v8, 0.0  ;;  %v3979_v63 = vmul.f32 1.442695, %v3955_v10  ;;  %v3981_v29 = vmul.f32 1.442695, %v3956_v52  ;;  %v3849_v24 = vadd.f32 %v3831_v22, %v10612_v18  ;;  %v4962_v10 = vld [vmem:[#allocation2 + $0xe58] sm:$0xff]  ;;  %5054 = vmatmul.mubr.bf16.gmra.mrb[16].mxu1 %v4974_v5  ;;  %5200 = vmatmul.mubr.bf16.gmra.mrb[224].mxu0 %v4974_v5 }
 0x8e0   :  { %v4024_v21 = vadd.f32 %v4023_v27, %v4022_v62  ;;  %v3926_v19 = vmax.f32 %v3924_v15, %v3925_v59  ;;  %v3930_v3 = vsel %vm3874_vm2, %v10940_v34, -inf  ;;  %v4960_v62 = vld [vmem:[#allocation2 + $0xe48] sm:$0xff]  ;;  %5085 = vmatpush1.bf16.msra.mxu1 %v4955_v16  ;;  %5231 = vmatpush1.bf16.msra.mxu0 %v4957_v6  ;;  %v4978_v55 = vpack.c.bf16 %v4869_v41, %v4866_v11 }
 0x8e1   :  { %7575 = vpow2.f32 %v3979_v63  ;;  %v3931_v12 = vmax.f32 %v3929_v50, %v3930_v3  ;;  %v10952_v44 = vadd.f32 %v10616_v26, %v3849_v24  ;;  %v3850_v13 = vadd.f32 %v3834_v53, %v10614_v58  ;;  %5086 = vmatprep.subr.bf16.mxu1 %v4960_v62  ;;  %5232 = vmatprep.subr.bf16.mxu0 %v4962_v10  ;;  %v4964_v3 = vld [vmem:[#allocation2 + $0xe68] sm:$0xff] }
 0x8e2   :  { %v4025_v52 = vrot.slane %v4024_v21, 4  ;;  %v3927_v15 = vrot.slane %v3926_v19, 1  ;;  %7577 = vpow2.f32 %v3981_v29  ;;  %v4977_v48 = vpack.c.bf16 %v4868_v31, %v4865_v43  ;;  %5063 = vmatprep.mubr.bf16.mxu1 %v4978_v55  ;;  %5209 = vmatprep.mubr.bf16.mxu0 %v4978_v55 }
 0x8e3   :  { %v3932_v49 = vrot.slane %v3931_v12, 4  ;;  %v12739_v59 = vrot.slane %v10721_v1, 4  ;;  %v3938_v11 = vsel %vm3874_vm2, %v10952_v44, -inf  ;;  %v10964_v58 = vadd.f32 %v10616_v26, %v3850_v13 }
 0x8e4   :  { %v3928_v18 = vmax.f32 %v3926_v19, %v3927_v15  ;;  %v4008_v39 = vadd.f32 %v12740_v46, %v10795_v60  ;;  %v12741_v43 = vmax.f32 %v10690_v45, %v10711_v61  ;;  %v12742_v31 = vmax.f32 %v10704_v4, %v10739_v32  ;;  %5087 = vmatpush1.bf16.msra.mxu1 %v4959_v54  ;;  %v4963_v60 = vld [vmem:[#allocation2 + $0xe60] sm:$0xff]  ;;  %v4965_v45 = vld [vmem:[#allocation2 + $0xe70] sm:$0xff] }
 0x8e5   :  { %v3999_v22 = vadd.f32 %v12739_v59, %v10721_v1  ;;  %v3933_v25 = vmax.f32 %v3931_v12, %v3932_v49  ;;  %5233 = vmatpush1.bf16.msra.mxu0 %v4961_v37  ;;  %v3939_v16 = vsel %vm3874_vm2, %v10964_v58, -inf  ;;  %5088 = vmatprep.subr.bf16.mxu1 %v4964_v3  ;;  %v12743_v4 = vrot.slane %v10864_v47, 4 }
 0x8e6   :  { %v10975_v27 = vpack.c.bf16 %v12742_v31, %v12741_v43  ;;  %v3957_v1 = vsub.f32 %v10854_v9, %v3928_v18  ;;  %v3958_v50 = vsub.f32 %v10862_v38, %v3928_v18  ;;  %5234 = vmatprep.subr.bf16.mxu0 %v4966_v20  ;;  %v4009_v61 = vrot.slane %v4008_v39, 2 }
 0x8e7   :  { %v4000_v26 = vrot.slane %v3999_v22, 2  ;;  %v4017_v32 = vadd.f32 %v12743_v4, %v10864_v47  ;;  %v12744_v9 = vmax.f32 %v10765_v42, %v10798_v56  ;;  %v12745_v38 = vmax.f32 %v10827_v0, %v10840_v40  ;;  %5064 = vmatmul.mubr.bf16.gmra.mrb[20].mxu1 %v4977_v48  ;;  %5210 = vmatmul.mubr.bf16.gmra.mrb[228].mxu0 %v4977_v48 }
 0x8e8   :  { %v3983_v63 = vmul.f32 1.442695, %v3957_v1  ;;  %v3985_v29 = vmul.f32 1.442695, %v3958_v50  ;;  %v3934_v19 = vrot.slane %v3933_v25, 2  ;;  %v3940_v53 = vmax.f32 %v3938_v11, %v3939_v16  ;;  %5089 = vmatpush1.bf16.msra.mxu1 %v4963_v60  ;;  %5106 = vmatprep.mubr.bf16.mxu1 %v12423_v57 }
 0x8e9   :  { %v10990_v6 = vpack.c.bf16 %v12745_v38, %v12744_v9  ;;  %v4001_v41 = vadd.f32 %v4000_v26, %v3999_v22  ;;  %v4010_v5 = vadd.f32 %v4009_v61, %v4008_v39  ;;  %v4018_v24 = vrot.slane %v4017_v32, 2  ;;  %5235 = vmatpush1.bf16.msra.mxu0 %v4965_v45  ;;  %5252 = vmatprep.mubr.bf16.mxu0 %v12423_v57 }
 0x8ea   :  { %v4026_v62 = vadd.f32 %v4025_v52, %v4024_v21  ;;  %7579 = vpow2.f32 %v3983_v63  ;;  %v3935_v10 = vmax.f32 %v3933_v25, %v3934_v19  ;;  %v3941_v15 = vrot.slane %v3940_v53, 4 }
 0x8eb   :  { %v12746_v56 = vmax.f32 %v10877_v17, %v10888_v7  ;;  %v12747_v0 = vmax.f32 %v10899_v35, %v10912_v2  ;;  %7581 = vpow2.f32 %v3985_v29  ;;  %v4002_v40 = vrot.slane %v4001_v41, 1  ;;  %v11000_v21 = vpop.eup %7575 }
 0x8ec   :  { %v4011_v47 = vrot.slane %v4010_v5, 1  ;;  %v4019_v12 = vadd.f32 %v4018_v24, %v4017_v32  ;;  %v3936_v52 = vrot.slane %v3935_v10, 1  ;;  %v3942_v55 = vmax.f32 %v3940_v53, %v3941_v15  ;;  %v11004_v17 = vpop.eup %7577 }
 0x8ed   :  { %v10998_v42 = vpack.c.bf16 %v12747_v0, %v12746_v56  ;;  %v4031_v7 = vsel %vm3874_vm2, %v11000_v21, 0.0  ;;  %v4003_v35 = vadd.f32 %v4002_v40, %v4001_v41  ;;  %v4032_v13 = vsel %vm3874_vm2, %v11004_v17, 0.0 }
 0x8ee   :  { %v4012_v2 = vadd.f32 %v4011_v47, %v4010_v5  ;;  %v3937_v54 = vmax.f32 %v3935_v10, %v3936_v52  ;;  %v3943_v37 = vrot.slane %v3942_v55, 2  ;;  %v4033_v18 = vadd.f32 %v4032_v13, %v4031_v7  ;;  %v12748_v5 = vld [vmem:[#allocation33_spill] sm:$0xff] }
 0x8ef   :  { %7583 = vrcp.f32 %v4003_v35  ;;  %v4020_v49 = vrot.slane %v4019_v12, 1  ;;  %v4027_v48 = vrot.slane %v4026_v62, 2  ;;  %5107 = vmatmul.mubr.bf16.vlgmr.msra.gmra.mrb[8].mxu1 %v10679_v36  ;;  %5253 = vmatmul.mubr.bf16.vlgmr.msra.gmra.mrb[216].mxu0 %v10679_v36  ;;  %v12749_v47 = vld [vmem:[#allocation49_spill] sm:$0xff] }
 0x8f0   :  { %v3959_v3 = vsub.f32 %v10915_v28, %v3937_v54  ;;  %v3960_v20 = vsub.f32 %v10940_v34, %v3937_v54  ;;  %v3944_v59 = vmax.f32 %v3942_v55, %v3943_v37  ;;  %7585 = vrcp.f32 %v4012_v2  ;;  %5116 = vmatprep.mubr.bf16.mxu1 %v12423_v57  ;;  %5262 = vmatprep.mubr.bf16.mxu0 %v12423_v57 }
 0x8f1   :  { %v4034_v22 = vrot.slane %v4033_v18, 4  ;;  %v4021_v43 = vadd.f32 %v4020_v49, %v4019_v12  ;;  %v4028_v31 = vadd.f32 %v4027_v48, %v4026_v62 }
 0x8f2   :  { %v3987_v11 = vmul.f32 1.442695, %v3959_v3  ;;  %v3989_v46 = vmul.f32 1.442695, %v3960_v20  ;;  %v3945_v39 = vrot.slane %v3944_v59, 1 }
 0x8f3   :  { %v4035_v1 = vadd.f32 %v4034_v22, %v4033_v18  ;;  %v4029_v61 = vrot.slane %v4028_v31, 1 }
 0x8f4   :  { %v11014_v50 = vpop.eup %7579  ;;  %7587 = vpow2.f32 %v3987_v11  ;;  %v3946_v25 = vmax.f32 %v3944_v59, %v3945_v39 }
 0x8f5   :  { %v11018_v28 = vpop.eup %7581  ;;  %v4040_v34 = vsel %vm3874_vm2, %v11014_v50, 0.0  ;;  %7589 = vpow2.f32 %v3989_v46  ;;  %v4036_v26 = vrot.slane %v4035_v1, 2 }
 0x8f6   :  { %v4041_v36 = vsel %vm3874_vm2, %v11018_v28, 0.0  ;;  %v3961_v16 = vsub.f32 %v10952_v44, %v3946_v25  ;;  %v3962_v60 = vsub.f32 %v10964_v58, %v3946_v25  ;;  %7591 = vrcp.f32 %v4021_v43 }
 0x8f7   :  { %v4042_v45 = vadd.f32 %v4041_v36, %v4040_v34  ;;  %v4037_v4 = vadd.f32 %v4036_v26, %v4035_v1  ;;  %5117 = vmatmul.mubr.bf16.gmra.mrb[12].mxu1 %v10975_v27  ;;  %5263 = vmatmul.mubr.bf16.gmra.mrb[220].mxu0 %v10975_v27  ;;  %v4030_v44 = vadd.f32 %v4029_v61, %v4028_v31 }
 0x8f8   :  { %v3991_v32 = vmul.f32 1.442695, %v3961_v16  ;;  %v3993_v9 = vmul.f32 1.442695, %v3962_v60  ;;  %5126 = vmatprep.mubr.bf16.mxu1 %v12423_v57  ;;  %5272 = vmatprep.mubr.bf16.mxu0 %v12423_v57 }
 0x8f9   :  { %v7584_v38 = vpop.eup %7583  ;;  %v4043_v63 = vrot.slane %v4042_v45, 4  ;;  %v4038_v29 = vrot.slane %v4037_v4, 1 }
 0x8fa   :  { %v7586_v19 = vpop.eup %7585  ;;  %7593 = vpow2.f32 %v3991_v32  ;;  %v4069_v53 = vmul.f32 %v7584_v38, %v10706_v23  ;;  %v4068_v41 = vmul.f32 %v7584_v38, %v10698_v14  ;;  %v12752_v38 = vld [vmem:[#allocation115_spill] sm:$0xff] }
 0x8fb   :  { %7595 = vpow2.f32 %v3993_v9  ;;  %v4039_v58 = vadd.f32 %v4038_v29, %v4037_v4  ;;  %v4071_v24 = vmul.f32 %v7586_v19, %v12748_v5  ;;  %v4044_v62 = vadd.f32 %v4043_v63, %v4042_v45  ;;  %v12750_v4 = vld [vmem:[#allocation106_spill] sm:$0xff] }
 0x8fc   :  { %4098 = vperm.xlu1 %7555, %v4069_v53   ;;  %4093 = vperm.xlu0 %7554, %v4068_v41   ;;  %v4072_v12 = vmul.f32 %v7586_v19, %v12749_v47  ;;  %v12754_v19 = vld [vmem:[#allocation104_spill] sm:$0xff]  ;;  %v12755_v41 = vld [vmem:[#allocation107_spill] sm:$0xff] }
 0x8fd   :  { %7597 = vrcp.f32 %v4039_v58  ;;  %v4045_v10 = vrot.slane %v4044_v62, 2  ;;  %v12756_v58 = vld [vmem:[#allocation112_spill] sm:$0xff] }
 0x8fe   :  { %v7588_v23 = vpop.eup %7587  ;;  %7599 = vrcp.f32 %v4030_v44 }
 0x8ff   :  { %v7590_v14 = vpop.eup %7589  ;;  %v4049_v15 = vsel %vm3874_vm2, %v7588_v23, 0.0  ;;  %v4046_v56 = vadd.f32 %v4045_v10, %v4044_v62  ;;  %5127 = vmatmul.mubr.bf16.gmra.mrb[16].mxu1 %v10990_v6  ;;  %5273 = vmatmul.mubr.bf16.gmra.mrb[224].mxu0 %v10990_v6 }
 0x900   :  { %v4050_v27 = vsel %vm3874_vm2, %v7590_v14, 0.0  ;;  %4103 = vperm.xlu1 %7555, %v4071_v24   ;;  %v7592_v0 = vpop.eup %7591  ;;  %5136 = vmatprep.mubr.bf16.mxu1 %v12423_v57  ;;  %v12757_v24 = vld [vmem:[#allocation114_spill] sm:$0xff] }
 0x901   :  { %v4051_v40 = vadd.f32 %v4050_v27, %v4049_v15  ;;  %v4047_v52 = vrot.slane %v4046_v56, 1  ;;  %v4074_v35 = vmul.f32 %v7592_v0, %v10837_v33  ;;  %5282 = vmatprep.mubr.bf16.mxu0 %v12423_v57  ;;  %v4075_v22 = vmul.f32 %v7592_v0, %v10849_v30 }
 0x903   :  { %v4052_v55 = vrot.slane %v4051_v40, 4  ;;  %v4048_v2 = vadd.f32 %v4047_v52, %v4046_v56 }
 0x904   :  { %v7594_v7 = vpop.eup %7593  ;;  %4108 = vperm.xlu1 %7555, %v4072_v12   ;;  %v12758_v12 = vld [vmem:[#allocation110_spill] sm:$0xff] }
 0x905   :  { %v7596_v13 = vpop.eup %7595  ;;  %v4058_v54 = vsel %vm3874_vm2, %v7594_v7, 0.0  ;;  %v4053_v37 = vadd.f32 %v4052_v55, %v4051_v40  ;;  %7601 = vrcp.f32 %v4048_v2  ;;  %v12759_v55 = vld [vmem:[#allocation113_spill] sm:$0xff] }
 0x906   :  { %v4059_v18 = vsel %vm3874_vm2, %v7596_v13, 0.0 }
 0x907   :  { %v7598_v49 = vpop.eup %7597  ;;  %v4060_v48 = vadd.f32 %v4059_v18, %v4058_v54  ;;  %v4054_v3 = vrot.slane %v4053_v37, 2  ;;  %5137 = vmatmul.mubr.bf16.gmra.mrb[20].mxu1 %v10998_v42  ;;  %5283 = vmatmul.mubr.bf16.gmra.mrb[228].mxu0 %v10998_v42 }
 0x908   :  { %4113 = vperm.xlu1 %7555, %v4074_v35   ;;  %v4081_v6 = vmul.f32 %v7598_v49, %v11004_v17  ;;  %v7600_v20 = vpop.eup %7599  ;;  %v4080_v42 = vmul.f32 %v7598_v49, %v11000_v21  ;;  %v12751_v21 = vld [vmem:[#allocation109_spill] sm:$0xff]  ;;  %v12760_v35 = vld [vmem:[#allocation119_spill] sm:$0xff] }
 0x909   :  { %v4061_v33 = vrot.slane %v4060_v48, 4  ;;  %v4055_v59 = vadd.f32 %v4054_v3, %v4053_v37  ;;  %v4077_v46 = vmul.f32 %v7600_v20, %v10919_v51  ;;  %v4078_v30 = vmul.f32 %v7600_v20, %v10929_v8 }
 0x90a   :  { %4138 = vperm.xlu0 %7554, %v4081_v6   ;;  %v12762_v6 = vld [vmem:[#allocation111_spill] sm:$0xff] }
 0x90b   :  { %v4056_v57 = vrot.slane %v4055_v59, 1  ;;  %v4062_v11 = vadd.f32 %v4061_v33, %v4060_v48  ;;  %v12763_v33 = vld [vmem:[#allocation101_spill] sm:$0xff] }
 0x90c   :  { %4118 = vperm.xlu1 %7555, %v4075_v22   ;;  %v12764_v22 = vld [vmem:[#allocation123_spill] sm:$0xff] }
 0x90d   :  { %v4057_v39 = vadd.f32 %v4056_v57, %v4055_v59  ;;  %v4063_v43 = vrot.slane %v4062_v11, 2 }
 0x90f   :  { %7603 = vrcp.f32 %v4057_v39  ;;  %v4064_v31 = vadd.f32 %v4063_v43, %v4062_v11  ;;  %v7602_v17 = vpop.eup %7601  ;;  %v12765_v11 = vld [vmem:[#allocation124_spill] sm:$0xff] }
 0x910   :  { %4123 = vperm.xlu1 %7555, %v4077_v46   ;;  %v4084_v1 = vmul.f32 %v7602_v17, %v11018_v28  ;;  %v4083_v51 = vmul.f32 %v7602_v17, %v11014_v50  ;;  %v12753_v50 = vld [vmem:[#allocation116_spill] sm:$0xff] }
 0x911   :  { %v4065_v25 = vrot.slane %v4064_v31, 1 }
 0x912   :  { %4148 = vperm.xlu0 %7554, %v4084_v1  }
 0x913   :  { %v4066_v34 = vadd.f32 %v4065_v25, %v4064_v31 }
 0x914   :  { %4128 = vperm.xlu1 %7555, %v4078_v30  }
 0x915   :  { %7605 = vrcp.f32 %v4066_v34 }
 0x918   :  { %4133 = vperm.xlu1 %7555, %v4080_v42  }
 0x919   :  { %v7604_v26 = vpop.eup %7603 }
 0x91a   :  { %v4087_v36 = vmul.f32 %v7604_v26, %v7590_v14  ;;  %v4086_v16 = vmul.f32 %v7604_v26, %v7588_v23 }
 0x91c   :  { %4143 = vperm.xlu1 %7555, %v4083_v51   ;;  %4158 = vperm.xlu0 %7554, %v4087_v36  }
 0x91f   :  { %v7606_v60 = vpop.eup %7605 }
 0x920   :  { %4153 = vperm.xlu1 %7555, %v4086_v16   ;;  %v4090_v28 = vmul.f32 %v7606_v60, %v7596_v13  ;;  %v4089_v45 = vmul.f32 %v7606_v60, %v7594_v7  ;;  %v12761_v13 = vld [vmem:[#allocation122_spill] sm:$0xff] }
 0x922   :  { %4168 = vperm.xlu0 %7554, %v4090_v28  }
 0x924   :  { %4163 = vperm.xlu1 %7555, %v4089_v45  }
 0x97b   :  { %v4099_v8 = vpop.permute.xlu1 %4098  ;;  %v4094_v61 = vpop.permute.xlu0 %4093 }
 0x97c   :  { %v4175_v32 = vmul.f32 %v4099_v8, %v12750_v4  ;;  %v4176_v9 = vmul.f32 %v4099_v8, %v12751_v21  ;;  %v4177_v63 = vmul.f32 %v4099_v8, %v12752_v38  ;;  %v4178_v29 = vmul.f32 %v4099_v8, %v12753_v50 }
 0x97d   :  { %v4171_v53 = vmul.f32 %v4094_v61, %v12754_v19  ;;  %v4172_v44 = vmul.f32 %v4094_v61, %v12755_v41  ;;  %v4173_v5 = vmul.f32 %v4094_v61, %v12756_v58  ;;  %v4174_v62 = vmul.f32 %v4094_v61, %v12757_v24 }
 0x97f   :  { %v4235_v23 = vadd.f32 %v4175_v32, %v4171_v53  ;;  %v4242_v10 = vadd.f32 %v4176_v9, %v4172_v44  ;;  %v4249_v14 = vadd.f32 %v4177_v63, %v4173_v5  ;;  %v4256_v15 = vadd.f32 %v4178_v29, %v4174_v62  ;;  %v4104_v27 = vpop.permute.xlu1 %4103 }
 0x980   :  { %v4179_v52 = vmul.f32 %v4104_v27, %v12758_v12  ;;  %v4180_v7 = vmul.f32 %v4104_v27, %v12759_v55  ;;  %v4181_v2 = vmul.f32 %v4104_v27, %v12760_v35  ;;  %v4182_v54 = vmul.f32 %v4104_v27, %v12761_v13  ;;  %v12772_v27 = vld [vmem:[#allocation127_spill] sm:$0xff] }
 0x981   :  { %v4236_v56 = vrot.slane %v4235_v23, 4  ;;  %v4243_v0 = vrot.slane %v4242_v10, 4  ;;  %v4250_v40 = vrot.slane %v4249_v14, 4  ;;  %v4257_v47 = vrot.slane %v4256_v15, 4 }
 0x983   :  { %v4237_v37 = vadd.f32 %v4236_v56, %v4235_v23  ;;  %v4244_v18 = vadd.f32 %v4243_v0, %v4242_v10  ;;  %v4251_v49 = vadd.f32 %v4250_v40, %v4249_v14  ;;  %v4258_v48 = vadd.f32 %v4257_v47, %v4256_v15  ;;  %v4109_v3 = vpop.permute.xlu1 %4108  ;;  %v12770_v23 = vld [vmem:[#allocation117_spill] sm:$0xff]  ;;  %v12771_v14 = vld [vmem:[#allocation120_spill] sm:$0xff]  ;;  %v12773_v0 = vld [vmem:[#allocation130_spill] sm:$0xff] }
 0x984   :  { %v4183_v20 = vmul.f32 %v4109_v3, %v12762_v6  ;;  %v4184_v59 = vmul.f32 %v4109_v3, %v12763_v33  ;;  %v4185_v57 = vmul.f32 %v4109_v3, %v12764_v22  ;;  %v4186_v46 = vmul.f32 %v4109_v3, %v12765_v11 }
 0x985   :  { %v4238_v39 = vrot.slane %v4237_v37, 2  ;;  %v4245_v43 = vrot.slane %v4244_v18, 2  ;;  %v4252_v31 = vrot.slane %v4251_v49, 2  ;;  %v4259_v17 = vrot.slane %v4258_v48, 2 }
 0x986   :  { %v4263_v1 = vadd.f32 %v4183_v20, %v4179_v52  ;;  %v4270_v25 = vadd.f32 %v4184_v59, %v4180_v7  ;;  %v4277_v30 = vadd.f32 %v4185_v57, %v4181_v2  ;;  %v4284_v34 = vadd.f32 %v4186_v46, %v4182_v54  ;;  %v12774_v7 = vld [vmem:[#allocation118_spill] sm:$0xff]  ;;  %v12775_v2 = vld [vmem:[#allocation121_spill] sm:$0xff]  ;;  %v12776_v54 = vld [vmem:[#allocation131_spill] sm:$0xff] }
 0x987   :  { %v4239_v42 = vadd.f32 %v4238_v39, %v4237_v37  ;;  %v4246_v51 = vadd.f32 %v4245_v43, %v4244_v18  ;;  %v4253_v26 = vadd.f32 %v4252_v31, %v4251_v49  ;;  %v4260_v36 = vadd.f32 %v4259_v17, %v4258_v48  ;;  %v4114_v16 = vpop.permute.xlu1 %4113  ;;  %v12777_v18 = vld [vmem:[#allocation132_spill] sm:$0xff] }
 0x988   :  { %v4264_v60 = vrot.slane %v4263_v1, 4  ;;  %v4271_v28 = vrot.slane %v4270_v25, 4  ;;  %v4278_v45 = vrot.slane %v4277_v30, 4  ;;  %v4285_v8 = vrot.slane %v4284_v34, 4 }
 0x989   :  { %v4240_v61 = vrot.slane %v4239_v42, 1  ;;  %v4247_v4 = vrot.slane %v4246_v51, 1  ;;  %v4254_v32 = vrot.slane %v4253_v26, 1  ;;  %v4261_v21 = vrot.slane %v4260_v36, 1 }
 0x98a   :  { %v4265_v9 = vadd.f32 %v4264_v60, %v4263_v1  ;;  %v4272_v38 = vadd.f32 %v4271_v28, %v4270_v25  ;;  %v4279_v63 = vadd.f32 %v4278_v45, %v4277_v30  ;;  %v4286_v50 = vadd.f32 %v4285_v8, %v4284_v34  ;;  %v12785_v28 = vld [vmem:[#allocation138_spill] sm:$0xff] }
 0x98b   :  { %v11068_v29 = vadd.f32 %v4240_v61, %v4239_v42  ;;  %v11070_v19 = vadd.f32 %v4247_v4, %v4246_v51  ;;  %v11072_v53 = vadd.f32 %v4254_v32, %v4253_v26  ;;  %v11074_v41 = vadd.f32 %v4261_v21, %v4260_v36  ;;  %v4119_v44 = vpop.permute.xlu1 %4118  ;;  %v12782_v42 = vld [vmem:[#allocation125_spill] sm:$0xff]  ;;  %v12783_v26 = vld [vmem:[#allocation128_spill] sm:$0xff]  ;;  %v12786_v21 = vld [vmem:[#allocation126_spill] sm:$0xff] }
 0x98c   :  { %v4266_v58 = vrot.slane %v4265_v9, 2  ;;  %v4273_v5 = vrot.slane %v4272_v38, 2  ;;  %v4280_v24 = vrot.slane %v4279_v63, 2  ;;  %v4287_v62 = vrot.slane %v4286_v50, 2 }
 0x98d   :  { %12766 = vst [vmem:[#allocation25_spill] sm:$0xff] %v11068_v29  ;;  %12767 = vst [vmem:[#allocation41_spill] sm:$0xff] %v11070_v19  ;;  %v4187_v10 = vmul.f32 %v4114_v16, %v12770_v23  ;;  %v4188_v15 = vmul.f32 %v4114_v16, %v12771_v14  ;;  %v4189_v56 = vmul.f32 %v4114_v16, %v12772_v27 }
 0x98e   :  { %12768 = vst [vmem:[#allocation34_spill] sm:$0xff] %v11072_v53  ;;  %12769 = vst [vmem:[#allocation50_spill] sm:$0xff] %v11074_v41  ;;  %v4190_v40 = vmul.f32 %v4114_v16, %v12773_v0  ;;  %v4267_v47 = vadd.f32 %v4266_v58, %v4265_v9  ;;  %v4274_v12 = vadd.f32 %v4273_v5, %v4272_v38  ;;  %v12784_v16 = vld [vmem:[#allocation135_spill] sm:$0xff]  ;;  %v12787_v38 = vld [vmem:[#allocation129_spill] sm:$0xff] }
 0x98f   :  { %v4281_v52 = vadd.f32 %v4280_v24, %v4279_v63  ;;  %v4288_v55 = vadd.f32 %v4287_v62, %v4286_v50  ;;  %v4191_v35 = vmul.f32 %v4119_v44, %v12774_v7  ;;  %v4192_v13 = vmul.f32 %v4119_v44, %v12775_v2  ;;  %v4124_v48 = vpop.permute.xlu1 %4123  ;;  %v12788_v50 = vld [vmem:[#allocation139_spill] sm:$0xff]  ;;  %v12789_v58 = vld [vmem:[#allocation140_spill] sm:$0xff] }
 0x990   :  { %v4193_v37 = vmul.f32 %v4119_v44, %v12776_v54  ;;  %v4194_v49 = vmul.f32 %v4119_v44, %v12777_v18  ;;  %v4268_v3 = vrot.slane %v4267_v47, 1  ;;  %v4275_v6 = vrot.slane %v4274_v12, 1 }
 0x991   :  { %v4282_v20 = vrot.slane %v4281_v52, 1  ;;  %v4289_v33 = vrot.slane %v4288_v55, 1  ;;  %v4291_v59 = vadd.f32 %v4191_v35, %v4187_v10  ;;  %v4298_v22 = vadd.f32 %v4192_v13, %v4188_v15 }
 0x992   :  { %v4305_v57 = vadd.f32 %v4193_v37, %v4189_v56  ;;  %v4312_v11 = vadd.f32 %v4194_v49, %v4190_v40  ;;  %v11084_v46 = vadd.f32 %v4268_v3, %v4267_v47  ;;  %v11086_v39 = vadd.f32 %v4275_v6, %v4274_v12 }
 0x993   :  { %v11088_v43 = vadd.f32 %v4282_v20, %v4281_v52  ;;  %v11090_v31 = vadd.f32 %v4289_v33, %v4288_v55  ;;  %v4292_v17 = vrot.slane %v4291_v59, 4  ;;  %v4299_v1 = vrot.slane %v4298_v22, 4  ;;  %v4129_v34 = vpop.permute.xlu1 %4128 }
 0x994   :  { %12778 = vst [vmem:[#allocation26_spill] sm:$0xff] %v11084_v46  ;;  %12779 = vst [vmem:[#allocation42_spill] sm:$0xff] %v11086_v39  ;;  %v4306_v25 = vrot.slane %v4305_v57, 4  ;;  %v4313_v30 = vrot.slane %v4312_v11, 4  ;;  %v4195_v51 = vmul.f32 %v4124_v48, %v12782_v42  ;;  %v4196_v36 = vmul.f32 %v4124_v48, %v12783_v26  ;;  %v12795_v42 = vld [vmem:[#allocation136_spill] sm:$0xff]  ;;  %v12796_v26 = vld [vmem:[#allocation143_spill] sm:$0xff] }
 0x995   :  { %12780 = vst [vmem:[#allocation35_spill] sm:$0xff] %v11088_v43  ;;  %12781 = vst [vmem:[#allocation51_spill] sm:$0xff] %v11090_v31  ;;  %v4197_v60 = vmul.f32 %v4124_v48, %v12784_v16  ;;  %v4198_v45 = vmul.f32 %v4124_v48, %v12785_v28  ;;  %v4293_v8 = vadd.f32 %v4292_v17, %v4291_v59  ;;  %v12797_v16 = vld [vmem:[#allocation146_spill] sm:$0xff] }
 0x996   :  { %v4300_v61 = vadd.f32 %v4299_v1, %v4298_v22  ;;  %v4307_v4 = vadd.f32 %v4306_v25, %v4305_v57  ;;  %v4314_v32 = vadd.f32 %v4313_v30, %v4312_v11  ;;  %v4199_v9 = vmul.f32 %v4129_v34, %v12786_v21  ;;  %v4139_v25 = vpop.permute.xlu0 %4138  ;;  %v12794_v30 = vld [vmem:[#allocation133_spill] sm:$0xff] }
 0x997   :  { %v4200_v63 = vmul.f32 %v4129_v34, %v12787_v38  ;;  %v4201_v44 = vmul.f32 %v4129_v34, %v12788_v50  ;;  %v4202_v5 = vmul.f32 %v4129_v34, %v12789_v58  ;;  %v4294_v24 = vrot.slane %v4293_v8, 2  ;;  %v4134_v6 = vpop.permute.xlu1 %4133  ;;  %v12799_v21 = vld [vmem:[#allocation137_spill] sm:$0xff]  ;;  %v12800_v38 = vld [vmem:[#allocation147_spill] sm:$0xff]  ;;  %v12801_v50 = vld [vmem:[#allocation148_spill] sm:$0xff] }
 0x998   :  { %v4301_v62 = vrot.slane %v4300_v61, 2  ;;  %v4308_v23 = vrot.slane %v4307_v4, 2  ;;  %v4315_v10 = vrot.slane %v4314_v32, 2  ;;  %v4319_v14 = vadd.f32 %v4199_v9, %v4195_v51 }
 0x999   :  { %v4326_v15 = vadd.f32 %v4200_v63, %v4196_v36  ;;  %v4333_v27 = vadd.f32 %v4201_v44, %v4197_v60  ;;  %v4340_v56 = vadd.f32 %v4202_v5, %v4198_v45  ;;  %v4295_v0 = vadd.f32 %v4294_v24, %v4293_v8 }
 0x99a   :  { %v4302_v40 = vadd.f32 %v4301_v62, %v4300_v61  ;;  %v4309_v47 = vadd.f32 %v4308_v23, %v4307_v4  ;;  %v4316_v12 = vadd.f32 %v4315_v10, %v4314_v32  ;;  %v4320_v52 = vrot.slane %v4319_v14, 4  ;;  %v12798_v4 = vld [vmem:[#allocation134_spill] sm:$0xff] }
 0x99b   :  { %v4327_v55 = vrot.slane %v4326_v15, 4  ;;  %v4334_v7 = vrot.slane %v4333_v27, 4  ;;  %v4341_v35 = vrot.slane %v4340_v56, 4  ;;  %v4296_v2 = vrot.slane %v4295_v0, 1 }
 0x99c   :  { %v4303_v13 = vrot.slane %v4302_v40, 1  ;;  %v4310_v54 = vrot.slane %v4309_v47, 1  ;;  %v4317_v37 = vrot.slane %v4316_v12, 1  ;;  %v4321_v18 = vadd.f32 %v4320_v52, %v4319_v14 }
 0x99d   :  { %v4328_v49 = vadd.f32 %v4327_v55, %v4326_v15  ;;  %v4335_v48 = vadd.f32 %v4334_v7, %v4333_v27  ;;  %v4342_v3 = vadd.f32 %v4341_v35, %v4340_v56  ;;  %v11100_v20 = vadd.f32 %v4296_v2, %v4295_v0  ;;  %v4144_v27 = vpop.permute.xlu1 %4143  ;;  %v4149_v35 = vpop.permute.xlu0 %4148  ;;  %v12806_v2 = vld [vmem:[#allocation141_spill] sm:$0xff] }
 0x99e   :  { %v11102_v33 = vadd.f32 %v4303_v13, %v4302_v40  ;;  %v11104_v59 = vadd.f32 %v4310_v54, %v4309_v47  ;;  %v11106_v22 = vadd.f32 %v4317_v37, %v4316_v12  ;;  %v4322_v57 = vrot.slane %v4321_v18, 2  ;;  %v12807_v54 = vld [vmem:[#allocation144_spill] sm:$0xff] }
 0x99f   :  { %12790 = vst [vmem:[#allocation27_spill] sm:$0xff] %v11100_v20  ;;  %v4329_v11 = vrot.slane %v4328_v49, 2  ;;  %v4336_v17 = vrot.slane %v4335_v48, 2  ;;  %v4343_v1 = vrot.slane %v4342_v3, 2  ;;  %v4203_v34 = vmul.f32 %v4134_v6, %v12794_v30  ;;  %v12811_v30 = vld [vmem:[#allocation145_spill] sm:$0xff] }
 0x9a0   :  { %12791 = vst [vmem:[#allocation43_spill] sm:$0xff] %v11102_v33  ;;  %12792 = vst [vmem:[#allocation36_spill] sm:$0xff] %v11104_v59  ;;  %v4204_v51 = vmul.f32 %v4134_v6, %v12795_v42  ;;  %v4205_v36 = vmul.f32 %v4134_v6, %v12796_v26  ;;  %v4206_v60 = vmul.f32 %v4134_v6, %v12797_v16  ;;  %v12812_v42 = vld [vmem:[#allocation155_spill] sm:$0xff]  ;;  %v12813_v26 = vld [vmem:[#allocation156_spill] sm:$0xff] }
 0x9a1   :  { %12793 = vst [vmem:[#allocation52_spill] sm:$0xff] %v11106_v22  ;;  %v4323_v28 = vadd.f32 %v4322_v57, %v4321_v18  ;;  %v4330_v45 = vadd.f32 %v4329_v11, %v4328_v49  ;;  %v4337_v8 = vadd.f32 %v4336_v17, %v4335_v48  ;;  %v4344_v61 = vadd.f32 %v4343_v1, %v4342_v3  ;;  %v12808_v18 = vld [vmem:[#allocation151_spill] sm:$0xff]  ;;  %v12809_v48 = vld [vmem:[#allocation154_spill] sm:$0xff] }
 0x9a2   :  { %v4207_v32 = vmul.f32 %v4139_v25, %v12798_v4  ;;  %v4208_v9 = vmul.f32 %v4139_v25, %v12799_v21  ;;  %v4209_v63 = vmul.f32 %v4139_v25, %v12800_v38  ;;  %v4210_v44 = vmul.f32 %v4139_v25, %v12801_v50  ;;  %v12810_v1 = vld [vmem:[#allocation142_spill] sm:$0xff] }
 0x9a3   :  { %v4324_v58 = vrot.slane %v4323_v28, 1  ;;  %v4331_v5 = vrot.slane %v4330_v45, 1  ;;  %v4338_v24 = vrot.slane %v4337_v8, 1  ;;  %v4345_v62 = vrot.slane %v4344_v61, 1 }
 0x9a4   :  { %v4347_v23 = vadd.f32 %v4207_v32, %v4203_v34  ;;  %v4354_v10 = vadd.f32 %v4208_v9, %v4204_v51  ;;  %v4361_v14 = vadd.f32 %v4209_v63, %v4205_v36  ;;  %v4368_v15 = vadd.f32 %v4210_v44, %v4206_v60 }
 0x9a5   :  { %v11116_v56 = vadd.f32 %v4324_v58, %v4323_v28  ;;  %v11118_v0 = vadd.f32 %v4331_v5, %v4330_v45  ;;  %v11120_v40 = vadd.f32 %v4338_v24, %v4337_v8  ;;  %v11122_v47 = vadd.f32 %v4345_v62, %v4344_v61 }
 0x9a6   :  { %v4348_v12 = vrot.slane %v4347_v23, 4  ;;  %v4355_v52 = vrot.slane %v4354_v10, 4  ;;  %v4362_v55 = vrot.slane %v4361_v14, 4  ;;  %v4369_v7 = vrot.slane %v4368_v15, 4 }
 0x9a7   :  { %12802 = vst [vmem:[#allocation28_spill] sm:$0xff] %v11116_v56  ;;  %12803 = vst [vmem:[#allocation44_spill] sm:$0xff] %v11118_v0  ;;  %v4211_v13 = vmul.f32 %v4144_v27, %v12806_v2  ;;  %v4212_v37 = vmul.f32 %v4144_v27, %v12807_v54  ;;  %v4213_v49 = vmul.f32 %v4144_v27, %v12808_v18 }
 0x9a8   :  { %12804 = vst [vmem:[#allocation234_spill] sm:$0xff] %v11120_v40  ;;  %12805 = vst [vmem:[#allocation236_spill] sm:$0xff] %v11122_v47  ;;  %v4214_v3 = vmul.f32 %v4144_v27, %v12809_v48  ;;  %v4349_v6 = vadd.f32 %v4348_v12, %v4347_v23  ;;  %v4356_v57 = vadd.f32 %v4355_v52, %v4354_v10  ;;  %v4154_v52 = vpop.permute.xlu1 %4153  ;;  %v12818_v48 = vld [vmem:[#allocation149_spill] sm:$0xff] }
 0x9a9   :  { %v4363_v11 = vadd.f32 %v4362_v55, %v4361_v14  ;;  %v4370_v17 = vadd.f32 %v4369_v7, %v4368_v15  ;;  %v4215_v25 = vmul.f32 %v4149_v35, %v12810_v1  ;;  %v4216_v34 = vmul.f32 %v4149_v35, %v12811_v30  ;;  %v12821_v1 = vld [vmem:[#allocation162_spill] sm:$0xff] }
 0x9aa   :  { %v4217_v51 = vmul.f32 %v4149_v35, %v12812_v42  ;;  %v4218_v36 = vmul.f32 %v4149_v35, %v12813_v26  ;;  %v4350_v16 = vrot.slane %v4349_v6, 2  ;;  %v4357_v60 = vrot.slane %v4356_v57, 2  ;;  %v12822_v26 = vld [vmem:[#allocation150_spill] sm:$0xff] }
 0x9ab   :  { %v4364_v28 = vrot.slane %v4363_v11, 2  ;;  %v4371_v45 = vrot.slane %v4370_v17, 2  ;;  %v4375_v8 = vadd.f32 %v4215_v25, %v4211_v13  ;;  %v4382_v61 = vadd.f32 %v4216_v34, %v4212_v37 }
 0x9ac   :  { %v4389_v4 = vadd.f32 %v4217_v51, %v4213_v49  ;;  %v4396_v32 = vadd.f32 %v4218_v36, %v4214_v3  ;;  %v4351_v21 = vadd.f32 %v4350_v16, %v4349_v6  ;;  %v4358_v9 = vadd.f32 %v4357_v60, %v4356_v57  ;;  %v4159_v49 = vpop.permute.xlu0 %4158  ;;  %v12819_v6 = vld [vmem:[#allocation152_spill] sm:$0xff]  ;;  %v12823_v16 = vld [vmem:[#allocation153_spill] sm:$0xff] }
 0x9ad   :  { %v4365_v38 = vadd.f32 %v4364_v28, %v4363_v11  ;;  %v4372_v63 = vadd.f32 %v4371_v45, %v4370_v17  ;;  %v4376_v50 = vrot.slane %v4375_v8, 4  ;;  %v4383_v44 = vrot.slane %v4382_v61, 4  ;;  %v12820_v11 = vld [vmem:[#allocation159_spill] sm:$0xff] }
 0x9ae   :  { %v4390_v58 = vrot.slane %v4389_v4, 4  ;;  %v4397_v5 = vrot.slane %v4396_v32, 4  ;;  %v4352_v24 = vrot.slane %v4351_v21, 1  ;;  %v4359_v62 = vrot.slane %v4358_v9, 1  ;;  %v12824_v28 = vld [vmem:[#allocation163_spill] sm:$0xff] }
 0x9af   :  { %v4366_v23 = vrot.slane %v4365_v38, 1  ;;  %v4373_v10 = vrot.slane %v4372_v63, 1  ;;  %v4377_v14 = vadd.f32 %v4376_v50, %v4375_v8  ;;  %v4384_v15 = vadd.f32 %v4383_v44, %v4382_v61  ;;  %v12825_v8 = vld [vmem:[#allocation164_spill] sm:$0xff] }
 0x9b0   :  { %v4391_v27 = vadd.f32 %v4390_v58, %v4389_v4  ;;  %v4398_v12 = vadd.f32 %v4397_v5, %v4396_v32  ;;  %v11132_v55 = vadd.f32 %v4352_v24, %v4351_v21  ;;  %v11134_v7 = vadd.f32 %v4359_v62, %v4358_v9  ;;  %v4164_v58 = vpop.permute.xlu1 %4163 }
 0x9b1   :  { %v11136_v35 = vadd.f32 %v4366_v23, %v4365_v38  ;;  %v11138_v2 = vadd.f32 %v4373_v10, %v4372_v63  ;;  %v4378_v13 = vrot.slane %v4377_v14, 2  ;;  %v4385_v54 = vrot.slane %v4384_v15, 2 }
 0x9b2   :  { %12814 = vst [vmem:[#allocation238_spill] sm:$0xff] %v11132_v55  ;;  %12815 = vst [vmem:[#allocation233_spill] sm:$0xff] %v11134_v7  ;;  %v4392_v37 = vrot.slane %v4391_v27, 2  ;;  %v4399_v18 = vrot.slane %v4398_v12, 2  ;;  %v4219_v3 = vmul.f32 %v4154_v52, %v12818_v48  ;;  %v4220_v57 = vmul.f32 %v4154_v52, %v12819_v6  ;;  %v12833_v48 = vld [vmem:[#allocation166_spill] sm:$0xff] }
 0x9b3   :  { %12816 = vst [vmem:[#allocation235_spill] sm:$0xff] %v11136_v35  ;;  %12817 = vst [vmem:[#allocation237_spill] sm:$0xff] %v11138_v2  ;;  %v4221_v17 = vmul.f32 %v4154_v52, %v12820_v11  ;;  %v4222_v25 = vmul.f32 %v4154_v52, %v12821_v1  ;;  %v4379_v30 = vadd.f32 %v4378_v13, %v4377_v14  ;;  %v12830_v52 = vld [vmem:[#allocation157_spill] sm:$0xff]  ;;  %v12834_v1 = vld [vmem:[#allocation158_spill] sm:$0xff] }
 0x9b4   :  { %v4386_v34 = vadd.f32 %v4385_v54, %v4384_v15  ;;  %v4393_v42 = vadd.f32 %v4392_v37, %v4391_v27  ;;  %v4400_v51 = vadd.f32 %v4399_v18, %v4398_v12  ;;  %v4223_v36 = vmul.f32 %v4159_v49, %v12822_v26  ;;  %v4169_v12 = vpop.permute.xlu0 %4168  ;;  %v12831_v54 = vld [vmem:[#allocation160_spill] sm:$0xff]  ;;  %v12832_v18 = vld [vmem:[#allocation165_spill] sm:$0xff] }
 0x9b5   :  { %v4224_v60 = vmul.f32 %v4159_v49, %v12823_v16  ;;  %v4225_v45 = vmul.f32 %v4159_v49, %v12824_v28  ;;  %v4226_v61 = vmul.f32 %v4159_v49, %v12825_v8  ;;  %v4380_v4 = vrot.slane %v4379_v30, 1  ;;  %v12837_v26 = vld [vmem:[#allocation168_spill] sm:$0xff] }
 0x9b6   :  { %v4387_v32 = vrot.slane %v4386_v34, 1  ;;  %v4394_v21 = vrot.slane %v4393_v42, 1  ;;  %v4401_v9 = vrot.slane %v4400_v51, 1  ;;  %v4403_v38 = vadd.f32 %v4223_v36, %v4219_v3 }
 0x9b7   :  { %v4410_v63 = vadd.f32 %v4224_v60, %v4220_v57  ;;  %v4417_v50 = vadd.f32 %v4225_v45, %v4221_v17  ;;  %v4424_v44 = vadd.f32 %v4226_v61, %v4222_v25  ;;  %v11148_v5 = vadd.f32 %v4380_v4, %v4379_v30  ;;  %v12835_v30 = vld [vmem:[#allocation161_spill] sm:$0xff] }
 0x9b8   :  { %v11150_v24 = vadd.f32 %v4387_v32, %v4386_v34  ;;  %v11152_v62 = vadd.f32 %v4394_v21, %v4393_v42  ;;  %v11154_v23 = vadd.f32 %v4401_v9, %v4400_v51  ;;  %v4404_v10 = vrot.slane %v4403_v38, 4  ;;  %v12836_v42 = vld [vmem:[#allocation167_spill] sm:$0xff] }
 0x9b9   :  { %12826 = vst [vmem:[#allocation239_spill] sm:$0xff] %v11148_v5  ;;  %v4411_v14 = vrot.slane %v4410_v63, 4  ;;  %v4418_v15 = vrot.slane %v4417_v50, 4  ;;  %v4425_v27 = vrot.slane %v4424_v44, 4  ;;  %v4227_v13 = vmul.f32 %v4164_v58, %v12830_v52 }
 0x9ba   :  { %12827 = vst [vmem:[#allocation242_spill] sm:$0xff] %v11150_v24  ;;  %12828 = vst [vmem:[#allocation248_spill] sm:$0xff] %v11152_v62  ;;  %v4228_v37 = vmul.f32 %v4164_v58, %v12831_v54  ;;  %v4229_v49 = vmul.f32 %v4164_v58, %v12832_v18  ;;  %v4230_v3 = vmul.f32 %v4164_v58, %v12833_v48 }
 0x9bb   :  { %12829 = vst [vmem:[#allocation250_spill] sm:$0xff] %v11154_v23  ;;  %v4405_v6 = vadd.f32 %v4404_v10, %v4403_v38  ;;  %v4412_v57 = vadd.f32 %v4411_v14, %v4410_v63  ;;  %v4419_v11 = vadd.f32 %v4418_v15, %v4417_v50  ;;  %v4426_v17 = vadd.f32 %v4425_v27, %v4424_v44 }
 0x9bc   :  { %v4231_v25 = vmul.f32 %v4169_v12, %v12834_v1  ;;  %v4232_v34 = vmul.f32 %v4169_v12, %v12835_v30  ;;  %v4233_v51 = vmul.f32 %v4169_v12, %v12836_v42  ;;  %v4234_v36 = vmul.f32 %v4169_v12, %v12837_v26 }
 0x9bd   :  { %v4406_v16 = vrot.slane %v4405_v6, 2  ;;  %v4413_v60 = vrot.slane %v4412_v57, 2  ;;  %v4420_v28 = vrot.slane %v4419_v11, 2  ;;  %v4427_v45 = vrot.slane %v4426_v17, 2 }
 0x9be   :  { %v4431_v8 = vadd.f32 %v4231_v25, %v4227_v13  ;;  %v4438_v61 = vadd.f32 %v4232_v34, %v4228_v37  ;;  %v4445_v4 = vadd.f32 %v4233_v51, %v4229_v49  ;;  %v4452_v32 = vadd.f32 %v4234_v36, %v4230_v3  ;;  %v4967_v13 = vld [vmem:[#allocation9 + $0x1d] sm:$0xf]  ;;  %v12842_v25 = vld [vmem:[#allocation102_spill] sm:$0xff]  ;;  %v12843_v34 = vld [vmem:[#allocation105_spill] sm:$0xff] }
 0x9bf   :  { %v4407_v21 = vadd.f32 %v4406_v16, %v4405_v6  ;;  %v4414_v9 = vadd.f32 %v4413_v60, %v4412_v57  ;;  %v4421_v38 = vadd.f32 %v4420_v28, %v4419_v11  ;;  %v4428_v63 = vadd.f32 %v4427_v45, %v4426_v17  ;;  %v12844_v60 = vld [vmem:[#allocation103_spill] sm:$0xff]  ;;  %v12845_v45 = vld [vmem:[#allocation108_spill] sm:$0xff] }
 0x9c0   :  { %v4432_v50 = vrot.slane %v4431_v8, 4  ;;  %v4439_v44 = vrot.slane %v4438_v61, 4  ;;  %v4446_v58 = vrot.slane %v4445_v4, 4  ;;  %v4453_v10 = vrot.slane %v4452_v32, 4 }
 0x9c1   :  { %v4408_v14 = vrot.slane %v4407_v21, 1  ;;  %v4415_v15 = vrot.slane %v4414_v9, 1  ;;  %v4422_v27 = vrot.slane %v4421_v38, 1  ;;  %v4429_v12 = vrot.slane %v4428_v63, 1 }
 0x9c2   :  { %v4433_v52 = vadd.f32 %v4432_v50, %v4431_v8  ;;  %v4440_v54 = vadd.f32 %v4439_v44, %v4438_v61  ;;  %v4447_v18 = vadd.f32 %v4446_v58, %v4445_v4  ;;  %v4454_v48 = vadd.f32 %v4453_v10, %v4452_v32 }
 0x9c3   :  { %v11164_v37 = vadd.f32 %v4408_v14, %v4407_v21  ;;  %v11166_v49 = vadd.f32 %v4415_v15, %v4414_v9  ;;  %v11168_v3 = vadd.f32 %v4422_v27, %v4421_v38  ;;  %v11170_v6 = vadd.f32 %v4429_v12, %v4428_v63  ;;  %v5108_v9 = vpop.f32.mrb[8].mxu1  ;;  %v5254_v38 = vpop.f32.mrb[216].mxu0 }
 0x9c4   :  { %v4434_v57 = vrot.slane %v4433_v52, 2  ;;  %v4441_v11 = vrot.slane %v4440_v54, 2  ;;  %v4448_v17 = vrot.slane %v4447_v18, 2  ;;  %v4455_v1 = vrot.slane %v4454_v48, 2  ;;  %v5110_v44 = vpop.f32.mrb[9].mxu1  ;;  %v5256_v58 = vpop.f32.mrb[217].mxu0 }
 0x9c5   :  { %12838 = vst [vmem:[#allocation254_spill] sm:$0xff] %v11164_v37  ;;  %12839 = vst [vmem:[#allocation243_spill] sm:$0xff] %v11166_v49  ;;  %v11173_v30 = vrot.slane %v4967_v13, %v12842_v25  ;;  %v11176_v42 = vrot.slane %v4967_v13, %v12843_v34  ;;  %v11179_v28 = vrot.slane %v4967_v13, %v12844_v60  ;;  %v5112_v12 = vpop.f32.mrb[10].mxu1 }
 0x9c6   :  { %12840 = vst [vmem:[#allocation249_spill] sm:$0xff] %v11168_v3  ;;  %12841 = vst [vmem:[#allocation251_spill] sm:$0xff] %v11170_v6  ;;  %v4435_v51 = vadd.f32 %v4434_v57, %v4433_v52  ;;  %v4442_v26 = vadd.f32 %v4441_v11, %v4440_v54  ;;  %v4449_v36 = vadd.f32 %v4448_v17, %v4447_v18  ;;  %v5258_v52 = vpop.f32.mrb[218].mxu0  ;;  %v5114_v57 = vpop.f32.mrb[11].mxu1 }
 0x9c7   :  { %v4456_v16 = vadd.f32 %v4455_v1, %v4454_v48  ;;  %v11182_v8 = vrot.slane %v4967_v13, %v12845_v45  ;;  %v11185_v63 = vadd.f32 %v5108_v9, %v11173_v30  ;;  %v11188_v50 = vadd.f32 %v5254_v38, %v11176_v42  ;;  %v5260_v11 = vpop.f32.mrb[219].mxu0 }
 0x9c8   :  { %v4436_v61 = vrot.slane %v4435_v51, 1  ;;  %v4443_v4 = vrot.slane %v4442_v26, 1  ;;  %v4450_v32 = vrot.slane %v4449_v36, 1  ;;  %v11205_v48 = vadd.f32 %v5110_v44, %v11179_v28 }
 0x9c9   :  { %v4457_v21 = vrot.slane %v4456_v16, 1  ;;  %v11199_v54 = vmul.f32 0.01, %v11185_v63  ;;  %v11202_v18 = vmul.f32 0.01, %v11188_v50  ;;  %v11208_v13 = vadd.f32 %v5256_v58, %v11182_v8 }
 0x9ca   :  { %v11190_v10 = vadd.f32 %v4436_v61, %v4435_v51  ;;  %v11192_v14 = vadd.f32 %v4443_v4, %v4442_v26  ;;  %v11194_v15 = vadd.f32 %v4450_v32, %v4449_v36  ;;  %v11211_v17 = vadd.f32 %v5112_v12, %v11173_v30 }
 0x9cb   :  { %v11196_v27 = vadd.f32 %v4457_v21, %v4456_v16  ;;  %v11214_v1 = vadd.f32 %v5258_v52, %v11176_v42  ;;  %v11217_v51 = vadd.f32 %v5114_v57, %v11179_v28  ;;  %v11220_v26 = vadd.f32 %v5260_v11, %v11182_v8  ;;  %v5118_v11 = vpop.f32.mrb[12].mxu1  ;;  %v5264_v16 = vpop.f32.mrb[220].mxu0 }
 0x9cc   :  { %12846 = vst [vmem:[#allocation255_spill] sm:$0xff] %v11190_v10  ;;  %12847 = vst [vmem:[#allocation240_spill] sm:$0xff] %v11192_v14  ;;  %v11227_v61 = vmul.f32 0.01, %v11205_v48  ;;  %v11230_v4 = vmul.f32 0.01, %v11208_v13  ;;  %v11257_v38 = vadd.f32 %v5118_v11, %v11173_v30  ;;  %v11260_v44 = vadd.f32 %v5264_v16, %v11176_v42 }
 0x9cd   :  { %12848 = vst [vmem:[#allocation244_spill] sm:$0xff] %v11194_v15  ;;  %12849 = vst [vmem:[#allocation246_spill] sm:$0xff] %v11196_v27  ;;  %v11233_v32 = vmul.f32 0.01, %v11211_v17  ;;  %v11236_v21 = vmul.f32 0.01, %v11214_v1 }
 0x9ce   :  { %v11239_v9 = vmul.f32 0.01, %v11217_v51  ;;  %v11246_v58 = vmul.f32 0.01, %v11220_v26  ;;  %v5120_v45 = vpop.f32.mrb[13].mxu1  ;;  %v5266_v34 = vpop.f32.mrb[221].mxu0 }
 0x9cf   :  { %v11263_v12 = vadd.f32 %v5120_v45, %v11179_v28  ;;  %v11266_v52 = vadd.f32 %v5266_v34, %v11182_v8  ;;  %v5122_v57 = vpop.f32.mrb[14].mxu1  ;;  %v5268_v27 = vpop.f32.mrb[222].mxu0  ;;  %v11269_v15 = vmul.f32 0.01, %v11257_v38  ;;  %v11272_v36 = vmul.f32 0.01, %v11260_v44 }
 0x9d0   :  { %v11275_v11 = vadd.f32 %v5122_v57, %v11173_v30  ;;  %v11278_v16 = vadd.f32 %v5268_v27, %v11176_v42  ;;  %v5124_v14 = vpop.f32.mrb[15].mxu1  ;;  %v5270_v45 = vpop.f32.mrb[223].mxu0 }
 0x9d1   :  { %v11281_v10 = vmul.f32 0.01, %v11263_v12  ;;  %v11284_v34 = vmul.f32 0.01, %v11266_v52  ;;  %v11287_v6 = vadd.f32 %v5124_v14, %v11179_v28  ;;  %v11290_v3 = vadd.f32 %v5270_v45, %v11182_v8 }
 0x9d2   :  { %v11297_v49 = vmul.f32 0.01, %v11275_v11  ;;  %v11300_v37 = vmul.f32 0.01, %v11278_v16  ;;  %v5128_v5 = vpop.f32.mrb[16].mxu1  ;;  %v5274_v14 = vpop.f32.mrb[224].mxu0 }
 0x9d3   :  { %v11307_v45 = vmul.f32 0.01, %v11287_v6  ;;  %v11310_v57 = vmul.f32 0.01, %v11290_v3  ;;  %v11321_v2 = vadd.f32 %v5128_v5, %v11173_v30  ;;  %v11324_v35 = vadd.f32 %v5274_v14, %v11176_v42  ;;  %v5130_v7 = vpop.f32.mrb[17].mxu1  ;;  %v5276_v55 = vpop.f32.mrb[225].mxu0 }
 0x9d4   :  { %v11327_v27 = vadd.f32 %v5130_v7, %v11179_v28  ;;  %v11330_v62 = vadd.f32 %v5276_v55, %v11182_v8  ;;  %v5132_v24 = vpop.f32.mrb[18].mxu1  ;;  %v5278_v47 = vpop.f32.mrb[226].mxu0 }
 0x9d5   :  { %12850 = vst [vmem:[#allocation252_spill] sm:$0xff] %v11324_v35  ;;  %v11333_v23 = vmul.f32 0.01, %v11321_v2  ;;  %v11336_v40 = vmul.f32 0.01, %v11324_v35  ;;  %v11339_v5 = vadd.f32 %v5132_v24, %v11173_v30  ;;  %v11342_v14 = vadd.f32 %v5278_v47, %v11176_v42  ;;  %v5134_v0 = vpop.f32.mrb[19].mxu1 }
 0x9d6   :  { %v5280_v7 = vpop.f32.mrb[227].mxu0  ;;  %v11345_v56 = vmul.f32 0.01, %v11327_v27  ;;  %v11348_v55 = vmul.f32 0.01, %v11330_v62  ;;  %v11351_v22 = vadd.f32 %v5134_v0, %v11179_v28 }
 0x9d7   :  { %12851 = vst [vmem:[#allocation241_spill] sm:$0xff] %v11336_v40  ;;  %12852 = vst [vmem:[#allocation245_spill] sm:$0xff] %v11342_v14  ;;  %v11354_v59 = vadd.f32 %v5280_v7, %v11182_v8  ;;  %v11361_v33 = vmul.f32 0.01, %v11339_v5  ;;  %v11364_v20 = vmul.f32 0.01, %v11342_v14 }
 0x9d8   :  { %v11371_v7 = vmul.f32 0.01, %v11351_v22 }
 0x9d9   :  { %12853 = vst [vmem:[#allocation247_spill] sm:$0xff] %v11364_v20  ;;  %v11374_v24 = vmul.f32 0.01, %v11354_v59 }
 0x9da   :  { %v5138_v53 = vpop.f32.mrb[20].mxu1  ;;  %v5284_v0 = vpop.f32.mrb[228].mxu0 }
 0x9db   :  { %12854 = vst [vmem:[#allocation253_spill] sm:$0xff] %v11374_v24  ;;  %v11385_v39 = vadd.f32 %v5138_v53, %v11173_v30  ;;  %v11388_v19 = vadd.f32 %v5284_v0, %v11176_v42  ;;  %v5140_v46 = vpop.f32.mrb[21].mxu1  ;;  %v5286_v29 = vpop.f32.mrb[229].mxu0 }
 0x9dc   :  { %v11391_v47 = vadd.f32 %v5140_v46, %v11179_v28  ;;  %v11394_v41 = vadd.f32 %v5286_v29, %v11182_v8  ;;  %v5142_v43 = vpop.f32.mrb[22].mxu1  ;;  %v5288_v60 = vpop.f32.mrb[230].mxu0 }
 0x9dd   :  { %12855 = vst [vmem:[#allocation258_spill] sm:$0xff] %v11388_v19  ;;  %v11397_v31 = vmul.f32 0.01, %v11385_v39  ;;  %v11400_v25 = vmul.f32 0.01, %v11388_v19  ;;  %v11403_v53 = vadd.f32 %v5142_v43, %v11173_v30  ;;  %v11406_v0 = vadd.f32 %v5288_v60, %v11176_v42  ;;  %v5144_v20 = vpop.f32.mrb[23].mxu1 }
 0x9de   :  { %12856 = vst [vmem:[#allocation264_spill] sm:$0xff] %v11394_v41  ;;  %v5290_v46 = vpop.f32.mrb[231].mxu0  ;;  %v11409_v14 = vmul.f32 0.01, %v11391_v47  ;;  %v11412_v29 = vmul.f32 0.01, %v11394_v41  ;;  %v11415_v40 = vadd.f32 %v5144_v20, %v11179_v28 }
 0x9df   :  { %12857 = vst [vmem:[#allocation266_spill] sm:$0xff] %v11400_v25  ;;  %v11418_v35 = vadd.f32 %v5290_v46, %v11182_v8  ;;  %v11425_v42 = vmul.f32 0.01, %v11403_v53  ;;  %v11428_v60 = vmul.f32 0.01, %v11406_v0 }
 0x9e0   :  { %12858 = vst [vmem:[#allocation270_spill] sm:$0xff] %v11412_v29  ;;  %v11435_v28 = vmul.f32 0.01, %v11415_v40 }
 0x9e1   :  { %12859 = vst [vmem:[#allocation259_spill] sm:$0xff] %v11428_v60  ;;  %v11438_v8 = vmul.f32 0.01, %v11418_v35 }
 0x9e2   :  { %7660 = dma.done.wait [#allocation6 + $0x2], 31744 }
 0x9e3   :  { %7661 = vsyncadd [#allocation6 + $0x2], 4294935552  ;;  %v12860_v20 = vmax.f32 %v11205_v48, %v11227_v61  ;;  %v12861_v25 = vmax.f32 %v11217_v51, %v11239_v9  ;;  %v5362_v46 = vld [vmem:[#allocation3 + $0x8] sm:$0xff]  ;;  %v5361_v29 = vld [vmem:[#allocation3] sm:$0xff]  ;;  %vm6309_vm3 = vcmask 1041409   ;;  %vm6311_vm4 = vcmask 1042434  }
 0x9e4   :  { %v5364_v41 = vld [vmem:[#allocation3 + $0x18] sm:$0xff]  ;;  %5453 = vmatprep.subr.bf16.mxu1 %v5362_v46  ;;  %v5363_v30 = vld [vmem:[#allocation3 + $0x10] sm:$0xff]  ;;  %v5366_v43 = vld [vmem:[#allocation3 + $0x28] sm:$0xff]  ;;  %vm6313_vm5 = vcmask 1043459   ;;  %vm6315_vm6 = vcmask 1044484   ;;  %vm6317_vm7 = vcmask 1045509  }
 0x9e5   :  { %v5427_v19 = vpack.c.bf16 %v12861_v25, %v12860_v20  ;;  %5454 = vmatpush1.bf16.msra.mxu1 %v5361_v29  ;;  %v5365_v24 = vld [vmem:[#allocation3 + $0x20] sm:$0xff]  ;;  %v5368_v60 = vld [vmem:[#allocation3 + $0x38] sm:$0xff]  ;;  %v5367_v48 = vld [vmem:[#allocation3 + $0x30] sm:$0xff]  ;;  %vm6319_vm8 = vcmask 1046534   ;;  %vm6321_vm9 = vcmask 1047559   ;;  %vm6343_vm10 = vcmask 1048064  }
 0x9e6   :  { %5455 = vmatprep.subr.bf16.mxu1 %v5364_v41  ;;  %v5370_v61 = vld [vmem:[#allocation3 + $0x48] sm:$0xff]  ;;  %v5369_v25 = vld [vmem:[#allocation3 + $0x40] sm:$0xff]  ;;  %v5371_v51 = vld [vmem:[#allocation3 + $0x50] sm:$0xff] }
 0x9e7   :  { %5485 = vmatprep.mubr.bf16.mxu1 %v5427_v19  ;;  %v5372_v19 = vld [vmem:[#allocation3 + $0x58] sm:$0xff]  ;;  %v5374_v9 = vld [vmem:[#allocation3 + $0x68] sm:$0xff]  ;;  %v5373_v41 = vld [vmem:[#allocation3 + $0x60] sm:$0xff] }
 0x9e8   :  { %v5376_v29 = vld [vmem:[#allocation3 + $0x78] sm:$0xff]  ;;  %v5636_v20 = vld [vmem:[#allocation2 + $0xea8] sm:$0xff]  ;;  %v5635_v46 = vld [vmem:[#allocation2 + $0xea0] sm:$0xff] }
 0x9e9   :  { %5456 = vmatpush1.bf16.msra.mxu1 %v5363_v30  ;;  %v5632_v30 = vld [vmem:[#allocation2 + $0xe88] sm:$0xff] }
 0x9ea   :  { %5457 = vmatprep.subr.bf16.mxu1 %v5366_v43  ;;  %v5631_v43 = vld [vmem:[#allocation2 + $0xe80] sm:$0xff]  ;;  %5725 = vmatprep.subr.bf16.mxu0 %v5632_v30  ;;  %v5648_v30 = vld [vmem:[#allocation2 + $0xf08] sm:$0xff] }
 0x9eb   :  { %5726 = vmatpush1.bf16.msra.mxu0 %v5631_v43  ;;  %v5381_v43 = vld [vmem:[#allocation3 + $0xa0] sm:$0xff] }
 0x9ec   :  { %5727 = vmatprep.subr.bf16.mxu0 %v5636_v20  ;;  %v5384_v20 = vld [vmem:[#allocation3 + $0xb8] sm:$0xff] }
 0x9ed   :  { %5458 = vmatpush1.bf16.msra.mxu1 %v5365_v24  ;;  %v5375_v24 = vld [vmem:[#allocation3 + $0x70] sm:$0xff] }
 0x9ee   :  { %5459 = vmatprep.subr.bf16.mxu1 %v5368_v60  ;;  %v5378_v60 = vld [vmem:[#allocation3 + $0x88] sm:$0xff] }
 0x9ef   :  { %5728 = vmatpush1.bf16.msra.mxu0 %v5635_v46  ;;  %v5383_v46 = vld [vmem:[#allocation3 + $0xb0] sm:$0xff] }
 0x9f1   :  { %5460 = vmatpush1.bf16.msra.mxu1 %v5367_v48  ;;  %v5640_v48 = vld [vmem:[#allocation2 + $0xec8] sm:$0xff] }
 0x9f2   :  { %5461 = vmatprep.subr.bf16.mxu1 %v5370_v61  ;;  %v5377_v61 = vld [vmem:[#allocation3 + $0x80] sm:$0xff]  ;;  %5729 = vmatprep.subr.bf16.mxu0 %v5640_v48  ;;  %v5386_v48 = vld [vmem:[#allocation3 + $0xc8] sm:$0xff] }
 0x9f5   :  { %5462 = vmatpush1.bf16.msra.mxu1 %v5369_v25  ;;  %v5380_v25 = vld [vmem:[#allocation3 + $0x98] sm:$0xff] }
 0x9f6   :  { %5463 = vmatprep.subr.bf16.mxu1 %v5372_v19  ;;  %v5639_v19 = vld [vmem:[#allocation2 + $0xec0] sm:$0xff] }
 0x9f7   :  { %5730 = vmatpush1.bf16.msra.mxu0 %v5639_v19  ;;  %v5385_v19 = vld [vmem:[#allocation3 + $0xc0] sm:$0xff] }
 0x9f9   :  { %5464 = vmatpush1.bf16.msra.mxu1 %v5371_v51  ;;  %v5644_v51 = vld [vmem:[#allocation2 + $0xee8] sm:$0xff] }
 0x9fa   :  { %5465 = vmatprep.subr.bf16.mxu1 %v5374_v9  ;;  %v5379_v9 = vld [vmem:[#allocation3 + $0x90] sm:$0xff]  ;;  %5731 = vmatprep.subr.bf16.mxu0 %v5644_v51  ;;  %v5388_v51 = vld [vmem:[#allocation3 + $0xd8] sm:$0xff] }
 0x9fd   :  { %5466 = vmatpush1.bf16.msra.mxu1 %v5373_v41  ;;  %v5382_v41 = vld [vmem:[#allocation3 + $0xa8] sm:$0xff] }
 0x9fe   :  { %5467 = vmatprep.subr.bf16.mxu1 %v5376_v29  ;;  %v5643_v29 = vld [vmem:[#allocation2 + $0xee0] sm:$0xff] }
 0x9ff   :  { %5732 = vmatpush1.bf16.msra.mxu0 %v5643_v29  ;;  %v5387_v29 = vld [vmem:[#allocation3 + $0xd0] sm:$0xff] }
 0xa00   :  { %5733 = vmatprep.subr.bf16.mxu0 %v5648_v30  ;;  %v5390_v30 = vld [vmem:[#allocation3 + $0xe8] sm:$0xff] }
 0xa01   :  { %5468 = vmatpush1.bf16.msra.mxu1 %v5375_v24  ;;  %v5647_v24 = vld [vmem:[#allocation2 + $0xf00] sm:$0xff] }
 0xa02   :  { %5469 = vmatprep.subr.bf16.mxu1 %v5378_v60  ;;  %v5652_v60 = vld [vmem:[#allocation2 + $0xf28] sm:$0xff] }
 0xa03   :  { %5734 = vmatpush1.bf16.msra.mxu0 %v5647_v24  ;;  %v5389_v24 = vld [vmem:[#allocation3 + $0xe0] sm:$0xff] }
 0xa04   :  { %5735 = vmatprep.subr.bf16.mxu0 %v5652_v60  ;;  %v5392_v60 = vld [vmem:[#allocation3 + $0xf8] sm:$0xff] }
 0xa05   :  { %5470 = vmatpush1.bf16.msra.mxu1 %v5377_v61  ;;  %v5651_v61 = vld [vmem:[#allocation2 + $0xf20] sm:$0xff] }
 0xa06   :  { %5471 = vmatprep.subr.bf16.mxu1 %v5380_v25  ;;  %v5656_v25 = vld [vmem:[#allocation2 + $0xf48] sm:$0xff] }
 0xa07   :  { %5736 = vmatpush1.bf16.msra.mxu0 %v5651_v61  ;;  %v5391_v61 = vld [vmem:[#allocation3 + $0xf0] sm:$0xff] }
 0xa08   :  { %5737 = vmatprep.subr.bf16.mxu0 %v5656_v25  ;;  %v5394_v25 = vld [vmem:[#allocation3 + $0x108] sm:$0xff] }
 0xa09   :  { %5472 = vmatpush1.bf16.msra.mxu1 %v5379_v9  ;;  %v5655_v9 = vld [vmem:[#allocation2 + $0xf40] sm:$0xff] }
 0xa0a   :  { %5473 = vmatprep.subr.bf16.mxu1 %v5382_v41  ;;  %v5660_v41 = vld [vmem:[#allocation2 + $0xf68] sm:$0xff] }
 0xa0b   :  { %5738 = vmatpush1.bf16.msra.mxu0 %v5655_v9  ;;  %v12863_v9 = vmax.f32 %v11211_v17, %v11233_v32  ;;  %v5398_v17 = vld [vmem:[#allocation3 + $0x128] sm:$0xff]  ;;  %v12867_v32 = vmax.f32 %v11275_v11, %v11297_v49  ;;  %v5399_v49 = vld [vmem:[#allocation3 + $0x130] sm:$0xff]  ;;  %v12872_v11 = vmax.f32 %v11391_v47, %v11409_v14  ;;  %v12877_v47 = vmax.f32 %v11220_v26, %v11246_v58  ;;  %v5413_v26 = vld [vmem:[#allocation3 + $0x1a0] sm:$0xff] }
 0xa0c   :  { %5739 = vmatprep.subr.bf16.mxu0 %v5660_v41  ;;  %v5416_v58 = vld [vmem:[#allocation3 + $0x1b8] sm:$0xff] }
 0xa0d   :  { %5474 = vmatpush1.bf16.msra.mxu1 %v5381_v43  ;;  %v5659_v43 = vld [vmem:[#allocation2 + $0xf60] sm:$0xff] }
 0xa0e   :  { %5475 = vmatprep.subr.bf16.mxu1 %v5384_v20  ;;  %v5664_v20 = vld [vmem:[#allocation2 + $0xf88] sm:$0xff] }
 0xa0f   :  { %5740 = vmatpush1.bf16.msra.mxu0 %v5659_v43  ;;  %v12865_v43 = vmax.f32 %v11287_v6, %v11307_v45  ;;  %v12866_v6 = vmax.f32 %v11257_v38, %v11269_v15  ;;  %v5680_v45 = vld [vmem:[#allocation2 + $0x1008] sm:$0xff] }
 0xa10   :  { %5741 = vmatprep.subr.bf16.mxu0 %v5664_v20  ;;  %v5402_v15 = vld [vmem:[#allocation3 + $0x148] sm:$0xff] }
 0xa11   :  { %5476 = vmatpush1.bf16.msra.mxu1 %v5383_v46  ;;  %v5663_v46 = vld [vmem:[#allocation2 + $0xf80] sm:$0xff] }
 0xa12   :  { %5477 = vmatprep.subr.bf16.mxu1 %v5386_v48  ;;  %v5668_v48 = vld [vmem:[#allocation2 + $0xfa8] sm:$0xff] }
 0xa13   :  { %5742 = vmatpush1.bf16.msra.mxu0 %v5663_v46  ;;  %v5671_v46 = vld [vmem:[#allocation2 + $0xfc0] sm:$0xff] }
 0xa14   :  { %5743 = vmatprep.subr.bf16.mxu0 %v5668_v48  ;;  %v12868_v48 = vmax.f32 %v11327_v27, %v11345_v56  ;;  %v12870_v56 = vmax.f32 %v11321_v2, %v11333_v23  ;;  %v12873_v27 = vmax.f32 %v11415_v40, %v11435_v28  ;;  %v5403_v2 = vld [vmem:[#allocation3 + $0x150] sm:$0xff]  ;;  %v5406_v23 = vld [vmem:[#allocation3 + $0x168] sm:$0xff]  ;;  %v12876_v40 = vmax.f32 %v11208_v13, %v11230_v4 }
 0xa15   :  { %5478 = vmatpush1.bf16.msra.mxu1 %v5385_v19  ;;  %v5667_v19 = vld [vmem:[#allocation2 + $0xfa0] sm:$0xff]  ;;  %v5411_v13 = vld [vmem:[#allocation3 + $0x190] sm:$0xff]  ;;  %v5414_v4 = vld [vmem:[#allocation3 + $0x1a8] sm:$0xff] }
 0xa16   :  { %5479 = vmatprep.subr.bf16.mxu1 %v5388_v51  ;;  %v12862_v51 = vmax.f32 %v11185_v63, %v11199_v54  ;;  %v5676_v63 = vld [vmem:[#allocation2 + $0xfe8] sm:$0xff]  ;;  %v5395_v54 = vld [vmem:[#allocation3 + $0x110] sm:$0xff]  ;;  %v5429_v28 = vpack.c.bf16 %v12877_v47, %v12876_v40  ;;  %v5939_v47 = vld [vmem:[#allocation3 + $0x220] sm:$0xff] }
 0xa17   :  { %5744 = vmatpush1.bf16.msra.mxu0 %v5667_v19  ;;  %v5397_v19 = vld [vmem:[#allocation3 + $0x120] sm:$0xff]  ;;  %v5940_v40 = vld [vmem:[#allocation3 + $0x228] sm:$0xff] }
 0xa18   :  { %v5426_v41 = vpack.c.bf16 %v12863_v9, %v12862_v51  ;;  %v5400_v51 = vld [vmem:[#allocation3 + $0x138] sm:$0xff]  ;;  %v5679_v9 = vld [vmem:[#allocation2 + $0x1000] sm:$0xff] }
 0xa19   :  { %5480 = vmatpush1.bf16.msra.mxu1 %v5387_v29  ;;  %v5672_v29 = vld [vmem:[#allocation2 + $0xfc8] sm:$0xff] }
 0xa1a   :  { %5481 = vmatprep.subr.bf16.mxu1 %v5390_v30  ;;  %v12864_v30 = vmax.f32 %v11263_v12, %v11281_v10  ;;  %5745 = vmatprep.subr.bf16.mxu0 %v5672_v29  ;;  %v5675_v10 = vld [vmem:[#allocation2 + $0xfe0] sm:$0xff]  ;;  %v5430_v12 = vpack.c.bf16 %v12867_v32, %v12866_v6  ;;  %v5404_v29 = vld [vmem:[#allocation3 + $0x158] sm:$0xff]  ;;  %v5423_v6 = vld [vmem:[#allocation3 + $0x1f0] sm:$0xff]  ;;  %v12878_v32 = vmax.f32 %v11188_v50, %v11202_v18 }
 0xa1b   :  { %5746 = vmatpush1.bf16.msra.mxu0 %v5671_v46  ;;  %v5420_v46 = vld [vmem:[#allocation3 + $0x1d8] sm:$0xff]  ;;  %v12883_v50 = vmax.f32 %v11278_v16, %v11300_v37  ;;  %v12896_v16 = vmax.f32 %v11418_v35, %v11438_v8  ;;  %v5692_v35 = vld [vmem:[#allocation2 + $0x1068] sm:$0xff]  ;;  %v5691_v8 = vld [vmem:[#allocation2 + $0x1060] sm:$0xff] }
 0xa1c   :  { %v5431_v20 = vpack.c.bf16 %v12865_v43, %v12864_v30  ;;  %5747 = vmatprep.subr.bf16.mxu0 %v5676_v63  ;;  %v5405_v30 = vld [vmem:[#allocation3 + $0x160] sm:$0xff]  ;;  %v5408_v43 = vld [vmem:[#allocation3 + $0x178] sm:$0xff]  ;;  %v5419_v63 = vld [vmem:[#allocation3 + $0x1d0] sm:$0xff] }
 0xa1d   :  { %5482 = vmatpush1.bf16.msra.mxu1 %v5389_v24  ;;  %v5393_v24 = vld [vmem:[#allocation3 + $0x100] sm:$0xff] }
 0xa1e   :  { %5483 = vmatprep.subr.bf16.mxu1 %v5392_v60  ;;  %v5396_v60 = vld [vmem:[#allocation3 + $0x118] sm:$0xff] }
 0xa1f   :  { %5748 = vmatpush1.bf16.msra.mxu0 %v5675_v10  ;;  %v5424_v10 = vld [vmem:[#allocation3 + $0x1f8] sm:$0xff] }
 0xa20   :  { %5749 = vmatprep.subr.bf16.mxu0 %v5680_v45 }
 0xa21   :  { %5484 = vmatpush1.bf16.msra.mxu1 %v5391_v61  ;;  %v12869_v61 = vmax.f32 %v11351_v22, %v11371_v7  ;;  %v12871_v22 = vmax.f32 %v11339_v5, %v11361_v33  ;;  %v5439_v7 = vpack.c.bf16 %v12873_v27, %v12872_v11  ;;  %v12874_v33 = vmax.f32 %v11385_v39, %v11397_v31  ;;  %v5407_v39 = vld [vmem:[#allocation3 + $0x170] sm:$0xff]  ;;  %v5410_v31 = vld [vmem:[#allocation3 + $0x188] sm:$0xff] }
 0xa22   :  { %5526 = vmatprep.subr.bf16.mxu1 %v5394_v25  ;;  %v12875_v5 = vmax.f32 %v11403_v53, %v11425_v42  ;;  %v5409_v53 = vld [vmem:[#allocation3 + $0x180] sm:$0xff]  ;;  %v5412_v42 = vld [vmem:[#allocation3 + $0x198] sm:$0xff] }
 0xa23   :  { %v5435_v25 = vpack.c.bf16 %v12869_v61, %v12868_v48  ;;  %5750 = vmatpush1.bf16.msra.mxu0 %v5679_v9  ;;  %v5434_v38 = vpack.c.bf16 %v12871_v22, %v12870_v56  ;;  %v12880_v48 = vmax.f32 %v11266_v52, %v11284_v34  ;;  %v12881_v61 = vmax.f32 %v11290_v3, %v11310_v57  ;;  %v12887_v3 = vld [vmem:[#allocation252_spill] sm:$0xff]  ;;  %v12888_v34 = vld [vmem:[#allocation241_spill] sm:$0xff]  ;;  %v12894_v56 = vld [vmem:[#allocation270_spill] sm:$0xff] }
 0xa24   :  { %5486 = vmatmul.mubr.bf16.vlgmr.msra.gmra.mrb[24].mxu1 %v5426_v41  ;;  %v5401_v41 = vld [vmem:[#allocation3 + $0x140] sm:$0xff]  ;;  %v5438_v14 = vpack.c.bf16 %v12875_v5, %v12874_v33  ;;  %v12889_v57 = vmax.f32 %v12887_v3, %v12888_v34  ;;  %v12890_v9 = vld [vmem:[#allocation245_spill] sm:$0xff] }
 0xa25   :  { %5527 = vmatpush1.bf16.msra.mxu1 %v5393_v24  ;;  %5495 = vmatprep.mubr.bf16.mxu1 %v5431_v20  ;;  %v5415_v20 = vld [vmem:[#allocation3 + $0x1b0] sm:$0xff]  ;;  %v5418_v24 = vld [vmem:[#allocation3 + $0x1c8] sm:$0xff]  ;;  %v5935_v5 = vld [vmem:[#allocation3 + $0x200] sm:$0xff] }
 0xa26   :  { %5528 = vmatprep.subr.bf16.mxu1 %v5396_v60  ;;  %v5417_v60 = vld [vmem:[#allocation3 + $0x1c0] sm:$0xff]  ;;  %v5936_v33 = vld [vmem:[#allocation3 + $0x208] sm:$0xff] }
 0xa29   :  { %5529 = vmatpush1.bf16.msra.mxu1 %v5395_v54  ;;  %v5422_v54 = vld [vmem:[#allocation3 + $0x1e8] sm:$0xff] }
 0xa2a   :  { %5530 = vmatprep.subr.bf16.mxu1 %v5398_v17  ;;  %v5421_v17 = vld [vmem:[#allocation3 + $0x1e0] sm:$0xff] }
 0xa2c   :  { %5496 = vmatmul.mubr.bf16.gmra.mrb[28].mxu1 %v5430_v12  ;;  %v12879_v12 = vmax.f32 %v11214_v1, %v11236_v21  ;;  %v12884_v1 = vmax.f32 %v11330_v62, %v11348_v55  ;;  %v12885_v21 = vld [vmem:[#allocation253_spill] sm:$0xff]  ;;  %v12898_v55 = vld [vmem:[#allocation266_spill] sm:$0xff] }
 0xa2d   :  { %5531 = vmatpush1.bf16.msra.mxu1 %v5397_v19  ;;  %5505 = vmatprep.mubr.bf16.mxu1 %v5435_v25  ;;  %v5433_v25 = vpack.c.bf16 %v12881_v61, %v12880_v48  ;;  %v12882_v19 = vmax.f32 %v11260_v44, %v11272_v36  ;;  %v12893_v44 = vld [vmem:[#allocation264_spill] sm:$0xff] }
 0xa2e   :  { %5532 = vmatprep.subr.bf16.mxu1 %v5400_v51  ;;  %v5428_v45 = vpack.c.bf16 %v12879_v12, %v12878_v32  ;;  %v12886_v51 = vmax.f32 %v11354_v59, %v12885_v21  ;;  %v12895_v37 = vmax.f32 %v12893_v44, %v12894_v56  ;;  %v12897_v59 = vld [vmem:[#allocation258_spill] sm:$0xff] }
 0xa2f   :  { %v5432_v18 = vpack.c.bf16 %v12883_v50, %v12882_v19  ;;  %v12899_v22 = vmax.f32 %v12897_v59, %v12898_v55  ;;  %v5951_v19 = vld [vmem:[#allocation3 + $0x280] sm:$0xff]  ;;  %v5633_v55 = vld [vmem:[#allocation2 + $0xe90] sm:$0xff] }
 0xa30   :  { %v5437_v52 = vpack.c.bf16 %v12886_v51, %v12884_v1  ;;  %v5441_v62 = vpack.c.bf16 %v12896_v16, %v12895_v37 }
 0xa31   :  { %5533 = vmatpush1.bf16.msra.mxu1 %v5399_v49  ;;  %v12891_v49 = vld [vmem:[#allocation247_spill] sm:$0xff] }
 0xa32   :  { %5534 = vmatprep.subr.bf16.mxu1 %v5402_v15  ;;  %v12892_v15 = vmax.f32 %v12890_v9, %v12891_v49 }
 0xa34   :  { %5506 = vmatmul.mubr.bf16.gmra.mrb[32].mxu1 %v5434_v38  ;;  %v5436_v36 = vpack.c.bf16 %v12892_v15, %v12889_v57  ;;  %v12900_v38 = vld [vmem:[#allocation259_spill] sm:$0xff]  ;;  %v5953_v57 = vld [vmem:[#allocation3 + $0x290] sm:$0xff] }
 0xa35   :  { %5535 = vmatpush1.bf16.msra.mxu1 %v5401_v41  ;;  %5515 = vmatprep.mubr.bf16.mxu1 %v5439_v7  ;;  %v12901_v11 = vmax.f32 %v11406_v0, %v12900_v38  ;;  %v5684_v7 = vld [vmem:[#allocation2 + $0x1028] sm:$0xff]  ;;  %v5683_v41 = vld [vmem:[#allocation2 + $0x1020] sm:$0xff]  ;;  %v5937_v0 = vld [vmem:[#allocation3 + $0x210] sm:$0xff] }
 0xa36   :  { %5536 = vmatprep.subr.bf16.mxu1 %v5404_v29  ;;  %5751 = vmatprep.subr.bf16.mxu0 %v5684_v7  ;;  %v5688_v29 = vld [vmem:[#allocation2 + $0x1048] sm:$0xff] }
 0xa37   :  { %v5440_v27 = vpack.c.bf16 %v12901_v11, %v12899_v22  ;;  %5752 = vmatpush1.bf16.msra.mxu0 %v5683_v41  ;;  %v5638_v11 = vld [vmem:[#allocation2 + $0xeb8] sm:$0xff] }
 0xa38   :  { %5753 = vmatprep.subr.bf16.mxu0 %v5688_v29  ;;  %v5958_v41 = vld [vmem:[#allocation3 + $0x2b8] sm:$0xff] }
 0xa39   :  { %5537 = vmatpush1.bf16.msra.mxu1 %v5403_v2  ;;  %v5687_v2 = vld [vmem:[#allocation2 + $0x1040] sm:$0xff] }
 0xa3a   :  { %5538 = vmatprep.subr.bf16.mxu1 %v5406_v23  ;;  %v5634_v23 = vld [vmem:[#allocation2 + $0xe98] sm:$0xff] }
 0xa3b   :  { %5754 = vmatpush1.bf16.msra.mxu0 %v5687_v2 }
 0xa3c   :  { %5516 = vmatmul.mubr.bf16.gmra.mrb[36].mxu1 %v5438_v14  ;;  %5755 = vmatprep.subr.bf16.mxu0 %v5692_v35  ;;  %v5938_v14 = vld [vmem:[#allocation3 + $0x218] sm:$0xff] }
 0xa3d   :  { %5539 = vmatpush1.bf16.msra.mxu1 %v5405_v30  ;;  %5558 = vmatprep.mubr.bf16.mxu1 %v5429_v28  ;;  %v5942_v28 = vld [vmem:[#allocation3 + $0x238] sm:$0xff]  ;;  %v5941_v30 = vld [vmem:[#allocation3 + $0x230] sm:$0xff] }
 0xa3e   :  { %5540 = vmatprep.subr.bf16.mxu1 %v5408_v43  ;;  %v5944_v43 = vld [vmem:[#allocation3 + $0x248] sm:$0xff] }
 0xa3f   :  { %5756 = vmatpush1.bf16.msra.mxu0 %v5691_v8  ;;  %v5637_v8 = vld [vmem:[#allocation2 + $0xeb0] sm:$0xff] }
 0xa40   :  { %5798 = vmatprep.subr.bf16.mxu0 %v5634_v23 }
 0xa41   :  { %5541 = vmatpush1.bf16.msra.mxu1 %v5407_v39  ;;  %v5943_v39 = vld [vmem:[#allocation3 + $0x240] sm:$0xff] }
 0xa42   :  { %5542 = vmatprep.subr.bf16.mxu1 %v5410_v31  ;;  %v5946_v31 = vld [vmem:[#allocation3 + $0x258] sm:$0xff] }
 0xa45   :  { %5543 = vmatpush1.bf16.msra.mxu1 %v5409_v53  ;;  %v5945_v53 = vld [vmem:[#allocation3 + $0x250] sm:$0xff] }
 0xa46   :  { %5544 = vmatprep.subr.bf16.mxu1 %v5412_v42  ;;  %v5948_v42 = vld [vmem:[#allocation3 + $0x268] sm:$0xff] }
 0xa49   :  { %5545 = vmatpush1.bf16.msra.mxu1 %v5411_v13  ;;  %v5425_v13 = vld [vmem:[#allocation9 + $0x21] sm:$0x3] }
 0xa4a   :  { %5546 = vmatprep.subr.bf16.mxu1 %v5414_v4  ;;  %v5947_v4 = vld [vmem:[#allocation3 + $0x260] sm:$0xff] }
 0xa4d   :  { %5547 = vmatpush1.bf16.msra.mxu1 %v5413_v26  ;;  %v12902_v26 = vld [vmem:[#allocation102_spill] sm:$0xff] }
 0xa4e   :  { %5548 = vmatprep.subr.bf16.mxu1 %v5416_v58  ;;  %v11545_v58 = vrot.slane %v5425_v13, %v12902_v26 }
 0xa51   :  { %5549 = vmatpush1.bf16.msra.mxu1 %v5415_v20  ;;  %v5950_v20 = vld [vmem:[#allocation3 + $0x278] sm:$0xff] }
 0xa52   :  { %5550 = vmatprep.subr.bf16.mxu1 %v5418_v24  ;;  %v12903_v24 = vld [vmem:[#allocation103_spill] sm:$0xff] }
 0xa55   :  { %5551 = vmatpush1.bf16.msra.mxu1 %v5417_v60  ;;  %v11548_v60 = vrot.slane %v5425_v13, %v12903_v24 }
 0xa56   :  { %5552 = vmatprep.subr.bf16.mxu1 %v5420_v46 }
 0xa59   :  { %5553 = vmatpush1.bf16.msra.mxu1 %v5419_v63  ;;  %v5949_v63 = vld [vmem:[#allocation3 + $0x270] sm:$0xff] }
 0xa5a   :  { %5554 = vmatprep.subr.bf16.mxu1 %v5422_v54 }
 0xa5d   :  { %5555 = vmatpush1.bf16.msra.mxu1 %v5421_v17 }
 0xa5e   :  { %5556 = vmatprep.subr.bf16.mxu1 %v5424_v10  ;;  %v5952_v10 = vld [vmem:[#allocation3 + $0x288] sm:$0xff] }
 0xa61   :  { %5557 = vmatpush1.bf16.msra.mxu1 %v5423_v6 }
 0xa62   :  { %6027 = vmatprep.subr.bf16.mxu1 %v5936_v33 }
 0xa64   :  { %5559 = vmatmul.mubr.bf16.vlgmr.msra.gmra.mrb[24].mxu1 %v5428_v45 }
 0xa65   :  { %5568 = vmatprep.mubr.bf16.mxu1 %v5433_v25  ;;  %6028 = vmatpush1.bf16.msra.mxu1 %v5935_v5 }
 0xa66   :  { %6029 = vmatprep.subr.bf16.mxu1 %v5938_v14  ;;  %v5642_v14 = vld [vmem:[#allocation2 + $0xed8] sm:$0xff] }
 0xa69   :  { %6030 = vmatpush1.bf16.msra.mxu1 %v5937_v0  ;;  %v5957_v0 = vld [vmem:[#allocation3 + $0x2b0] sm:$0xff] }
 0xa6a   :  { %6031 = vmatprep.subr.bf16.mxu1 %v5940_v40 }
 0xa6c   :  { %5569 = vmatmul.mubr.bf16.gmra.mrb[28].mxu1 %v5432_v18  ;;  %v5954_v18 = vld [vmem:[#allocation3 + $0x298] sm:$0xff] }
 0xa6d   :  { %5578 = vmatprep.mubr.bf16.mxu1 %v5437_v52  ;;  %6032 = vmatpush1.bf16.msra.mxu1 %v5939_v47 }
 0xa6e   :  { %6033 = vmatprep.subr.bf16.mxu1 %v5942_v28 }
 0xa71   :  { %6034 = vmatpush1.bf16.msra.mxu1 %v5941_v30  ;;  %v5960_v30 = vld [vmem:[#allocation3 + $0x2c8] sm:$0xff] }
 0xa72   :  { %6035 = vmatprep.subr.bf16.mxu1 %v5944_v43 }
 0xa74   :  { %5579 = vmatmul.mubr.bf16.gmra.mrb[32].mxu1 %v5436_v36  ;;  %v5956_v36 = vld [vmem:[#allocation3 + $0x2a8] sm:$0xff] }
 0xa75   :  { %5588 = vmatprep.mubr.bf16.mxu1 %v5441_v62  ;;  %6036 = vmatpush1.bf16.msra.mxu1 %v5943_v39 }
 0xa76   :  { %6037 = vmatprep.subr.bf16.mxu1 %v5946_v31 }
 0xa79   :  { %6038 = vmatpush1.bf16.msra.mxu1 %v5945_v53 }
 0xa7a   :  { %6039 = vmatprep.subr.bf16.mxu1 %v5948_v42 }
 0xa7c   :  { %5589 = vmatmul.mubr.bf16.gmra.mrb[36].mxu1 %v5440_v27  ;;  %v5955_v27 = vld [vmem:[#allocation3 + $0x2a0] sm:$0xff] }
 0xa7d   :  { %6040 = vmatpush1.bf16.msra.mxu1 %v5947_v4  ;;  %v5641_v4 = vld [vmem:[#allocation2 + $0xed0] sm:$0xff] }
 0xa7e   :  { %6041 = vmatprep.subr.bf16.mxu1 %v5950_v20 }
 0xa81   :  { %6042 = vmatpush1.bf16.msra.mxu1 %v5949_v63  ;;  %v5646_v63 = vld [vmem:[#allocation2 + $0xef8] sm:$0xff] }
 0xa82   :  { %6043 = vmatprep.subr.bf16.mxu1 %v5952_v10 }
 0xa85   :  { %6044 = vmatpush1.bf16.msra.mxu1 %v5951_v19 }
 0xa86   :  { %6045 = vmatprep.subr.bf16.mxu1 %v5954_v18 }
 0xa89   :  { %6046 = vmatpush1.bf16.msra.mxu1 %v5953_v57  ;;  %v5649_v57 = vld [vmem:[#allocation2 + $0xf10] sm:$0xff] }
 0xa8a   :  { %6047 = vmatprep.subr.bf16.mxu1 %v5956_v36  ;;  %v5654_v36 = vld [vmem:[#allocation2 + $0xf38] sm:$0xff] }
 0xa8d   :  { %6048 = vmatpush1.bf16.msra.mxu1 %v5955_v27  ;;  %v5662_v27 = vld [vmem:[#allocation2 + $0xf78] sm:$0xff] }
 0xa8e   :  { %6049 = vmatprep.subr.bf16.mxu1 %v5958_v41  ;;  %v5666_v41 = vld [vmem:[#allocation2 + $0xf98] sm:$0xff] }
 0xa91   :  { %6050 = vmatpush1.bf16.msra.mxu1 %v5957_v0  ;;  %v5686_v0 = vld [vmem:[#allocation2 + $0x1038] sm:$0xff] }
 0xa92   :  { %6051 = vmatprep.subr.bf16.mxu1 %v5960_v30  ;;  %v5689_v30 = vld [vmem:[#allocation2 + $0x1050] sm:$0xff] }
 0xb37   :  { %v5560_v46 = vpop.f32.mrb[24].mxu1 }
 0xb38   :  { %v7339_v54 = vadd.f32 %v5560_v46, %v11545_v58  ;;  %v5562_v17 = vpop.f32.mrb[25].mxu1 }
 0xb39   :  { %v7340_v6 = vadd.f32 %v5562_v17, %v11548_v60  ;;  %v5564_v32 = vpop.f32.mrb[26].mxu1 }
 0xb3a   :  { %v5599_v12 = vmul.f32 0.01, %v7339_v54  ;;  %v7341_v45 = vadd.f32 %v5564_v32, %v11545_v58  ;;  %v5566_v48 = vpop.f32.mrb[27].mxu1 }
 0xb3b   :  { %v5600_v61 = vmul.f32 0.01, %v7340_v6  ;;  %v7342_v25 = vadd.f32 %v5566_v48, %v11548_v60 }
 0xb3c   :  { %v5601_v50 = vmul.f32 0.01, %v7341_v45  ;;  %v5615_v21 = vmax.f32 %v7339_v54, %v5599_v12  ;;  %v5959_v54 = vld [vmem:[#allocation3 + $0x2c0] sm:$0xff]  ;;  %v5645_v12 = vld [vmem:[#allocation2 + $0xef0] sm:$0xff] }
 0xb3d   :  { %v5602_v1 = vmul.f32 0.01, %v7342_v25  ;;  %v5616_v52 = vmax.f32 %v7340_v6, %v5600_v61  ;;  %6052 = vmatpush1.bf16.msra.mxu1 %v5959_v54  ;;  %v12906_v54 = vld [vmem:[#allocation23_spill] sm:$0xff] }
 0xb3e   :  { %v5617_v51 = vmax.f32 %v7341_v45, %v5601_v50 }
 0xb3f   :  { %v5618_v3 = vmax.f32 %v7342_v25, %v5602_v1  ;;  %v5570_v34 = vpop.f32.mrb[28].mxu1  ;;  %v5650_v25 = vld [vmem:[#allocation2 + $0xf18] sm:$0xff] }
 0xb40   :  { %v7343_v9 = vadd.f32 %v5570_v34, %v11545_v58  ;;  %v5572_v49 = vpop.f32.mrb[29].mxu1  ;;  %v11555_v15 = vpack.c.bf16 %v5617_v51, %v5615_v21 }
 0xb41   :  { %v7344_v44 = vadd.f32 %v5572_v49, %v11548_v60  ;;  %v5574_v56 = vpop.f32.mrb[30].mxu1  ;;  %v11558_v37 = vpack.c.bf16 %v5618_v3, %v5616_v52 }
 0xb42   :  { %v5603_v16 = vmul.f32 0.01, %v7343_v9  ;;  %v7345_v62 = vadd.f32 %v5574_v56, %v11545_v58  ;;  %v5576_v59 = vpop.f32.mrb[31].mxu1 }
 0xb43   :  { %v5604_v22 = vmul.f32 0.01, %v7344_v44  ;;  %v7346_v38 = vadd.f32 %v5576_v59, %v11548_v60  ;;  %5757 = vmatprep.mubr.bf16.mxu0 %v11558_v37  ;;  %v5653_v59 = vld [vmem:[#allocation2 + $0xf30] sm:$0xff] }
 0xb44   :  { %v5605_v7 = vmul.f32 0.01, %v7345_v62  ;;  %5758 = vmatmul.mubr.bf16.vlgmr.msra.gmra.mrb[232].mxu0 %v11555_v15  ;;  %v5619_v2 = vmax.f32 %v7343_v9, %v5603_v16 }
 0xb45   :  { %v5606_v29 = vmul.f32 0.01, %v7346_v38  ;;  %5799 = vmatpush1.bf16.msra.mxu0 %v5633_v55  ;;  %v5620_v23 = vmax.f32 %v7344_v44, %v5604_v22  ;;  %v5658_v22 = vld [vmem:[#allocation2 + $0xf58] sm:$0xff] }
 0xb46   :  { %v5621_v35 = vmax.f32 %v7345_v62, %v5605_v7  ;;  %5800 = vmatprep.subr.bf16.mxu0 %v5638_v11  ;;  %v5661_v7 = vld [vmem:[#allocation2 + $0xf70] sm:$0xff] }
 0xb47   :  { %v5622_v33 = vmax.f32 %v7346_v38, %v5606_v29  ;;  %v5580_v5 = vpop.f32.mrb[32].mxu1  ;;  %v5665_v29 = vld [vmem:[#allocation2 + $0xf90] sm:$0xff] }
 0xb48   :  { %v7347_v40 = vadd.f32 %v5580_v5, %v11545_v58  ;;  %v5582_v47 = vpop.f32.mrb[33].mxu1  ;;  %v11565_v28 = vpack.c.bf16 %v5621_v35, %v5619_v2  ;;  %v5670_v2 = vld [vmem:[#allocation2 + $0xfb8] sm:$0xff]  ;;  %v5669_v35 = vld [vmem:[#allocation2 + $0xfb0] sm:$0xff] }
 0xb49   :  { %v7348_v43 = vadd.f32 %v5582_v47, %v11548_v60  ;;  %5801 = vmatpush1.bf16.msra.mxu0 %v5637_v8  ;;  %v5584_v39 = vpop.f32.mrb[34].mxu1  ;;  %v11568_v31 = vpack.c.bf16 %v5622_v33, %v5620_v23  ;;  %v5674_v8 = vld [vmem:[#allocation2 + $0xfd8] sm:$0xff]  ;;  %v5673_v23 = vld [vmem:[#allocation2 + $0xfd0] sm:$0xff] }
 0xb4a   :  { %v5607_v53 = vmul.f32 0.01, %v7347_v40  ;;  %v7349_v42 = vadd.f32 %v5584_v39, %v11545_v58  ;;  %v5586_v13 = vpop.f32.mrb[35].mxu1  ;;  %5802 = vmatprep.subr.bf16.mxu0 %v5642_v14  ;;  %v5678_v33 = vld [vmem:[#allocation2 + $0xff8] sm:$0xff]  ;;  %v5677_v5 = vld [vmem:[#allocation2 + $0xff0] sm:$0xff] }
 0xb4b   :  { %v5608_v20 = vmul.f32 0.01, %v7348_v43  ;;  %v7350_v46 = vadd.f32 %v5586_v13, %v11548_v60  ;;  %5767 = vmatprep.mubr.bf16.mxu0 %v11568_v31  ;;  %v5682_v14 = vld [vmem:[#allocation2 + $0x1018] sm:$0xff]  ;;  %v5693_v39 = vld [vmem:[#allocation2 + $0x1070] sm:$0xff]  ;;  %v5964_v13 = vld [vmem:[#allocation3 + $0x2e8] sm:$0xff] }
 0xb4c   :  { %v5609_v17 = vmul.f32 0.01, %v7349_v42  ;;  %5768 = vmatmul.mubr.bf16.gmra.mrb[236].mxu0 %v11565_v28  ;;  %v5623_v6 = vmax.f32 %v7347_v40, %v5607_v53  ;;  %v5685_v40 = vld [vmem:[#allocation2 + $0x1030] sm:$0xff]  ;;  %v5690_v47 = vld [vmem:[#allocation2 + $0x1058] sm:$0xff] }
 0xb4d   :  { %v5610_v10 = vmul.f32 0.01, %v7350_v46  ;;  %5803 = vmatpush1.bf16.msra.mxu0 %v5641_v4  ;;  %v5624_v45 = vmax.f32 %v7348_v43, %v5608_v20  ;;  %v5694_v43 = vld [vmem:[#allocation2 + $0x1078] sm:$0xff]  ;;  %v5963_v4 = vld [vmem:[#allocation3 + $0x2e0] sm:$0xff] }
 0xb4e   :  { %v5625_v32 = vmax.f32 %v7349_v42, %v5609_v17  ;;  %5804 = vmatprep.subr.bf16.mxu0 %v5646_v63  ;;  %v5962_v53 = vld [vmem:[#allocation3 + $0x2d8] sm:$0xff]  ;;  %v5961_v42 = vld [vmem:[#allocation3 + $0x2d0] sm:$0xff] }
 0xb4f   :  { %v5626_v48 = vmax.f32 %v7350_v46, %v5610_v10  ;;  %v5590_v61 = vpop.f32.mrb[36].mxu1  ;;  %6053 = vmatprep.subr.bf16.mxu1 %v5962_v53  ;;  %v5966_v20 = vld [vmem:[#allocation3 + $0x2f8] sm:$0xff]  ;;  %v12934_v53 = vld [vmem:[#allocation248_spill] sm:$0xff] }
 0xb50   :  { %v7351_v19 = vadd.f32 %v5590_v61, %v11545_v58  ;;  %v5592_v50 = vpop.f32.mrb[37].mxu1  ;;  %v11575_v18 = vpack.c.bf16 %v5625_v32, %v5623_v6  ;;  %6054 = vmatpush1.bf16.msra.mxu1 %v5961_v42  ;;  %v12905_v46 = vld [vmem:[#allocation47_spill] sm:$0xff]  ;;  %v12908_v32 = vld [vmem:[#allocation32_spill] sm:$0xff] }
 0xb51   :  { %v7352_v1 = vadd.f32 %v5592_v50, %v11548_v60  ;;  %5805 = vmatpush1.bf16.msra.mxu0 %v5645_v12  ;;  %v5594_v21 = vpop.f32.mrb[38].mxu1  ;;  %v11578_v51 = vpack.c.bf16 %v5626_v48, %v5624_v45  ;;  %6055 = vmatprep.subr.bf16.mxu1 %v5964_v13  ;;  %v12907_v10 = vld [vmem:[#allocation39_spill] sm:$0xff]  ;;  %v12909_v45 = vld [vmem:[#allocation48_spill] sm:$0xff]  ;;  %v12935_v13 = vld [vmem:[#allocation250_spill] sm:$0xff] }
 0xb52   :  { %v5611_v52 = vmul.f32 0.01, %v7351_v19  ;;  %v7353_v3 = vadd.f32 %v5594_v21, %v11545_v58  ;;  %v5596_v34 = vpop.f32.mrb[39].mxu1  ;;  %5806 = vmatprep.subr.bf16.mxu0 %v5650_v25  ;;  %v12910_v61 = vld [vmem:[#allocation24_spill] sm:$0xff] }
 0xb53   :  { %v5612_v9 = vmul.f32 0.01, %v7352_v1  ;;  %v7354_v49 = vadd.f32 %v5596_v34, %v11548_v60  ;;  %5777 = vmatprep.mubr.bf16.mxu0 %v11578_v51  ;;  %v5657_v60 = vld [vmem:[#allocation2 + $0xf50] sm:$0xff] }
 0xb54   :  { %v5613_v44 = vmul.f32 0.01, %v7353_v3  ;;  %5778 = vmatmul.mubr.bf16.gmra.mrb[240].mxu0 %v11575_v18  ;;  %v5627_v16 = vmax.f32 %v7351_v19, %v5611_v52  ;;  %6056 = vmatpush1.bf16.msra.mxu1 %v5963_v4  ;;  %v12911_v19 = vld [vmem:[#allocation40_spill] sm:$0xff]  ;;  %v12915_v52 = vld [vmem:[#allocation42_spill] sm:$0xff] }
 0xb55   :  { %v5614_v56 = vmul.f32 0.01, %v7354_v49  ;;  %5807 = vmatpush1.bf16.msra.mxu0 %v5649_v57  ;;  %v5628_v55 = vmax.f32 %v7352_v1, %v5612_v9  ;;  %6057 = vmatprep.subr.bf16.mxu1 %v5966_v20  ;;  %v12913_v1 = vld [vmem:[#allocation26_spill] sm:$0xff]  ;;  %v12917_v57 = vld [vmem:[#allocation35_spill] sm:$0xff] }
 0xb56   :  { %v5629_v62 = vmax.f32 %v7353_v3, %v5613_v44  ;;  %5808 = vmatprep.subr.bf16.mxu0 %v5654_v36  ;;  %v12916_v34 = vld [vmem:[#allocation34_spill] sm:$0xff]  ;;  %v12919_v36 = vld [vmem:[#allocation51_spill] sm:$0xff] }
 0xb57   :  { %v5630_v58 = vmax.f32 %v7354_v49, %v5614_v56  ;;  %v6391_v9 = vsel %vm6309_vm3, %v12917_v57, %v12916_v34  ;;  %v12918_v49 = vld [vmem:[#allocation50_spill] sm:$0xff]  ;;  %v12920_v56 = vld [vmem:[#allocation27_spill] sm:$0xff]  ;;  %v12946_v34 = vld [vmem:[#allocation21_spill] sm:$0xff] }
 0xb58   :  { %v5702_v38 = vpack.c.bf16 %v5629_v62, %v5627_v16  ;;  %v6398_v44 = vsel %vm6309_vm3, %v12919_v36, %v12918_v49  ;;  %v12921_v62 = vld [vmem:[#allocation43_spill] sm:$0xff]  ;;  %v12936_v20 = vld [vmem:[#allocation254_spill] sm:$0xff]  ;;  %v12947_v49 = vld [vmem:[#allocation37_spill] sm:$0xff] }
 0xb59   :  { %5809 = vmatpush1.bf16.msra.mxu0 %v5653_v59  ;;  %v5703_v11 = vpack.c.bf16 %v5630_v58, %v5628_v55  ;;  %v12922_v55 = vld [vmem:[#allocation36_spill] sm:$0xff] }
 0xb5a   :  { %5810 = vmatprep.subr.bf16.mxu0 %v5658_v22  ;;  %v6392_v58 = vsel %vm6311_vm4, %v12922_v55, %v6391_v9  ;;  %v12923_v22 = vld [vmem:[#allocation52_spill] sm:$0xff]  ;;  %v12950_v55 = vld [vmem:[#allocation22_spill] sm:$0xff] }
 0xb5b   :  { %5787 = vmatprep.mubr.bf16.mxu0 %v5703_v11  ;;  %v6462_v9 = vld [vmem:[#allocation3 + $0x428] sm:$0xff] }
 0xb5c   :  { %5788 = vmatmul.mubr.bf16.gmra.mrb[244].mxu0 %v5702_v38 }
 0xb5d   :  { %5811 = vmatpush1.bf16.msra.mxu0 %v5657_v60  ;;  %5830 = vmatprep.mubr.bf16.mxu0 %v11558_v37  ;;  %v5681_v37 = vld [vmem:[#allocation2 + $0x1010] sm:$0xff] }
 0xb5e   :  { %5812 = vmatprep.subr.bf16.mxu0 %v5662_v27  ;;  %v12925_v27 = vld [vmem:[#allocation44_spill] sm:$0xff] }
 0xb61   :  { %5813 = vmatpush1.bf16.msra.mxu0 %v5661_v7 }
 0xb62   :  { %5814 = vmatprep.subr.bf16.mxu0 %v5666_v41  ;;  %v12926_v41 = vld [vmem:[#allocation234_spill] sm:$0xff] }
 0xb65   :  { %5815 = vmatpush1.bf16.msra.mxu0 %v5665_v29  ;;  %v6393_v29 = vsel %vm6313_vm5, %v12926_v41, %v6392_v58  ;;  %v6468_v41 = vld [vmem:[#allocation3 + $0x458] sm:$0xff] }
 0xb66   :  { %5816 = vmatprep.subr.bf16.mxu0 %v5670_v2  ;;  %v12927_v2 = vld [vmem:[#allocation236_spill] sm:$0xff] }
 0xb69   :  { %5817 = vmatpush1.bf16.msra.mxu0 %v5669_v35 }
 0xb6a   :  { %5818 = vmatprep.subr.bf16.mxu0 %v5674_v8  ;;  %v12928_v8 = vld [vmem:[#allocation238_spill] sm:$0xff] }
 0xb6d   :  { %5819 = vmatpush1.bf16.msra.mxu0 %v5673_v23 }
 0xb6e   :  { %5820 = vmatprep.subr.bf16.mxu0 %v5678_v33  ;;  %v12929_v33 = vld [vmem:[#allocation233_spill] sm:$0xff] }
 0xb71   :  { %5821 = vmatpush1.bf16.msra.mxu0 %v5677_v5 }
 0xb72   :  { %5822 = vmatprep.subr.bf16.mxu0 %v5682_v14  ;;  %v12930_v14 = vld [vmem:[#allocation235_spill] sm:$0xff] }
 0xb75   :  { %5823 = vmatpush1.bf16.msra.mxu0 %v5681_v37  ;;  %v6394_v37 = vsel %vm6315_vm6, %v12930_v14, %v6393_v29  ;;  %v6467_v29 = vld [vmem:[#allocation3 + $0x450] sm:$0xff] }
 0xb76   :  { %5824 = vmatprep.subr.bf16.mxu0 %v5686_v0  ;;  %v12931_v0 = vld [vmem:[#allocation237_spill] sm:$0xff]  ;;  %v6395_v42 = vsel %vm6317_vm7, %v12934_v53, %v6394_v37 }
 0xb77   :  { %v6471_v37 = vld [vmem:[#allocation3 + $0x470] sm:$0xff] }
 0xb79   :  { %5825 = vmatpush1.bf16.msra.mxu0 %v5685_v40 }
 0xb7a   :  { %5826 = vmatprep.subr.bf16.mxu0 %v5690_v47  ;;  %v12932_v47 = vld [vmem:[#allocation239_spill] sm:$0xff] }
 0xb7d   :  { %5827 = vmatpush1.bf16.msra.mxu0 %v5689_v30 }
 0xb7e   :  { %5828 = vmatprep.subr.bf16.mxu0 %v5694_v43  ;;  %v12933_v43 = vld [vmem:[#allocation242_spill] sm:$0xff] }
 0xb81   :  { %5829 = vmatpush1.bf16.msra.mxu0 %v5693_v39 }
 0xb84   :  { %5831 = vmatmul.mubr.bf16.vlgmr.msra.gmra.mrb[248].mxu0 %v11555_v15  ;;  %v5965_v15 = vld [vmem:[#allocation3 + $0x2f0] sm:$0xff] }
 0xb85   :  { %5840 = vmatprep.mubr.bf16.mxu0 %v11568_v31  ;;  %6058 = vmatpush1.bf16.msra.mxu1 %v5965_v15  ;;  %v5968_v31 = vld [vmem:[#allocation3 + $0x308] sm:$0xff] }
 0xb86   :  { %6100 = vmatprep.subr.bf16.mxu1 %v5968_v31  ;;  %v12937_v31 = vld [vmem:[#allocation243_spill] sm:$0xff] }
 0xb8c   :  { %5841 = vmatmul.mubr.bf16.gmra.mrb[252].mxu0 %v11565_v28  ;;  %v12904_v28 = vld [vmem:[#allocation31_spill] sm:$0xff] }
 0xb8d   :  { %5850 = vmatprep.mubr.bf16.mxu0 %v11578_v51  ;;  %v6333_v63 = vsel %vm6309_vm3, %v12905_v46, %v12904_v28  ;;  %v12914_v51 = vld [vmem:[#allocation41_spill] sm:$0xff] }
 0xb8e   :  { %v6334_v17 = vsel %vm6311_vm4, %v12906_v54, %v6333_v63  ;;  %v6384_v3 = vsel %vm6309_vm3, %v12915_v52, %v12914_v51  ;;  %v12938_v46 = vld [vmem:[#allocation249_spill] sm:$0xff]  ;;  %v12939_v54 = vld [vmem:[#allocation251_spill] sm:$0xff] }
 0xb8f   :  { %v6335_v6 = vsel %vm6313_vm5, %v12907_v10, %v6334_v17  ;;  %v6385_v59 = vsel %vm6311_vm4, %v12921_v62, %v6384_v3  ;;  %v6396_v63 = vsel %vm6319_vm8, %v12938_v46, %v6395_v42  ;;  %v6458_v10 = vld [vmem:[#allocation3 + $0x408] sm:$0xff]  ;;  %v6459_v3 = vld [vmem:[#allocation3 + $0x410] sm:$0xff] }
 0xb90   :  { %v6336_v12 = vsel %vm6315_vm6, %v12908_v32, %v6335_v6  ;;  %v6386_v7 = vsel %vm6313_vm5, %v12925_v27, %v6385_v59  ;;  %v6457_v6 = vld [vmem:[#allocation3 + $0x400] sm:$0xff]  ;;  %v6460_v32 = vld [vmem:[#allocation3 + $0x418] sm:$0xff]  ;;  %6600 = vmatprep.subr.bf16.mxu0 %v6458_v10  ;;  %v6466_v27 = vld [vmem:[#allocation3 + $0x448] sm:$0xff] }
 0xb91   :  { %v6337_v48 = vsel %vm6317_vm7, %v12909_v45, %v6336_v12  ;;  %v6387_v5 = vsel %vm6315_vm6, %v12929_v33, %v6386_v7  ;;  %v12940_v12 = vld [vmem:[#allocation255_spill] sm:$0xff]  ;;  %6601 = vmatpush1.bf16.msra.mxu0 %v6457_v6  ;;  %v6475_v6 = vld [vmem:[#allocation3 + $0x490] sm:$0xff] }
 0xb92   :  { %v6338_v25 = vsel %vm6319_vm8, %v12910_v61, %v6337_v48  ;;  %v6388_v39 = vsel %vm6317_vm7, %v12933_v43, %v6387_v5  ;;  %v12941_v48 = vld [vmem:[#allocation240_spill] sm:$0xff]  ;;  %6602 = vmatprep.subr.bf16.mxu0 %v6460_v32  ;;  %v6472_v33 = vld [vmem:[#allocation3 + $0x478] sm:$0xff] }
 0xb93   :  { %v6339_v50 = vsel %vm6321_vm9, %v12911_v19, %v6338_v25  ;;  %v6389_v28 = vsel %vm6319_vm8, %v12937_v31, %v6388_v39  ;;  %v12942_v25 = vld [vmem:[#allocation244_spill] sm:$0xff]  ;;  %v6476_v31 = vld [vmem:[#allocation3 + $0x498] sm:$0xff] }
 0xb94   :  { %5851 = vmatmul.mubr.bf16.gmra.mrb[0].mxu0 %v11575_v18  ;;  %6340 = vrot.lane.b32.xlu0 %v6339_v50, %s7668_s11  ;;  %v12912_v18 = vld [vmem:[#allocation25_spill] sm:$0xff]  ;;  %v11662_v61 = vsel %vm6321_vm9, %v12941_v48, %v6389_v28  ;;  %v11666_v19 = vsel %vm6321_vm9, %v12942_v25, %v6396_v63  ;;  %v12943_v50 = vld [vmem:[#allocation246_spill] sm:$0xff]  ;;  %v6461_v59 = vld [vmem:[#allocation3 + $0x420] sm:$0xff] }
 0xb95   :  { %5860 = vmatprep.mubr.bf16.mxu0 %v5703_v11  ;;  %v6377_v21 = vsel %vm6309_vm3, %v12913_v1, %v12912_v18  ;;  %v12924_v11 = vld [vmem:[#allocation28_spill] sm:$0xff]  ;;  %v12944_v1 = vld [vmem:[#allocation29_spill] sm:$0xff]  ;;  %6603 = vmatpush1.bf16.msra.mxu0 %v6459_v3 }
 0xb96   :  { %v6378_v16 = vsel %vm6311_vm4, %v12920_v56, %v6377_v21  ;;  %v12945_v21 = vld [vmem:[#allocation45_spill] sm:$0xff]  ;;  %6604 = vmatprep.subr.bf16.mxu0 %v6462_v9  ;;  %v6465_v7 = vld [vmem:[#allocation3 + $0x440] sm:$0xff] }
 0xb97   :  { %v6379_v60 = vsel %vm6313_vm5, %v12924_v11, %v6378_v16  ;;  %v6310_v51 = vsel %vm6309_vm3, %v12945_v21, %v12944_v1  ;;  %v12949_v16 = vld [vmem:[#allocation46_spill] sm:$0xff]  ;;  %v6478_v48 = vld [vmem:[#allocation3 + $0x4a8] sm:$0xff]  ;;  %v6477_v9 = vld [vmem:[#allocation3 + $0x4a0] sm:$0xff] }
 0xb98   :  { %v6380_v23 = vsel %vm6315_vm6, %v12928_v8, %v6379_v60  ;;  %v6312_v57 = vsel %vm6311_vm4, %v12946_v34, %v6310_v51  ;;  %v6463_v60 = vld [vmem:[#allocation3 + $0x430] sm:$0xff]  ;;  %v6469_v8 = vld [vmem:[#allocation3 + $0x460] sm:$0xff] }
 0xb99   :  { %v6381_v30 = vsel %vm6317_vm7, %v12932_v47, %v6380_v23  ;;  %v6314_v36 = vsel %vm6313_vm5, %v12947_v49, %v6312_v57  ;;  %6605 = vmatpush1.bf16.msra.mxu0 %v6461_v59  ;;  %v6474_v47 = vld [vmem:[#allocation3 + $0x488] sm:$0xff]  ;;  %v5970_v57 = vld [vmem:[#allocation3 + $0x318] sm:$0xff] }
 0xb9a   :  { %v6382_v15 = vsel %vm6319_vm8, %v12936_v20, %v6381_v30  ;;  %v6473_v20 = vld [vmem:[#allocation3 + $0x480] sm:$0xff] }
 0xb9b   :  { %v6383_v45 = vsel %vm6321_vm9, %v12940_v12, %v6382_v15 }
 0xb9c   :  { %5861 = vmatmul.mubr.bf16.gmra.mrb[4].mxu0 %v5702_v38  ;;  %v6399_v38 = vsel %vm6311_vm4, %v12923_v22, %v6398_v44  ;;  %v6579_v52 = vpack.c.bf16 %v6383_v45, %v6383_v45  ;;  %v12948_v44 = vld [vmem:[#allocation30_spill] sm:$0xff] }
 0xb9d   :  { %v6400_v35 = vsel %vm6313_vm5, %v12927_v2, %v6399_v38  ;;  %v6316_v56 = vsel %vm6315_vm6, %v12948_v44, %v6314_v36  ;;  %v6464_v22 = vld [vmem:[#allocation3 + $0x438] sm:$0xff]  ;;  %v6470_v2 = vld [vmem:[#allocation3 + $0x468] sm:$0xff] }
 0xb9e   :  { %v6401_v40 = vsel %vm6315_vm6, %v12931_v0, %v6400_v35  ;;  %6632 = vmatprep.mubr.bf16.mxu0 %v6579_v52  ;;  %v6318_v62 = vsel %vm6317_vm7, %v12949_v16, %v6316_v56  ;;  %v12951_v38 = vld [vmem:[#allocation38_spill] sm:$0xff]  ;;  %6606 = vmatprep.subr.bf16.mxu0 %v6464_v22  ;;  %v11686_v35 = vld [vmem:[#allocation9 + $0x23] sm:$0xf]  ;;  %v5972_v22 = vld [vmem:[#allocation3 + $0x328] sm:$0xff] }
 0xb9f   :  { %v6402_v4 = vsel %vm6317_vm7, %v12935_v13, %v6401_v40  ;;  %v6320_v58 = vsel %vm6319_vm8, %v12950_v55, %v6318_v62  ;;  %6607 = vmatpush1.bf16.msra.mxu0 %v6463_v60  ;;  %v11690_v23 = vrot.slane %v11686_v35, %v12902_v26  ;;  %v11694_v5 = vrot.slane %v11686_v35, %v12903_v24  ;;  %v5967_v52 = vld [vmem:[#allocation3 + $0x300] sm:$0xff]  ;;  %v6480_v36 = vld [vmem:[#allocation3 + $0x4b8] sm:$0xff]  ;;  %v5969_v62 = vld [vmem:[#allocation3 + $0x310] sm:$0xff] }
 0xba0   :  { %v6403_v17 = vsel %vm6319_vm8, %v12939_v54, %v6402_v4  ;;  %v6322_v11 = vsel %vm6321_vm9, %v12951_v38, %v6320_v58  ;;  %6608 = vmatprep.subr.bf16.mxu0 %v6466_v27  ;;  %v6479_v38 = vld [vmem:[#allocation3 + $0x4b0] sm:$0xff] }
 0xba1   :  { %v6404_v18 = vsel %vm6321_vm9, %v12943_v50, %v6403_v17  ;;  %6324 = vst.msk [vmem:[#allocation5] sm:$0xff] %vm3539_vm1, %v6322_v11 }
 0xba2   :  { %6412 = vst [vmem:[#allocation5 + $0x20] sm:$0xff] %v6404_v18 }
 0xba3   :  { %6609 = vmatpush1.bf16.msra.mxu0 %v6465_v7  ;;  %v6482_v7 = vld [vmem:[#allocation3 + $0x4c8] sm:$0xff] }
 0xba4   :  { %6610 = vmatprep.subr.bf16.mxu0 %v6468_v41 }
 0xba7   :  { %6611 = vmatpush1.bf16.msra.mxu0 %v6467_v29 }
 0xba8   :  { %6612 = vmatprep.subr.bf16.mxu0 %v6470_v2 }
 0xbab   :  { %6613 = vmatpush1.bf16.msra.mxu0 %v6469_v8 }
 0xbac   :  { %6614 = vmatprep.subr.bf16.mxu0 %v6472_v33 }
 0xbaf   :  { %6615 = vmatpush1.bf16.msra.mxu0 %v6471_v37  ;;  %v5971_v37 = vld [vmem:[#allocation3 + $0x320] sm:$0xff] }
 0xbb0   :  { %6616 = vmatprep.subr.bf16.mxu0 %v6474_v47  ;;  %v5974_v47 = vld [vmem:[#allocation3 + $0x338] sm:$0xff] }
 0xbb3   :  { %6617 = vmatpush1.bf16.msra.mxu0 %v6473_v20 }
 0xbb4   :  { %6618 = vmatprep.subr.bf16.mxu0 %v6476_v31 }
 0xbb7   :  { %6619 = vmatpush1.bf16.msra.mxu0 %v6475_v6 }
 0xbb8   :  { %6620 = vmatprep.subr.bf16.mxu0 %v6478_v48 }
 0xbbb   :  { %6621 = vmatpush1.bf16.msra.mxu0 %v6477_v9 }
 0xbbc   :  { %6622 = vmatprep.subr.bf16.mxu0 %v6480_v36 }
 0xbbf   :  { %6623 = vmatpush1.bf16.msra.mxu0 %v6479_v38  ;;  %v5983_v38 = vld [vmem:[#allocation3 + $0x380] sm:$0xff] }
 0xbc0   :  { %6624 = vmatprep.subr.bf16.mxu0 %v6482_v7  ;;  %v5987_v7 = vld [vmem:[#allocation3 + $0x3a0] sm:$0xff] }
 0xc17   :  { %v5759_v14 = vpop.f32.mrb[232].mxu0 }
 0xc18   :  { %v5760_v0 = vadd.f32 %v5759_v14, %v11690_v23  ;;  %v5761_v40 = vpop.f32.mrb[233].mxu0 }
 0xc19   :  { %v5762_v30 = vadd.f32 %v5761_v40, %v11694_v5  ;;  %v5763_v43 = vpop.f32.mrb[234].mxu0 }
 0xc1a   :  { %v5871_v39 = vmul.f32 0.01, %v5760_v0  ;;  %v5764_v53 = vadd.f32 %v5763_v43, %v11690_v23  ;;  %v5765_v42 = vpop.f32.mrb[235].mxu0 }
 0xc1b   :  { %v5872_v13 = vmul.f32 0.01, %v5762_v30  ;;  %v5766_v4 = vadd.f32 %v5765_v42, %v11694_v5 }
 0xc1c   :  { %v5875_v15 = vmul.f32 0.01, %v5764_v53  ;;  %v5903_v46 = vmax.f32 %v5760_v0, %v5871_v39  ;;  %v6484_v39 = vld [vmem:[#allocation3 + $0x4d8] sm:$0xff] }
 0xc1d   :  { %v5876_v28 = vmul.f32 0.01, %v5766_v4  ;;  %v5904_v54 = vmax.f32 %v5762_v30, %v5872_v13  ;;  %v6481_v30 = vld [vmem:[#allocation3 + $0x4c0] sm:$0xff] }
 0xc1e   :  { %v5907_v63 = vmax.f32 %v5764_v53, %v5875_v15  ;;  %6625 = vmatpush1.bf16.msra.mxu0 %v6481_v30 }
 0xc1f   :  { %v5908_v17 = vmax.f32 %v5766_v4, %v5876_v28  ;;  %v5769_v10 = vpop.f32.mrb[236].mxu0  ;;  %v5973_v4 = vld [vmem:[#allocation3 + $0x330] sm:$0xff]  ;;  %v5976_v28 = vld [vmem:[#allocation3 + $0x348] sm:$0xff]  ;;  %6626 = vmatprep.subr.bf16.mxu0 %v6484_v39 }
 0xc20   :  { %v6000_v32 = vpack.c.bf16 %v5907_v63, %v5903_v46  ;;  %v5770_v12 = vadd.f32 %v5769_v10, %v11690_v23  ;;  %v5771_v45 = vpop.f32.mrb[237].mxu0  ;;  %v6483_v46 = vld [vmem:[#allocation3 + $0x4d0] sm:$0xff]  ;;  %v6486_v10 = vld [vmem:[#allocation3 + $0x4e8] sm:$0xff] }
 0xc21   :  { %v5772_v25 = vadd.f32 %v5771_v45, %v11694_v5  ;;  %v5773_v50 = vpop.f32.mrb[238].mxu0  ;;  %v6001_v18 = vpack.c.bf16 %v5908_v17, %v5904_v54 }
 0xc22   :  { %v5879_v1 = vmul.f32 0.01, %v5770_v12  ;;  %v5774_v21 = vadd.f32 %v5773_v50, %v11690_v23  ;;  %v5775_v51 = vpop.f32.mrb[239].mxu0  ;;  %v5975_v50 = vld [vmem:[#allocation3 + $0x340] sm:$0xff]  ;;  %6627 = vmatpush1.bf16.msra.mxu0 %v6483_v46  ;;  %v5998_v46 = vld [vmem:[#allocation3 + $0x3f8] sm:$0xff] }
 0xc23   :  { %v5880_v3 = vmul.f32 0.01, %v5772_v25  ;;  %v5776_v34 = vadd.f32 %v5775_v51, %v11694_v5  ;;  %6059 = vmatprep.mubr.bf16.mxu1 %v6001_v18  ;;  %6628 = vmatprep.subr.bf16.mxu0 %v6486_v10  ;;  %v6485_v51 = vld [vmem:[#allocation3 + $0x4e0] sm:$0xff] }
 0xc24   :  { %v5883_v49 = vmul.f32 0.01, %v5774_v21  ;;  %6060 = vmatmul.mubr.bf16.vlgmr.msra.gmra.mrb[40].mxu1 %v6000_v32  ;;  %v5911_v56 = vmax.f32 %v5770_v12, %v5879_v1 }
 0xc25   :  { %v5884_v44 = vmul.f32 0.01, %v5776_v34  ;;  %6101 = vmatpush1.bf16.msra.mxu1 %v5967_v52  ;;  %v5912_v59 = vmax.f32 %v5772_v25, %v5880_v3  ;;  %v6488_v3 = vld [vmem:[#allocation3 + $0x4f8] sm:$0xff] }
 0xc26   :  { %v5915_v16 = vmax.f32 %v5774_v21, %v5883_v49  ;;  %6102 = vmatprep.subr.bf16.mxu1 %v5970_v57  ;;  %v5978_v21 = vld [vmem:[#allocation3 + $0x358] sm:$0xff]  ;;  %6629 = vmatpush1.bf16.msra.mxu0 %v6485_v51 }
 0xc27   :  { %v5916_v55 = vmax.f32 %v5776_v34, %v5884_v44  ;;  %v5779_v58 = vpop.f32.mrb[240].mxu0  ;;  %v5980_v44 = vld [vmem:[#allocation3 + $0x368] sm:$0xff]  ;;  %6630 = vmatprep.subr.bf16.mxu0 %v6488_v3 }
 0xc28   :  { %v5780_v11 = vadd.f32 %v5779_v58, %v11690_v23  ;;  %v5781_v60 = vpop.f32.mrb[241].mxu0  ;;  %v6004_v27 = vpack.c.bf16 %v5915_v16, %v5911_v56  ;;  %v6487_v56 = vld [vmem:[#allocation3 + $0x4f0] sm:$0xff]  ;;  %v6490_v16 = vld [vmem:[#allocation3 + $0x508] sm:$0xff] }
 0xc29   :  { %v5782_v41 = vadd.f32 %v5781_v60, %v11694_v5  ;;  %6103 = vmatpush1.bf16.msra.mxu1 %v5969_v62  ;;  %v5783_v29 = vpop.f32.mrb[242].mxu0  ;;  %v6005_v2 = vpack.c.bf16 %v5916_v55, %v5912_v59  ;;  %v5979_v59 = vld [vmem:[#allocation3 + $0x360] sm:$0xff]  ;;  %v5982_v55 = vld [vmem:[#allocation3 + $0x378] sm:$0xff]  ;;  %v5981_v58 = vld [vmem:[#allocation3 + $0x370] sm:$0xff] }
 0xc2a   :  { %v5887_v8 = vmul.f32 0.01, %v5780_v11  ;;  %v5784_v33 = vadd.f32 %v5783_v29, %v11690_v23  ;;  %v5785_v14 = vpop.f32.mrb[243].mxu0  ;;  %6104 = vmatprep.subr.bf16.mxu1 %v5972_v22  ;;  %6631 = vmatpush1.bf16.msra.mxu0 %v6487_v56  ;;  %v5984_v22 = vld [vmem:[#allocation3 + $0x388] sm:$0xff]  ;;  %v5985_v60 = vld [vmem:[#allocation3 + $0x390] sm:$0xff]  ;;  %v6581_v56 = vpack.c.bf16 %v11666_v19, %v11666_v19 }
 0xc2b   :  { %v5888_v0 = vmul.f32 0.01, %v5782_v41  ;;  %v5786_v40 = vadd.f32 %v5785_v14, %v11694_v5  ;;  %6069 = vmatprep.mubr.bf16.mxu1 %v6005_v2  ;;  %6641 = vmatprep.subr.bf16.mxu0 %v6490_v16  ;;  %v5989_v29 = vld [vmem:[#allocation3 + $0x3b0] sm:$0xff]  ;;  %v5992_v2 = vld [vmem:[#allocation3 + $0x3c8] sm:$0xff] }
 0xc2c   :  { %v5891_v43 = vmul.f32 0.01, %v5784_v33  ;;  %6070 = vmatmul.mubr.bf16.gmra.mrb[44].mxu1 %v6004_v27  ;;  %v5919_v42 = vmax.f32 %v5780_v11, %v5887_v8  ;;  %v5986_v11 = vld [vmem:[#allocation3 + $0x398] sm:$0xff]  ;;  %v5988_v27 = vld [vmem:[#allocation3 + $0x3a8] sm:$0xff]  ;;  %v5991_v8 = vld [vmem:[#allocation3 + $0x3c0] sm:$0xff] }
 0xc2d   :  { %v5892_v53 = vmul.f32 0.01, %v5786_v40  ;;  %6105 = vmatpush1.bf16.msra.mxu1 %v5971_v37  ;;  %v5920_v20 = vmax.f32 %v5782_v41, %v5888_v0  ;;  %v5990_v41 = vld [vmem:[#allocation3 + $0x3b8] sm:$0xff]  ;;  %v12952_v14 = vld [vmem:[#allocation105_spill] sm:$0xff]  ;;  %v12953_v0 = vld [vmem:[#allocation108_spill] sm:$0xff] }
 0xc2e   :  { %v5923_v13 = vmax.f32 %v5784_v33, %v5891_v43  ;;  %6106 = vmatprep.subr.bf16.mxu1 %v5974_v47  ;;  %v5994_v33 = vld [vmem:[#allocation3 + $0x3d8] sm:$0xff]  ;;  %v11714_v37 = vrot.slane %v11686_v35, %v12952_v14  ;;  %v5993_v47 = vld [vmem:[#allocation3 + $0x3d0] sm:$0xff]  ;;  %v5996_v43 = vld [vmem:[#allocation3 + $0x3e8] sm:$0xff] }
 0xc2f   :  { %v5924_v15 = vmax.f32 %v5786_v40, %v5892_v53  ;;  %v5789_v31 = vpop.f32.mrb[244].mxu0  ;;  %v11718_v40 = vrot.slane %v11686_v35, %v12953_v0  ;;  %v6491_v0 = vld [vmem:[#allocation3 + $0x510] sm:$0xff] }
 0xc30   :  { %v5790_v63 = vadd.f32 %v5789_v31, %v11690_v23  ;;  %v5791_v54 = vpop.f32.mrb[245].mxu0  ;;  %v6008_v17 = vpack.c.bf16 %v5923_v13, %v5919_v42  ;;  %v5995_v31 = vld [vmem:[#allocation3 + $0x3e0] sm:$0xff] }
 0xc31   :  { %v5792_v6 = vadd.f32 %v5791_v54, %v11694_v5  ;;  %6107 = vmatpush1.bf16.msra.mxu1 %v5973_v4  ;;  %v5793_v32 = vpop.f32.mrb[246].mxu0  ;;  %v6009_v12 = vpack.c.bf16 %v5924_v15, %v5920_v20 }
 0xc32   :  { %v5895_v45 = vmul.f32 0.01, %v5790_v63  ;;  %v5794_v48 = vadd.f32 %v5793_v32, %v11690_v23  ;;  %v5795_v25 = vpop.f32.mrb[247].mxu0  ;;  %6108 = vmatprep.subr.bf16.mxu1 %v5976_v28  ;;  %v5977_v23 = vld [vmem:[#allocation3 + $0x350] sm:$0xff] }
 0xc33   :  { %v5896_v18 = vmul.f32 0.01, %v5792_v6  ;;  %v5796_v1 = vadd.f32 %v5795_v25, %v11694_v5  ;;  %6079 = vmatprep.mubr.bf16.mxu1 %v6009_v12  ;;  %v5997_v32 = vld [vmem:[#allocation3 + $0x3f0] sm:$0xff] }
 0xc34   :  { %v5899_v52 = vmul.f32 0.01, %v5794_v48  ;;  %6080 = vmatmul.mubr.bf16.gmra.mrb[48].mxu1 %v6008_v17  ;;  %v5927_v57 = vmax.f32 %v5790_v63, %v5895_v45  ;;  %v6341_v17 = vpop.permute.xlu0 %6340 }
 0xc35   :  { %v5900_v34 = vmul.f32 0.01, %v5796_v1  ;;  %6109 = vmatpush1.bf16.msra.mxu1 %v5975_v50  ;;  %v5928_v49 = vmax.f32 %v5792_v6, %v5896_v18  ;;  %6344 = vst.msk [vmem:[#allocation5] sm:$0xff] %vm6343_vm10, %v6341_v17 }
 0xc36   :  { %v5931_v9 = vmax.f32 %v5794_v48, %v5899_v52  ;;  %6110 = vmatprep.subr.bf16.mxu1 %v5978_v21 }
 0xc37   :  { %v5932_v36 = vmax.f32 %v5796_v1, %v5900_v34 }
 0xc38   :  { %v6012_v5 = vpack.c.bf16 %v5931_v9, %v5927_v57  ;;  %v12954_v57 = vld [vmem:[#allocation93_spill] sm:$0xff] }
 0xc39   :  { %6111 = vmatpush1.bf16.msra.mxu1 %v5977_v23  ;;  %v6013_v62 = vpack.c.bf16 %v5932_v36, %v5928_v49 }
 0xc3a   :  { %6112 = vmatprep.subr.bf16.mxu1 %v5980_v44 }
 0xc3b   :  { %6089 = vmatprep.mubr.bf16.mxu1 %v6013_v62 }
 0xc3c   :  { %6090 = vmatmul.mubr.bf16.gmra.mrb[52].mxu1 %v6012_v5  ;;  %v6449_v44 = vld [vmem:[#allocation5] sm:$0xff]  ;;  %v12955_v5 = vld [vmem:[#allocation85_spill] sm:$0xff] }
 0xc3d   :  { %6113 = vmatpush1.bf16.msra.mxu1 %v5979_v59  ;;  %v6578_v59 = vpack.c.bf16 %v6449_v44, %v6449_v44 }
 0xc3e   :  { %6114 = vmatprep.subr.bf16.mxu1 %v5982_v55  ;;  %v6489_v55 = vld [vmem:[#allocation3 + $0x500] sm:$0xff] }
 0xc3f   :  { %6633 = vmatmul.mubr.bf16.vlgmr.msra.gmra.mrb[8].mxu0 %v6578_v59  ;;  %v12965_v59 = vld [vmem:[#allocation90_spill] sm:$0xff] }
 0xc40   :  { %6642 = vmatpush1.bf16.msra.mxu0 %v6489_v55  ;;  %6673 = vmatprep.mubr.bf16.mxu0 %v6581_v56  ;;  %v6500_v56 = vld [vmem:[#allocation3 + $0x558] sm:$0xff]  ;;  %v6502_v55 = vld [vmem:[#allocation3 + $0x568] sm:$0xff] }
 0xc41   :  { %6115 = vmatpush1.bf16.msra.mxu1 %v5981_v58  ;;  %v12956_v58 = vld [vmem:[#allocation94_spill] sm:$0xff] }
 0xc42   :  { %6116 = vmatprep.subr.bf16.mxu1 %v5984_v22 }
 0xc45   :  { %6117 = vmatpush1.bf16.msra.mxu1 %v5983_v38 }
 0xc46   :  { %6118 = vmatprep.subr.bf16.mxu1 %v5986_v11 }
 0xc49   :  { %6119 = vmatpush1.bf16.msra.mxu1 %v5985_v60  ;;  %v6492_v60 = vld [vmem:[#allocation3 + $0x518] sm:$0xff] }
 0xc4a   :  { %6120 = vmatprep.subr.bf16.mxu1 %v5988_v27  ;;  %6643 = vmatprep.subr.bf16.mxu0 %v6492_v60  ;;  %v12968_v60 = vld [vmem:[#allocation100_spill] sm:$0xff] }
 0xc4b   :  { %6644 = vmatpush1.bf16.msra.mxu0 %v6491_v0  ;;  %v6511_v0 = vld [vmem:[#allocation3 + $0x5b0] sm:$0xff] }
 0xc4d   :  { %6121 = vmatpush1.bf16.msra.mxu1 %v5987_v7 }
 0xc4e   :  { %6122 = vmatprep.subr.bf16.mxu1 %v5990_v41 }
 0xc51   :  { %6123 = vmatpush1.bf16.msra.mxu1 %v5989_v29 }
 0xc52   :  { %6124 = vmatprep.subr.bf16.mxu1 %v5992_v2 }
 0xc55   :  { %6125 = vmatpush1.bf16.msra.mxu1 %v5991_v8 }
 0xc56   :  { %6126 = vmatprep.subr.bf16.mxu1 %v5994_v33 }
 0xc57   :  { %v5832_v30 = vpop.f32.mrb[248].mxu0 }
 0xc58   :  { %v5833_v39 = vadd.f32 %v5832_v30, %v11714_v37  ;;  %v5834_v53 = vpop.f32.mrb[249].mxu0 }
 0xc59   :  { %v5835_v42 = vadd.f32 %v5834_v53, %v11718_v40  ;;  %v5836_v13 = vpop.f32.mrb[250].mxu0  ;;  %6127 = vmatpush1.bf16.msra.mxu1 %v5993_v47  ;;  %v12957_v47 = vld [vmem:[#allocation86_spill] sm:$0xff]  ;;  %v12958_v53 = vld [vmem:[#allocation95_spill] sm:$0xff] }
 0xc5a   :  { %v5873_v4 = vmul.f32 0.01, %v5833_v39  ;;  %v5837_v20 = vadd.f32 %v5836_v13, %v11714_v37  ;;  %v5838_v15 = vpop.f32.mrb[251].mxu0  ;;  %6128 = vmatprep.subr.bf16.mxu1 %v5996_v43 }
 0xc5b   :  { %v5874_v28 = vmul.f32 0.01, %v5835_v42  ;;  %v5839_v35 = vadd.f32 %v5838_v15, %v11718_v40  ;;  %v6493_v15 = vld [vmem:[#allocation3 + $0x520] sm:$0xff] }
 0xc5c   :  { %v5877_v63 = vmul.f32 0.01, %v5837_v20  ;;  %v5905_v10 = vmax.f32 %v5833_v39, %v5873_v4  ;;  %v6494_v39 = vld [vmem:[#allocation3 + $0x528] sm:$0xff] }
 0xc5d   :  { %v5878_v54 = vmul.f32 0.01, %v5839_v35  ;;  %6129 = vmatpush1.bf16.msra.mxu1 %v5995_v31  ;;  %v5906_v12 = vmax.f32 %v5835_v42, %v5874_v28  ;;  %6645 = vmatprep.subr.bf16.mxu0 %v6494_v39  ;;  %v12959_v31 = vld [vmem:[#allocation87_spill] sm:$0xff]  ;;  %v6515_v39 = vld [vmem:[#allocation3 + $0x5d0] sm:$0xff] }
 0xc5e   :  { %v5909_v6 = vmax.f32 %v5837_v20, %v5877_v63  ;;  %6130 = vmatprep.subr.bf16.mxu1 %v5998_v46  ;;  %v6496_v63 = vld [vmem:[#allocation3 + $0x538] sm:$0xff]  ;;  %6646 = vmatpush1.bf16.msra.mxu0 %v6493_v15  ;;  %v6580_v15 = vpack.c.bf16 %v11662_v61, %v11662_v61  ;;  %v6529_v61 = vld [vmem:[#allocation3 + $0x640] sm:$0xff] }
 0xc5f   :  { %v5910_v45 = vmax.f32 %v5839_v35, %v5878_v54  ;;  %v5842_v48 = vpop.f32.mrb[252].mxu0  ;;  %v12960_v54 = vld [vmem:[#allocation96_spill] sm:$0xff]  ;;  %6647 = vmatprep.subr.bf16.mxu0 %v6496_v63 }
 0xc60   :  { %v6002_v25 = vpack.c.bf16 %v5909_v6, %v5905_v10  ;;  %v5843_v50 = vadd.f32 %v5842_v48, %v11714_v37  ;;  %v5844_v18 = vpop.f32.mrb[253].mxu0  ;;  %v6525_v63 = vld [vmem:[#allocation3 + $0x620] sm:$0xff] }
 0xc61   :  { %v5845_v1 = vadd.f32 %v5844_v18, %v11718_v40  ;;  %v5846_v21 = vpop.f32.mrb[254].mxu0  ;;  %6131 = vmatpush1.bf16.msra.mxu1 %v5997_v32  ;;  %v6003_v51 = vpack.c.bf16 %v5910_v45, %v5906_v12  ;;  %v6495_v18 = vld [vmem:[#allocation3 + $0x530] sm:$0xff] }
 0xc62   :  { %v5881_v52 = vmul.f32 0.01, %v5843_v50  ;;  %v5847_v3 = vadd.f32 %v5846_v21, %v11714_v37  ;;  %v5848_v34 = vpop.f32.mrb[255].mxu0  ;;  %7187 = vmatprep.subr.bf16.mxu1 %v12954_v57  ;;  %6648 = vmatpush1.bf16.msra.mxu0 %v6495_v18  ;;  %v6537_v18 = vld [vmem:[#allocation3 + $0x680] sm:$0xff] }
 0xc63   :  { %v5882_v9 = vmul.f32 0.01, %v5845_v1  ;;  %v5849_v23 = vadd.f32 %v5848_v34, %v11718_v40  ;;  %6132 = vmatprep.mubr.bf16.mxu1 %v6003_v51 }
 0xc64   :  { %v5885_v49 = vmul.f32 0.01, %v5847_v3  ;;  %6133 = vmatmul.mubr.bf16.vlgmr.msra.gmra.mrb[40].mxu1 %v6002_v25  ;;  %v5913_v16 = vmax.f32 %v5843_v50, %v5881_v52  ;;  %v6498_v52 = vld [vmem:[#allocation3 + $0x548] sm:$0xff] }
 0xc65   :  { %v5886_v36 = vmul.f32 0.01, %v5849_v23  ;;  %7188 = vmatpush3.bf16.msra.mxu1 %v12955_v5  ;;  %v5914_v22 = vmax.f32 %v5845_v1, %v5882_v9  ;;  %v12961_v1 = vld [vmem:[#allocation88_spill] sm:$0xff]  ;;  %6649 = vmatprep.subr.bf16.mxu0 %v6498_v52  ;;  %v12964_v5 = vld [vmem:[#allocation98_spill] sm:$0xff] }
 0xc66   :  { %v5917_v62 = vmax.f32 %v5847_v3, %v5885_v49  ;;  %7189 = vmatprep.subr.bf16.mxu1 %v12956_v58  ;;  %v12962_v3 = vld [vmem:[#allocation97_spill] sm:$0xff]  ;;  %v12966_v58 = vld [vmem:[#allocation99_spill] sm:$0xff] }
 0xc67   :  { %v5918_v38 = vmax.f32 %v5849_v23, %v5886_v36  ;;  %v5852_v11 = vpop.f32.mrb[0].mxu0  ;;  %v12963_v49 = vld [vmem:[#allocation89_spill] sm:$0xff]  ;;  %v6541_v52 = vld [vmem:[#allocation3 + $0x6a0] sm:$0xff] }
 0xc68   :  { %v5853_v27 = vadd.f32 %v5852_v11, %v11714_v37  ;;  %v5854_v7 = vpop.f32.mrb[1].mxu0  ;;  %v6006_v41 = vpack.c.bf16 %v5917_v62, %v5913_v16  ;;  %v6499_v62 = vld [vmem:[#allocation3 + $0x550] sm:$0xff]  ;;  %v6504_v11 = vld [vmem:[#allocation3 + $0x578] sm:$0xff] }
 0xc69   :  { %v5855_v29 = vadd.f32 %v5854_v7, %v11718_v40  ;;  %v5856_v19 = vpop.f32.mrb[2].mxu0  ;;  %v6007_v2 = vpack.c.bf16 %v5918_v38, %v5914_v22  ;;  %7190 = vmatpush3.bf16.msra.mxu1 %v12957_v47  ;;  %v6501_v22 = vld [vmem:[#allocation3 + $0x560] sm:$0xff]  ;;  %v6514_v47 = vld [vmem:[#allocation3 + $0x5c8] sm:$0xff] }
 0xc6a   :  { %v5889_v8 = vmul.f32 0.01, %v5853_v27  ;;  %v5857_v33 = vadd.f32 %v5856_v19, %v11714_v37  ;;  %v5858_v14 = vpop.f32.mrb[3].mxu0  ;;  %7191 = vmatprep.subr.bf16.mxu1 %v12958_v53  ;;  %v12967_v38 = vld [vmem:[#allocation91_spill] sm:$0xff]  ;;  %v12969_v7 = vld [vmem:[#allocation92_spill] sm:$0xff] }
 0xc6b   :  { %v5890_v30 = vmul.f32 0.01, %v5855_v29  ;;  %v5859_v43 = vadd.f32 %v5858_v14, %v11718_v40  ;;  %6142 = vmatprep.mubr.bf16.mxu1 %v6007_v2  ;;  %v6508_v19 = vld [vmem:[#allocation3 + $0x598] sm:$0xff]  ;;  %v6507_v2 = vld [vmem:[#allocation3 + $0x590] sm:$0xff]  ;;  %v6518_v53 = vld [vmem:[#allocation3 + $0x5e8] sm:$0xff] }
 0xc6c   :  { %v5893_v42 = vmul.f32 0.01, %v5857_v33  ;;  %6143 = vmatmul.mubr.bf16.gmra.mrb[44].mxu1 %v6006_v41  ;;  %v5921_v4 = vmax.f32 %v5853_v27, %v5889_v8  ;;  %v6503_v27 = vld [vmem:[#allocation3 + $0x570] sm:$0xff]  ;;  %v6506_v41 = vld [vmem:[#allocation3 + $0x588] sm:$0xff]  ;;  %v6512_v14 = vld [vmem:[#allocation3 + $0x5b8] sm:$0xff] }
 0xc6d   :  { %v5894_v13 = vmul.f32 0.01, %v5859_v43  ;;  %7192 = vmatpush3.bf16.msra.mxu1 %v12959_v31  ;;  %v5922_v28 = vmax.f32 %v5855_v29, %v5890_v30  ;;  %v6505_v29 = vld [vmem:[#allocation3 + $0x580] sm:$0xff]  ;;  %v6510_v8 = vld [vmem:[#allocation3 + $0x5a8] sm:$0xff] }
 0xc6e   :  { %v5925_v20 = vmax.f32 %v5857_v33, %v5893_v42  ;;  %7193 = vmatprep.subr.bf16.mxu1 %v12960_v54  ;;  %v6509_v33 = vld [vmem:[#allocation3 + $0x5a0] sm:$0xff]  ;;  %v6528_v54 = vld [vmem:[#allocation3 + $0x638] sm:$0xff] }
 0xc6f   :  { %v5926_v35 = vmax.f32 %v5859_v43, %v5894_v13  ;;  %v5862_v46 = vpop.f32.mrb[4].mxu0  ;;  %v6513_v30 = vld [vmem:[#allocation3 + $0x5c0] sm:$0xff]  ;;  %v6516_v43 = vld [vmem:[#allocation3 + $0x5d8] sm:$0xff] }
 0xc70   :  { %v5863_v17 = vadd.f32 %v5862_v46, %v11714_v37  ;;  %v5864_v10 = vpop.f32.mrb[5].mxu0  ;;  %v6010_v6 = vpack.c.bf16 %v5925_v20, %v5921_v4  ;;  %v6517_v42 = vld [vmem:[#allocation3 + $0x5e0] sm:$0xff]  ;;  %v6520_v13 = vld [vmem:[#allocation3 + $0x5f8] sm:$0xff]  ;;  %v6519_v4 = vld [vmem:[#allocation3 + $0x5f0] sm:$0xff] }
 0xc71   :  { %v5865_v32 = vadd.f32 %v5864_v10, %v11718_v40  ;;  %v5866_v12 = vpop.f32.mrb[6].mxu0  ;;  %v6011_v45 = vpack.c.bf16 %v5926_v35, %v5922_v28  ;;  %7194 = vmatpush3.bf16.msra.mxu1 %v12961_v1  ;;  %v6522_v20 = vld [vmem:[#allocation3 + $0x608] sm:$0xff]  ;;  %v6521_v31 = vld [vmem:[#allocation3 + $0x600] sm:$0xff]  ;;  %v6524_v28 = vld [vmem:[#allocation3 + $0x618] sm:$0xff] }
 0xc72   :  { %v5897_v48 = vmul.f32 0.01, %v5863_v17  ;;  %v5867_v25 = vadd.f32 %v5866_v12, %v11714_v37  ;;  %v5868_v50 = vpop.f32.mrb[7].mxu0  ;;  %7195 = vmatprep.subr.bf16.mxu1 %v12962_v3  ;;  %v6497_v37 = vld [vmem:[#allocation3 + $0x540] sm:$0xff]  ;;  %v6523_v35 = vld [vmem:[#allocation3 + $0x610] sm:$0xff]  ;;  %v6526_v46 = vld [vmem:[#allocation3 + $0x628] sm:$0xff] }
 0xc73   :  { %v5898_v21 = vmul.f32 0.01, %v5865_v32  ;;  %v5869_v51 = vadd.f32 %v5868_v50, %v11718_v40  ;;  %6152 = vmatprep.mubr.bf16.mxu1 %v6011_v45  ;;  %6650 = vmatpush1.bf16.msra.mxu0 %v6497_v37  ;;  %v6530_v10 = vld [vmem:[#allocation3 + $0x648] sm:$0xff]  ;;  %v6533_v45 = vld [vmem:[#allocation3 + $0x660] sm:$0xff]  ;;  %v6540_v1 = vld [vmem:[#allocation3 + $0x698] sm:$0xff] }
 0xc74   :  { %v5901_v34 = vmul.f32 0.01, %v5867_v25  ;;  %6153 = vmatmul.mubr.bf16.gmra.mrb[48].mxu1 %v6010_v6  ;;  %v5929_v9 = vmax.f32 %v5863_v17, %v5897_v48  ;;  %6651 = vmatprep.subr.bf16.mxu0 %v6500_v56  ;;  %v6527_v17 = vld [vmem:[#allocation3 + $0x630] sm:$0xff]  ;;  %v6532_v6 = vld [vmem:[#allocation3 + $0x658] sm:$0xff]  ;;  %v6534_v12 = vld [vmem:[#allocation3 + $0x668] sm:$0xff] }
 0xc75   :  { %v5902_v57 = vmul.f32 0.01, %v5869_v51  ;;  %7196 = vmatpush3.bf16.msra.mxu1 %v12963_v49  ;;  %v5930_v36 = vmax.f32 %v5865_v32, %v5898_v21  ;;  %v6531_v32 = vld [vmem:[#allocation3 + $0x650] sm:$0xff]  ;;  %v6536_v48 = vld [vmem:[#allocation3 + $0x678] sm:$0xff]  ;;  %v6538_v50 = vld [vmem:[#allocation3 + $0x688] sm:$0xff] }
 0xc76   :  { %v5933_v23 = vmax.f32 %v5867_v25, %v5901_v34  ;;  %7197 = vmatprep.subr.bf16.mxu1 %v12964_v5  ;;  %v6535_v25 = vld [vmem:[#allocation3 + $0x670] sm:$0xff]  ;;  %v6544_v3 = vld [vmem:[#allocation3 + $0x6b8] sm:$0xff]  ;;  %v6550_v49 = vld [vmem:[#allocation3 + $0x6e8] sm:$0xff] }
 0xc77   :  { %v5934_v44 = vmax.f32 %v5869_v51, %v5902_v57  ;;  %6652 = vmatpush1.bf16.msra.mxu0 %v6499_v62  ;;  %v6539_v21 = vld [vmem:[#allocation3 + $0x690] sm:$0xff]  ;;  %v6542_v51 = vld [vmem:[#allocation3 + $0x6a8] sm:$0xff] }
 0xc78   :  { %v6014_v40 = vpack.c.bf16 %v5933_v23, %v5929_v9  ;;  %6653 = vmatprep.subr.bf16.mxu0 %v6502_v55  ;;  %v6543_v34 = vld [vmem:[#allocation3 + $0x6b0] sm:$0xff]  ;;  %v6546_v57 = vld [vmem:[#allocation3 + $0x6c8] sm:$0xff]  ;;  %v6545_v9 = vld [vmem:[#allocation3 + $0x6c0] sm:$0xff] }
 0xc79   :  { %v6015_v16 = vpack.c.bf16 %v5934_v44, %v5930_v36  ;;  %7198 = vmatpush3.bf16.msra.mxu1 %v12965_v59  ;;  %v6548_v23 = vld [vmem:[#allocation3 + $0x6d8] sm:$0xff]  ;;  %v6547_v37 = vld [vmem:[#allocation3 + $0x6d0] sm:$0xff]  ;;  %v6549_v36 = vld [vmem:[#allocation3 + $0x6e0] sm:$0xff] }
 0xc7a   :  { %7199 = vmatprep.subr.bf16.mxu1 %v12966_v58  ;;  %v6552_v44 = vld [vmem:[#allocation3 + $0x6f8] sm:$0xff]  ;;  %v6551_v56 = vld [vmem:[#allocation3 + $0x6f0] sm:$0xff]  ;;  %v6554_v5 = vld [vmem:[#allocation3 + $0x708] sm:$0xff] }
 0xc7b   :  { %6162 = vmatprep.mubr.bf16.mxu1 %v6015_v16  ;;  %6654 = vmatpush1.bf16.msra.mxu0 %v6501_v22  ;;  %v5999_v16 = vld [vmem:[#allocation9 + $0x27] sm:$0x3] }
 0xc7c   :  { %6163 = vmatmul.mubr.bf16.gmra.mrb[52].mxu1 %v6014_v40  ;;  %6655 = vmatprep.subr.bf16.mxu0 %v6504_v11  ;;  %v6447_v40 = vld [vmem:[%s11805_s2] sm:$0xff]  ;;  %v11761_v62 = vrot.slane %v5999_v16, %v12902_v26  ;;  %v11764_v59 = vrot.slane %v5999_v16, %v12903_v24 }
 0xc7d   :  { %7200 = vmatpush3.bf16.msra.mxu1 %v12967_v38  ;;  %6448 = vst.msk [vmem:[#allocation5 + $0x38] sm:$0xff] %vm3539_vm1, %v6447_v40 }
 0xc7e   :  { %7201 = vmatprep.subr.bf16.mxu1 %v12968_v60 }
 0xc7f   :  { %6656 = vmatpush1.bf16.msra.mxu0 %v6503_v27 }
 0xc80   :  { %6657 = vmatprep.subr.bf16.mxu0 %v6506_v41 }
 0xc81   :  { %7202 = vmatpush3.bf16.msra.mxu1 %v12969_v7 }
 0xc83   :  { %6658 = vmatpush1.bf16.msra.mxu0 %v6505_v29 }
 0xc84   :  { %6659 = vmatprep.subr.bf16.mxu0 %v6508_v19 }
 0xc87   :  { %6660 = vmatpush1.bf16.msra.mxu0 %v6507_v2 }
 0xc88   :  { %6661 = vmatprep.subr.bf16.mxu0 %v6510_v8 }
 0xc8b   :  { %6662 = vmatpush1.bf16.msra.mxu0 %v6509_v33 }
 0xc8c   :  { %6663 = vmatprep.subr.bf16.mxu0 %v6512_v14 }
 0xc8f   :  { %6664 = vmatpush1.bf16.msra.mxu0 %v6511_v0 }
 0xc90   :  { %6665 = vmatprep.subr.bf16.mxu0 %v6514_v47 }
 0xc93   :  { %6666 = vmatpush1.bf16.msra.mxu0 %v6513_v30 }
 0xc94   :  { %6667 = vmatprep.subr.bf16.mxu0 %v6516_v43 }
 0xc97   :  { %6668 = vmatpush1.bf16.msra.mxu0 %v6515_v39 }
 0xc98   :  { %6669 = vmatprep.subr.bf16.mxu0 %v6518_v53 }
 0xc9b   :  { %6670 = vmatpush1.bf16.msra.mxu0 %v6517_v42 }
 0xc9c   :  { %6671 = vmatprep.subr.bf16.mxu0 %v6520_v13 }
 0xc9f   :  { %6672 = vmatpush1.bf16.msra.mxu0 %v6519_v4 }
 0xca0   :  { %6682 = vmatprep.subr.bf16.mxu0 %v6522_v20 }
 0xca2   :  { %6674 = vmatmul.mubr.bf16.vlgmr.msra.gmra.mrb[8].mxu0 %v6580_v15 }
 0xca3   :  { %6683 = vmatpush1.bf16.msra.mxu0 %v6521_v31 }
 0xca4   :  { %6684 = vmatprep.subr.bf16.mxu0 %v6524_v28 }
 0xca7   :  { %6685 = vmatpush1.bf16.msra.mxu0 %v6523_v35 }
 0xca8   :  { %6686 = vmatprep.subr.bf16.mxu0 %v6526_v46 }
 0xcab   :  { %6687 = vmatpush1.bf16.msra.mxu0 %v6525_v63 }
 0xcac   :  { %6688 = vmatprep.subr.bf16.mxu0 %v6528_v54 }
 0xcaf   :  { %6689 = vmatpush1.bf16.msra.mxu0 %v6527_v17 }
 0xcb0   :  { %6690 = vmatprep.subr.bf16.mxu0 %v6530_v10 }
 0xcb3   :  { %6691 = vmatpush1.bf16.msra.mxu0 %v6529_v61 }
 0xcb4   :  { %6692 = vmatprep.subr.bf16.mxu0 %v6532_v6 }
 0xcb7   :  { %6693 = vmatpush1.bf16.msra.mxu0 %v6531_v32 }
 0xcb8   :  { %6694 = vmatprep.subr.bf16.mxu0 %v6534_v12 }
 0xcbb   :  { %6695 = vmatpush1.bf16.msra.mxu0 %v6533_v45 }
 0xcbc   :  { %6696 = vmatprep.subr.bf16.mxu0 %v6536_v48 }
 0xcbf   :  { %6697 = vmatpush1.bf16.msra.mxu0 %v6535_v25 }
 0xcc0   :  { %6698 = vmatprep.subr.bf16.mxu0 %v6538_v50 }
 0xcc3   :  { %6699 = vmatpush1.bf16.msra.mxu0 %v6537_v18 }
 0xcc4   :  { %6700 = vmatprep.subr.bf16.mxu0 %v6540_v1 }
 0xcc7   :  { %6701 = vmatpush1.bf16.msra.mxu0 %v6539_v21 }
 0xcc8   :  { %6702 = vmatprep.subr.bf16.mxu0 %v6542_v51 }
 0xccb   :  { %6703 = vmatpush1.bf16.msra.mxu0 %v6541_v52 }
 0xccc   :  { %6704 = vmatprep.subr.bf16.mxu0 %v6544_v3 }
 0xccf   :  { %6705 = vmatpush1.bf16.msra.mxu0 %v6543_v34 }
 0xcd0   :  { %6706 = vmatprep.subr.bf16.mxu0 %v6546_v57 }
 0xcd3   :  { %6707 = vmatpush1.bf16.msra.mxu0 %v6545_v9 }
 0xcd4   :  { %6708 = vmatprep.subr.bf16.mxu0 %v6548_v23 }
 0xcd7   :  { %6709 = vmatpush1.bf16.msra.mxu0 %v6547_v37 }
 0xcd8   :  { %6710 = vmatprep.subr.bf16.mxu0 %v6550_v49 }
 0xcdb   :  { %6711 = vmatpush1.bf16.msra.mxu0 %v6549_v36 }
 0xcdc   :  { %6712 = vmatprep.subr.bf16.mxu0 %v6552_v44 }
 0xcdf   :  { %6713 = vmatpush1.bf16.msra.mxu0 %v6551_v56 }
 0xce0   :  { %6723 = vmatprep.subr.bf16.mxu0 %v6554_v5 }
 0xd37   :  { %v6134_v55 = vpop.f32.mrb[40].mxu1 }
 0xd38   :  { %v7355_v58 = vadd.f32 %v6134_v55, %v11761_v62  ;;  %v6136_v22 = vpop.f32.mrb[41].mxu1 }
 0xd39   :  { %v7356_v38 = vadd.f32 %v6136_v22, %v11764_v59  ;;  %v6138_v11 = vpop.f32.mrb[42].mxu1 }
 0xd3a   :  { %v6173_v60 = vmul.f32 0.01, %v7355_v58  ;;  %v7357_v27 = vadd.f32 %v6138_v11, %v11761_v62  ;;  %v6140_v7 = vpop.f32.mrb[43].mxu1 }
 0xd3b   :  { %v6174_v41 = vmul.f32 0.01, %v7356_v38  ;;  %v7358_v29 = vadd.f32 %v6140_v7, %v11764_v59 }
 0xd3c   :  { %v6189_v19 = vmax.f32 %v7355_v58, %v6173_v60  ;;  %v6175_v2 = vmul.f32 0.01, %v7357_v27 }
 0xd3d   :  { %v6190_v8 = vmax.f32 %v7356_v38, %v6174_v41  ;;  %v6176_v33 = vmul.f32 0.01, %v7358_v29 }
 0xd3e   :  { %v6205_v14 = vrot.slane %v6189_v19, 4  ;;  %v6191_v0 = vmax.f32 %v7357_v27, %v6175_v2 }
 0xd3f   :  { %v6211_v47 = vrot.slane %v6190_v8, 4  ;;  %v6192_v30 = vmax.f32 %v7358_v29, %v6176_v33  ;;  %v6144_v43 = vpop.f32.mrb[44].mxu1 }
 0xd40   :  { %v6206_v39 = vmax.f32 %v6189_v19, %v6205_v14  ;;  %v6217_v53 = vrot.slane %v6191_v0, 4  ;;  %v7359_v42 = vadd.f32 %v6144_v43, %v11761_v62  ;;  %v6146_v13 = vpop.f32.mrb[45].mxu1 }
 0xd41   :  { %v6212_v4 = vmax.f32 %v6190_v8, %v6211_v47  ;;  %v6223_v20 = vrot.slane %v6192_v30, 4  ;;  %v7360_v15 = vadd.f32 %v6146_v13, %v11764_v59  ;;  %v6148_v31 = vpop.f32.mrb[46].mxu1 }
 0xd42   :  { %v6207_v28 = vrot.slane %v6206_v39, 2  ;;  %v6218_v35 = vmax.f32 %v6191_v0, %v6217_v53  ;;  %v6177_v46 = vmul.f32 0.01, %v7359_v42  ;;  %v7361_v63 = vadd.f32 %v6148_v31, %v11761_v62  ;;  %v6150_v54 = vpop.f32.mrb[47].mxu1 }
 0xd43   :  { %v6213_v17 = vrot.slane %v6212_v4, 2  ;;  %v6224_v10 = vmax.f32 %v6192_v30, %v6223_v20  ;;  %v6178_v61 = vmul.f32 0.01, %v7360_v15  ;;  %v7362_v6 = vadd.f32 %v6150_v54, %v11764_v59 }
 0xd44   :  { %v6208_v32 = vmax.f32 %v6206_v39, %v6207_v28  ;;  %v6219_v12 = vrot.slane %v6218_v35, 2  ;;  %v6193_v45 = vmax.f32 %v7359_v42, %v6177_v46  ;;  %v6179_v48 = vmul.f32 0.01, %v7361_v63 }
 0xd45   :  { %v6214_v25 = vmax.f32 %v6212_v4, %v6213_v17  ;;  %v6225_v50 = vrot.slane %v6224_v10, 2  ;;  %v6194_v18 = vmax.f32 %v7360_v15, %v6178_v61  ;;  %v6180_v1 = vmul.f32 0.01, %v7362_v6 }
 0xd46   :  { %v6209_v21 = vrot.slane %v6208_v32, 1  ;;  %v6220_v51 = vmax.f32 %v6218_v35, %v6219_v12  ;;  %v6229_v52 = vrot.slane %v6193_v45, 4  ;;  %v6195_v3 = vmax.f32 %v7361_v63, %v6179_v48 }
 0xd47   :  { %v6215_v34 = vrot.slane %v6214_v25, 1  ;;  %v6226_v57 = vmax.f32 %v6224_v10, %v6225_v50  ;;  %v6235_v9 = vrot.slane %v6194_v18, 4  ;;  %v6196_v23 = vmax.f32 %v7362_v6, %v6180_v1  ;;  %v6154_v37 = vpop.f32.mrb[48].mxu1 }
 0xd48   :  { %v6210_v49 = vmax.f32 %v6208_v32, %v6209_v21  ;;  %v6221_v36 = vrot.slane %v6220_v51, 1  ;;  %v6230_v44 = vmax.f32 %v6193_v45, %v6229_v52  ;;  %v6241_v56 = vrot.slane %v6195_v3, 4  ;;  %v6156_v5 = vpop.f32.mrb[49].mxu1 }
 0xd49   :  { %v6216_v40 = vmax.f32 %v6214_v25, %v6215_v34  ;;  %v6227_v16 = vrot.slane %v6226_v57, 1  ;;  %v6236_v55 = vmax.f32 %v6194_v18, %v6235_v9  ;;  %v6247_v58 = vrot.slane %v6196_v23, 4  ;;  %v6158_v22 = vpop.f32.mrb[50].mxu1 }
 0xd4a   :  { %v6222_v38 = vmax.f32 %v6220_v51, %v6221_v36  ;;  %v6231_v11 = vrot.slane %v6230_v44, 2  ;;  %v6242_v60 = vmax.f32 %v6195_v3, %v6241_v56  ;;  %v7363_v27 = vadd.f32 %v6154_v37, %v11761_v62  ;;  %v6160_v7 = vpop.f32.mrb[51].mxu1 }
 0xd4b   :  { %v6228_v41 = vmax.f32 %v6226_v57, %v6227_v16  ;;  %v6237_v29 = vrot.slane %v6236_v55, 2  ;;  %v6248_v19 = vmax.f32 %v6196_v23, %v6247_v58  ;;  %v7364_v2 = vadd.f32 %v6156_v5, %v11764_v59 }
 0xd4c   :  { %v6429_v8 = vsel %vm6309_vm3, %v6222_v38, %v6210_v49  ;;  %v6232_v33 = vmax.f32 %v6230_v44, %v6231_v11  ;;  %v6243_v14 = vrot.slane %v6242_v60, 2  ;;  %v6181_v0 = vmul.f32 0.01, %v7363_v27 }
 0xd4d   :  { %v6436_v47 = vsel %vm6309_vm3, %v6228_v41, %v6216_v40  ;;  %v6238_v30 = vmax.f32 %v6236_v55, %v6237_v29  ;;  %v6249_v43 = vrot.slane %v6248_v19, 2  ;;  %v6182_v39 = vmul.f32 0.01, %v7364_v2 }
 0xd4e   :  { %v6233_v53 = vrot.slane %v6232_v33, 1  ;;  %v6244_v42 = vmax.f32 %v6242_v60, %v6243_v14  ;;  %v6197_v13 = vmax.f32 %v7363_v27, %v6181_v0  ;;  %v7365_v4 = vadd.f32 %v6158_v22, %v11761_v62 }
 0xd4f   :  { %v6239_v20 = vrot.slane %v6238_v30, 1  ;;  %v6250_v15 = vmax.f32 %v6248_v19, %v6249_v43  ;;  %v6198_v31 = vmax.f32 %v7364_v2, %v6182_v39  ;;  %v7366_v28 = vadd.f32 %v6160_v7, %v11764_v59  ;;  %v6164_v35 = vpop.f32.mrb[52].mxu1 }
 0xd50   :  { %v6234_v46 = vmax.f32 %v6232_v33, %v6233_v53  ;;  %v6245_v63 = vrot.slane %v6244_v42, 1  ;;  %v6253_v54 = vrot.slane %v6197_v13, 4  ;;  %v6183_v17 = vmul.f32 0.01, %v7365_v4  ;;  %v6166_v10 = vpop.f32.mrb[53].mxu1 }
 0xd51   :  { %v6240_v61 = vmax.f32 %v6238_v30, %v6239_v20  ;;  %v6251_v6 = vrot.slane %v6250_v15, 1  ;;  %v6259_v32 = vrot.slane %v6198_v31, 4  ;;  %v6184_v12 = vmul.f32 0.01, %v7366_v28  ;;  %v6168_v45 = vpop.f32.mrb[54].mxu1 }
 0xd52   :  { %v6430_v48 = vsel %vm6311_vm4, %v6234_v46, %v6429_v8  ;;  %v6246_v25 = vmax.f32 %v6244_v42, %v6245_v63  ;;  %v6254_v50 = vmax.f32 %v6197_v13, %v6253_v54  ;;  %v6199_v18 = vmax.f32 %v7365_v4, %v6183_v17  ;;  %v6170_v1 = vpop.f32.mrb[55].mxu1 }
 0xd53   :  { %v6437_v21 = vsel %vm6311_vm4, %v6240_v61, %v6436_v47  ;;  %v6252_v51 = vmax.f32 %v6250_v15, %v6251_v6  ;;  %v6260_v52 = vmax.f32 %v6198_v31, %v6259_v32  ;;  %v6200_v3 = vmax.f32 %v7366_v28, %v6184_v12 }
 0xd54   :  { %v6431_v34 = vsel %vm6313_vm5, %v6246_v25, %v6430_v48  ;;  %v6255_v57 = vrot.slane %v6254_v50, 2  ;;  %v6265_v9 = vrot.slane %v6199_v18, 4  ;;  %v7367_v23 = vadd.f32 %v6164_v35, %v11761_v62 }
 0xd55   :  { %v6438_v37 = vsel %vm6313_vm5, %v6252_v51, %v6437_v21  ;;  %v6261_v49 = vrot.slane %v6260_v52, 2  ;;  %v6271_v36 = vrot.slane %v6200_v3, 4  ;;  %v7368_v44 = vadd.f32 %v6166_v10, %v11764_v59 }
 0xd56   :  { %v6256_v56 = vmax.f32 %v6254_v50, %v6255_v57  ;;  %v6266_v5 = vmax.f32 %v6199_v18, %v6265_v9  ;;  %v6185_v40 = vmul.f32 0.01, %v7367_v23  ;;  %v7369_v16 = vadd.f32 %v6168_v45, %v11761_v62 }
 0xd57   :  { %v6262_v55 = vmax.f32 %v6260_v52, %v6261_v49  ;;  %v6272_v58 = vmax.f32 %v6200_v3, %v6271_v36  ;;  %v6186_v22 = vmul.f32 0.01, %v7368_v44  ;;  %v7370_v38 = vadd.f32 %v6170_v1, %v11764_v59 }
 0xd58   :  { %v6257_v11 = vrot.slane %v6256_v56, 1  ;;  %v6267_v60 = vrot.slane %v6266_v5, 2  ;;  %v6201_v27 = vmax.f32 %v7367_v23, %v6185_v40  ;;  %v6187_v7 = vmul.f32 0.01, %v7369_v16  ;;  %v6556_v40 = vld [vmem:[#allocation3 + $0x718] sm:$0xff] }
 0xd59   :  { %v6263_v41 = vrot.slane %v6262_v55, 1  ;;  %v6273_v29 = vrot.slane %v6272_v58, 2  ;;  %v6202_v19 = vmax.f32 %v7368_v44, %v6186_v22  ;;  %v6188_v2 = vmul.f32 0.01, %v7370_v38  ;;  %v6560_v22 = vld [vmem:[#allocation3 + $0x738] sm:$0xff] }
 0xd5a   :  { %v6258_v8 = vmax.f32 %v6256_v56, %v6257_v11  ;;  %v6268_v33 = vmax.f32 %v6266_v5, %v6267_v60  ;;  %v6277_v14 = vrot.slane %v6201_v27, 4  ;;  %v6203_v0 = vmax.f32 %v7369_v16, %v6187_v7  ;;  %v6553_v5 = vld [vmem:[#allocation3 + $0x700] sm:$0xff]  ;;  %v6555_v16 = vld [vmem:[#allocation3 + $0x710] sm:$0xff]  ;;  %v6562_v11 = vld [vmem:[#allocation3 + $0x748] sm:$0xff] }
 0xd5b   :  { %v6264_v47 = vmax.f32 %v6262_v55, %v6263_v41  ;;  %v6274_v30 = vmax.f32 %v6272_v58, %v6273_v29  ;;  %v6283_v62 = vrot.slane %v6202_v19, 4  ;;  %v6204_v43 = vmax.f32 %v7370_v38, %v6188_v2  ;;  %v6558_v55 = vld [vmem:[#allocation3 + $0x728] sm:$0xff]  ;;  %v6557_v58 = vld [vmem:[#allocation3 + $0x720] sm:$0xff]  ;;  %v6559_v38 = vld [vmem:[#allocation3 + $0x730] sm:$0xff] }
 0xd5c   :  { %v6432_v39 = vsel %vm6315_vm6, %v6258_v8, %v6431_v34  ;;  %v6269_v53 = vrot.slane %v6268_v33, 1  ;;  %v6278_v59 = vmax.f32 %v6201_v27, %v6277_v14  ;;  %v6289_v42 = vrot.slane %v6203_v0, 4  ;;  %v6456_v34 = vld [vmem:[#allocation5 + $0x38] sm:$0xff]  ;;  %v6561_v60 = vld [vmem:[#allocation3 + $0x740] sm:$0xff]  ;;  %v6563_v7 = vld [vmem:[#allocation3 + $0x750] sm:$0xff] }
 0xd5d   :  { %v6439_v13 = vsel %vm6315_vm6, %v6264_v47, %v6438_v37  ;;  %v6275_v4 = vrot.slane %v6274_v30, 1  ;;  %v6284_v20 = vmax.f32 %v6202_v19, %v6283_v62  ;;  %v6295_v15 = vrot.slane %v6204_v43, 4  ;;  %v7607_v37 = vld [vmem:[#allocation5 + $0x20] sm:$0xff]  ;;  %v6564_v27 = vld [vmem:[#allocation3 + $0x758] sm:$0xff]  ;;  %v6566_v41 = vld [vmem:[#allocation3 + $0x768] sm:$0xff] }
 0xd5e   :  { %v6270_v31 = vmax.f32 %v6268_v33, %v6269_v53  ;;  %v6279_v28 = vrot.slane %v6278_v59, 2  ;;  %v6290_v35 = vmax.f32 %v6203_v0, %v6289_v42  ;;  %v6582_v49 = vpack.c.bf16 %v7607_v37, %v7607_v37  ;;  %v6565_v29 = vld [vmem:[#allocation3 + $0x760] sm:$0xff]  ;;  %v6568_v19 = vld [vmem:[#allocation3 + $0x778] sm:$0xff]  ;;  %v6567_v2 = vld [vmem:[#allocation3 + $0x770] sm:$0xff] }
 0xd5f   :  { %v6276_v46 = vmax.f32 %v6274_v30, %v6275_v4  ;;  %v6285_v63 = vrot.slane %v6284_v20, 2  ;;  %v6296_v54 = vmax.f32 %v6204_v43, %v6295_v15  ;;  %v6585_v56 = vpack.c.bf16 %v6456_v34, %v6456_v34  ;;  %v6570_v8 = vld [vmem:[#allocation3 + $0x788] sm:$0xff]  ;;  %v6569_v33 = vld [vmem:[#allocation3 + $0x780] sm:$0xff]  ;;  %v6572_v14 = vld [vmem:[#allocation3 + $0x798] sm:$0xff] }
 0xd60   :  { %v6433_v17 = vsel %vm6317_vm7, %v6270_v31, %v6432_v39  ;;  %v6280_v10 = vmax.f32 %v6278_v59, %v6279_v28  ;;  %v6291_v61 = vrot.slane %v6290_v35, 2  ;;  %v6571_v0 = vld [vmem:[#allocation3 + $0x790] sm:$0xff]  ;;  %v6574_v47 = vld [vmem:[#allocation3 + $0x7a8] sm:$0xff]  ;;  %v6573_v30 = vld [vmem:[#allocation3 + $0x7a0] sm:$0xff] }
 0xd61   :  { %v6440_v6 = vsel %vm6317_vm7, %v6276_v46, %v6439_v13  ;;  %v6286_v32 = vmax.f32 %v6284_v20, %v6285_v63  ;;  %v6297_v12 = vrot.slane %v6296_v54, 2  ;;  %v6576_v62 = vld [vmem:[#allocation3 + $0x7b8] sm:$0xff]  ;;  %v6575_v43 = vld [vmem:[#allocation3 + $0x7b0] sm:$0xff]  ;;  %v6577_v53 = vld [vmem:[#allocation9 + $0x29] sm:$0x3] }
 0xd62   :  { %v6281_v45 = vrot.slane %v6280_v10, 1  ;;  %v6292_v48 = vmax.f32 %v6290_v35, %v6291_v61  ;;  %v6590_v59 = vrot.slane %v6577_v53, %v12902_v26  ;;  %v6594_v42 = vrot.slane %v6577_v53, %v12903_v24 }
 0xd63   :  { %v6287_v25 = vrot.slane %v6286_v32, 1  ;;  %v6298_v50 = vmax.f32 %v6296_v54, %v6297_v12 }
 0xd64   :  { %v6282_v18 = vmax.f32 %v6280_v10, %v6281_v45  ;;  %v6293_v1 = vrot.slane %v6292_v48, 1 }
 0xd65   :  { %v6288_v21 = vmax.f32 %v6286_v32, %v6287_v25  ;;  %v6299_v51 = vrot.slane %v6298_v50, 1 }
 0xd66   :  { %v6434_v52 = vsel %vm6319_vm8, %v6282_v18, %v6433_v17  ;;  %v6294_v3 = vmax.f32 %v6292_v48, %v6293_v1 }
 0xd67   :  { %v6441_v57 = vsel %vm6319_vm8, %v6288_v21, %v6440_v6  ;;  %v6300_v9 = vmax.f32 %v6298_v50, %v6299_v51  ;;  %v6918_v6 = vld [vmem:[#allocation9 + $0x2b] ss:$0 sm:$0xff] }
 0xd68   :  { %v6435_v23 = vsel %vm6321_vm9, %v6294_v3, %v6434_v52 }
 0xd69   :  { %v6442_v36 = vsel %vm6321_vm9, %v6300_v9, %v6441_v57  ;;  %v6583_v44 = vpack.c.bf16 %v6435_v23, %v6435_v23 }
 0xd6a   :  { %v6584_v39 = vpack.c.bf16 %v6442_v36, %v6442_v36 }
 0xd6b   :  { %6714 = vmatprep.mubr.bf16.mxu0 %v6583_v44 }
 0xd6c   :  { %6715 = vmatmul.mubr.bf16.vlgmr.msra.gmra.mrb[8].mxu0 %v6582_v49 }
 0xd6d   :  { %6724 = vmatpush1.bf16.msra.mxu0 %v6553_v5  ;;  %6917 = vmatprep.mubr.msk.bf16.mxu0 %vm3539_vm1, %v6585_v56 }
 0xd6e   :  { %6725 = vmatprep.subr.bf16.mxu0 %v6556_v40 }
 0xd71   :  { %6726 = vmatpush1.bf16.msra.mxu0 %v6555_v16 }
 0xd72   :  { %6727 = vmatprep.subr.bf16.mxu0 %v6558_v55 }
 0xd75   :  { %6728 = vmatpush1.bf16.msra.mxu0 %v6557_v58 }
 0xd76   :  { %6729 = vmatprep.subr.bf16.mxu0 %v6560_v22 }
 0xd79   :  { %6730 = vmatpush1.bf16.msra.mxu0 %v6559_v38 }
 0xd7a   :  { %6731 = vmatprep.subr.bf16.mxu0 %v6562_v11 }
 0xd7d   :  { %6732 = vmatpush1.bf16.msra.mxu0 %v6561_v60 }
 0xd7e   :  { %6733 = vmatprep.subr.bf16.mxu0 %v6564_v27 }
 0xd81   :  { %6734 = vmatpush1.bf16.msra.mxu0 %v6563_v7 }
 0xd82   :  { %6735 = vmatprep.subr.bf16.mxu0 %v6566_v41 }
 0xd85   :  { %6736 = vmatpush1.bf16.msra.mxu0 %v6565_v29 }
 0xd86   :  { %6737 = vmatprep.subr.bf16.mxu0 %v6568_v19 }
 0xd89   :  { %6738 = vmatpush1.bf16.msra.mxu0 %v6567_v2 }
 0xd8a   :  { %6739 = vmatprep.subr.bf16.mxu0 %v6570_v8 }
 0xd8d   :  { %6740 = vmatpush1.bf16.msra.mxu0 %v6569_v33 }
 0xd8e   :  { %6741 = vmatprep.subr.bf16.mxu0 %v6572_v14 }
 0xd91   :  { %6742 = vmatpush1.bf16.msra.mxu0 %v6571_v0 }
 0xd92   :  { %6743 = vmatprep.subr.bf16.mxu0 %v6574_v47 }
 0xd95   :  { %6744 = vmatpush1.bf16.msra.mxu0 %v6573_v30 }
 0xd96   :  { %6745 = vmatprep.subr.bf16.mxu0 %v6576_v62 }
 0xd99   :  { %6746 = vmatpush1.bf16.msra.mxu0 %v6575_v43 }
 0xd9c   :  { %6756 = vmatmul.mubr.bf16.vlgmr.msra.gmra.mrb[8].mxu0 %v6584_v39 }
 0xe6f   :  { %v6757_v13 = vpop.f32.mrb[8].mxu0 }
 0xe70   :  { %v7371_v4 = vadd.f32 %v6757_v13, %v6590_v59  ;;  %v6759_v20 = vpop.f32.mrb[9].mxu0 }
 0xe71   :  { %v7372_v15 = vadd.f32 %v6759_v20, %v6594_v42  ;;  %v6761_v31 = vpop.f32.mrb[10].mxu0 }
 0xe72   :  { %v6764_v28 = vmul.f32 0.01, %v7371_v4  ;;  %v6762_v35 = vpop.f32.mrb[11].mxu0 }
 0xe73   :  { %v6765_v46 = vmul.f32 0.01, %v7372_v15 }
 0xe74   :  { %v6766_v63 = vmax.f32 %v7371_v4, %v6764_v28 }
 0xe75   :  { %v6767_v54 = vmax.f32 %v7372_v15, %v6765_v46 }
 0xe76   :  { %v6785_v10 = vpack.c.bf16 %v6766_v63, %v6766_v63 }
 0xe77   :  { %v6786_v17 = vpack.c.bf16 %v6767_v54, %v6767_v54 }
 0xe79   :  { %6825 = vmatprep.mubr.bf16.mxu1 %v6786_v17 }
 0xe7a   :  { %6826 = vmatmul.mubr.bf16.vlgmr.msra.gmra.mrb[56].mxu1 %v6785_v10 }
 0xf4d   :  { %v7203_v61 = vpop.f32.mrb[56].mxu1 }
 0xf4e   :  { %v7204_v32 = vpop.f32.mrb[57].mxu1 }
 0xf4f   :  { %v7205_v26 = vadd.f32 %v7204_v32, %v7203_v61  ;;  %v7206_v12 = vpop.f32.mrb[58].mxu1 }
 0xf50   :  { %v7207_v24 = vpop.f32.mrb[59].mxu1 }
 0xf51   :  { %v6828_v45 = vadd.f32 %v7205_v26, %v6918_v6 }
 0xf53   :  { %6833 = vst.msk [vmem:[%s11811_s8] sm:$0xff] %vm3539_vm1, %v6828_v45 }
 0xf54   :  { %6838 = vsyncpa [#allocation8], 1 }
 0xf55   :  { %6839 = vsyncpa [#allocation10], 1 }
 0xf56   :  { %6840 = vsyncmov [#allocation6] }
 0xf59   :  { %s6841_s7 = vpop.sfrf %6840 }
 0xf5a   :  { %p6919_p2 = scmp.ne.s32.totalorder %s6841_s7, 0 }
 0xf5c   :  { %6845 = shalt.err (%p6919_p2)  }
 0xf5d   :  { %6847 = vsyncmov [#allocation6 + $0x1] }
 0xf60   :  { %s6848_s30 = vpop.sfrf %6847 }
 0xf61   :  { %p6920_p3 = scmp.ne.s32.totalorder %s6848_s30, 0 }
 0xf63   :  { %6852 = shalt.err (%p6920_p3)  }
 0xf64   :  { %6854 = vsyncmov [#allocation6 + $0x2] }
 0xf67   :  { %s6855_s9 = vpop.sfrf %6854 }
 0xf68   :  { %p6921_p4 = scmp.ne.s32.totalorder %s6855_s9, 0 }
 0xf6a   :  { %6859 = shalt.err (%p6921_p4)  }

</bundles_post_ra>
